<compile_context>
chip_gen: v5e
topology: v5e:2x2
jax: 0.10.0
libtpu: 0.0.40
codegen_flags: <defaults>
</compile_context>

<pallas_src>
import jax
import jax.numpy as jnp
from jax import lax
from jax.experimental import pallas as pl
from jax.experimental.pallas import tpu as pltpu

# ----------------------------- sizes ---------------------------------------
B = 2                       # batch
IMG_H = IMG_W = 64          # input image spatial size (module accepts any H, W)
DET_SIZE = 128              # BlazeFace input size (module resizes to 128x128)
CROP_SIZE = 224             # DECA input size (module resizes crops to 224x224)
POOL = 8                    # encoder front-end average pool 224 -> 28
ENC_FEAT = 3 * (CROP_SIZE // POOL) ** 2          # 2352
N_SHAPE, N_TEX, N_EXP, N_POSE, N_CAM, N_LIGHT = 100, 50, 50, 6, 3, 27
N_PARAM = N_SHAPE + N_TEX + N_EXP + N_POSE + N_CAM + N_LIGHT   # 236 (DECA code dim)
N_PARAM_PAD = 256                                # padded to 2 lane-vregs
POSE_OFF = N_SHAPE + N_TEX + N_EXP               # 200
CAM_OFF = POSE_OFF + N_POSE                      # 206
N_LMK = 68                                       # FLAME 2D landmarks
LMK_PAD = 128                                    # lane-aligned x/y/z blocks in w_lmk
DET_FEAT = 3 * DET_SIZE * DET_SIZE               # 49152
DET_OUT = 128                                    # synthetic detector head width (model def)
DET_USED = 8                                     # only [:4] consumed; pad to 8 for inference
DET_KT = 1                                       # K-grid steps (1 on v6e/v7x; sweep 2 on v5e)
DET_TK = DET_FEAT // DET_KT


# ------------------------ K1: detector head kernel -------------------------
def _det_kernel(x_ref, w_ref, b_ref, o_ref):
    k = pl.program_id(0)

    @pl.when(k == 0)
    def _():
        o_ref[...] = jnp.zeros_like(o_ref)

    # Lane-dense transposed weight (DET_USED, TK); contract both operands on
    # their K axis (an "nt" MXU matmul) and accumulate into the resident output.
    o_ref[...] += lax.dot_general(
        x_ref[...], w_ref[...],
        dimension_numbers=(((1,), (1,)), ((), ())),
        preferred_element_type=jnp.float32)

    @pl.when(k == pl.num_programs(0) - 1)
    def _():
        o_ref[...] = jax.nn.sigmoid(o_ref[...] + b_ref[...])


def detector_head(x_flat_bf16, wT_bf16, b):
    return pl.pallas_call(
        _det_kernel,
        out_shape=jax.ShapeDtypeStruct((B, DET_USED), jnp.float32),
        grid_spec=pltpu.PrefetchScalarGridSpec(
            num_scalar_prefetch=0,
            grid=(DET_KT,),
            in_specs=[
                pl.BlockSpec((B, DET_TK), lambda k: (0, k)),
                pl.BlockSpec((DET_USED, DET_TK), lambda k: (0, k)),
                pl.BlockSpec((1, DET_USED), lambda k: (0, 0)),
            ],
            out_specs=pl.BlockSpec((B, DET_USED), lambda k: (0, 0)),
        ),
        compiler_params=pltpu.CompilerParams(dimension_semantics=("arbitrary",)),
    )(x_flat_bf16, wT_bf16, b)


# --------- K2+K3 fused: DECA encoder + FLAME landmarks + ortho proj ---------
def _enc_flame_kernel(feats_ref, we_ref, be_ref, wl_ref, tp_ref, o_ref):
    # DECA encoder head: pooled bf16 features -> 256-padded parameter code (VMEM resident).
    code = jnp.dot(feats_ref[...], we_ref[...],
                   preferred_element_type=jnp.float32) + be_ref[...]   # (B, 256) f32

    # FLAME landmark blendshapes: one lane-dense matmul; x/y/z occupy 128-aligned
    # column blocks (lanes >= 68 in each block are exactly zero by construction).
    p = jnp.dot(code.astype(jnp.bfloat16), wl_ref[...],
                preferred_element_type=jnp.float32) + tp_ref[...]      # (B, 384)
    px = p[:, 0:LMK_PAD]
    py = p[:, LMK_PAD:2 * LMK_PAD]
    pz = p[:, 2 * LMK_PAD:3 * LMK_PAD]

    # Rodrigues: global head rotation from first 3 pose params.
    # Matches DECA batch_rodrigues: angle = ||r + 1e-8||, axis = r / angle.
    pose = code[:, POSE_OFF:POSE_OFF + N_POSE]                         # (B, 6)
    cam = code[:, CAM_OFF:CAM_OFF + N_CAM]                             # (B, 3)
    rx, ry, rz = pose[:, 0:1], pose[:, 1:2], pose[:, 2:3]
    rxe, rye, rze = rx + 1e-8, ry + 1e-8, rz + 1e-8
    theta = jnp.sqrt(rxe * rxe + rye * rye + rze * rze)
    kx, ky, kz = rx / theta, ry / theta, rz / theta
    s = jnp.sin(theta)
    c = jnp.cos(theta)
    oc = 1.0 - c
    r00 = c + kx * kx * oc
    r01 = kx * ky * oc - kz * s
    r02 = kx * kz * oc + ky * s
    r10 = ky * kx * oc + kz * s
    r11 = c + ky * ky * oc
    r12 = ky * kz * oc - kx * s

    gx = r00 * px + r01 * py + r02 * pz                                # (B, 128)
    gy = r10 * px + r11 * py + r12 * pz                                # (z row dropped)

    # util.batch_orth_proj: (X + cam[:, 1:]) * cam[:, 0], keep xy, flip y, /2 + 0.5
    scale, tcx, tcy = cam[:, 0:1], cam[:, 1:2], cam[:, 2:3]
    x2d = ((gx + tcx) * scale) * 0.5 + 0.5
    y2d = (-((gy + tcy) * scale)) * 0.5 + 0.5
    # Single lane-dense unmasked (B, 256) store; lanes >= 68 in each half are junk
    # padding that is sliced away outside the kernel.
    o_ref[...] = jnp.concatenate([x2d, y2d], axis=1)


def deca_flame_head(feats_bf16, w_enc_bf16, b_enc, w_lmk_bf16, tmpl_pad):
    out = pl.pallas_call(
        _enc_flame_kernel,
        out_shape=jax.ShapeDtypeStruct((B, 2 * LMK_PAD), jnp.float32),
        grid=(1,),
        in_specs=[
            pl.BlockSpec((B, ENC_FEAT), lambda i: (0, 0)),
            pl.BlockSpec((ENC_FEAT, N_PARAM_PAD), lambda i: (0, 0)),
            pl.BlockSpec((1, N_PARAM_PAD), lambda i: (0, 0)),
            pl.BlockSpec((N_PARAM_PAD, 3 * LMK_PAD), lambda i: (0, 0)),
            pl.BlockSpec((1, 3 * LMK_PAD), lambda i: (0, 0)),
        ],
        out_specs=pl.BlockSpec((B, 2 * LMK_PAD), lambda i: (0, 0)),
    )(feats_bf16, w_enc_bf16, b_enc, w_lmk_bf16, tmpl_pad)
    x2d = out[:, 0:N_LMK]
    y2d = out[:, LMK_PAD:LMK_PAD + N_LMK]
    return jnp.stack([x2d, y2d], axis=-1)                              # (B, 68, 2)


# ------------------------------ JAX glue ------------------------------------
def resize_nearest(x, out_h, out_w):
    # matches torch.nn.functional.interpolate default mode='nearest'
    _, _, h, w = x.shape
    rows = (jnp.arange(out_h) * h) // out_h
    cols = (jnp.arange(out_w) * w) // out_w
    return x[:, :, rows[:, None], cols[None, :]]


def crop_resize_norm(img, top, left, height, width):
    # img: (3, H, W). Emulates torchvision crop (zero pad out-of-bounds),
    # division by the crop's max, and nearest-resize to 224x224.
    _, h, w = img.shape
    i = jnp.arange(CROP_SIZE)
    src_r = top + (i * height) // CROP_SIZE
    src_c = left + (i * width) // CROP_SIZE
    vr = (src_r >= 0) & (src_r < h)
    vc = (src_c >= 0) & (src_c < w)
    rr = jnp.clip(src_r, 0, h - 1)
    cc = jnp.clip(src_c, 0, w - 1)
    out = img[:, rr[:, None], cc[None, :]]
    out = out * (vr[:, None] & vc[None, :]).astype(img.dtype)
    rows = jnp.arange(h)
    cols = jnp.arange(w)
    rmask = (rows >= top) & (rows < top + height)
    cmask = (cols >= left) & (cols < left + width)
    m = jnp.max(jnp.where((rmask[:, None] & cmask[None, :])[None], img, -jnp.inf))
    m = jnp.maximum(m, 1e-6)
    return out / m                                             # (3, 224, 224)


def forward(imgs, params):
    """imgs: RGB NCHW float32 in [0, 255]. params: prepared (inference) params."""
    b, _, h, w = imgs.shape

    # BlazeFace stage: resize to 128, normalize, lane-dense bf16 detector head (Pallas K1).
    img128 = resize_nearest(imgs, DET_SIZE, DET_SIZE)
    det_in = ((img128 / 127.5) - 1.0).reshape(b, DET_FEAT).astype(jnp.bfloat16)
    det_feats = detector_head(det_in, params["w_det"], params["b_det"])
    s = det_feats[:, :4]
    front = jnp.stack([0.05 + 0.25 * s[:, 0],                  # ymin
                       0.05 + 0.25 * s[:, 1],                  # xmin
                       0.65 + 0.25 * s[:, 2],                  # ymax
                       0.65 + 0.25 * s[:, 3]], axis=1)         # xmax
    det = jnp.stack([front[:, 0] - 0.1, front[:, 1] - 0.1,
                     front[:, 2] + 0.1, front[:, 3] + 0.1], axis=1)
    top = (det[:, 0] * h).astype(jnp.int32)
    left = (det[:, 1] * w).astype(jnp.int32)
    height = ((det[:, 2] - det[:, 0]) * h).astype(jnp.int32)
    width = ((det[:, 3] - det[:, 1]) * w).astype(jnp.int32)

    # Per-image dynamic crop + max-normalize + nearest resize to 224x224.
    cropped = jax.vmap(crop_resize_norm)(imgs, top, left, height, width)

    # DECA encode + FLAME landmarks + projection, fused (Pallas K2+K3).
    pw = CROP_SIZE // POOL
    feats = (cropped.reshape(b, 3, pw, POOL, pw, POOL).mean(axis=(3, 5))
             .reshape(b, ENC_FEAT).astype(jnp.bfloat16))
    return deca_flame_head(feats, params["w_enc"], params["b_enc"],
                           params["w_lmk"], params["tmpl_pad"])


# ------------------------------ parameters ----------------------------------
def init_params(key):
    ks = jax.random.split(key, 6)
    w_det = jax.random.normal(ks[0], (DET_FEAT, DET_OUT), jnp.float32) / jnp.sqrt(DET_FEAT)
    b_det = jnp.zeros((1, DET_OUT), jnp.float32)
    w_enc = jax.random.normal(ks[1], (ENC_FEAT, N_PARAM), jnp.float32) / jnp.sqrt(ENC_FEAT)
    b_enc = jnp.zeros((N_PARAM,), jnp.float32)
    b_enc = b_enc.at[N_SHAPE + N_TEX + N_EXP + N_POSE].set(8.0)   # DECA-like cam scale
    b_enc = b_enc.reshape(1, N_PARAM)
    bx = jax.random.normal(ks[2], (N_SHAPE + N_EXP, N_LMK), jnp.float32) * 0.01
    by = jax.random.normal(ks[3], (N_SHAPE + N_EXP, N_LMK), jnp.float32) * 0.01
    bz = jax.random.normal(ks[4], (N_SHAPE + N_EXP, N_LMK), jnp.float32) * 0.01
    tmpl = jax.random.normal(ks[5], (3, N_LMK), jnp.float32) * 0.1
    return dict(w_det=w_det, b_det=b_det, w_enc=w_enc, b_enc=b_enc,
                bx=bx, by=by, bz=bz, tmpl=tmpl)


def prepare_params(p):
    """One-time (outside the forward path) repacking for the TPU kernels:
       - slice the detector head to the consumed outputs, TRANSPOSE to a lane-dense
         (8, 49152) layout, and cast to bf16,
       - zero-pad the encoder head 236 -> 256 columns and cast to bf16,
       - concatenate bx/by/bz into one lane-dense (256, 384) bf16 landmark weight whose
         rows are laid out by (padded) code index (shape / exp rows filled, rest zero)."""
    w_det = p["w_det"][:, :DET_USED].T.astype(jnp.bfloat16)           # (8, 49152)
    b_det = p["b_det"][:, :DET_USED]                                   # (1, 8)

    w_enc = jnp.zeros((ENC_FEAT, N_PARAM_PAD), jnp.float32)
    w_enc = w_enc.at[:, :N_PARAM].set(p["w_enc"]).astype(jnp.bfloat16)
    b_enc = jnp.zeros((1, N_PARAM_PAD), jnp.float32)
    b_enc = b_enc.at[:, :N_PARAM].set(p["b_enc"])

    w_lmk = jnp.zeros((N_PARAM_PAD, 3 * LMK_PAD), jnp.float32)
    for axis, basis in enumerate((p["bx"], p["by"], p["bz"])):
        col = axis * LMK_PAD
        w_lmk = w_lmk.at[0:N_SHAPE, col:col + N_LMK].set(basis[:N_SHAPE])
        w_lmk = w_lmk.at[N_SHAPE + N_TEX:N_SHAPE + N_TEX + N_EXP,
                         col:col + N_LMK].set(basis[N_SHAPE:])
    w_lmk = w_lmk.astype(jnp.bfloat16)

    tmpl_pad = jnp.zeros((1, 3 * LMK_PAD), jnp.float32)
    for axis in range(3):
        col = axis * LMK_PAD
        tmpl_pad = tmpl_pad.at[0, col:col + N_LMK].set(p["tmpl"][axis])

    return dict(w_det=w_det, b_det=b_det, w_enc=w_enc, b_enc=b_enc,
                w_lmk=w_lmk, tmpl_pad=tmpl_pad)


if __name__ == "__main__":
    root = jax.random.PRNGKey(0)
    pkey, ikey = jax.random.split(root)
    params = prepare_params(init_params(pkey))
    imgs = jax.random.uniform(ikey, (B, 3, IMG_H, IMG_W), jnp.float32, 0.0, 255.0)

    out = jax.jit(forward)(imgs, params)
    out = jax.block_until_ready(out)

    assert out.shape == (B, N_LMK, 2), out.shape
    assert bool(jnp.all(jnp.isfinite(out)))
    print("KERNEL_OK")
</pallas_src>

<mosaic_0001>
module attributes {stable_mosaic.version = 11 : i64} {
  func.func @_det_kernel(%arg0: i32, %arg1: memref<2x49152xbf16, #tpu.memory_space<vmem>>, %arg2: memref<8x49152xbf16, #tpu.memory_space<vmem>>, %arg3: memref<1x8xf32, #tpu.memory_space<vmem>>, %arg4: memref<2x8xf32, #tpu.memory_space<vmem>>) attributes {dimension_semantics = [#tpu.dimension_semantics<arbitrary>], iteration_bounds = array<i64: 1>, scalar_prefetch = 0 : i64, scratch_operands = 0 : i64, tpu.core_type = #tpu.core_type<tc>, window_params = [{transform_indices = @transform_0, window_bounds = array<i64: 2, 49152>}, {transform_indices = @transform_1, window_bounds = array<i64: 8, 49152>}, {pipeline_mode = #tpu.pipeline_mode<synchronous>, transform_indices = @transform_2, window_bounds = array<i64: 1, 8>}, {pipeline_mode = #tpu.pipeline_mode<synchronous>, transform_indices = @transform_3, window_bounds = array<i64: 2, 8>}]} {
    %c0_i32 = arith.constant 0 : i32
    %0 = arith.cmpi eq, %arg0, %c0_i32 : i32
    %1 = arith.extui %0 : i1 to i32
    %c0_i32_0 = arith.constant 0 : i32
    %2 = arith.cmpi ne, %1, %c0_i32_0 : i32
    scf.if %2 {
      %cst_10 = arith.constant 0.000000e+00 : f32
      %12 = vector.broadcast %cst_10 : f32 to vector<2x8xf32>
      %c0_11 = arith.constant 0 : index
      %c0_12 = arith.constant 0 : index
      %13 = vector.load %arg4[%c0_11, %c0_12] : memref<2x8xf32, #tpu.memory_space<vmem>>, vector<2x8xf32>
      tpu.vector_store %arg4[%c0_11, %c0_12], %12 {strides = array<i32>} : memref<2x8xf32, #tpu.memory_space<vmem>>, vector<2x8xf32>,
    } else {
    }
    %c0 = arith.constant 0 : index
    %c0_1 = arith.constant 0 : index
    %3 = vector.load %arg4[%c0, %c0_1] : memref<2x8xf32, #tpu.memory_space<vmem>>, vector<2x8xf32>
    %c0_2 = arith.constant 0 : index
    %c0_3 = arith.constant 0 : index
    %4 = vector.load %arg1[%c0_2, %c0_3] : memref<2x49152xbf16, #tpu.memory_space<vmem>>, vector<2x49152xbf16>
    %c0_4 = arith.constant 0 : index
    %c0_5 = arith.constant 0 : index
    %5 = vector.load %arg2[%c0_4, %c0_5] : memref<8x49152xbf16, #tpu.memory_space<vmem>>, vector<8x49152xbf16>
    %cst = arith.constant dense<0.000000e+00> : vector<2x8xf32>
    %6 = tpu.matmul %4, %5, %cst {dimension_numbers = #tpu.dot_dimension_numbers<[1], [1], [0], [0], [0, 0, 1, 0], [], []>} : vector<2x49152xbf16>, vector<8x49152xbf16>, vector<2x8xf32> -> vector<2x8xf32>
    %7 = arith.addf %3, %6 : vector<2x8xf32>
    %c0_6 = arith.constant 0 : index
    %c0_7 = arith.constant 0 : index
    %8 = vector.load %arg4[%c0_6, %c0_7] : memref<2x8xf32, #tpu.memory_space<vmem>>, vector<2x8xf32>
    tpu.vector_store %arg4[%c0_6, %c0_7], %7 {strides = array<i32>} : memref<2x8xf32, #tpu.memory_space<vmem>>, vector<2x8xf32>,
    %c0_i32_8 = arith.constant 0 : i32
    %9 = arith.cmpi eq, %arg0, %c0_i32_8 : i32
    %10 = arith.extui %9 : i1 to i32
    %c0_i32_9 = arith.constant 0 : i32
    %11 = arith.cmpi ne, %10, %c0_i32_9 : i32
    scf.if %11 {
      %c0_10 = arith.constant 0 : index
      %c0_11 = arith.constant 0 : index
      %12 = vector.load %arg4[%c0_10, %c0_11] : memref<2x8xf32, #tpu.memory_space<vmem>>, vector<2x8xf32>
      %c0_12 = arith.constant 0 : index
      %c0_13 = arith.constant 0 : index
      %13 = vector.load %arg3[%c0_12, %c0_13] : memref<1x8xf32, #tpu.memory_space<vmem>>, vector<1x8xf32>
      %14 = vector.broadcast %13 : vector<1x8xf32> to vector<2x8xf32>
      %15 = arith.addf %12, %14 : vector<2x8xf32>
      %16 = arith.negf %15 : vector<2x8xf32>
      %17 = math.exp %16 : vector<2x8xf32>
      %cst_14 = arith.constant 1.000000e+00 : f32
      %18 = vector.broadcast %cst_14 : f32 to vector<2x8xf32>
      %19 = arith.addf %18, %17 : vector<2x8xf32>
      %20 = arith.divf %18, %19 : vector<2x8xf32>
      %c0_15 = arith.constant 0 : index
      %c0_16 = arith.constant 0 : index
      %21 = vector.load %arg4[%c0_15, %c0_16] : memref<2x8xf32, #tpu.memory_space<vmem>>, vector<2x8xf32>
      tpu.vector_store %arg4[%c0_15, %c0_16], %20 {strides = array<i32>} : memref<2x8xf32, #tpu.memory_space<vmem>>, vector<2x8xf32>,
    } else {
    }
    return
  }
  func.func @transform_0(%arg0: i32) -> (i32, i32) {
    %c0_i32 = arith.constant 0 : i32
    %c0_i32_0 = arith.constant 0 : i32
    return %c0_i32, %arg0 : i32, i32
  }
  func.func @transform_1(%arg0: i32) -> (i32, i32) {
    %c0_i32 = arith.constant 0 : i32
    %c0_i32_0 = arith.constant 0 : i32
    return %c0_i32, %arg0 : i32, i32
  }
  func.func @transform_2(%arg0: i32) -> (i32, i32) {
    %c0_i32 = arith.constant 0 : i32
    %c0_i32_0 = arith.constant 0 : i32
    %c0_i32_1 = arith.constant 0 : i32
    return %c0_i32, %c0_i32_0 : i32, i32
  }
  func.func @transform_3(%arg0: i32) -> (i32, i32) {
    %c0_i32 = arith.constant 0 : i32
    %c0_i32_0 = arith.constant 0 : i32
    %c0_i32_1 = arith.constant 0 : i32
    return %c0_i32, %c0_i32_0 : i32, i32
  }
}

module attributes {stable_mosaic.version = 11 : i64} {
  func.func @_enc_flame_kernel(%arg0: i32, %arg1: memref<2x2352xbf16, #tpu.memory_space<vmem>>, %arg2: memref<2352x256xbf16, #tpu.memory_space<vmem>>, %arg3: memref<1x256xf32, #tpu.memory_space<vmem>>, %arg4: memref<256x384xbf16, #tpu.memory_space<vmem>>, %arg5: memref<1x384xf32, #tpu.memory_space<vmem>>, %arg6: memref<2x256xf32, #tpu.memory_space<vmem>>) attributes {dimension_semantics = [#tpu.dimension_semantics<arbitrary>], iteration_bounds = array<i64: 1>, scalar_prefetch = 0 : i64, scratch_operands = 0 : i64, tpu.core_type = #tpu.core_type<tc>, window_params = [{pipeline_mode = #tpu.pipeline_mode<synchronous>, transform_indices = @transform_0, window_bounds = array<i64: 2, 2352>}, {pipeline_mode = #tpu.pipeline_mode<synchronous>, transform_indices = @transform_1, window_bounds = array<i64: 2352, 256>}, {pipeline_mode = #tpu.pipeline_mode<synchronous>, transform_indices = @transform_2, window_bounds = array<i64: 1, 256>}, {pipeline_mode = #tpu.pipeline_mode<synchronous>, transform_indices = @transform_3, window_bounds = array<i64: 256, 384>}, {pipeline_mode = #tpu.pipeline_mode<synchronous>, transform_indices = @transform_4, window_bounds = array<i64: 1, 384>}, {pipeline_mode = #tpu.pipeline_mode<synchronous>, transform_indices = @transform_5, window_bounds = array<i64: 2, 256>}]} {
    %c0 = arith.constant 0 : index
    %c0_0 = arith.constant 0 : index
    %0 = vector.load %arg1[%c0, %c0_0] : memref<2x2352xbf16, #tpu.memory_space<vmem>>, vector<2x2352xbf16>
    %c0_1 = arith.constant 0 : index
    %c0_2 = arith.constant 0 : index
    %1 = vector.load %arg2[%c0_1, %c0_2] : memref<2352x256xbf16, #tpu.memory_space<vmem>>, vector<2352x256xbf16>
    %cst = arith.constant dense<0.000000e+00> : vector<2x256xf32>
    %2 = tpu.matmul %0, %1, %cst {dimension_numbers = #tpu.dot_dimension_numbers<[1], [0], [0], [1], [0, 0, 1, 1], [], []>} : vector<2x2352xbf16>, vector<2352x256xbf16>, vector<2x256xf32> -> vector<2x256xf32>
    %c0_3 = arith.constant 0 : index
    %c0_4 = arith.constant 0 : index
    %3 = vector.load %arg3[%c0_3, %c0_4] : memref<1x256xf32, #tpu.memory_space<vmem>>, vector<1x256xf32>
    %4 = vector.broadcast %3 : vector<1x256xf32> to vector<2x256xf32>
    %5 = arith.addf %2, %4 : vector<2x256xf32>
    %6 = arith.truncf %5 : vector<2x256xf32> to vector<2x256xbf16>
    %c0_5 = arith.constant 0 : index
    %c0_6 = arith.constant 0 : index
    %7 = vector.load %arg4[%c0_5, %c0_6] : memref<256x384xbf16, #tpu.memory_space<vmem>>, vector<256x384xbf16>
    %cst_7 = arith.constant dense<0.000000e+00> : vector<2x384xf32>
    %8 = tpu.matmul %6, %7, %cst_7 {dimension_numbers = #tpu.dot_dimension_numbers<[1], [0], [0], [1], [0, 0, 1, 1], [], []>} : vector<2x256xbf16>, vector<256x384xbf16>, vector<2x384xf32> -> vector<2x384xf32>
    %c0_8 = arith.constant 0 : index
    %c0_9 = arith.constant 0 : index
    %9 = vector.load %arg5[%c0_8, %c0_9] : memref<1x384xf32, #tpu.memory_space<vmem>>, vector<1x384xf32>
    %10 = vector.broadcast %9 : vector<1x384xf32> to vector<2x384xf32>
    %11 = arith.addf %8, %10 : vector<2x384xf32>
    %12 = vector.extract_strided_slice %11 {offsets = [0, 0], sizes = [2, 128], strides = [1, 1]} : vector<2x384xf32> to vector<2x128xf32>
    %13 = vector.extract_strided_slice %11 {offsets = [0, 128], sizes = [2, 128], strides = [1, 1]} : vector<2x384xf32> to vector<2x128xf32>
    %14 = vector.extract_strided_slice %11 {offsets = [0, 256], sizes = [2, 128], strides = [1, 1]} : vector<2x384xf32> to vector<2x128xf32>
    %15 = vector.extract_strided_slice %5 {offsets = [0, 200], sizes = [2, 6], strides = [1, 1]} : vector<2x256xf32> to vector<2x6xf32>
    %16 = vector.extract_strided_slice %5 {offsets = [0, 206], sizes = [2, 3], strides = [1, 1]} : vector<2x256xf32> to vector<2x3xf32>
    %17 = vector.extract_strided_slice %15 {offsets = [0, 0], sizes = [2, 1], strides = [1, 1]} : vector<2x6xf32> to vector<2x1xf32>
    %18 = vector.extract_strided_slice %15 {offsets = [0, 1], sizes = [2, 1], strides = [1, 1]} : vector<2x6xf32> to vector<2x1xf32>
    %19 = vector.extract_strided_slice %15 {offsets = [0, 2], sizes = [2, 1], strides = [1, 1]} : vector<2x6xf32> to vector<2x1xf32>
    %cst_10 = arith.constant 9.99999993E-9 : f32
    %20 = vector.broadcast %cst_10 : f32 to vector<2x1xf32>
    %21 = arith.addf %17, %20 : vector<2x1xf32>
    %cst_11 = arith.constant 9.99999993E-9 : f32
    %22 = vector.broadcast %cst_11 : f32 to vector<2x1xf32>
    %23 = arith.addf %18, %22 : vector<2x1xf32>
    %cst_12 = arith.constant 9.99999993E-9 : f32
    %24 = vector.broadcast %cst_12 : f32 to vector<2x1xf32>
    %25 = arith.addf %19, %24 : vector<2x1xf32>
    %26 = arith.mulf %21, %21 : vector<2x1xf32>
    %27 = arith.mulf %23, %23 : vector<2x1xf32>
    %28 = arith.addf %26, %27 : vector<2x1xf32>
    %29 = arith.mulf %25, %25 : vector<2x1xf32>
    %30 = arith.addf %28, %29 : vector<2x1xf32>
    %31 = math.sqrt %30 : vector<2x1xf32>
    %32 = arith.divf %17, %31 : vector<2x1xf32>
    %33 = arith.divf %18, %31 : vector<2x1xf32>
    %34 = arith.divf %19, %31 : vector<2x1xf32>
    %35 = math.sin %31 : vector<2x1xf32>
    %36 = math.cos %31 : vector<2x1xf32>
    %cst_13 = arith.constant 1.000000e+00 : f32
    %37 = vector.broadcast %cst_13 : f32 to vector<2x1xf32>
    %38 = arith.subf %37, %36 : vector<2x1xf32>
    %39 = arith.mulf %32, %32 : vector<2x1xf32>
    %40 = arith.mulf %39, %38 : vector<2x1xf32>
    %41 = arith.addf %36, %40 : vector<2x1xf32>
    %42 = arith.mulf %32, %33 : vector<2x1xf32>
    %43 = arith.mulf %42, %38 : vector<2x1xf32>
    %44 = arith.mulf %34, %35 : vector<2x1xf32>
    %45 = arith.subf %43, %44 : vector<2x1xf32>
    %46 = arith.mulf %32, %34 : vector<2x1xf32>
    %47 = arith.mulf %46, %38 : vector<2x1xf32>
    %48 = arith.mulf %33, %35 : vector<2x1xf32>
    %49 = arith.addf %47, %48 : vector<2x1xf32>
    %50 = arith.mulf %33, %32 : vector<2x1xf32>
    %51 = arith.mulf %50, %38 : vector<2x1xf32>
    %52 = arith.mulf %34, %35 : vector<2x1xf32>
    %53 = arith.addf %51, %52 : vector<2x1xf32>
    %54 = arith.mulf %33, %33 : vector<2x1xf32>
    %55 = arith.mulf %54, %38 : vector<2x1xf32>
    %56 = arith.addf %36, %55 : vector<2x1xf32>
    %57 = arith.mulf %33, %34 : vector<2x1xf32>
    %58 = arith.mulf %57, %38 : vector<2x1xf32>
    %59 = arith.mulf %32, %35 : vector<2x1xf32>
    %60 = arith.subf %58, %59 : vector<2x1xf32>
    %61 = vector.broadcast %41 : vector<2x1xf32> to vector<2x128xf32>
    %62 = arith.mulf %61, %12 : vector<2x128xf32>
    %63 = vector.broadcast %45 : vector<2x1xf32> to vector<2x128xf32>
    %64 = arith.mulf %63, %13 : vector<2x128xf32>
    %65 = arith.addf %62, %64 : vector<2x128xf32>
    %66 = vector.broadcast %49 : vector<2x1xf32> to vector<2x128xf32>
    %67 = arith.mulf %66, %14 : vector<2x128xf32>
    %68 = arith.addf %65, %67 : vector<2x128xf32>
    %69 = vector.broadcast %53 : vector<2x1xf32> to vector<2x128xf32>
    %70 = arith.mulf %69, %12 : vector<2x128xf32>
    %71 = vector.broadcast %56 : vector<2x1xf32> to vector<2x128xf32>
    %72 = arith.mulf %71, %13 : vector<2x128xf32>
    %73 = arith.addf %70, %72 : vector<2x128xf32>
    %74 = vector.broadcast %60 : vector<2x1xf32> to vector<2x128xf32>
    %75 = arith.mulf %74, %14 : vector<2x128xf32>
    %76 = arith.addf %73, %75 : vector<2x128xf32>
    %77 = vector.extract_strided_slice %16 {offsets = [0, 0], sizes = [2, 1], strides = [1, 1]} : vector<2x3xf32> to vector<2x1xf32>
    %78 = vector.extract_strided_slice %16 {offsets = [0, 1], sizes = [2, 1], strides = [1, 1]} : vector<2x3xf32> to vector<2x1xf32>
    %79 = vector.extract_strided_slice %16 {offsets = [0, 2], sizes = [2, 1], strides = [1, 1]} : vector<2x3xf32> to vector<2x1xf32>
    %80 = vector.broadcast %78 : vector<2x1xf32> to vector<2x128xf32>
    %81 = arith.addf %68, %80 : vector<2x128xf32>
    %82 = vector.broadcast %77 : vector<2x1xf32> to vector<2x128xf32>
    %83 = arith.mulf %81, %82 : vector<2x128xf32>
    %cst_14 = arith.constant 5.000000e-01 : f32
    %84 = vector.broadcast %cst_14 : f32 to vector<2x128xf32>
    %85 = arith.mulf %83, %84 : vector<2x128xf32>
    %cst_15 = arith.constant 5.000000e-01 : f32
    %86 = vector.broadcast %cst_15 : f32 to vector<2x128xf32>
    %87 = arith.addf %85, %86 : vector<2x128xf32>
    %88 = vector.broadcast %79 : vector<2x1xf32> to vector<2x128xf32>
    %89 = arith.addf %76, %88 : vector<2x128xf32>
    %90 = vector.broadcast %77 : vector<2x1xf32> to vector<2x128xf32>
    %91 = arith.mulf %89, %90 : vector<2x128xf32>
    %cst_16 = arith.constant 0.000000e+00 : f32
    %92 = vector.broadcast %cst_16 : f32 to vector<2x128xf32>
    %93 = arith.subf %92, %91 : vector<2x128xf32>
    %cst_17 = arith.constant 5.000000e-01 : f32
    %94 = vector.broadcast %cst_17 : f32 to vector<2x128xf32>
    %95 = arith.mulf %93, %94 : vector<2x128xf32>
    %cst_18 = arith.constant 5.000000e-01 : f32
    %96 = vector.broadcast %cst_18 : f32 to vector<2x128xf32>
    %97 = arith.addf %95, %96 : vector<2x128xf32>
    %98 = tpu.concatenate %87, %97 in 1 : vector<2x128xf32>, vector<2x128xf32> -> vector<2x256xf32>
    %c0_19 = arith.constant 0 : index
    %c0_20 = arith.constant 0 : index
    %99 = vector.load %arg6[%c0_19, %c0_20] : memref<2x256xf32, #tpu.memory_space<vmem>>, vector<2x256xf32>
    tpu.vector_store %arg6[%c0_19, %c0_20], %98 {strides = array<i32>} : memref<2x256xf32, #tpu.memory_space<vmem>>, vector<2x256xf32>,
    return
  }
  func.func @transform_0(%arg0: i32) -> (i32, i32) {
    %c0_i32 = arith.constant 0 : i32
    %c0_i32_0 = arith.constant 0 : i32
    %c0_i32_1 = arith.constant 0 : i32
    return %c0_i32, %c0_i32_0 : i32, i32
  }
  func.func @transform_1(%arg0: i32) -> (i32, i32) {
    %c0_i32 = arith.constant 0 : i32
    %c0_i32_0 = arith.constant 0 : i32
    %c0_i32_1 = arith.constant 0 : i32
    return %c0_i32, %c0_i32_0 : i32, i32
  }
  func.func @transform_2(%arg0: i32) -> (i32, i32) {
    %c0_i32 = arith.constant 0 : i32
    %c0_i32_0 = arith.constant 0 : i32
    %c0_i32_1 = arith.constant 0 : i32
    return %c0_i32, %c0_i32_0 : i32, i32
  }
  func.func @transform_3(%arg0: i32) -> (i32, i32) {
    %c0_i32 = arith.constant 0 : i32
    %c0_i32_0 = arith.constant 0 : i32
    %c0_i32_1 = arith.constant 0 : i32
    return %c0_i32, %c0_i32_0 : i32, i32
  }
  func.func @transform_4(%arg0: i32) -> (i32, i32) {
    %c0_i32 = arith.constant 0 : i32
    %c0_i32_0 = arith.constant 0 : i32
    %c0_i32_1 = arith.constant 0 : i32
    return %c0_i32, %c0_i32_0 : i32, i32
  }
  func.func @transform_5(%arg0: i32) -> (i32, i32) {
    %c0_i32 = arith.constant 0 : i32
    %c0_i32_0 = arith.constant 0 : i32
    %c0_i32_1 = arith.constant 0 : i32
    return %c0_i32, %c0_i32_0 : i32, i32
  }
}

</mosaic_0001>

<bundles_post_ra>
// kernel: forward.2
= control target key start
LH: loop header
LB: loop body
LE: loop exit
PB: predicated region body
PF: predicated region fallthrough
CT: control target
= control target key end

     0   :  { %vm19_vm0 = vcmask 58368   ;;  %s8267_s1 = inlined_call_operand.vmem [shape: bf16[8,49152], index: 1, kind: input, shape index: {}]   ;;  %s8268_s0 = inlined_call_operand.vmem [shape: bf16[2,49152], index: 0, kind: input, shape index: {}]   ;;  %s8269_s2 = inlined_call_operand.vmem [shape: f32[1,8], index: 2, kind: input, shape index: {}]   ;;  %s8270_s3 = inlined_call_operand.vmem [shape: f32[2,8], index: 3, kind: output, shape index: {}]  }
   0x1   :  { %v70_v0 = vld [vmem:[%s8267_s1] sm:$0xff]  ;;  %v71_v1 = vld [vmem:[%s8267_s1 + $0x8] sm:$0xff]  ;;  %v73_v7 = vld [vmem:[%s8267_s1 + $0x18] sm:$0xff] }
   0x2   :  { %v22_v2 = vld [vmem:[%s8268_s0] sm:$0xff]  ;;  %v1318_v3 = vunpack.c.l.b16 %v70_v0  ;;  %v1319_v4 = vunpack.c.h.b16 %v70_v0  ;;  %v1320_v5 = vunpack.c.l.b16 %v71_v1  ;;  %v1321_v6 = vunpack.c.h.b16 %v71_v1  ;;  %v72_v8 = vld [vmem:[%s8267_s1 + $0x10] sm:$0xff]  ;;  %v75_v17 = vld [vmem:[%s8267_s1 + $0x28] sm:$0xff] }
   0x3   :  { %263 = vst [vmem:[#allocation1] ss:$9 sm:$0xff] %v22_v2  ;;  %v1324_v9 = vunpack.c.l.b16 %v73_v7  ;;  %v1322_v10 = vunpack.c.l.b16 %v72_v8  ;;  %v1325_v11 = vunpack.c.h.b16 %v73_v7  ;;  %v1323_v12 = vunpack.c.h.b16 %v72_v8  ;;  %v74_v18 = vld [vmem:[%s8267_s1 + $0x20] sm:$0xff]  ;;  %v23_v29 = vld [vmem:[%s8268_s0 + $0x8] sm:$0xff]  ;;  %v77_v40 = vld [vmem:[%s8267_s1 + $0x38] sm:$0xff] }
   0x4   :  { %v1702_v13 = vpack.c.b16 %v1318_v3, %v1318_v3  ;;  %v1703_v14 = vpack.c.b16 %v1319_v4, %v1319_v4  ;;  %v1704_v15 = vpack.c.b16 %v1320_v5, %v1320_v5  ;;  %v1705_v16 = vpack.c.b16 %v1321_v6, %v1321_v6  ;;  %v76_v41 = vld [vmem:[%s8267_s1 + $0x30] sm:$0xff]  ;;  %v79_v59 = vld [vmem:[%s8267_s1 + $0x48] sm:$0xff]  ;;  %v78_v60 = vld [vmem:[%s8267_s1 + $0x40] sm:$0xff] }
   0x5   :  { %v1708_v19 = vpack.c.b16 %v1324_v9, %v1324_v9  ;;  %v1706_v20 = vpack.c.b16 %v1322_v10, %v1322_v10  ;;  %v1709_v21 = vpack.c.b16 %v1325_v11, %v1325_v11  ;;  %v1707_v22 = vpack.c.b16 %v1323_v12, %v1323_v12  ;;  %v24_v58 = vld [vmem:[%s8268_s0 + $0x10] sm:$0xff]  ;;  %v81_v5 = vld [vmem:[%s8267_s1 + $0x58] sm:$0xff] }
   0x6   :  { %2477 = vmatpush.bf16.xpose.msra.mxu0 %v1702_v13  ;;  %2490 = vmatpush.bf16.xpose.msra.mxu1 %v1703_v14  ;;  %v1328_v23 = vunpack.c.l.b16 %v75_v17  ;;  %v1326_v24 = vunpack.c.l.b16 %v74_v18  ;;  %v1329_v25 = vunpack.c.h.b16 %v75_v17  ;;  %v1327_v26 = vunpack.c.h.b16 %v74_v18  ;;  %v80_v6 = vld [vmem:[%s8267_s1 + $0x50] sm:$0xff] }
   0x7   :  { %2503 = vmatpush.bf16.xpose.msra.mxu2 %v1704_v15  ;;  %2516 = vmatpush.bf16.xpose.msra.mxu3 %v1705_v16  ;;  %v1332_v42 = vunpack.c.l.b16 %v77_v40  ;;  %v1330_v43 = vunpack.c.l.b16 %v76_v41  ;;  %v1333_v44 = vunpack.c.h.b16 %v77_v40  ;;  %v1331_v45 = vunpack.c.h.b16 %v76_v41 }
   0x8   :  { %v1712_v36 = vpack.c.b16 %v1328_v23, %v1328_v23  ;;  %v1710_v37 = vpack.c.b16 %v1326_v24, %v1326_v24  ;;  %v1713_v38 = vpack.c.b16 %v1329_v25, %v1329_v25  ;;  %v1711_v39 = vpack.c.b16 %v1327_v26, %v1327_v26  ;;  %v25_v23 = vld [vmem:[%s8268_s0 + $0x18] sm:$0xff]  ;;  %v83_v24 = vld [vmem:[%s8267_s1 + $0x68] sm:$0xff]  ;;  %v82_v25 = vld [vmem:[%s8267_s1 + $0x60] sm:$0xff] }
   0x9   :  { %v1716_v46 = vpack.c.b16 %v1332_v42, %v1332_v42  ;;  %v1714_v47 = vpack.c.b16 %v1330_v43, %v1330_v43  ;;  %v1717_v51 = vpack.c.b16 %v1333_v44, %v1333_v44  ;;  %v1715_v52 = vpack.c.b16 %v1331_v45, %v1331_v45 }
   0xa   :  { %v264_v27 = vld [vmem:[#allocation1] sm:$0xff]  ;;  %v265_v28 = vld [vmem:[#allocation1 + $0x9] sm:$0xff]  ;;  %v266_v30 = vld [vmem:[#allocation1 + $0x12] sm:$0xff]  ;;  %v1336_v61 = vunpack.c.l.b16 %v79_v59  ;;  %v1334_v62 = vunpack.c.l.b16 %v78_v60  ;;  %v1337_v63 = vunpack.c.h.b16 %v79_v59  ;;  %v1335_v0 = vunpack.c.h.b16 %v78_v60 }
   0xb   :  { %v267_v31 = vld [vmem:[#allocation1 + $0x1b] sm:$0xff]  ;;  %v268_v32 = vld [vmem:[#allocation1 + $0x24] sm:$0xff]  ;;  %v269_v33 = vld [vmem:[#allocation1 + $0x2d] sm:$0xff]  ;;  %v1340_v7 = vunpack.c.l.b16 %v81_v5  ;;  %v1338_v8 = vunpack.c.l.b16 %v80_v6  ;;  %v1341_v9 = vunpack.c.h.b16 %v81_v5  ;;  %v1339_v10 = vunpack.c.h.b16 %v80_v6 }
   0xc   :  { %v270_v34 = vld [vmem:[#allocation1 + $0x36] sm:$0xff]  ;;  %v271_v35 = vld [vmem:[#allocation1 + $0x3f] sm:$0xff]  ;;  %v1720_v1 = vpack.c.b16 %v1336_v61, %v1336_v61  ;;  %v1718_v2 = vpack.c.b16 %v1334_v62, %v1334_v62  ;;  %v1721_v3 = vpack.c.b16 %v1337_v63, %v1337_v63  ;;  %v1719_v4 = vpack.c.b16 %v1335_v0, %v1335_v0 }
   0xd   :  { %273 = vst [vmem:[#allocation1] ss:$9 sm:$0xff] %v23_v29  ;;  %2478 = vmatmul.bf16.vlgmr.msra.gmra.mxu0 %v264_v27  ;;  %2491 = vmatmul.bf16.vlgmr.msra.gmra.mxu1 %v265_v28  ;;  %v1724_v11 = vpack.c.b16 %v1340_v7, %v1340_v7  ;;  %v1722_v12 = vpack.c.b16 %v1338_v8, %v1338_v8  ;;  %v1344_v26 = vunpack.c.l.b16 %v83_v24  ;;  %v1342_v27 = vunpack.c.l.b16 %v82_v25  ;;  %v89_v63 = vld [vmem:[%s8267_s1 + $0x98] sm:$0xff]  ;;  %v88_v0 = vld [vmem:[%s8267_s1 + $0x90] sm:$0xff] }
   0xe   :  { %2529 = vmatpush.bf16.xpose.msrb.mxu0 %v1706_v20  ;;  %2542 = vmatpush.bf16.xpose.msrb.mxu1 %v1707_v22  ;;  %v1725_v16 = vpack.c.b16 %v1341_v9, %v1341_v9  ;;  %v1723_v17 = vpack.c.b16 %v1339_v10, %v1339_v10  ;;  %v1345_v28 = vunpack.c.h.b16 %v83_v24  ;;  %v1343_v29 = vunpack.c.h.b16 %v82_v25 }
   0xf   :  { %2555 = vmatpush.bf16.xpose.msrb.mxu2 %v1708_v19  ;;  %2568 = vmatpush.bf16.xpose.msrb.mxu3 %v1709_v21 }
  0x10   :  { %2504 = vmatmul.bf16.vlgmr.msra.gmra.mxu2 %v266_v30  ;;  %2517 = vmatmul.bf16.vlgmr.msra.gmra.mxu3 %v267_v31  ;;  %v1728_v30 = vpack.c.b16 %v1344_v26, %v1344_v26  ;;  %v1726_v31 = vpack.c.b16 %v1342_v27, %v1342_v27 }
  0x14   :  { %v274_v48 = vld [vmem:[#allocation1] sm:$0xff]  ;;  %v275_v49 = vld [vmem:[#allocation1 + $0x9] sm:$0xff]  ;;  %v276_v50 = vld [vmem:[#allocation1 + $0x12] sm:$0xff] }
  0x15   :  { %v277_v53 = vld [vmem:[#allocation1 + $0x1b] sm:$0xff]  ;;  %v278_v54 = vld [vmem:[#allocation1 + $0x24] sm:$0xff]  ;;  %v279_v55 = vld [vmem:[#allocation1 + $0x2d] sm:$0xff] }
  0x16   :  { %2581 = vmatpush.bf16.xpose.msra.mxu0 %v1710_v37  ;;  %2594 = vmatpush.bf16.xpose.msra.mxu1 %v1711_v39  ;;  %v280_v56 = vld [vmem:[#allocation1 + $0x36] sm:$0xff]  ;;  %v281_v57 = vld [vmem:[#allocation1 + $0x3f] sm:$0xff] }
  0x17   :  { %2607 = vmatpush.bf16.xpose.msra.mxu2 %v1712_v36  ;;  %2620 = vmatpush.bf16.xpose.msra.mxu3 %v1713_v38  ;;  %283 = vst [vmem:[#allocation1] ss:$9 sm:$0xff] %v24_v58 }
  0x1d   :  { %2530 = vmatmul.bf16.vlgmr.msrb.gmra.mxu0 %v268_v32  ;;  %2543 = vmatmul.bf16.vlgmr.msrb.gmra.mxu1 %v269_v33  ;;  %v1729_v32 = vpack.c.b16 %v1345_v28, %v1345_v28  ;;  %v1727_v33 = vpack.c.b16 %v1343_v29, %v1343_v29 }
  0x1e   :  { %2633 = vmatpush.bf16.xpose.msrb.mxu0 %v1714_v47  ;;  %2646 = vmatpush.bf16.xpose.msrb.mxu1 %v1715_v52  ;;  %v284_v13 = vld [vmem:[#allocation1] sm:$0xff]  ;;  %v285_v14 = vld [vmem:[#allocation1 + $0x9] sm:$0xff]  ;;  %v286_v15 = vld [vmem:[#allocation1 + $0x12] sm:$0xff] }
  0x1f   :  { %v287_v18 = vld [vmem:[#allocation1 + $0x1b] sm:$0xff]  ;;  %v288_v19 = vld [vmem:[#allocation1 + $0x24] sm:$0xff]  ;;  %v289_v20 = vld [vmem:[#allocation1 + $0x2d] sm:$0xff] }
  0x20   :  { %2556 = vmatmul.bf16.vlgmr.msrb.gmra.mxu2 %v270_v34  ;;  %2569 = vmatmul.bf16.vlgmr.msrb.gmra.mxu3 %v271_v35  ;;  %v290_v21 = vld [vmem:[#allocation1 + $0x36] sm:$0xff]  ;;  %v291_v22 = vld [vmem:[#allocation1 + $0x3f] sm:$0xff] }
  0x21   :  { %2659 = vmatpush.bf16.xpose.msrb.mxu2 %v1716_v46  ;;  %2672 = vmatpush.bf16.xpose.msrb.mxu3 %v1717_v51  ;;  %293 = vst [vmem:[#allocation1] ss:$9 sm:$0xff] %v25_v23  ;;  %v85_v34 = vld [vmem:[%s8267_s1 + $0x78] sm:$0xff]  ;;  %v84_v35 = vld [vmem:[%s8267_s1 + $0x70] sm:$0xff]  ;;  %v86_v51 = vld [vmem:[%s8267_s1 + $0x80] sm:$0xff] }
  0x22   :  { %v1348_v36 = vunpack.c.l.b16 %v85_v34  ;;  %v1346_v37 = vunpack.c.l.b16 %v84_v35  ;;  %v1349_v38 = vunpack.c.h.b16 %v85_v34  ;;  %v1347_v39 = vunpack.c.h.b16 %v84_v35 }
  0x23   :  { %v1351_v58 = vunpack.c.h.b16 %v86_v51 }
  0x24   :  { %v1732_v40 = vpack.c.b16 %v1348_v36, %v1348_v36  ;;  %v1730_v41 = vpack.c.b16 %v1346_v37, %v1346_v37  ;;  %v1733_v42 = vpack.c.b16 %v1349_v38, %v1349_v38  ;;  %v1731_v43 = vpack.c.b16 %v1347_v39, %v1347_v39  ;;  %v93_v37 = vld [vmem:[%s8267_s1 + $0xb8] sm:$0xff]  ;;  %v92_v38 = vld [vmem:[%s8267_s1 + $0xb0] sm:$0xff] }
  0x25   :  { %v1735_v62 = vpack.c.b16 %v1351_v58, %v1351_v58  ;;  %v1364_v39 = vunpack.c.l.b16 %v93_v37 }
  0x28   :  { %v294_v44 = vld [vmem:[#allocation1] sm:$0xff]  ;;  %v295_v45 = vld [vmem:[#allocation1 + $0x9] sm:$0xff]  ;;  %v296_v46 = vld [vmem:[#allocation1 + $0x12] sm:$0xff] }
  0x29   :  { %v297_v47 = vld [vmem:[#allocation1 + $0x1b] sm:$0xff] }
  0x2a   :  { %v300_v52 = vld [vmem:[#allocation1 + $0x36] sm:$0xff] }
  0x2d   :  { %2582 = vmatmul.bf16.vlgmr.msra.gmra.mxu0 %v274_v48  ;;  %2595 = vmatmul.bf16.vlgmr.msra.gmra.mxu1 %v275_v49  ;;  %v298_v48 = vld [vmem:[#allocation1 + $0x24] sm:$0xff]  ;;  %v299_v49 = vld [vmem:[#allocation1 + $0x2d] sm:$0xff] }
  0x2e   :  { %2685 = vmatpush.bf16.xpose.msra.mxu0 %v1718_v2  ;;  %2698 = vmatpush.bf16.xpose.msra.mxu1 %v1719_v4  ;;  %v1354_v2 = vunpack.c.l.b16 %v88_v0  ;;  %v1355_v4 = vunpack.c.h.b16 %v88_v0 }
  0x30   :  { %2608 = vmatmul.bf16.vlgmr.msra.gmra.mxu2 %v276_v50  ;;  %2621 = vmatmul.bf16.vlgmr.msra.gmra.mxu3 %v277_v53  ;;  %v87_v50 = vld [vmem:[%s8267_s1 + $0x88] sm:$0xff]  ;;  %v301_v53 = vld [vmem:[#allocation1 + $0x3f] sm:$0xff]  ;;  %v1738_v6 = vpack.c.b16 %v1354_v2, %v1354_v2  ;;  %v1739_v8 = vpack.c.b16 %v1355_v4, %v1355_v4 }
  0x31   :  { %2711 = vmatpush.bf16.xpose.msra.mxu2 %v1720_v1  ;;  %2724 = vmatpush.bf16.xpose.msra.mxu3 %v1721_v3  ;;  %v1356_v1 = vunpack.c.l.b16 %v89_v63  ;;  %v1357_v3 = vunpack.c.h.b16 %v89_v63  ;;  %v94_v2 = vld [vmem:[%s8267_s1 + $0xc0] sm:$0xff] }
  0x33   :  { %v1740_v5 = vpack.c.b16 %v1356_v1, %v1356_v1  ;;  %v1741_v7 = vpack.c.b16 %v1357_v3, %v1357_v3  ;;  %v95_v1 = vld [vmem:[%s8267_s1 + $0xc8] sm:$0xff] }
  0x3d   :  { %2634 = vmatmul.bf16.vlgmr.msrb.gmra.mxu0 %v278_v54  ;;  %2647 = vmatmul.bf16.vlgmr.msrb.gmra.mxu1 %v279_v55  ;;  %v26_v54 = vld [vmem:[%s8268_s0 + $0x20] sm:$0xff]  ;;  %v1352_v55 = vunpack.c.l.b16 %v87_v50 }
  0x3e   :  { %2737 = vmatpush.bf16.xpose.msrb.mxu0 %v1722_v12  ;;  %2750 = vmatpush.bf16.xpose.msrb.mxu1 %v1723_v17  ;;  %303 = vst [vmem:[#allocation1] ss:$9 sm:$0xff] %v26_v54 }
  0x3f   :  { %v1736_v59 = vpack.c.b16 %v1352_v55, %v1352_v55 }
  0x40   :  { %2660 = vmatmul.bf16.vlgmr.msrb.gmra.mxu2 %v280_v56  ;;  %2673 = vmatmul.bf16.vlgmr.msrb.gmra.mxu3 %v281_v57  ;;  %v1350_v56 = vunpack.c.l.b16 %v86_v51  ;;  %v1353_v57 = vunpack.c.h.b16 %v87_v50 }
  0x41   :  { %2763 = vmatpush.bf16.xpose.msrb.mxu2 %v1724_v11  ;;  %2776 = vmatpush.bf16.xpose.msrb.mxu3 %v1725_v16  ;;  %v90_v16 = vld [vmem:[%s8267_s1 + $0xa0] sm:$0xff] }
  0x42   :  { %v1734_v60 = vpack.c.b16 %v1350_v56, %v1350_v56  ;;  %v1737_v61 = vpack.c.b16 %v1353_v57, %v1353_v57  ;;  %v1359_v23 = vunpack.c.h.b16 %v90_v16 }
  0x45   :  { %v304_v9 = vld [vmem:[#allocation1] sm:$0xff]  ;;  %v305_v10 = vld [vmem:[#allocation1 + $0x9] sm:$0xff]  ;;  %v306_v11 = vld [vmem:[#allocation1 + $0x12] sm:$0xff] }
  0x46   :  { %v307_v12 = vld [vmem:[#allocation1 + $0x1b] sm:$0xff] }
  0x47   :  { %v310_v17 = vld [vmem:[#allocation1 + $0x36] sm:$0xff] }
  0x4d   :  { %2686 = vmatmul.bf16.vlgmr.msra.gmra.mxu0 %v284_v13  ;;  %2699 = vmatmul.bf16.vlgmr.msra.gmra.mxu1 %v285_v14  ;;  %v308_v13 = vld [vmem:[#allocation1 + $0x24] sm:$0xff]  ;;  %v309_v14 = vld [vmem:[#allocation1 + $0x2d] sm:$0xff] }
  0x4e   :  { %2789 = vmatpush.bf16.xpose.msra.mxu0 %v1726_v31  ;;  %2802 = vmatpush.bf16.xpose.msra.mxu1 %v1727_v33 }
  0x50   :  { %2712 = vmatmul.bf16.vlgmr.msra.gmra.mxu2 %v286_v15  ;;  %2725 = vmatmul.bf16.vlgmr.msra.gmra.mxu3 %v287_v18  ;;  %v91_v15 = vld [vmem:[%s8267_s1 + $0xa8] sm:$0xff]  ;;  %v311_v18 = vld [vmem:[#allocation1 + $0x3f] sm:$0xff] }
  0x51   :  { %2815 = vmatpush.bf16.xpose.msra.mxu2 %v1728_v30  ;;  %2828 = vmatpush.bf16.xpose.msra.mxu3 %v1729_v32  ;;  %v1743_v30 = vpack.c.b16 %v1359_v23, %v1359_v23 }
  0x5d   :  { %2738 = vmatmul.bf16.vlgmr.msrb.gmra.mxu0 %v288_v19  ;;  %2751 = vmatmul.bf16.vlgmr.msrb.gmra.mxu1 %v289_v20  ;;  %v27_v19 = vld [vmem:[%s8268_s0 + $0x28] sm:$0xff]  ;;  %v1360_v20 = vunpack.c.l.b16 %v91_v15 }
  0x5e   :  { %2841 = vmatpush.bf16.xpose.msrb.mxu0 %v1730_v41  ;;  %2854 = vmatpush.bf16.xpose.msrb.mxu1 %v1731_v43  ;;  %313 = vst [vmem:[#allocation1] ss:$9 sm:$0xff] %v27_v19  ;;  %v1365_v41 = vunpack.c.h.b16 %v93_v37 }
  0x5f   :  { %v1744_v27 = vpack.c.b16 %v1360_v20, %v1360_v20 }
  0x60   :  { %2764 = vmatmul.bf16.vlgmr.msrb.gmra.mxu2 %v290_v21  ;;  %2777 = vmatmul.bf16.vlgmr.msrb.gmra.mxu3 %v291_v22  ;;  %v1358_v21 = vunpack.c.l.b16 %v90_v16  ;;  %v1361_v22 = vunpack.c.h.b16 %v91_v15  ;;  %v1749_v50 = vpack.c.b16 %v1365_v41, %v1365_v41 }
  0x61   :  { %2867 = vmatpush.bf16.xpose.msrb.mxu2 %v1732_v40  ;;  %2880 = vmatpush.bf16.xpose.msrb.mxu3 %v1733_v42  ;;  %v1362_v40 = vunpack.c.l.b16 %v92_v38  ;;  %v1363_v42 = vunpack.c.h.b16 %v92_v38 }
  0x62   :  { %v1742_v28 = vpack.c.b16 %v1358_v21, %v1358_v21  ;;  %v1745_v29 = vpack.c.b16 %v1361_v22, %v1361_v22 }
  0x63   :  { %v1747_v51 = vpack.c.b16 %v1363_v42, %v1363_v42 }
  0x65   :  { %v314_v58 = vld [vmem:[#allocation1] sm:$0xff]  ;;  %v319_v0 = vld [vmem:[#allocation1 + $0x2d] sm:$0xff]  ;;  %v320_v3 = vld [vmem:[#allocation1 + $0x36] sm:$0xff] }
  0x66   :  { %v321_v4 = vld [vmem:[#allocation1 + $0x3f] sm:$0xff] }
  0x6d   :  { %2790 = vmatmul.bf16.vlgmr.msra.gmra.mxu0 %v294_v44  ;;  %2803 = vmatmul.bf16.vlgmr.msra.gmra.mxu1 %v295_v45 }
  0x6e   :  { %2893 = vmatpush.bf16.xpose.msra.mxu0 %v1734_v60  ;;  %2906 = vmatpush.bf16.xpose.msra.mxu1 %v1735_v62  ;;  %v316_v60 = vld [vmem:[#allocation1 + $0x12] sm:$0xff]  ;;  %v318_v62 = vld [vmem:[#allocation1 + $0x24] sm:$0xff] }
  0x70   :  { %2816 = vmatmul.bf16.vlgmr.msra.gmra.mxu2 %v296_v46  ;;  %2829 = vmatmul.bf16.vlgmr.msra.gmra.mxu3 %v297_v47 }
  0x71   :  { %2919 = vmatpush.bf16.xpose.msra.mxu2 %v1736_v59  ;;  %2932 = vmatpush.bf16.xpose.msra.mxu3 %v1737_v61  ;;  %v315_v59 = vld [vmem:[#allocation1 + $0x9] sm:$0xff]  ;;  %v317_v61 = vld [vmem:[#allocation1 + $0x1b] sm:$0xff] }
  0x7d   :  { %2842 = vmatmul.bf16.vlgmr.msrb.gmra.mxu0 %v298_v48  ;;  %2855 = vmatmul.bf16.vlgmr.msrb.gmra.mxu1 %v299_v49  ;;  %v1748_v48 = vpack.c.b16 %v1364_v39, %v1364_v39  ;;  %v1746_v49 = vpack.c.b16 %v1362_v40, %v1362_v40 }
  0x7e   :  { %2945 = vmatpush.bf16.xpose.msrb.mxu0 %v1738_v6  ;;  %2958 = vmatpush.bf16.xpose.msrb.mxu1 %v1739_v8  ;;  %v1368_v6 = vunpack.c.l.b16 %v95_v1  ;;  %v1369_v8 = vunpack.c.h.b16 %v95_v1 }
  0x80   :  { %2868 = vmatmul.bf16.vlgmr.msrb.gmra.mxu2 %v300_v52  ;;  %2881 = vmatmul.bf16.vlgmr.msrb.gmra.mxu3 %v301_v53  ;;  %v1752_v15 = vpack.c.b16 %v1368_v6, %v1368_v6 }
  0x81   :  { %2971 = vmatpush.bf16.xpose.msrb.mxu2 %v1740_v5  ;;  %2984 = vmatpush.bf16.xpose.msrb.mxu3 %v1741_v7  ;;  %v28_v5 = vld [vmem:[%s8268_s0 + $0x30] sm:$0xff]  ;;  %v1366_v7 = vunpack.c.l.b16 %v94_v2 }
  0x82   :  { %323 = vst [vmem:[#allocation1] ss:$9 sm:$0xff] %v28_v5 }
  0x83   :  { %v1750_v16 = vpack.c.b16 %v1366_v7, %v1366_v7 }
  0x8a   :  { %v2479_v24 = vpop.f32.mrf.mxu0  ;;  %v2492_v25 = vpop.f32.mrf.mxu1 }
  0x8b   :  { %v2493_v26 = vadd.f32 %v2492_v25, %v2479_v24 }
  0x8d   :  { %2894 = vmatmul.bf16.vlgmr.msra.gmra.mxu0 %v304_v9  ;;  %2907 = vmatmul.bf16.vlgmr.msra.gmra.mxu1 %v305_v10  ;;  %v1367_v9 = vunpack.c.h.b16 %v94_v2 }
  0x8e   :  { %2997 = vmatpush.bf16.xpose.msra.mxu0 %v1742_v28  ;;  %3010 = vmatpush.bf16.xpose.msra.mxu1 %v1743_v30 }
  0x90   :  { %2920 = vmatmul.bf16.vlgmr.msra.gmra.mxu2 %v306_v11  ;;  %2933 = vmatmul.bf16.vlgmr.msra.gmra.mxu3 %v307_v12 }
  0x91   :  { %3023 = vmatpush.bf16.xpose.msra.mxu2 %v1744_v27  ;;  %3036 = vmatpush.bf16.xpose.msra.mxu3 %v1745_v29  ;;  %v96_v27 = vld [vmem:[%s8267_s1 + $0xd0] sm:$0xff] }
  0x92   :  { %v2481_v34 = vpop.f32.mrf.mxu0  ;;  %v2494_v35 = vpop.f32.mrf.mxu1  ;;  %v1370_v29 = vunpack.c.l.b16 %v96_v27 }
  0x93   :  { %v2505_v31 = vpop.f32.mrf.mxu2  ;;  %v2518_v32 = vpop.f32.mrf.mxu3 }
  0x94   :  { %v2506_v33 = vadd.f32 %v2505_v31, %v2493_v26  ;;  %v97_v26 = vld [vmem:[%s8267_s1 + $0xd8] sm:$0xff]  ;;  %v1371_v31 = vunpack.c.h.b16 %v96_v27  ;;  %v1754_v38 = vpack.c.b16 %v1370_v29, %v1370_v29 }
  0x95   :  { %v1372_v28 = vunpack.c.l.b16 %v97_v26  ;;  %v1373_v30 = vunpack.c.h.b16 %v97_v26 }
  0x96   :  { %v2519_v36 = vadd.f32 %v2518_v32, %v2506_v33  ;;  %v1755_v40 = vpack.c.b16 %v1371_v31, %v1371_v31 }
  0x97   :  { %v1756_v37 = vpack.c.b16 %v1372_v28, %v1372_v28  ;;  %v1757_v39 = vpack.c.b16 %v1373_v30, %v1373_v30 }
  0x9a   :  { %v2531_v45 = vpop.f32.mrf.mxu0  ;;  %v2544_v46 = vpop.f32.mrf.mxu1 }
  0x9b   :  { %v2507_v43 = vpop.f32.mrf.mxu2  ;;  %v2520_v44 = vpop.f32.mrf.mxu3  ;;  %v2532_v47 = vadd.f32 %v2531_v45, %v2519_v36 }
  0x9d   :  { %v2545_v52 = vadd.f32 %v2544_v46, %v2532_v47  ;;  %2946 = vmatmul.bf16.vlgmr.msrb.gmra.mxu0 %v308_v13  ;;  %2959 = vmatmul.bf16.vlgmr.msrb.gmra.mxu1 %v309_v14  ;;  %v324_v47 = vld [vmem:[#allocation1] sm:$0xff] }
  0x9e   :  { %3049 = vmatpush.bf16.xpose.msrb.mxu0 %v1746_v49  ;;  %3062 = vmatpush.bf16.xpose.msrb.mxu1 %v1747_v51  ;;  %v326_v49 = vld [vmem:[#allocation1 + $0x12] sm:$0xff]  ;;  %v328_v51 = vld [vmem:[#allocation1 + $0x24] sm:$0xff] }
  0xa0   :  { %2972 = vmatmul.bf16.vlgmr.msrb.gmra.mxu2 %v310_v17  ;;  %2985 = vmatmul.bf16.vlgmr.msrb.gmra.mxu3 %v311_v18  ;;  %v1753_v17 = vpack.c.b16 %v1369_v8, %v1369_v8  ;;  %v1751_v18 = vpack.c.b16 %v1367_v9, %v1367_v9 }
  0xa1   :  { %3075 = vmatpush.bf16.xpose.msrb.mxu2 %v1748_v48  ;;  %3088 = vmatpush.bf16.xpose.msrb.mxu3 %v1749_v50  ;;  %v325_v48 = vld [vmem:[#allocation1 + $0x9] sm:$0xff]  ;;  %v327_v50 = vld [vmem:[#allocation1 + $0x1b] sm:$0xff] }
  0xa2   :  { %v2533_v56 = vpop.f32.mrf.mxu0  ;;  %v2546_v57 = vpop.f32.mrf.mxu1 }
  0xa3   :  { %v2557_v53 = vpop.f32.mrf.mxu2  ;;  %v2570_v54 = vpop.f32.mrf.mxu3  ;;  %v330_v56 = vld [vmem:[#allocation1 + $0x36] sm:$0xff]  ;;  %v331_v57 = vld [vmem:[#allocation1 + $0x3f] sm:$0xff] }
  0xa4   :  { %v2558_v55 = vadd.f32 %v2557_v53, %v2545_v52  ;;  %v329_v53 = vld [vmem:[#allocation1 + $0x2d] sm:$0xff] }
  0xa6   :  { %v2571_v63 = vadd.f32 %v2570_v54, %v2558_v55  ;;  %v99_v54 = vld [vmem:[%s8267_s1 + $0xe8] sm:$0xff]  ;;  %v98_v55 = vld [vmem:[%s8267_s1 + $0xe0] sm:$0xff] }
  0xaa   :  { %v2583_v12 = vpop.f32.mrf.mxu0  ;;  %v2596_v13 = vpop.f32.mrf.mxu1 }
  0xab   :  { %v2559_v10 = vpop.f32.mrf.mxu2  ;;  %v2572_v11 = vpop.f32.mrf.mxu3  ;;  %v2584_v14 = vadd.f32 %v2583_v12, %v2571_v63 }
  0xad   :  { %v2597_v19 = vadd.f32 %v2596_v13, %v2584_v14  ;;  %2998 = vmatmul.bf16.vlgmr.msra.gmra.mxu0 %v314_v58  ;;  %3011 = vmatmul.bf16.vlgmr.msra.gmra.mxu1 %v315_v59  ;;  %v29_v58 = vld [vmem:[%s8268_s0 + $0x38] sm:$0xff]  ;;  %v1376_v59 = vunpack.c.l.b16 %v99_v54 }
  0xae   :  { %3101 = vmatpush.bf16.xpose.msra.mxu0 %v1750_v16  ;;  %3114 = vmatpush.bf16.xpose.msra.mxu1 %v1751_v18  ;;  %333 = vst [vmem:[#allocation1] ss:$9 sm:$0xff] %v29_v58  ;;  %v100_v16 = vld [vmem:[%s8267_s1 + $0xf0] sm:$0xff] }
  0xaf   :  { %v1378_v18 = vunpack.c.l.b16 %v100_v16 }
  0xb0   :  { %3024 = vmatmul.bf16.vlgmr.msra.gmra.mxu2 %v316_v60  ;;  %3037 = vmatmul.bf16.vlgmr.msra.gmra.mxu3 %v317_v61  ;;  %v1374_v60 = vunpack.c.l.b16 %v98_v55  ;;  %v1377_v61 = vunpack.c.h.b16 %v99_v54 }
  0xb1   :  { %3127 = vmatpush.bf16.xpose.msra.mxu2 %v1752_v15  ;;  %3140 = vmatpush.bf16.xpose.msra.mxu3 %v1753_v17  ;;  %v101_v15 = vld [vmem:[%s8267_s1 + $0xf8] sm:$0xff]  ;;  %v1762_v27 = vpack.c.b16 %v1378_v18, %v1378_v18 }
  0xb2   :  { %v2585_v23 = vpop.f32.mrf.mxu0  ;;  %v2598_v24 = vpop.f32.mrf.mxu1  ;;  %v1758_v5 = vpack.c.b16 %v1374_v60, %v1374_v60  ;;  %v1761_v6 = vpack.c.b16 %v1377_v61, %v1377_v61  ;;  %v1380_v17 = vunpack.c.l.b16 %v101_v15 }
  0xb3   :  { %v2609_v20 = vpop.f32.mrf.mxu2  ;;  %v2622_v21 = vpop.f32.mrf.mxu3 }
  0xb4   :  { %v2610_v22 = vadd.f32 %v2609_v20, %v2597_v19  ;;  %v1381_v19 = vunpack.c.h.b16 %v101_v15  ;;  %v1379_v20 = vunpack.c.h.b16 %v100_v16  ;;  %v1764_v26 = vpack.c.b16 %v1380_v17, %v1380_v17 }
  0xb6   :  { %v2623_v25 = vadd.f32 %v2622_v21, %v2610_v22  ;;  %v1765_v28 = vpack.c.b16 %v1381_v19, %v1381_v19  ;;  %v1763_v29 = vpack.c.b16 %v1379_v20, %v1379_v20 }
  0xba   :  { %v2635_v34 = vpop.f32.mrf.mxu0  ;;  %v2648_v35 = vpop.f32.mrf.mxu1 }
  0xbb   :  { %v2611_v32 = vpop.f32.mrf.mxu2  ;;  %v2624_v33 = vpop.f32.mrf.mxu3  ;;  %v2636_v36 = vadd.f32 %v2635_v34, %v2623_v25 }
  0xbd   :  { %v2649_v41 = vadd.f32 %v2648_v35, %v2636_v36  ;;  %3050 = vmatmul.bf16.vlgmr.msrb.gmra.mxu0 %v318_v62  ;;  %3063 = vmatmul.bf16.vlgmr.msrb.gmra.mxu1 %v319_v0  ;;  %v1375_v62 = vunpack.c.h.b16 %v98_v55  ;;  %v334_v36 = vld [vmem:[#allocation1] sm:$0xff] }
  0xbe   :  { %3153 = vmatpush.bf16.xpose.msrb.mxu0 %v1754_v38  ;;  %3166 = vmatpush.bf16.xpose.msrb.mxu1 %v1755_v40  ;;  %v336_v38 = vld [vmem:[#allocation1 + $0x12] sm:$0xff]  ;;  %v338_v40 = vld [vmem:[#allocation1 + $0x24] sm:$0xff] }
  0xbf   :  { %v1759_v7 = vpack.c.b16 %v1375_v62, %v1375_v62 }
  0xc0   :  { %3076 = vmatmul.bf16.vlgmr.msrb.gmra.mxu2 %v320_v3  ;;  %3089 = vmatmul.bf16.vlgmr.msrb.gmra.mxu3 %v321_v4  ;;  %v1760_v4 = vpack.c.b16 %v1376_v59, %v1376_v59 }
  0xc1   :  { %3179 = vmatpush.bf16.xpose.msrb.mxu2 %v1756_v37  ;;  %3192 = vmatpush.bf16.xpose.msrb.mxu3 %v1757_v39  ;;  %v335_v37 = vld [vmem:[#allocation1 + $0x9] sm:$0xff]  ;;  %v337_v39 = vld [vmem:[#allocation1 + $0x1b] sm:$0xff] }
  0xc2   :  { %v2637_v45 = vpop.f32.mrf.mxu0  ;;  %v2650_v46 = vpop.f32.mrf.mxu1 }
  0xc3   :  { %v2661_v42 = vpop.f32.mrf.mxu2  ;;  %v2674_v43 = vpop.f32.mrf.mxu3  ;;  %v340_v45 = vld [vmem:[#allocation1 + $0x36] sm:$0xff]  ;;  %v341_v46 = vld [vmem:[#allocation1 + $0x3f] sm:$0xff] }
  0xc4   :  { %v2662_v44 = vadd.f32 %v2661_v42, %v2649_v41  ;;  %v339_v42 = vld [vmem:[#allocation1 + $0x2d] sm:$0xff] }
  0xc6   :  { %v2675_v52 = vadd.f32 %v2674_v43, %v2662_v44  ;;  %v103_v43 = vld [vmem:[%s8267_s1 + $0x108] sm:$0xff]  ;;  %v102_v44 = vld [vmem:[%s8267_s1 + $0x100] sm:$0xff] }
  0xca   :  { %v2687_v1 = vpop.f32.mrf.mxu0  ;;  %v2700_v2 = vpop.f32.mrf.mxu1 }
  0xcb   :  { %v2663_v63 = vpop.f32.mrf.mxu2  ;;  %v2676_v0 = vpop.f32.mrf.mxu3  ;;  %v2688_v3 = vadd.f32 %v2687_v1, %v2675_v52 }
  0xcd   :  { %v2701_v8 = vadd.f32 %v2700_v2, %v2688_v3  ;;  %3102 = vmatmul.bf16.vlgmr.msra.gmra.mxu0 %v324_v47  ;;  %3115 = vmatmul.bf16.vlgmr.msra.gmra.mxu1 %v325_v48  ;;  %v30_v47 = vld [vmem:[%s8268_s0 + $0x40] sm:$0xff]  ;;  %v1384_v48 = vunpack.c.l.b16 %v103_v43 }
  0xce   :  { %3205 = vmatpush.bf16.xpose.msra.mxu0 %v1758_v5  ;;  %3218 = vmatpush.bf16.xpose.msra.mxu1 %v1759_v7  ;;  %343 = vst [vmem:[#allocation1] ss:$9 sm:$0xff] %v30_v47  ;;  %v104_v5 = vld [vmem:[%s8267_s1 + $0x110] sm:$0xff] }
  0xcf   :  { %v1386_v7 = vunpack.c.l.b16 %v104_v5 }
  0xd0   :  { %3128 = vmatmul.bf16.vlgmr.msra.gmra.mxu2 %v326_v49  ;;  %3141 = vmatmul.bf16.vlgmr.msra.gmra.mxu3 %v327_v50  ;;  %v1382_v49 = vunpack.c.l.b16 %v102_v44  ;;  %v1385_v50 = vunpack.c.h.b16 %v103_v43 }
  0xd1   :  { %3231 = vmatpush.bf16.xpose.msra.mxu2 %v1760_v4  ;;  %3244 = vmatpush.bf16.xpose.msra.mxu3 %v1761_v6  ;;  %v105_v4 = vld [vmem:[%s8267_s1 + $0x118] sm:$0xff]  ;;  %v1770_v16 = vpack.c.b16 %v1386_v7, %v1386_v7 }
  0xd2   :  { %v2689_v12 = vpop.f32.mrf.mxu0  ;;  %v2702_v13 = vpop.f32.mrf.mxu1  ;;  %v1766_v58 = vpack.c.b16 %v1382_v49, %v1382_v49  ;;  %v1769_v59 = vpack.c.b16 %v1385_v50, %v1385_v50  ;;  %v1388_v6 = vunpack.c.l.b16 %v105_v4 }
  0xd3   :  { %v2713_v9 = vpop.f32.mrf.mxu2  ;;  %v2726_v10 = vpop.f32.mrf.mxu3 }
  0xd4   :  { %v2714_v11 = vadd.f32 %v2713_v9, %v2701_v8  ;;  %v1389_v8 = vunpack.c.h.b16 %v105_v4  ;;  %v1387_v9 = vunpack.c.h.b16 %v104_v5  ;;  %v1772_v15 = vpack.c.b16 %v1388_v6, %v1388_v6 }
  0xd6   :  { %v2727_v14 = vadd.f32 %v2726_v10, %v2714_v11  ;;  %v1773_v17 = vpack.c.b16 %v1389_v8, %v1389_v8  ;;  %v1771_v18 = vpack.c.b16 %v1387_v9, %v1387_v9 }
  0xda   :  { %v2739_v23 = vpop.f32.mrf.mxu0  ;;  %v2752_v24 = vpop.f32.mrf.mxu1 }
  0xdb   :  { %v2715_v21 = vpop.f32.mrf.mxu2  ;;  %v2728_v22 = vpop.f32.mrf.mxu3  ;;  %v2740_v25 = vadd.f32 %v2739_v23, %v2727_v14 }
  0xdd   :  { %v2753_v30 = vadd.f32 %v2752_v24, %v2740_v25  ;;  %3154 = vmatmul.bf16.vlgmr.msrb.gmra.mxu0 %v328_v51  ;;  %3167 = vmatmul.bf16.vlgmr.msrb.gmra.mxu1 %v329_v53  ;;  %v1383_v51 = vunpack.c.h.b16 %v102_v44  ;;  %v344_v25 = vld [vmem:[#allocation1] sm:$0xff] }
  0xde   :  { %3257 = vmatpush.bf16.xpose.msrb.mxu0 %v1762_v27  ;;  %3270 = vmatpush.bf16.xpose.msrb.mxu1 %v1763_v29  ;;  %v346_v27 = vld [vmem:[#allocation1 + $0x12] sm:$0xff]  ;;  %v348_v29 = vld [vmem:[#allocation1 + $0x24] sm:$0xff] }
  0xdf   :  { %v1767_v60 = vpack.c.b16 %v1383_v51, %v1383_v51 }
  0xe0   :  { %3180 = vmatmul.bf16.vlgmr.msrb.gmra.mxu2 %v330_v56  ;;  %3193 = vmatmul.bf16.vlgmr.msrb.gmra.mxu3 %v331_v57  ;;  %v1768_v57 = vpack.c.b16 %v1384_v48, %v1384_v48 }
  0xe1   :  { %3283 = vmatpush.bf16.xpose.msrb.mxu2 %v1764_v26  ;;  %3296 = vmatpush.bf16.xpose.msrb.mxu3 %v1765_v28  ;;  %v345_v26 = vld [vmem:[#allocation1 + $0x9] sm:$0xff]  ;;  %v347_v28 = vld [vmem:[#allocation1 + $0x1b] sm:$0xff] }
  0xe2   :  { %v2741_v34 = vpop.f32.mrf.mxu0  ;;  %v2754_v35 = vpop.f32.mrf.mxu1 }
  0xe3   :  { %v2765_v31 = vpop.f32.mrf.mxu2  ;;  %v2778_v32 = vpop.f32.mrf.mxu3  ;;  %v350_v34 = vld [vmem:[#allocation1 + $0x36] sm:$0xff]  ;;  %v351_v35 = vld [vmem:[#allocation1 + $0x3f] sm:$0xff] }
  0xe4   :  { %v2766_v33 = vadd.f32 %v2765_v31, %v2753_v30  ;;  %v349_v31 = vld [vmem:[#allocation1 + $0x2d] sm:$0xff] }
  0xe6   :  { %v2779_v41 = vadd.f32 %v2778_v32, %v2766_v33  ;;  %v107_v32 = vld [vmem:[%s8267_s1 + $0x128] sm:$0xff]  ;;  %v106_v33 = vld [vmem:[%s8267_s1 + $0x120] sm:$0xff] }
  0xea   :  { %v2791_v54 = vpop.f32.mrf.mxu0  ;;  %v2804_v55 = vpop.f32.mrf.mxu1 }
  0xeb   :  { %v2767_v52 = vpop.f32.mrf.mxu2  ;;  %v2780_v53 = vpop.f32.mrf.mxu3  ;;  %v2792_v56 = vadd.f32 %v2791_v54, %v2779_v41 }
  0xed   :  { %v2805_v61 = vadd.f32 %v2804_v55, %v2792_v56  ;;  %3206 = vmatmul.bf16.vlgmr.msra.gmra.mxu0 %v334_v36  ;;  %3219 = vmatmul.bf16.vlgmr.msra.gmra.mxu1 %v335_v37  ;;  %v31_v36 = vld [vmem:[%s8268_s0 + $0x48] sm:$0xff]  ;;  %v1392_v37 = vunpack.c.l.b16 %v107_v32 }
  0xee   :  { %3309 = vmatpush.bf16.xpose.msra.mxu0 %v1766_v58  ;;  %3322 = vmatpush.bf16.xpose.msra.mxu1 %v1767_v60  ;;  %353 = vst [vmem:[#allocation1] ss:$9 sm:$0xff] %v31_v36  ;;  %v108_v58 = vld [vmem:[%s8267_s1 + $0x130] sm:$0xff] }
  0xef   :  { %v1394_v60 = vunpack.c.l.b16 %v108_v58 }
  0xf0   :  { %3232 = vmatmul.bf16.vlgmr.msra.gmra.mxu2 %v336_v38  ;;  %3245 = vmatmul.bf16.vlgmr.msra.gmra.mxu3 %v337_v39  ;;  %v1390_v38 = vunpack.c.l.b16 %v106_v33  ;;  %v1393_v39 = vunpack.c.h.b16 %v107_v32 }
  0xf1   :  { %3335 = vmatpush.bf16.xpose.msra.mxu2 %v1768_v57  ;;  %3348 = vmatpush.bf16.xpose.msra.mxu3 %v1769_v59  ;;  %v109_v57 = vld [vmem:[%s8267_s1 + $0x138] sm:$0xff]  ;;  %v1778_v5 = vpack.c.b16 %v1394_v60, %v1394_v60 }
  0xf2   :  { %v2793_v1 = vpop.f32.mrf.mxu0  ;;  %v2806_v2 = vpop.f32.mrf.mxu1  ;;  %v1774_v47 = vpack.c.b16 %v1390_v38, %v1390_v38  ;;  %v1777_v48 = vpack.c.b16 %v1393_v39, %v1393_v39  ;;  %v1396_v59 = vunpack.c.l.b16 %v109_v57 }
  0xf3   :  { %v2817_v62 = vpop.f32.mrf.mxu2  ;;  %v2830_v63 = vpop.f32.mrf.mxu3 }
  0xf4   :  { %v2818_v0 = vadd.f32 %v2817_v62, %v2805_v61  ;;  %v1397_v61 = vunpack.c.h.b16 %v109_v57  ;;  %v1395_v62 = vunpack.c.h.b16 %v108_v58  ;;  %v1780_v4 = vpack.c.b16 %v1396_v59, %v1396_v59 }
  0xf6   :  { %v2831_v3 = vadd.f32 %v2830_v63, %v2818_v0  ;;  %v1781_v6 = vpack.c.b16 %v1397_v61, %v1397_v61  ;;  %v1779_v7 = vpack.c.b16 %v1395_v62, %v1395_v62 }
  0xfa   :  { %v2843_v12 = vpop.f32.mrf.mxu0  ;;  %v2856_v13 = vpop.f32.mrf.mxu1 }
  0xfb   :  { %v2819_v10 = vpop.f32.mrf.mxu2  ;;  %v2832_v11 = vpop.f32.mrf.mxu3  ;;  %v2844_v14 = vadd.f32 %v2843_v12, %v2831_v3 }
  0xfd   :  { %v2857_v19 = vadd.f32 %v2856_v13, %v2844_v14  ;;  %3258 = vmatmul.bf16.vlgmr.msrb.gmra.mxu0 %v338_v40  ;;  %3271 = vmatmul.bf16.vlgmr.msrb.gmra.mxu1 %v339_v42  ;;  %v1391_v40 = vunpack.c.h.b16 %v106_v33  ;;  %v354_v14 = vld [vmem:[#allocation1] sm:$0xff] }
  0xfe   :  { %3361 = vmatpush.bf16.xpose.msrb.mxu0 %v1770_v16  ;;  %3374 = vmatpush.bf16.xpose.msrb.mxu1 %v1771_v18  ;;  %v356_v16 = vld [vmem:[#allocation1 + $0x12] sm:$0xff]  ;;  %v358_v18 = vld [vmem:[#allocation1 + $0x24] sm:$0xff] }
  0xff   :  { %v1775_v49 = vpack.c.b16 %v1391_v40, %v1391_v40 }
 0x100   :  { %3284 = vmatmul.bf16.vlgmr.msrb.gmra.mxu2 %v340_v45  ;;  %3297 = vmatmul.bf16.vlgmr.msrb.gmra.mxu3 %v341_v46  ;;  %v1776_v46 = vpack.c.b16 %v1392_v37, %v1392_v37 }
 0x101   :  { %3387 = vmatpush.bf16.xpose.msrb.mxu2 %v1772_v15  ;;  %3400 = vmatpush.bf16.xpose.msrb.mxu3 %v1773_v17  ;;  %v355_v15 = vld [vmem:[#allocation1 + $0x9] sm:$0xff]  ;;  %v357_v17 = vld [vmem:[#allocation1 + $0x1b] sm:$0xff] }
 0x102   :  { %v2845_v23 = vpop.f32.mrf.mxu0  ;;  %v2858_v24 = vpop.f32.mrf.mxu1 }
 0x103   :  { %v2869_v20 = vpop.f32.mrf.mxu2  ;;  %v2882_v21 = vpop.f32.mrf.mxu3  ;;  %v360_v23 = vld [vmem:[#allocation1 + $0x36] sm:$0xff]  ;;  %v361_v24 = vld [vmem:[#allocation1 + $0x3f] sm:$0xff] }
 0x104   :  { %v2870_v22 = vadd.f32 %v2869_v20, %v2857_v19  ;;  %v359_v20 = vld [vmem:[#allocation1 + $0x2d] sm:$0xff] }
 0x106   :  { %v2883_v30 = vadd.f32 %v2882_v21, %v2870_v22  ;;  %v111_v21 = vld [vmem:[%s8267_s1 + $0x148] sm:$0xff]  ;;  %v110_v22 = vld [vmem:[%s8267_s1 + $0x140] sm:$0xff] }
 0x10a   :  { %v2895_v43 = vpop.f32.mrf.mxu0  ;;  %v2908_v44 = vpop.f32.mrf.mxu1 }
 0x10b   :  { %v2871_v41 = vpop.f32.mrf.mxu2  ;;  %v2884_v42 = vpop.f32.mrf.mxu3  ;;  %v2896_v45 = vadd.f32 %v2895_v43, %v2883_v30 }
 0x10d   :  { %v2909_v50 = vadd.f32 %v2908_v44, %v2896_v45  ;;  %3310 = vmatmul.bf16.vlgmr.msra.gmra.mxu0 %v344_v25  ;;  %3323 = vmatmul.bf16.vlgmr.msra.gmra.mxu1 %v345_v26  ;;  %v32_v25 = vld [vmem:[%s8268_s0 + $0x50] sm:$0xff]  ;;  %v1400_v26 = vunpack.c.l.b16 %v111_v21 }
 0x10e   :  { %3413 = vmatpush.bf16.xpose.msra.mxu0 %v1774_v47  ;;  %3426 = vmatpush.bf16.xpose.msra.mxu1 %v1775_v49  ;;  %363 = vst [vmem:[#allocation1] ss:$9 sm:$0xff] %v32_v25  ;;  %v112_v47 = vld [vmem:[%s8267_s1 + $0x150] sm:$0xff] }
 0x10f   :  { %v1402_v49 = vunpack.c.l.b16 %v112_v47 }
 0x110   :  { %3336 = vmatmul.bf16.vlgmr.msra.gmra.mxu2 %v346_v27  ;;  %3349 = vmatmul.bf16.vlgmr.msra.gmra.mxu3 %v347_v28  ;;  %v1398_v27 = vunpack.c.l.b16 %v110_v22  ;;  %v1401_v28 = vunpack.c.h.b16 %v111_v21 }
 0x111   :  { %3439 = vmatpush.bf16.xpose.msra.mxu2 %v1776_v46  ;;  %3452 = vmatpush.bf16.xpose.msra.mxu3 %v1777_v48  ;;  %v113_v46 = vld [vmem:[%s8267_s1 + $0x158] sm:$0xff]  ;;  %v1786_v58 = vpack.c.b16 %v1402_v49, %v1402_v49 }
 0x112   :  { %v2897_v54 = vpop.f32.mrf.mxu0  ;;  %v2910_v55 = vpop.f32.mrf.mxu1  ;;  %v1782_v36 = vpack.c.b16 %v1398_v27, %v1398_v27  ;;  %v1785_v37 = vpack.c.b16 %v1401_v28, %v1401_v28  ;;  %v1404_v48 = vunpack.c.l.b16 %v113_v46 }
 0x113   :  { %v2921_v51 = vpop.f32.mrf.mxu2  ;;  %v2934_v52 = vpop.f32.mrf.mxu3 }
 0x114   :  { %v2922_v53 = vadd.f32 %v2921_v51, %v2909_v50  ;;  %v1405_v50 = vunpack.c.h.b16 %v113_v46  ;;  %v1403_v51 = vunpack.c.h.b16 %v112_v47  ;;  %v1788_v57 = vpack.c.b16 %v1404_v48, %v1404_v48 }
 0x116   :  { %v2935_v56 = vadd.f32 %v2934_v52, %v2922_v53  ;;  %v1789_v59 = vpack.c.b16 %v1405_v50, %v1405_v50  ;;  %v1787_v60 = vpack.c.b16 %v1403_v51, %v1403_v51 }
 0x11a   :  { %v2947_v1 = vpop.f32.mrf.mxu0  ;;  %v2960_v2 = vpop.f32.mrf.mxu1 }
 0x11b   :  { %v2923_v63 = vpop.f32.mrf.mxu2  ;;  %v2936_v0 = vpop.f32.mrf.mxu3  ;;  %v2948_v3 = vadd.f32 %v2947_v1, %v2935_v56 }
 0x11d   :  { %v2961_v8 = vadd.f32 %v2960_v2, %v2948_v3  ;;  %3362 = vmatmul.bf16.vlgmr.msrb.gmra.mxu0 %v348_v29  ;;  %3375 = vmatmul.bf16.vlgmr.msrb.gmra.mxu1 %v349_v31  ;;  %v1399_v29 = vunpack.c.h.b16 %v110_v22  ;;  %v364_v3 = vld [vmem:[#allocation1] sm:$0xff] }
 0x11e   :  { %3465 = vmatpush.bf16.xpose.msrb.mxu0 %v1778_v5  ;;  %3478 = vmatpush.bf16.xpose.msrb.mxu1 %v1779_v7  ;;  %v366_v5 = vld [vmem:[#allocation1 + $0x12] sm:$0xff]  ;;  %v368_v7 = vld [vmem:[#allocation1 + $0x24] sm:$0xff] }
 0x11f   :  { %v1783_v38 = vpack.c.b16 %v1399_v29, %v1399_v29 }
 0x120   :  { %3388 = vmatmul.bf16.vlgmr.msrb.gmra.mxu2 %v350_v34  ;;  %3401 = vmatmul.bf16.vlgmr.msrb.gmra.mxu3 %v351_v35  ;;  %v1784_v35 = vpack.c.b16 %v1400_v26, %v1400_v26 }
 0x121   :  { %3491 = vmatpush.bf16.xpose.msrb.mxu2 %v1780_v4  ;;  %3504 = vmatpush.bf16.xpose.msrb.mxu3 %v1781_v6  ;;  %v365_v4 = vld [vmem:[#allocation1 + $0x9] sm:$0xff]  ;;  %v367_v6 = vld [vmem:[#allocation1 + $0x1b] sm:$0xff] }
 0x122   :  { %v2949_v12 = vpop.f32.mrf.mxu0  ;;  %v2962_v13 = vpop.f32.mrf.mxu1 }
 0x123   :  { %v2973_v9 = vpop.f32.mrf.mxu2  ;;  %v2986_v10 = vpop.f32.mrf.mxu3  ;;  %v370_v12 = vld [vmem:[#allocation1 + $0x36] sm:$0xff]  ;;  %v371_v13 = vld [vmem:[#allocation1 + $0x3f] sm:$0xff] }
 0x124   :  { %v2974_v11 = vadd.f32 %v2973_v9, %v2961_v8  ;;  %v369_v9 = vld [vmem:[#allocation1 + $0x2d] sm:$0xff] }
 0x126   :  { %v2987_v19 = vadd.f32 %v2986_v10, %v2974_v11  ;;  %v115_v10 = vld [vmem:[%s8267_s1 + $0x168] sm:$0xff]  ;;  %v114_v11 = vld [vmem:[%s8267_s1 + $0x160] sm:$0xff] }
 0x12a   :  { %v2999_v32 = vpop.f32.mrf.mxu0  ;;  %v3012_v33 = vpop.f32.mrf.mxu1 }
 0x12b   :  { %v2975_v30 = vpop.f32.mrf.mxu2  ;;  %v2988_v31 = vpop.f32.mrf.mxu3  ;;  %v3000_v34 = vadd.f32 %v2999_v32, %v2987_v19 }
 0x12d   :  { %v3013_v39 = vadd.f32 %v3012_v33, %v3000_v34  ;;  %3414 = vmatmul.bf16.vlgmr.msra.gmra.mxu0 %v354_v14  ;;  %3427 = vmatmul.bf16.vlgmr.msra.gmra.mxu1 %v355_v15  ;;  %v33_v14 = vld [vmem:[%s8268_s0 + $0x58] sm:$0xff]  ;;  %v1408_v15 = vunpack.c.l.b16 %v115_v10 }
 0x12e   :  { %3517 = vmatpush.bf16.xpose.msra.mxu0 %v1782_v36  ;;  %3530 = vmatpush.bf16.xpose.msra.mxu1 %v1783_v38  ;;  %373 = vst [vmem:[#allocation1] ss:$9 sm:$0xff] %v33_v14  ;;  %v116_v36 = vld [vmem:[%s8267_s1 + $0x170] sm:$0xff] }
 0x12f   :  { %v1410_v38 = vunpack.c.l.b16 %v116_v36 }
 0x130   :  { %3440 = vmatmul.bf16.vlgmr.msra.gmra.mxu2 %v356_v16  ;;  %3453 = vmatmul.bf16.vlgmr.msra.gmra.mxu3 %v357_v17  ;;  %v1406_v16 = vunpack.c.l.b16 %v114_v11  ;;  %v1409_v17 = vunpack.c.h.b16 %v115_v10 }
 0x131   :  { %3543 = vmatpush.bf16.xpose.msra.mxu2 %v1784_v35  ;;  %3556 = vmatpush.bf16.xpose.msra.mxu3 %v1785_v37  ;;  %v117_v35 = vld [vmem:[%s8267_s1 + $0x178] sm:$0xff]  ;;  %v1794_v47 = vpack.c.b16 %v1410_v38, %v1410_v38 }
 0x132   :  { %v3001_v43 = vpop.f32.mrf.mxu0  ;;  %v3014_v44 = vpop.f32.mrf.mxu1  ;;  %v1790_v25 = vpack.c.b16 %v1406_v16, %v1406_v16  ;;  %v1793_v26 = vpack.c.b16 %v1409_v17, %v1409_v17  ;;  %v1412_v37 = vunpack.c.l.b16 %v117_v35 }
 0x133   :  { %v3025_v40 = vpop.f32.mrf.mxu2  ;;  %v3038_v41 = vpop.f32.mrf.mxu3 }
 0x134   :  { %v3026_v42 = vadd.f32 %v3025_v40, %v3013_v39  ;;  %v1413_v39 = vunpack.c.h.b16 %v117_v35  ;;  %v1411_v40 = vunpack.c.h.b16 %v116_v36  ;;  %v1796_v46 = vpack.c.b16 %v1412_v37, %v1412_v37 }
 0x136   :  { %v3039_v45 = vadd.f32 %v3038_v41, %v3026_v42  ;;  %v1797_v48 = vpack.c.b16 %v1413_v39, %v1413_v39  ;;  %v1795_v49 = vpack.c.b16 %v1411_v40, %v1411_v40 }
 0x13a   :  { %v3051_v54 = vpop.f32.mrf.mxu0  ;;  %v3064_v55 = vpop.f32.mrf.mxu1 }
 0x13b   :  { %v3027_v52 = vpop.f32.mrf.mxu2  ;;  %v3040_v53 = vpop.f32.mrf.mxu3  ;;  %v3052_v56 = vadd.f32 %v3051_v54, %v3039_v45 }
 0x13d   :  { %v3065_v61 = vadd.f32 %v3064_v55, %v3052_v56  ;;  %3466 = vmatmul.bf16.vlgmr.msrb.gmra.mxu0 %v358_v18  ;;  %3479 = vmatmul.bf16.vlgmr.msrb.gmra.mxu1 %v359_v20  ;;  %v1407_v18 = vunpack.c.h.b16 %v114_v11  ;;  %v374_v56 = vld [vmem:[#allocation1] sm:$0xff] }
 0x13e   :  { %3569 = vmatpush.bf16.xpose.msrb.mxu0 %v1786_v58  ;;  %3582 = vmatpush.bf16.xpose.msrb.mxu1 %v1787_v60  ;;  %v376_v58 = vld [vmem:[#allocation1 + $0x12] sm:$0xff]  ;;  %v378_v60 = vld [vmem:[#allocation1 + $0x24] sm:$0xff] }
 0x13f   :  { %v1791_v27 = vpack.c.b16 %v1407_v18, %v1407_v18 }
 0x140   :  { %3492 = vmatmul.bf16.vlgmr.msrb.gmra.mxu2 %v360_v23  ;;  %3505 = vmatmul.bf16.vlgmr.msrb.gmra.mxu3 %v361_v24  ;;  %v1792_v24 = vpack.c.b16 %v1408_v15, %v1408_v15 }
 0x141   :  { %3595 = vmatpush.bf16.xpose.msrb.mxu2 %v1788_v57  ;;  %3608 = vmatpush.bf16.xpose.msrb.mxu3 %v1789_v59  ;;  %v375_v57 = vld [vmem:[#allocation1 + $0x9] sm:$0xff]  ;;  %v377_v59 = vld [vmem:[#allocation1 + $0x1b] sm:$0xff] }
 0x142   :  { %v3053_v1 = vpop.f32.mrf.mxu0  ;;  %v3066_v2 = vpop.f32.mrf.mxu1 }
 0x143   :  { %v3077_v62 = vpop.f32.mrf.mxu2  ;;  %v3090_v63 = vpop.f32.mrf.mxu3  ;;  %v380_v1 = vld [vmem:[#allocation1 + $0x36] sm:$0xff]  ;;  %v381_v2 = vld [vmem:[#allocation1 + $0x3f] sm:$0xff] }
 0x144   :  { %v3078_v0 = vadd.f32 %v3077_v62, %v3065_v61  ;;  %v379_v62 = vld [vmem:[#allocation1 + $0x2d] sm:$0xff] }
 0x146   :  { %v3091_v8 = vadd.f32 %v3090_v63, %v3078_v0  ;;  %v119_v63 = vld [vmem:[%s8267_s1 + $0x188] sm:$0xff]  ;;  %v118_v0 = vld [vmem:[%s8267_s1 + $0x180] sm:$0xff] }
 0x14a   :  { %v3103_v21 = vpop.f32.mrf.mxu0  ;;  %v3116_v22 = vpop.f32.mrf.mxu1 }
 0x14b   :  { %v3079_v19 = vpop.f32.mrf.mxu2  ;;  %v3092_v20 = vpop.f32.mrf.mxu3  ;;  %v3104_v23 = vadd.f32 %v3103_v21, %v3091_v8 }
 0x14d   :  { %v3117_v28 = vadd.f32 %v3116_v22, %v3104_v23  ;;  %3518 = vmatmul.bf16.vlgmr.msra.gmra.mxu0 %v364_v3  ;;  %3531 = vmatmul.bf16.vlgmr.msra.gmra.mxu1 %v365_v4  ;;  %v34_v3 = vld [vmem:[%s8268_s0 + $0x60] sm:$0xff]  ;;  %v1416_v4 = vunpack.c.l.b16 %v119_v63 }
 0x14e   :  { %3621 = vmatpush.bf16.xpose.msra.mxu0 %v1790_v25  ;;  %3634 = vmatpush.bf16.xpose.msra.mxu1 %v1791_v27  ;;  %383 = vst [vmem:[#allocation1] ss:$9 sm:$0xff] %v34_v3  ;;  %v120_v25 = vld [vmem:[%s8267_s1 + $0x190] sm:$0xff] }
 0x14f   :  { %v1418_v27 = vunpack.c.l.b16 %v120_v25 }
 0x150   :  { %3544 = vmatmul.bf16.vlgmr.msra.gmra.mxu2 %v366_v5  ;;  %3557 = vmatmul.bf16.vlgmr.msra.gmra.mxu3 %v367_v6  ;;  %v1414_v5 = vunpack.c.l.b16 %v118_v0  ;;  %v1417_v6 = vunpack.c.h.b16 %v119_v63 }
 0x151   :  { %3647 = vmatpush.bf16.xpose.msra.mxu2 %v1792_v24  ;;  %3660 = vmatpush.bf16.xpose.msra.mxu3 %v1793_v26  ;;  %v121_v24 = vld [vmem:[%s8267_s1 + $0x198] sm:$0xff]  ;;  %v1802_v36 = vpack.c.b16 %v1418_v27, %v1418_v27 }
 0x152   :  { %v3105_v32 = vpop.f32.mrf.mxu0  ;;  %v3118_v33 = vpop.f32.mrf.mxu1  ;;  %v1798_v14 = vpack.c.b16 %v1414_v5, %v1414_v5  ;;  %v1801_v15 = vpack.c.b16 %v1417_v6, %v1417_v6  ;;  %v1420_v26 = vunpack.c.l.b16 %v121_v24 }
 0x153   :  { %v3129_v29 = vpop.f32.mrf.mxu2  ;;  %v3142_v30 = vpop.f32.mrf.mxu3 }
 0x154   :  { %v3130_v31 = vadd.f32 %v3129_v29, %v3117_v28  ;;  %v1421_v28 = vunpack.c.h.b16 %v121_v24  ;;  %v1419_v29 = vunpack.c.h.b16 %v120_v25  ;;  %v1804_v35 = vpack.c.b16 %v1420_v26, %v1420_v26 }
 0x156   :  { %v3143_v34 = vadd.f32 %v3142_v30, %v3130_v31  ;;  %v1805_v37 = vpack.c.b16 %v1421_v28, %v1421_v28  ;;  %v1803_v38 = vpack.c.b16 %v1419_v29, %v1419_v29 }
 0x15a   :  { %v3155_v43 = vpop.f32.mrf.mxu0  ;;  %v3168_v44 = vpop.f32.mrf.mxu1 }
 0x15b   :  { %v3131_v41 = vpop.f32.mrf.mxu2  ;;  %v3144_v42 = vpop.f32.mrf.mxu3  ;;  %v3156_v45 = vadd.f32 %v3155_v43, %v3143_v34 }
 0x15d   :  { %v3169_v50 = vadd.f32 %v3168_v44, %v3156_v45  ;;  %3570 = vmatmul.bf16.vlgmr.msrb.gmra.mxu0 %v368_v7  ;;  %3583 = vmatmul.bf16.vlgmr.msrb.gmra.mxu1 %v369_v9  ;;  %v1415_v7 = vunpack.c.h.b16 %v118_v0  ;;  %v384_v45 = vld [vmem:[#allocation1] sm:$0xff] }
 0x15e   :  { %3673 = vmatpush.bf16.xpose.msrb.mxu0 %v1794_v47  ;;  %3686 = vmatpush.bf16.xpose.msrb.mxu1 %v1795_v49  ;;  %v386_v47 = vld [vmem:[#allocation1 + $0x12] sm:$0xff]  ;;  %v388_v49 = vld [vmem:[#allocation1 + $0x24] sm:$0xff] }
 0x15f   :  { %v1799_v16 = vpack.c.b16 %v1415_v7, %v1415_v7 }
 0x160   :  { %3596 = vmatmul.bf16.vlgmr.msrb.gmra.mxu2 %v370_v12  ;;  %3609 = vmatmul.bf16.vlgmr.msrb.gmra.mxu3 %v371_v13  ;;  %v1800_v13 = vpack.c.b16 %v1416_v4, %v1416_v4 }
 0x161   :  { %3699 = vmatpush.bf16.xpose.msrb.mxu2 %v1796_v46  ;;  %3712 = vmatpush.bf16.xpose.msrb.mxu3 %v1797_v48  ;;  %v385_v46 = vld [vmem:[#allocation1 + $0x9] sm:$0xff]  ;;  %v387_v48 = vld [vmem:[#allocation1 + $0x1b] sm:$0xff] }
 0x162   :  { %v3157_v54 = vpop.f32.mrf.mxu0  ;;  %v3170_v55 = vpop.f32.mrf.mxu1 }
 0x163   :  { %v3181_v51 = vpop.f32.mrf.mxu2  ;;  %v3194_v52 = vpop.f32.mrf.mxu3  ;;  %v390_v54 = vld [vmem:[#allocation1 + $0x36] sm:$0xff]  ;;  %v391_v55 = vld [vmem:[#allocation1 + $0x3f] sm:$0xff] }
 0x164   :  { %v3182_v53 = vadd.f32 %v3181_v51, %v3169_v50  ;;  %v389_v51 = vld [vmem:[#allocation1 + $0x2d] sm:$0xff] }
 0x166   :  { %v3195_v61 = vadd.f32 %v3194_v52, %v3182_v53  ;;  %v123_v52 = vld [vmem:[%s8267_s1 + $0x1a8] sm:$0xff]  ;;  %v122_v53 = vld [vmem:[%s8267_s1 + $0x1a0] sm:$0xff] }
 0x16a   :  { %v3207_v10 = vpop.f32.mrf.mxu0  ;;  %v3220_v11 = vpop.f32.mrf.mxu1 }
 0x16b   :  { %v3183_v8 = vpop.f32.mrf.mxu2  ;;  %v3196_v9 = vpop.f32.mrf.mxu3  ;;  %v3208_v12 = vadd.f32 %v3207_v10, %v3195_v61 }
 0x16d   :  { %v3221_v17 = vadd.f32 %v3220_v11, %v3208_v12  ;;  %3622 = vmatmul.bf16.vlgmr.msra.gmra.mxu0 %v374_v56  ;;  %3635 = vmatmul.bf16.vlgmr.msra.gmra.mxu1 %v375_v57  ;;  %v35_v56 = vld [vmem:[%s8268_s0 + $0x68] sm:$0xff]  ;;  %v1424_v57 = vunpack.c.l.b16 %v123_v52 }
 0x16e   :  { %3725 = vmatpush.bf16.xpose.msra.mxu0 %v1798_v14  ;;  %3738 = vmatpush.bf16.xpose.msra.mxu1 %v1799_v16  ;;  %393 = vst [vmem:[#allocation1] ss:$9 sm:$0xff] %v35_v56  ;;  %v124_v14 = vld [vmem:[%s8267_s1 + $0x1b0] sm:$0xff] }
 0x16f   :  { %v1426_v16 = vunpack.c.l.b16 %v124_v14 }
 0x170   :  { %3648 = vmatmul.bf16.vlgmr.msra.gmra.mxu2 %v376_v58  ;;  %3661 = vmatmul.bf16.vlgmr.msra.gmra.mxu3 %v377_v59  ;;  %v1422_v58 = vunpack.c.l.b16 %v122_v53  ;;  %v1425_v59 = vunpack.c.h.b16 %v123_v52 }
 0x171   :  { %3751 = vmatpush.bf16.xpose.msra.mxu2 %v1800_v13  ;;  %3764 = vmatpush.bf16.xpose.msra.mxu3 %v1801_v15  ;;  %v125_v13 = vld [vmem:[%s8267_s1 + $0x1b8] sm:$0xff]  ;;  %v1810_v25 = vpack.c.b16 %v1426_v16, %v1426_v16 }
 0x172   :  { %v3209_v21 = vpop.f32.mrf.mxu0  ;;  %v3222_v22 = vpop.f32.mrf.mxu1  ;;  %v1806_v3 = vpack.c.b16 %v1422_v58, %v1422_v58  ;;  %v1809_v4 = vpack.c.b16 %v1425_v59, %v1425_v59  ;;  %v1428_v15 = vunpack.c.l.b16 %v125_v13 }
 0x173   :  { %v3233_v18 = vpop.f32.mrf.mxu2  ;;  %v3246_v19 = vpop.f32.mrf.mxu3 }
 0x174   :  { %v3234_v20 = vadd.f32 %v3233_v18, %v3221_v17  ;;  %v1429_v17 = vunpack.c.h.b16 %v125_v13  ;;  %v1427_v18 = vunpack.c.h.b16 %v124_v14  ;;  %v1812_v24 = vpack.c.b16 %v1428_v15, %v1428_v15 }
 0x176   :  { %v3247_v23 = vadd.f32 %v3246_v19, %v3234_v20  ;;  %v1813_v26 = vpack.c.b16 %v1429_v17, %v1429_v17  ;;  %v1811_v27 = vpack.c.b16 %v1427_v18, %v1427_v18 }
 0x17a   :  { %v3259_v32 = vpop.f32.mrf.mxu0  ;;  %v3272_v33 = vpop.f32.mrf.mxu1 }
 0x17b   :  { %v3235_v30 = vpop.f32.mrf.mxu2  ;;  %v3248_v31 = vpop.f32.mrf.mxu3  ;;  %v3260_v34 = vadd.f32 %v3259_v32, %v3247_v23 }
 0x17d   :  { %v3273_v39 = vadd.f32 %v3272_v33, %v3260_v34  ;;  %3674 = vmatmul.bf16.vlgmr.msrb.gmra.mxu0 %v378_v60  ;;  %3687 = vmatmul.bf16.vlgmr.msrb.gmra.mxu1 %v379_v62  ;;  %v1423_v60 = vunpack.c.h.b16 %v122_v53  ;;  %v394_v34 = vld [vmem:[#allocation1] sm:$0xff] }
 0x17e   :  { %3777 = vmatpush.bf16.xpose.msrb.mxu0 %v1802_v36  ;;  %3790 = vmatpush.bf16.xpose.msrb.mxu1 %v1803_v38  ;;  %v396_v36 = vld [vmem:[#allocation1 + $0x12] sm:$0xff]  ;;  %v398_v38 = vld [vmem:[#allocation1 + $0x24] sm:$0xff] }
 0x17f   :  { %v1807_v5 = vpack.c.b16 %v1423_v60, %v1423_v60 }
 0x180   :  { %3700 = vmatmul.bf16.vlgmr.msrb.gmra.mxu2 %v380_v1  ;;  %3713 = vmatmul.bf16.vlgmr.msrb.gmra.mxu3 %v381_v2  ;;  %v1808_v2 = vpack.c.b16 %v1424_v57, %v1424_v57 }
 0x181   :  { %3803 = vmatpush.bf16.xpose.msrb.mxu2 %v1804_v35  ;;  %3816 = vmatpush.bf16.xpose.msrb.mxu3 %v1805_v37  ;;  %v395_v35 = vld [vmem:[#allocation1 + $0x9] sm:$0xff]  ;;  %v397_v37 = vld [vmem:[#allocation1 + $0x1b] sm:$0xff] }
 0x182   :  { %v3261_v43 = vpop.f32.mrf.mxu0  ;;  %v3274_v44 = vpop.f32.mrf.mxu1 }
 0x183   :  { %v3285_v40 = vpop.f32.mrf.mxu2  ;;  %v3298_v41 = vpop.f32.mrf.mxu3  ;;  %v400_v43 = vld [vmem:[#allocation1 + $0x36] sm:$0xff]  ;;  %v401_v44 = vld [vmem:[#allocation1 + $0x3f] sm:$0xff] }
 0x184   :  { %v3286_v42 = vadd.f32 %v3285_v40, %v3273_v39  ;;  %v399_v40 = vld [vmem:[#allocation1 + $0x2d] sm:$0xff] }
 0x186   :  { %v3299_v50 = vadd.f32 %v3298_v41, %v3286_v42  ;;  %v127_v41 = vld [vmem:[%s8267_s1 + $0x1c8] sm:$0xff]  ;;  %v126_v42 = vld [vmem:[%s8267_s1 + $0x1c0] sm:$0xff] }
 0x18a   :  { %v3311_v63 = vpop.f32.mrf.mxu0  ;;  %v3324_v0 = vpop.f32.mrf.mxu1 }
 0x18b   :  { %v3287_v61 = vpop.f32.mrf.mxu2  ;;  %v3300_v62 = vpop.f32.mrf.mxu3  ;;  %v3312_v1 = vadd.f32 %v3311_v63, %v3299_v50 }
 0x18d   :  { %v3325_v6 = vadd.f32 %v3324_v0, %v3312_v1  ;;  %3726 = vmatmul.bf16.vlgmr.msra.gmra.mxu0 %v384_v45  ;;  %3739 = vmatmul.bf16.vlgmr.msra.gmra.mxu1 %v385_v46  ;;  %v36_v45 = vld [vmem:[%s8268_s0 + $0x70] sm:$0xff]  ;;  %v1432_v46 = vunpack.c.l.b16 %v127_v41 }
 0x18e   :  { %3829 = vmatpush.bf16.xpose.msra.mxu0 %v1806_v3  ;;  %3842 = vmatpush.bf16.xpose.msra.mxu1 %v1807_v5  ;;  %403 = vst [vmem:[#allocation1] ss:$9 sm:$0xff] %v36_v45  ;;  %v128_v3 = vld [vmem:[%s8267_s1 + $0x1d0] sm:$0xff] }
 0x18f   :  { %v1434_v5 = vunpack.c.l.b16 %v128_v3 }
 0x190   :  { %3752 = vmatmul.bf16.vlgmr.msra.gmra.mxu2 %v386_v47  ;;  %3765 = vmatmul.bf16.vlgmr.msra.gmra.mxu3 %v387_v48  ;;  %v1430_v47 = vunpack.c.l.b16 %v126_v42  ;;  %v1433_v48 = vunpack.c.h.b16 %v127_v41 }
 0x191   :  { %3855 = vmatpush.bf16.xpose.msra.mxu2 %v1808_v2  ;;  %3868 = vmatpush.bf16.xpose.msra.mxu3 %v1809_v4  ;;  %v129_v2 = vld [vmem:[%s8267_s1 + $0x1d8] sm:$0xff]  ;;  %v1818_v14 = vpack.c.b16 %v1434_v5, %v1434_v5 }
 0x192   :  { %v3313_v10 = vpop.f32.mrf.mxu0  ;;  %v3326_v11 = vpop.f32.mrf.mxu1  ;;  %v1814_v56 = vpack.c.b16 %v1430_v47, %v1430_v47  ;;  %v1817_v57 = vpack.c.b16 %v1433_v48, %v1433_v48  ;;  %v1436_v4 = vunpack.c.l.b16 %v129_v2 }
 0x193   :  { %v3337_v7 = vpop.f32.mrf.mxu2  ;;  %v3350_v8 = vpop.f32.mrf.mxu3 }
 0x194   :  { %v3338_v9 = vadd.f32 %v3337_v7, %v3325_v6  ;;  %v1437_v6 = vunpack.c.h.b16 %v129_v2  ;;  %v1435_v7 = vunpack.c.h.b16 %v128_v3  ;;  %v1820_v13 = vpack.c.b16 %v1436_v4, %v1436_v4 }
 0x196   :  { %v3351_v12 = vadd.f32 %v3350_v8, %v3338_v9  ;;  %v1821_v15 = vpack.c.b16 %v1437_v6, %v1437_v6  ;;  %v1819_v16 = vpack.c.b16 %v1435_v7, %v1435_v7 }
 0x19a   :  { %v3363_v21 = vpop.f32.mrf.mxu0  ;;  %v3376_v22 = vpop.f32.mrf.mxu1 }
 0x19b   :  { %v3339_v19 = vpop.f32.mrf.mxu2  ;;  %v3352_v20 = vpop.f32.mrf.mxu3  ;;  %v3364_v23 = vadd.f32 %v3363_v21, %v3351_v12 }
 0x19d   :  { %v3377_v28 = vadd.f32 %v3376_v22, %v3364_v23  ;;  %3778 = vmatmul.bf16.vlgmr.msrb.gmra.mxu0 %v388_v49  ;;  %3791 = vmatmul.bf16.vlgmr.msrb.gmra.mxu1 %v389_v51  ;;  %v1431_v49 = vunpack.c.h.b16 %v126_v42  ;;  %v404_v23 = vld [vmem:[#allocation1] sm:$0xff] }
 0x19e   :  { %3881 = vmatpush.bf16.xpose.msrb.mxu0 %v1810_v25  ;;  %3894 = vmatpush.bf16.xpose.msrb.mxu1 %v1811_v27  ;;  %v406_v25 = vld [vmem:[#allocation1 + $0x12] sm:$0xff]  ;;  %v408_v27 = vld [vmem:[#allocation1 + $0x24] sm:$0xff] }
 0x19f   :  { %v1815_v58 = vpack.c.b16 %v1431_v49, %v1431_v49 }
 0x1a0   :  { %3804 = vmatmul.bf16.vlgmr.msrb.gmra.mxu2 %v390_v54  ;;  %3817 = vmatmul.bf16.vlgmr.msrb.gmra.mxu3 %v391_v55  ;;  %v1816_v55 = vpack.c.b16 %v1432_v46, %v1432_v46 }
 0x1a1   :  { %3907 = vmatpush.bf16.xpose.msrb.mxu2 %v1812_v24  ;;  %3920 = vmatpush.bf16.xpose.msrb.mxu3 %v1813_v26  ;;  %v405_v24 = vld [vmem:[#allocation1 + $0x9] sm:$0xff]  ;;  %v407_v26 = vld [vmem:[#allocation1 + $0x1b] sm:$0xff] }
 0x1a2   :  { %v3365_v32 = vpop.f32.mrf.mxu0  ;;  %v3378_v33 = vpop.f32.mrf.mxu1 }
 0x1a3   :  { %v3389_v29 = vpop.f32.mrf.mxu2  ;;  %v3402_v30 = vpop.f32.mrf.mxu3  ;;  %v410_v32 = vld [vmem:[#allocation1 + $0x36] sm:$0xff]  ;;  %v411_v33 = vld [vmem:[#allocation1 + $0x3f] sm:$0xff] }
 0x1a4   :  { %v3390_v31 = vadd.f32 %v3389_v29, %v3377_v28  ;;  %v409_v29 = vld [vmem:[#allocation1 + $0x2d] sm:$0xff] }
 0x1a6   :  { %v3403_v39 = vadd.f32 %v3402_v30, %v3390_v31  ;;  %v131_v30 = vld [vmem:[%s8267_s1 + $0x1e8] sm:$0xff]  ;;  %v130_v31 = vld [vmem:[%s8267_s1 + $0x1e0] sm:$0xff] }
 0x1aa   :  { %v3415_v52 = vpop.f32.mrf.mxu0  ;;  %v3428_v53 = vpop.f32.mrf.mxu1 }
 0x1ab   :  { %v3391_v50 = vpop.f32.mrf.mxu2  ;;  %v3404_v51 = vpop.f32.mrf.mxu3  ;;  %v3416_v54 = vadd.f32 %v3415_v52, %v3403_v39 }
 0x1ad   :  { %v3429_v59 = vadd.f32 %v3428_v53, %v3416_v54  ;;  %3830 = vmatmul.bf16.vlgmr.msra.gmra.mxu0 %v394_v34  ;;  %3843 = vmatmul.bf16.vlgmr.msra.gmra.mxu1 %v395_v35  ;;  %v37_v34 = vld [vmem:[%s8268_s0 + $0x78] sm:$0xff]  ;;  %v1440_v35 = vunpack.c.l.b16 %v131_v30 }
 0x1ae   :  { %3933 = vmatpush.bf16.xpose.msra.mxu0 %v1814_v56  ;;  %3946 = vmatpush.bf16.xpose.msra.mxu1 %v1815_v58  ;;  %413 = vst [vmem:[#allocation1] ss:$9 sm:$0xff] %v37_v34  ;;  %v132_v56 = vld [vmem:[%s8267_s1 + $0x1f0] sm:$0xff] }
 0x1af   :  { %v1442_v58 = vunpack.c.l.b16 %v132_v56 }
 0x1b0   :  { %3856 = vmatmul.bf16.vlgmr.msra.gmra.mxu2 %v396_v36  ;;  %3869 = vmatmul.bf16.vlgmr.msra.gmra.mxu3 %v397_v37  ;;  %v1438_v36 = vunpack.c.l.b16 %v130_v31  ;;  %v1441_v37 = vunpack.c.h.b16 %v131_v30 }
 0x1b1   :  { %3959 = vmatpush.bf16.xpose.msra.mxu2 %v1816_v55  ;;  %3972 = vmatpush.bf16.xpose.msra.mxu3 %v1817_v57  ;;  %v133_v55 = vld [vmem:[%s8267_s1 + $0x1f8] sm:$0xff]  ;;  %v1826_v3 = vpack.c.b16 %v1442_v58, %v1442_v58 }
 0x1b2   :  { %v3417_v63 = vpop.f32.mrf.mxu0  ;;  %v3430_v0 = vpop.f32.mrf.mxu1  ;;  %v1822_v45 = vpack.c.b16 %v1438_v36, %v1438_v36  ;;  %v1825_v46 = vpack.c.b16 %v1441_v37, %v1441_v37  ;;  %v1444_v57 = vunpack.c.l.b16 %v133_v55 }
 0x1b3   :  { %v3441_v60 = vpop.f32.mrf.mxu2  ;;  %v3454_v61 = vpop.f32.mrf.mxu3 }
 0x1b4   :  { %v3442_v62 = vadd.f32 %v3441_v60, %v3429_v59  ;;  %v1445_v59 = vunpack.c.h.b16 %v133_v55  ;;  %v1443_v60 = vunpack.c.h.b16 %v132_v56  ;;  %v1828_v2 = vpack.c.b16 %v1444_v57, %v1444_v57 }
 0x1b6   :  { %v3455_v1 = vadd.f32 %v3454_v61, %v3442_v62  ;;  %v1829_v4 = vpack.c.b16 %v1445_v59, %v1445_v59  ;;  %v1827_v5 = vpack.c.b16 %v1443_v60, %v1443_v60 }
 0x1ba   :  { %v3467_v10 = vpop.f32.mrf.mxu0  ;;  %v3480_v11 = vpop.f32.mrf.mxu1 }
 0x1bb   :  { %v3443_v8 = vpop.f32.mrf.mxu2  ;;  %v3456_v9 = vpop.f32.mrf.mxu3  ;;  %v3468_v12 = vadd.f32 %v3467_v10, %v3455_v1 }
 0x1bd   :  { %v3481_v17 = vadd.f32 %v3480_v11, %v3468_v12  ;;  %3882 = vmatmul.bf16.vlgmr.msrb.gmra.mxu0 %v398_v38  ;;  %3895 = vmatmul.bf16.vlgmr.msrb.gmra.mxu1 %v399_v40  ;;  %v1439_v38 = vunpack.c.h.b16 %v130_v31  ;;  %v414_v12 = vld [vmem:[#allocation1] sm:$0xff] }
 0x1be   :  { %3985 = vmatpush.bf16.xpose.msrb.mxu0 %v1818_v14  ;;  %3998 = vmatpush.bf16.xpose.msrb.mxu1 %v1819_v16  ;;  %v416_v14 = vld [vmem:[#allocation1 + $0x12] sm:$0xff]  ;;  %v418_v16 = vld [vmem:[#allocation1 + $0x24] sm:$0xff] }
 0x1bf   :  { %v1823_v47 = vpack.c.b16 %v1439_v38, %v1439_v38 }
 0x1c0   :  { %3908 = vmatmul.bf16.vlgmr.msrb.gmra.mxu2 %v400_v43  ;;  %3921 = vmatmul.bf16.vlgmr.msrb.gmra.mxu3 %v401_v44  ;;  %v1824_v44 = vpack.c.b16 %v1440_v35, %v1440_v35 }
 0x1c1   :  { %4011 = vmatpush.bf16.xpose.msrb.mxu2 %v1820_v13  ;;  %4024 = vmatpush.bf16.xpose.msrb.mxu3 %v1821_v15  ;;  %v415_v13 = vld [vmem:[#allocation1 + $0x9] sm:$0xff]  ;;  %v417_v15 = vld [vmem:[#allocation1 + $0x1b] sm:$0xff] }
 0x1c2   :  { %v3469_v21 = vpop.f32.mrf.mxu0  ;;  %v3482_v22 = vpop.f32.mrf.mxu1 }
 0x1c3   :  { %v3493_v18 = vpop.f32.mrf.mxu2  ;;  %v3506_v19 = vpop.f32.mrf.mxu3  ;;  %v420_v21 = vld [vmem:[#allocation1 + $0x36] sm:$0xff]  ;;  %v421_v22 = vld [vmem:[#allocation1 + $0x3f] sm:$0xff] }
 0x1c4   :  { %v3494_v20 = vadd.f32 %v3493_v18, %v3481_v17  ;;  %v419_v18 = vld [vmem:[#allocation1 + $0x2d] sm:$0xff] }
 0x1c6   :  { %v3507_v28 = vadd.f32 %v3506_v19, %v3494_v20  ;;  %v135_v19 = vld [vmem:[%s8267_s1 + $0x208] sm:$0xff]  ;;  %v134_v20 = vld [vmem:[%s8267_s1 + $0x200] sm:$0xff] }
 0x1ca   :  { %v3519_v41 = vpop.f32.mrf.mxu0  ;;  %v3532_v42 = vpop.f32.mrf.mxu1 }
 0x1cb   :  { %v3495_v39 = vpop.f32.mrf.mxu2  ;;  %v3508_v40 = vpop.f32.mrf.mxu3  ;;  %v3520_v43 = vadd.f32 %v3519_v41, %v3507_v28 }
 0x1cd   :  { %v3533_v48 = vadd.f32 %v3532_v42, %v3520_v43  ;;  %3934 = vmatmul.bf16.vlgmr.msra.gmra.mxu0 %v404_v23  ;;  %3947 = vmatmul.bf16.vlgmr.msra.gmra.mxu1 %v405_v24  ;;  %v38_v23 = vld [vmem:[%s8268_s0 + $0x80] sm:$0xff]  ;;  %v1448_v24 = vunpack.c.l.b16 %v135_v19 }
 0x1ce   :  { %4037 = vmatpush.bf16.xpose.msra.mxu0 %v1822_v45  ;;  %4050 = vmatpush.bf16.xpose.msra.mxu1 %v1823_v47  ;;  %423 = vst [vmem:[#allocation1] ss:$9 sm:$0xff] %v38_v23  ;;  %v136_v45 = vld [vmem:[%s8267_s1 + $0x210] sm:$0xff] }
 0x1cf   :  { %v1450_v47 = vunpack.c.l.b16 %v136_v45 }
 0x1d0   :  { %3960 = vmatmul.bf16.vlgmr.msra.gmra.mxu2 %v406_v25  ;;  %3973 = vmatmul.bf16.vlgmr.msra.gmra.mxu3 %v407_v26  ;;  %v1446_v25 = vunpack.c.l.b16 %v134_v20  ;;  %v1449_v26 = vunpack.c.h.b16 %v135_v19 }
 0x1d1   :  { %4063 = vmatpush.bf16.xpose.msra.mxu2 %v1824_v44  ;;  %4076 = vmatpush.bf16.xpose.msra.mxu3 %v1825_v46  ;;  %v137_v44 = vld [vmem:[%s8267_s1 + $0x218] sm:$0xff]  ;;  %v1834_v56 = vpack.c.b16 %v1450_v47, %v1450_v47 }
 0x1d2   :  { %v3521_v52 = vpop.f32.mrf.mxu0  ;;  %v3534_v53 = vpop.f32.mrf.mxu1  ;;  %v1830_v34 = vpack.c.b16 %v1446_v25, %v1446_v25  ;;  %v1833_v35 = vpack.c.b16 %v1449_v26, %v1449_v26  ;;  %v1452_v46 = vunpack.c.l.b16 %v137_v44 }
 0x1d3   :  { %v3545_v49 = vpop.f32.mrf.mxu2  ;;  %v3558_v50 = vpop.f32.mrf.mxu3 }
 0x1d4   :  { %v3546_v51 = vadd.f32 %v3545_v49, %v3533_v48  ;;  %v1453_v48 = vunpack.c.h.b16 %v137_v44  ;;  %v1451_v49 = vunpack.c.h.b16 %v136_v45  ;;  %v1836_v55 = vpack.c.b16 %v1452_v46, %v1452_v46 }
 0x1d6   :  { %v3559_v54 = vadd.f32 %v3558_v50, %v3546_v51  ;;  %v1837_v57 = vpack.c.b16 %v1453_v48, %v1453_v48  ;;  %v1835_v58 = vpack.c.b16 %v1451_v49, %v1451_v49 }
 0x1da   :  { %v3571_v63 = vpop.f32.mrf.mxu0  ;;  %v3584_v0 = vpop.f32.mrf.mxu1 }
 0x1db   :  { %v3547_v61 = vpop.f32.mrf.mxu2  ;;  %v3560_v62 = vpop.f32.mrf.mxu3  ;;  %v3572_v1 = vadd.f32 %v3571_v63, %v3559_v54 }
 0x1dd   :  { %v3585_v6 = vadd.f32 %v3584_v0, %v3572_v1  ;;  %3986 = vmatmul.bf16.vlgmr.msrb.gmra.mxu0 %v408_v27  ;;  %3999 = vmatmul.bf16.vlgmr.msrb.gmra.mxu1 %v409_v29  ;;  %v1447_v27 = vunpack.c.h.b16 %v134_v20  ;;  %v424_v1 = vld [vmem:[#allocation1] sm:$0xff] }
 0x1de   :  { %4089 = vmatpush.bf16.xpose.msrb.mxu0 %v1826_v3  ;;  %4102 = vmatpush.bf16.xpose.msrb.mxu1 %v1827_v5  ;;  %v426_v3 = vld [vmem:[#allocation1 + $0x12] sm:$0xff]  ;;  %v428_v5 = vld [vmem:[#allocation1 + $0x24] sm:$0xff] }
 0x1df   :  { %v1831_v36 = vpack.c.b16 %v1447_v27, %v1447_v27 }
 0x1e0   :  { %4012 = vmatmul.bf16.vlgmr.msrb.gmra.mxu2 %v410_v32  ;;  %4025 = vmatmul.bf16.vlgmr.msrb.gmra.mxu3 %v411_v33  ;;  %v1832_v33 = vpack.c.b16 %v1448_v24, %v1448_v24 }
 0x1e1   :  { %4115 = vmatpush.bf16.xpose.msrb.mxu2 %v1828_v2  ;;  %4128 = vmatpush.bf16.xpose.msrb.mxu3 %v1829_v4  ;;  %v425_v2 = vld [vmem:[#allocation1 + $0x9] sm:$0xff]  ;;  %v427_v4 = vld [vmem:[#allocation1 + $0x1b] sm:$0xff] }
 0x1e2   :  { %v3573_v10 = vpop.f32.mrf.mxu0  ;;  %v3586_v11 = vpop.f32.mrf.mxu1 }
 0x1e3   :  { %v3597_v7 = vpop.f32.mrf.mxu2  ;;  %v3610_v8 = vpop.f32.mrf.mxu3  ;;  %v430_v10 = vld [vmem:[#allocation1 + $0x36] sm:$0xff]  ;;  %v431_v11 = vld [vmem:[#allocation1 + $0x3f] sm:$0xff] }
 0x1e4   :  { %v3598_v9 = vadd.f32 %v3597_v7, %v3585_v6  ;;  %v429_v7 = vld [vmem:[#allocation1 + $0x2d] sm:$0xff] }
 0x1e6   :  { %v3611_v17 = vadd.f32 %v3610_v8, %v3598_v9  ;;  %v139_v8 = vld [vmem:[%s8267_s1 + $0x228] sm:$0xff]  ;;  %v138_v9 = vld [vmem:[%s8267_s1 + $0x220] sm:$0xff] }
 0x1ea   :  { %v3623_v30 = vpop.f32.mrf.mxu0  ;;  %v3636_v31 = vpop.f32.mrf.mxu1 }
 0x1eb   :  { %v3599_v28 = vpop.f32.mrf.mxu2  ;;  %v3612_v29 = vpop.f32.mrf.mxu3  ;;  %v3624_v32 = vadd.f32 %v3623_v30, %v3611_v17 }
 0x1ed   :  { %v3637_v37 = vadd.f32 %v3636_v31, %v3624_v32  ;;  %4038 = vmatmul.bf16.vlgmr.msra.gmra.mxu0 %v414_v12  ;;  %4051 = vmatmul.bf16.vlgmr.msra.gmra.mxu1 %v415_v13  ;;  %v39_v12 = vld [vmem:[%s8268_s0 + $0x88] sm:$0xff]  ;;  %v1456_v13 = vunpack.c.l.b16 %v139_v8 }
 0x1ee   :  { %4141 = vmatpush.bf16.xpose.msra.mxu0 %v1830_v34  ;;  %4154 = vmatpush.bf16.xpose.msra.mxu1 %v1831_v36  ;;  %433 = vst [vmem:[#allocation1] ss:$9 sm:$0xff] %v39_v12  ;;  %v140_v34 = vld [vmem:[%s8267_s1 + $0x230] sm:$0xff] }
 0x1ef   :  { %v1458_v36 = vunpack.c.l.b16 %v140_v34 }
 0x1f0   :  { %4064 = vmatmul.bf16.vlgmr.msra.gmra.mxu2 %v416_v14  ;;  %4077 = vmatmul.bf16.vlgmr.msra.gmra.mxu3 %v417_v15  ;;  %v1454_v14 = vunpack.c.l.b16 %v138_v9  ;;  %v1457_v15 = vunpack.c.h.b16 %v139_v8 }
 0x1f1   :  { %4167 = vmatpush.bf16.xpose.msra.mxu2 %v1832_v33  ;;  %4180 = vmatpush.bf16.xpose.msra.mxu3 %v1833_v35  ;;  %v141_v33 = vld [vmem:[%s8267_s1 + $0x238] sm:$0xff]  ;;  %v1842_v45 = vpack.c.b16 %v1458_v36, %v1458_v36 }
 0x1f2   :  { %v3625_v41 = vpop.f32.mrf.mxu0  ;;  %v3638_v42 = vpop.f32.mrf.mxu1  ;;  %v1838_v23 = vpack.c.b16 %v1454_v14, %v1454_v14  ;;  %v1841_v24 = vpack.c.b16 %v1457_v15, %v1457_v15  ;;  %v1460_v35 = vunpack.c.l.b16 %v141_v33 }
 0x1f3   :  { %v3649_v38 = vpop.f32.mrf.mxu2  ;;  %v3662_v39 = vpop.f32.mrf.mxu3 }
 0x1f4   :  { %v3650_v40 = vadd.f32 %v3649_v38, %v3637_v37  ;;  %v1461_v37 = vunpack.c.h.b16 %v141_v33  ;;  %v1459_v38 = vunpack.c.h.b16 %v140_v34  ;;  %v1844_v44 = vpack.c.b16 %v1460_v35, %v1460_v35 }
 0x1f6   :  { %v3663_v43 = vadd.f32 %v3662_v39, %v3650_v40  ;;  %v1845_v46 = vpack.c.b16 %v1461_v37, %v1461_v37  ;;  %v1843_v47 = vpack.c.b16 %v1459_v38, %v1459_v38 }
 0x1fa   :  { %v3675_v52 = vpop.f32.mrf.mxu0  ;;  %v3688_v53 = vpop.f32.mrf.mxu1 }
 0x1fb   :  { %v3651_v50 = vpop.f32.mrf.mxu2  ;;  %v3664_v51 = vpop.f32.mrf.mxu3  ;;  %v3676_v54 = vadd.f32 %v3675_v52, %v3663_v43 }
 0x1fd   :  { %v3689_v59 = vadd.f32 %v3688_v53, %v3676_v54  ;;  %4090 = vmatmul.bf16.vlgmr.msrb.gmra.mxu0 %v418_v16  ;;  %4103 = vmatmul.bf16.vlgmr.msrb.gmra.mxu1 %v419_v18  ;;  %v1455_v16 = vunpack.c.h.b16 %v138_v9  ;;  %v434_v54 = vld [vmem:[#allocation1] sm:$0xff] }
 0x1fe   :  { %4193 = vmatpush.bf16.xpose.msrb.mxu0 %v1834_v56  ;;  %4206 = vmatpush.bf16.xpose.msrb.mxu1 %v1835_v58  ;;  %v436_v56 = vld [vmem:[#allocation1 + $0x12] sm:$0xff]  ;;  %v438_v58 = vld [vmem:[#allocation1 + $0x24] sm:$0xff] }
 0x1ff   :  { %v1839_v25 = vpack.c.b16 %v1455_v16, %v1455_v16 }
 0x200   :  { %4116 = vmatmul.bf16.vlgmr.msrb.gmra.mxu2 %v420_v21  ;;  %4129 = vmatmul.bf16.vlgmr.msrb.gmra.mxu3 %v421_v22  ;;  %v1840_v22 = vpack.c.b16 %v1456_v13, %v1456_v13 }
 0x201   :  { %4219 = vmatpush.bf16.xpose.msrb.mxu2 %v1836_v55  ;;  %4232 = vmatpush.bf16.xpose.msrb.mxu3 %v1837_v57  ;;  %v435_v55 = vld [vmem:[#allocation1 + $0x9] sm:$0xff]  ;;  %v437_v57 = vld [vmem:[#allocation1 + $0x1b] sm:$0xff] }
 0x202   :  { %v3677_v63 = vpop.f32.mrf.mxu0  ;;  %v3690_v0 = vpop.f32.mrf.mxu1 }
 0x203   :  { %v3701_v60 = vpop.f32.mrf.mxu2  ;;  %v3714_v61 = vpop.f32.mrf.mxu3  ;;  %v440_v63 = vld [vmem:[#allocation1 + $0x36] sm:$0xff]  ;;  %v441_v0 = vld [vmem:[#allocation1 + $0x3f] sm:$0xff] }
 0x204   :  { %v3702_v62 = vadd.f32 %v3701_v60, %v3689_v59  ;;  %v439_v60 = vld [vmem:[#allocation1 + $0x2d] sm:$0xff] }
 0x206   :  { %v3715_v6 = vadd.f32 %v3714_v61, %v3702_v62  ;;  %v143_v61 = vld [vmem:[%s8267_s1 + $0x248] sm:$0xff]  ;;  %v142_v62 = vld [vmem:[%s8267_s1 + $0x240] sm:$0xff] }
 0x20a   :  { %v3727_v19 = vpop.f32.mrf.mxu0  ;;  %v3740_v20 = vpop.f32.mrf.mxu1 }
 0x20b   :  { %v3703_v17 = vpop.f32.mrf.mxu2  ;;  %v3716_v18 = vpop.f32.mrf.mxu3  ;;  %v3728_v21 = vadd.f32 %v3727_v19, %v3715_v6 }
 0x20d   :  { %v3741_v26 = vadd.f32 %v3740_v20, %v3728_v21  ;;  %4142 = vmatmul.bf16.vlgmr.msra.gmra.mxu0 %v424_v1  ;;  %4155 = vmatmul.bf16.vlgmr.msra.gmra.mxu1 %v425_v2  ;;  %v40_v1 = vld [vmem:[%s8268_s0 + $0x90] sm:$0xff]  ;;  %v1464_v2 = vunpack.c.l.b16 %v143_v61 }
 0x20e   :  { %4245 = vmatpush.bf16.xpose.msra.mxu0 %v1838_v23  ;;  %4258 = vmatpush.bf16.xpose.msra.mxu1 %v1839_v25  ;;  %443 = vst [vmem:[#allocation1] ss:$9 sm:$0xff] %v40_v1  ;;  %v144_v23 = vld [vmem:[%s8267_s1 + $0x250] sm:$0xff] }
 0x20f   :  { %v1466_v25 = vunpack.c.l.b16 %v144_v23 }
 0x210   :  { %4168 = vmatmul.bf16.vlgmr.msra.gmra.mxu2 %v426_v3  ;;  %4181 = vmatmul.bf16.vlgmr.msra.gmra.mxu3 %v427_v4  ;;  %v1462_v3 = vunpack.c.l.b16 %v142_v62  ;;  %v1465_v4 = vunpack.c.h.b16 %v143_v61 }
 0x211   :  { %4271 = vmatpush.bf16.xpose.msra.mxu2 %v1840_v22  ;;  %4284 = vmatpush.bf16.xpose.msra.mxu3 %v1841_v24  ;;  %v145_v22 = vld [vmem:[%s8267_s1 + $0x258] sm:$0xff]  ;;  %v1850_v34 = vpack.c.b16 %v1466_v25, %v1466_v25 }
 0x212   :  { %v3729_v30 = vpop.f32.mrf.mxu0  ;;  %v3742_v31 = vpop.f32.mrf.mxu1  ;;  %v1846_v12 = vpack.c.b16 %v1462_v3, %v1462_v3  ;;  %v1849_v13 = vpack.c.b16 %v1465_v4, %v1465_v4  ;;  %v1468_v24 = vunpack.c.l.b16 %v145_v22 }
 0x213   :  { %v3753_v27 = vpop.f32.mrf.mxu2  ;;  %v3766_v28 = vpop.f32.mrf.mxu3 }
 0x214   :  { %v3754_v29 = vadd.f32 %v3753_v27, %v3741_v26  ;;  %v1469_v26 = vunpack.c.h.b16 %v145_v22  ;;  %v1467_v27 = vunpack.c.h.b16 %v144_v23  ;;  %v1852_v33 = vpack.c.b16 %v1468_v24, %v1468_v24 }
 0x216   :  { %v3767_v32 = vadd.f32 %v3766_v28, %v3754_v29  ;;  %v1853_v35 = vpack.c.b16 %v1469_v26, %v1469_v26  ;;  %v1851_v36 = vpack.c.b16 %v1467_v27, %v1467_v27 }
 0x21a   :  { %v3779_v41 = vpop.f32.mrf.mxu0  ;;  %v3792_v42 = vpop.f32.mrf.mxu1 }
 0x21b   :  { %v3755_v39 = vpop.f32.mrf.mxu2  ;;  %v3768_v40 = vpop.f32.mrf.mxu3  ;;  %v3780_v43 = vadd.f32 %v3779_v41, %v3767_v32 }
 0x21d   :  { %v3793_v48 = vadd.f32 %v3792_v42, %v3780_v43  ;;  %4194 = vmatmul.bf16.vlgmr.msrb.gmra.mxu0 %v428_v5  ;;  %4207 = vmatmul.bf16.vlgmr.msrb.gmra.mxu1 %v429_v7  ;;  %v1463_v5 = vunpack.c.h.b16 %v142_v62  ;;  %v444_v43 = vld [vmem:[#allocation1] sm:$0xff] }
 0x21e   :  { %4297 = vmatpush.bf16.xpose.msrb.mxu0 %v1842_v45  ;;  %4310 = vmatpush.bf16.xpose.msrb.mxu1 %v1843_v47  ;;  %v446_v45 = vld [vmem:[#allocation1 + $0x12] sm:$0xff]  ;;  %v448_v47 = vld [vmem:[#allocation1 + $0x24] sm:$0xff] }
 0x21f   :  { %v1847_v14 = vpack.c.b16 %v1463_v5, %v1463_v5 }
 0x220   :  { %4220 = vmatmul.bf16.vlgmr.msrb.gmra.mxu2 %v430_v10  ;;  %4233 = vmatmul.bf16.vlgmr.msrb.gmra.mxu3 %v431_v11  ;;  %v1848_v11 = vpack.c.b16 %v1464_v2, %v1464_v2 }
 0x221   :  { %4323 = vmatpush.bf16.xpose.msrb.mxu2 %v1844_v44  ;;  %4336 = vmatpush.bf16.xpose.msrb.mxu3 %v1845_v46  ;;  %v445_v44 = vld [vmem:[#allocation1 + $0x9] sm:$0xff]  ;;  %v447_v46 = vld [vmem:[#allocation1 + $0x1b] sm:$0xff] }
 0x222   :  { %v3781_v52 = vpop.f32.mrf.mxu0  ;;  %v3794_v53 = vpop.f32.mrf.mxu1 }
 0x223   :  { %v3805_v49 = vpop.f32.mrf.mxu2  ;;  %v3818_v50 = vpop.f32.mrf.mxu3  ;;  %v450_v52 = vld [vmem:[#allocation1 + $0x36] sm:$0xff]  ;;  %v451_v53 = vld [vmem:[#allocation1 + $0x3f] sm:$0xff] }
 0x224   :  { %v3806_v51 = vadd.f32 %v3805_v49, %v3793_v48  ;;  %v449_v49 = vld [vmem:[#allocation1 + $0x2d] sm:$0xff] }
 0x226   :  { %v3819_v59 = vadd.f32 %v3818_v50, %v3806_v51  ;;  %v147_v50 = vld [vmem:[%s8267_s1 + $0x268] sm:$0xff]  ;;  %v146_v51 = vld [vmem:[%s8267_s1 + $0x260] sm:$0xff] }
 0x22a   :  { %v3831_v8 = vpop.f32.mrf.mxu0  ;;  %v3844_v9 = vpop.f32.mrf.mxu1 }
 0x22b   :  { %v3807_v6 = vpop.f32.mrf.mxu2  ;;  %v3820_v7 = vpop.f32.mrf.mxu3  ;;  %v3832_v10 = vadd.f32 %v3831_v8, %v3819_v59 }
 0x22d   :  { %v3845_v15 = vadd.f32 %v3844_v9, %v3832_v10  ;;  %4246 = vmatmul.bf16.vlgmr.msra.gmra.mxu0 %v434_v54  ;;  %4259 = vmatmul.bf16.vlgmr.msra.gmra.mxu1 %v435_v55  ;;  %v41_v54 = vld [vmem:[%s8268_s0 + $0x98] sm:$0xff]  ;;  %v1472_v55 = vunpack.c.l.b16 %v147_v50 }
 0x22e   :  { %4349 = vmatpush.bf16.xpose.msra.mxu0 %v1846_v12  ;;  %4362 = vmatpush.bf16.xpose.msra.mxu1 %v1847_v14  ;;  %453 = vst [vmem:[#allocation1] ss:$9 sm:$0xff] %v41_v54  ;;  %v148_v12 = vld [vmem:[%s8267_s1 + $0x270] sm:$0xff] }
 0x22f   :  { %v1474_v14 = vunpack.c.l.b16 %v148_v12 }
 0x230   :  { %4272 = vmatmul.bf16.vlgmr.msra.gmra.mxu2 %v436_v56  ;;  %4285 = vmatmul.bf16.vlgmr.msra.gmra.mxu3 %v437_v57  ;;  %v1470_v56 = vunpack.c.l.b16 %v146_v51  ;;  %v1473_v57 = vunpack.c.h.b16 %v147_v50 }
 0x231   :  { %4375 = vmatpush.bf16.xpose.msra.mxu2 %v1848_v11  ;;  %4388 = vmatpush.bf16.xpose.msra.mxu3 %v1849_v13  ;;  %v149_v11 = vld [vmem:[%s8267_s1 + $0x278] sm:$0xff]  ;;  %v1858_v23 = vpack.c.b16 %v1474_v14, %v1474_v14 }
 0x232   :  { %v3833_v19 = vpop.f32.mrf.mxu0  ;;  %v3846_v20 = vpop.f32.mrf.mxu1  ;;  %v1854_v1 = vpack.c.b16 %v1470_v56, %v1470_v56  ;;  %v1857_v2 = vpack.c.b16 %v1473_v57, %v1473_v57  ;;  %v1476_v13 = vunpack.c.l.b16 %v149_v11 }
 0x233   :  { %v3857_v16 = vpop.f32.mrf.mxu2  ;;  %v3870_v17 = vpop.f32.mrf.mxu3 }
 0x234   :  { %v3858_v18 = vadd.f32 %v3857_v16, %v3845_v15  ;;  %v1477_v15 = vunpack.c.h.b16 %v149_v11  ;;  %v1475_v16 = vunpack.c.h.b16 %v148_v12  ;;  %v1860_v22 = vpack.c.b16 %v1476_v13, %v1476_v13 }
 0x236   :  { %v3871_v21 = vadd.f32 %v3870_v17, %v3858_v18  ;;  %v1861_v24 = vpack.c.b16 %v1477_v15, %v1477_v15  ;;  %v1859_v25 = vpack.c.b16 %v1475_v16, %v1475_v16 }
 0x23a   :  { %v3883_v30 = vpop.f32.mrf.mxu0  ;;  %v3896_v31 = vpop.f32.mrf.mxu1 }
 0x23b   :  { %v3859_v28 = vpop.f32.mrf.mxu2  ;;  %v3872_v29 = vpop.f32.mrf.mxu3  ;;  %v3884_v32 = vadd.f32 %v3883_v30, %v3871_v21 }
 0x23d   :  { %v3897_v37 = vadd.f32 %v3896_v31, %v3884_v32  ;;  %4298 = vmatmul.bf16.vlgmr.msrb.gmra.mxu0 %v438_v58  ;;  %4311 = vmatmul.bf16.vlgmr.msrb.gmra.mxu1 %v439_v60  ;;  %v1471_v58 = vunpack.c.h.b16 %v146_v51  ;;  %v454_v32 = vld [vmem:[#allocation1] sm:$0xff] }
 0x23e   :  { %4401 = vmatpush.bf16.xpose.msrb.mxu0 %v1850_v34  ;;  %4414 = vmatpush.bf16.xpose.msrb.mxu1 %v1851_v36  ;;  %v456_v34 = vld [vmem:[#allocation1 + $0x12] sm:$0xff]  ;;  %v458_v36 = vld [vmem:[#allocation1 + $0x24] sm:$0xff] }
 0x23f   :  { %v1855_v3 = vpack.c.b16 %v1471_v58, %v1471_v58 }
 0x240   :  { %4324 = vmatmul.bf16.vlgmr.msrb.gmra.mxu2 %v440_v63  ;;  %4337 = vmatmul.bf16.vlgmr.msrb.gmra.mxu3 %v441_v0  ;;  %v1856_v0 = vpack.c.b16 %v1472_v55, %v1472_v55 }
 0x241   :  { %4427 = vmatpush.bf16.xpose.msrb.mxu2 %v1852_v33  ;;  %4440 = vmatpush.bf16.xpose.msrb.mxu3 %v1853_v35  ;;  %v455_v33 = vld [vmem:[#allocation1 + $0x9] sm:$0xff]  ;;  %v457_v35 = vld [vmem:[#allocation1 + $0x1b] sm:$0xff] }
 0x242   :  { %v3885_v41 = vpop.f32.mrf.mxu0  ;;  %v3898_v42 = vpop.f32.mrf.mxu1 }
 0x243   :  { %v3909_v38 = vpop.f32.mrf.mxu2  ;;  %v3922_v39 = vpop.f32.mrf.mxu3  ;;  %v460_v41 = vld [vmem:[#allocation1 + $0x36] sm:$0xff]  ;;  %v461_v42 = vld [vmem:[#allocation1 + $0x3f] sm:$0xff] }
 0x244   :  { %v3910_v40 = vadd.f32 %v3909_v38, %v3897_v37  ;;  %v459_v38 = vld [vmem:[#allocation1 + $0x2d] sm:$0xff] }
 0x246   :  { %v3923_v48 = vadd.f32 %v3922_v39, %v3910_v40  ;;  %v151_v39 = vld [vmem:[%s8267_s1 + $0x288] sm:$0xff]  ;;  %v150_v40 = vld [vmem:[%s8267_s1 + $0x280] sm:$0xff] }
 0x24a   :  { %v3935_v61 = vpop.f32.mrf.mxu0  ;;  %v3948_v62 = vpop.f32.mrf.mxu1 }
 0x24b   :  { %v3911_v59 = vpop.f32.mrf.mxu2  ;;  %v3924_v60 = vpop.f32.mrf.mxu3  ;;  %v3936_v63 = vadd.f32 %v3935_v61, %v3923_v48 }
 0x24d   :  { %v3949_v4 = vadd.f32 %v3948_v62, %v3936_v63  ;;  %4350 = vmatmul.bf16.vlgmr.msra.gmra.mxu0 %v444_v43  ;;  %4363 = vmatmul.bf16.vlgmr.msra.gmra.mxu1 %v445_v44  ;;  %v42_v43 = vld [vmem:[%s8268_s0 + $0xa0] sm:$0xff]  ;;  %v1480_v44 = vunpack.c.l.b16 %v151_v39 }
 0x24e   :  { %4453 = vmatpush.bf16.xpose.msra.mxu0 %v1854_v1  ;;  %4466 = vmatpush.bf16.xpose.msra.mxu1 %v1855_v3  ;;  %463 = vst [vmem:[#allocation1] ss:$9 sm:$0xff] %v42_v43  ;;  %v152_v1 = vld [vmem:[%s8267_s1 + $0x290] sm:$0xff] }
 0x24f   :  { %v1482_v3 = vunpack.c.l.b16 %v152_v1 }
 0x250   :  { %4376 = vmatmul.bf16.vlgmr.msra.gmra.mxu2 %v446_v45  ;;  %4389 = vmatmul.bf16.vlgmr.msra.gmra.mxu3 %v447_v46  ;;  %v1478_v45 = vunpack.c.l.b16 %v150_v40  ;;  %v1481_v46 = vunpack.c.h.b16 %v151_v39 }
 0x251   :  { %4479 = vmatpush.bf16.xpose.msra.mxu2 %v1856_v0  ;;  %4492 = vmatpush.bf16.xpose.msra.mxu3 %v1857_v2  ;;  %v153_v0 = vld [vmem:[%s8267_s1 + $0x298] sm:$0xff]  ;;  %v1866_v12 = vpack.c.b16 %v1482_v3, %v1482_v3 }
 0x252   :  { %v3937_v8 = vpop.f32.mrf.mxu0  ;;  %v3950_v9 = vpop.f32.mrf.mxu1  ;;  %v1862_v54 = vpack.c.b16 %v1478_v45, %v1478_v45  ;;  %v1865_v55 = vpack.c.b16 %v1481_v46, %v1481_v46  ;;  %v1484_v2 = vunpack.c.l.b16 %v153_v0 }
 0x253   :  { %v3961_v5 = vpop.f32.mrf.mxu2  ;;  %v3974_v6 = vpop.f32.mrf.mxu3 }
 0x254   :  { %v3962_v7 = vadd.f32 %v3961_v5, %v3949_v4  ;;  %v1485_v4 = vunpack.c.h.b16 %v153_v0  ;;  %v1483_v5 = vunpack.c.h.b16 %v152_v1  ;;  %v1868_v11 = vpack.c.b16 %v1484_v2, %v1484_v2 }
 0x256   :  { %v3975_v10 = vadd.f32 %v3974_v6, %v3962_v7  ;;  %v1869_v13 = vpack.c.b16 %v1485_v4, %v1485_v4  ;;  %v1867_v14 = vpack.c.b16 %v1483_v5, %v1483_v5 }
 0x25a   :  { %v3987_v19 = vpop.f32.mrf.mxu0  ;;  %v4000_v20 = vpop.f32.mrf.mxu1 }
 0x25b   :  { %v3963_v17 = vpop.f32.mrf.mxu2  ;;  %v3976_v18 = vpop.f32.mrf.mxu3  ;;  %v3988_v21 = vadd.f32 %v3987_v19, %v3975_v10 }
 0x25d   :  { %v4001_v26 = vadd.f32 %v4000_v20, %v3988_v21  ;;  %4402 = vmatmul.bf16.vlgmr.msrb.gmra.mxu0 %v448_v47  ;;  %4415 = vmatmul.bf16.vlgmr.msrb.gmra.mxu1 %v449_v49  ;;  %v1479_v47 = vunpack.c.h.b16 %v150_v40  ;;  %v464_v21 = vld [vmem:[#allocation1] sm:$0xff] }
 0x25e   :  { %4505 = vmatpush.bf16.xpose.msrb.mxu0 %v1858_v23  ;;  %4518 = vmatpush.bf16.xpose.msrb.mxu1 %v1859_v25  ;;  %v466_v23 = vld [vmem:[#allocation1 + $0x12] sm:$0xff]  ;;  %v468_v25 = vld [vmem:[#allocation1 + $0x24] sm:$0xff] }
 0x25f   :  { %v1863_v56 = vpack.c.b16 %v1479_v47, %v1479_v47 }
 0x260   :  { %4428 = vmatmul.bf16.vlgmr.msrb.gmra.mxu2 %v450_v52  ;;  %4441 = vmatmul.bf16.vlgmr.msrb.gmra.mxu3 %v451_v53  ;;  %v1864_v53 = vpack.c.b16 %v1480_v44, %v1480_v44 }
 0x261   :  { %4531 = vmatpush.bf16.xpose.msrb.mxu2 %v1860_v22  ;;  %4544 = vmatpush.bf16.xpose.msrb.mxu3 %v1861_v24  ;;  %v465_v22 = vld [vmem:[#allocation1 + $0x9] sm:$0xff]  ;;  %v467_v24 = vld [vmem:[#allocation1 + $0x1b] sm:$0xff] }
 0x262   :  { %v3989_v30 = vpop.f32.mrf.mxu0  ;;  %v4002_v31 = vpop.f32.mrf.mxu1 }
 0x263   :  { %v4013_v27 = vpop.f32.mrf.mxu2  ;;  %v4026_v28 = vpop.f32.mrf.mxu3  ;;  %v470_v30 = vld [vmem:[#allocation1 + $0x36] sm:$0xff]  ;;  %v471_v31 = vld [vmem:[#allocation1 + $0x3f] sm:$0xff] }
 0x264   :  { %v4014_v29 = vadd.f32 %v4013_v27, %v4001_v26  ;;  %v469_v27 = vld [vmem:[#allocation1 + $0x2d] sm:$0xff] }
 0x266   :  { %v4027_v37 = vadd.f32 %v4026_v28, %v4014_v29  ;;  %v155_v28 = vld [vmem:[%s8267_s1 + $0x2a8] sm:$0xff]  ;;  %v154_v29 = vld [vmem:[%s8267_s1 + $0x2a0] sm:$0xff] }
 0x26a   :  { %v4039_v50 = vpop.f32.mrf.mxu0  ;;  %v4052_v51 = vpop.f32.mrf.mxu1 }
 0x26b   :  { %v4015_v48 = vpop.f32.mrf.mxu2  ;;  %v4028_v49 = vpop.f32.mrf.mxu3  ;;  %v4040_v52 = vadd.f32 %v4039_v50, %v4027_v37 }
 0x26d   :  { %v4053_v57 = vadd.f32 %v4052_v51, %v4040_v52  ;;  %4454 = vmatmul.bf16.vlgmr.msra.gmra.mxu0 %v454_v32  ;;  %4467 = vmatmul.bf16.vlgmr.msra.gmra.mxu1 %v455_v33  ;;  %v43_v32 = vld [vmem:[%s8268_s0 + $0xa8] sm:$0xff]  ;;  %v1488_v33 = vunpack.c.l.b16 %v155_v28 }
 0x26e   :  { %4557 = vmatpush.bf16.xpose.msra.mxu0 %v1862_v54  ;;  %4570 = vmatpush.bf16.xpose.msra.mxu1 %v1863_v56  ;;  %473 = vst [vmem:[#allocation1] ss:$9 sm:$0xff] %v43_v32  ;;  %v156_v54 = vld [vmem:[%s8267_s1 + $0x2b0] sm:$0xff] }
 0x26f   :  { %v1490_v56 = vunpack.c.l.b16 %v156_v54 }
 0x270   :  { %4480 = vmatmul.bf16.vlgmr.msra.gmra.mxu2 %v456_v34  ;;  %4493 = vmatmul.bf16.vlgmr.msra.gmra.mxu3 %v457_v35  ;;  %v1486_v34 = vunpack.c.l.b16 %v154_v29  ;;  %v1489_v35 = vunpack.c.h.b16 %v155_v28 }
 0x271   :  { %4583 = vmatpush.bf16.xpose.msra.mxu2 %v1864_v53  ;;  %4596 = vmatpush.bf16.xpose.msra.mxu3 %v1865_v55  ;;  %v157_v53 = vld [vmem:[%s8267_s1 + $0x2b8] sm:$0xff]  ;;  %v1874_v1 = vpack.c.b16 %v1490_v56, %v1490_v56 }
 0x272   :  { %v4041_v61 = vpop.f32.mrf.mxu0  ;;  %v4054_v62 = vpop.f32.mrf.mxu1  ;;  %v1870_v43 = vpack.c.b16 %v1486_v34, %v1486_v34  ;;  %v1873_v44 = vpack.c.b16 %v1489_v35, %v1489_v35  ;;  %v1492_v55 = vunpack.c.l.b16 %v157_v53 }
 0x273   :  { %v4065_v58 = vpop.f32.mrf.mxu2  ;;  %v4078_v59 = vpop.f32.mrf.mxu3 }
 0x274   :  { %v4066_v60 = vadd.f32 %v4065_v58, %v4053_v57  ;;  %v1493_v57 = vunpack.c.h.b16 %v157_v53  ;;  %v1491_v58 = vunpack.c.h.b16 %v156_v54  ;;  %v1876_v0 = vpack.c.b16 %v1492_v55, %v1492_v55 }
 0x276   :  { %v4079_v63 = vadd.f32 %v4078_v59, %v4066_v60  ;;  %v1877_v2 = vpack.c.b16 %v1493_v57, %v1493_v57  ;;  %v1875_v3 = vpack.c.b16 %v1491_v58, %v1491_v58 }
 0x27a   :  { %v4091_v8 = vpop.f32.mrf.mxu0  ;;  %v4104_v9 = vpop.f32.mrf.mxu1 }
 0x27b   :  { %v4067_v6 = vpop.f32.mrf.mxu2  ;;  %v4080_v7 = vpop.f32.mrf.mxu3  ;;  %v4092_v10 = vadd.f32 %v4091_v8, %v4079_v63 }
 0x27d   :  { %v4105_v15 = vadd.f32 %v4104_v9, %v4092_v10  ;;  %4506 = vmatmul.bf16.vlgmr.msrb.gmra.mxu0 %v458_v36  ;;  %4519 = vmatmul.bf16.vlgmr.msrb.gmra.mxu1 %v459_v38  ;;  %v1487_v36 = vunpack.c.h.b16 %v154_v29  ;;  %v474_v10 = vld [vmem:[#allocation1] sm:$0xff] }
 0x27e   :  { %4609 = vmatpush.bf16.xpose.msrb.mxu0 %v1866_v12  ;;  %4622 = vmatpush.bf16.xpose.msrb.mxu1 %v1867_v14  ;;  %v476_v12 = vld [vmem:[#allocation1 + $0x12] sm:$0xff]  ;;  %v478_v14 = vld [vmem:[#allocation1 + $0x24] sm:$0xff] }
 0x27f   :  { %v1871_v45 = vpack.c.b16 %v1487_v36, %v1487_v36 }
 0x280   :  { %4532 = vmatmul.bf16.vlgmr.msrb.gmra.mxu2 %v460_v41  ;;  %4545 = vmatmul.bf16.vlgmr.msrb.gmra.mxu3 %v461_v42  ;;  %v1872_v42 = vpack.c.b16 %v1488_v33, %v1488_v33 }
 0x281   :  { %4635 = vmatpush.bf16.xpose.msrb.mxu2 %v1868_v11  ;;  %4648 = vmatpush.bf16.xpose.msrb.mxu3 %v1869_v13  ;;  %v475_v11 = vld [vmem:[#allocation1 + $0x9] sm:$0xff]  ;;  %v477_v13 = vld [vmem:[#allocation1 + $0x1b] sm:$0xff] }
 0x282   :  { %v4093_v19 = vpop.f32.mrf.mxu0  ;;  %v4106_v20 = vpop.f32.mrf.mxu1 }
 0x283   :  { %v4117_v16 = vpop.f32.mrf.mxu2  ;;  %v4130_v17 = vpop.f32.mrf.mxu3  ;;  %v480_v19 = vld [vmem:[#allocation1 + $0x36] sm:$0xff]  ;;  %v481_v20 = vld [vmem:[#allocation1 + $0x3f] sm:$0xff] }
 0x284   :  { %v4118_v18 = vadd.f32 %v4117_v16, %v4105_v15  ;;  %v479_v16 = vld [vmem:[#allocation1 + $0x2d] sm:$0xff] }
 0x286   :  { %v4131_v26 = vadd.f32 %v4130_v17, %v4118_v18  ;;  %v159_v17 = vld [vmem:[%s8267_s1 + $0x2c8] sm:$0xff]  ;;  %v158_v18 = vld [vmem:[%s8267_s1 + $0x2c0] sm:$0xff] }
 0x28a   :  { %v4143_v39 = vpop.f32.mrf.mxu0  ;;  %v4156_v40 = vpop.f32.mrf.mxu1 }
 0x28b   :  { %v4119_v37 = vpop.f32.mrf.mxu2  ;;  %v4132_v38 = vpop.f32.mrf.mxu3  ;;  %v4144_v41 = vadd.f32 %v4143_v39, %v4131_v26 }
 0x28d   :  { %v4157_v46 = vadd.f32 %v4156_v40, %v4144_v41  ;;  %4558 = vmatmul.bf16.vlgmr.msra.gmra.mxu0 %v464_v21  ;;  %4571 = vmatmul.bf16.vlgmr.msra.gmra.mxu1 %v465_v22  ;;  %v44_v21 = vld [vmem:[%s8268_s0 + $0xb0] sm:$0xff]  ;;  %v1496_v22 = vunpack.c.l.b16 %v159_v17 }
 0x28e   :  { %4661 = vmatpush.bf16.xpose.msra.mxu0 %v1870_v43  ;;  %4674 = vmatpush.bf16.xpose.msra.mxu1 %v1871_v45  ;;  %483 = vst [vmem:[#allocation1] ss:$9 sm:$0xff] %v44_v21  ;;  %v160_v43 = vld [vmem:[%s8267_s1 + $0x2d0] sm:$0xff] }
 0x28f   :  { %v1498_v45 = vunpack.c.l.b16 %v160_v43 }
 0x290   :  { %4584 = vmatmul.bf16.vlgmr.msra.gmra.mxu2 %v466_v23  ;;  %4597 = vmatmul.bf16.vlgmr.msra.gmra.mxu3 %v467_v24  ;;  %v1494_v23 = vunpack.c.l.b16 %v158_v18  ;;  %v1497_v24 = vunpack.c.h.b16 %v159_v17 }
 0x291   :  { %4687 = vmatpush.bf16.xpose.msra.mxu2 %v1872_v42  ;;  %4700 = vmatpush.bf16.xpose.msra.mxu3 %v1873_v44  ;;  %v161_v42 = vld [vmem:[%s8267_s1 + $0x2d8] sm:$0xff]  ;;  %v1882_v54 = vpack.c.b16 %v1498_v45, %v1498_v45 }
 0x292   :  { %v4145_v50 = vpop.f32.mrf.mxu0  ;;  %v4158_v51 = vpop.f32.mrf.mxu1  ;;  %v1878_v32 = vpack.c.b16 %v1494_v23, %v1494_v23  ;;  %v1881_v33 = vpack.c.b16 %v1497_v24, %v1497_v24  ;;  %v1500_v44 = vunpack.c.l.b16 %v161_v42 }
 0x293   :  { %v4169_v47 = vpop.f32.mrf.mxu2  ;;  %v4182_v48 = vpop.f32.mrf.mxu3 }
 0x294   :  { %v4170_v49 = vadd.f32 %v4169_v47, %v4157_v46  ;;  %v1501_v46 = vunpack.c.h.b16 %v161_v42  ;;  %v1499_v47 = vunpack.c.h.b16 %v160_v43  ;;  %v1884_v53 = vpack.c.b16 %v1500_v44, %v1500_v44 }
 0x296   :  { %v4183_v52 = vadd.f32 %v4182_v48, %v4170_v49  ;;  %v1885_v55 = vpack.c.b16 %v1501_v46, %v1501_v46  ;;  %v1883_v56 = vpack.c.b16 %v1499_v47, %v1499_v47 }
 0x29a   :  { %v4195_v61 = vpop.f32.mrf.mxu0  ;;  %v4208_v62 = vpop.f32.mrf.mxu1 }
 0x29b   :  { %v4171_v59 = vpop.f32.mrf.mxu2  ;;  %v4184_v60 = vpop.f32.mrf.mxu3  ;;  %v4196_v63 = vadd.f32 %v4195_v61, %v4183_v52 }
 0x29d   :  { %v4209_v4 = vadd.f32 %v4208_v62, %v4196_v63  ;;  %4610 = vmatmul.bf16.vlgmr.msrb.gmra.mxu0 %v468_v25  ;;  %4623 = vmatmul.bf16.vlgmr.msrb.gmra.mxu1 %v469_v27  ;;  %v1495_v25 = vunpack.c.h.b16 %v158_v18  ;;  %v484_v63 = vld [vmem:[#allocation1] sm:$0xff] }
 0x29e   :  { %4713 = vmatpush.bf16.xpose.msrb.mxu0 %v1874_v1  ;;  %4726 = vmatpush.bf16.xpose.msrb.mxu1 %v1875_v3  ;;  %v486_v1 = vld [vmem:[#allocation1 + $0x12] sm:$0xff]  ;;  %v488_v3 = vld [vmem:[#allocation1 + $0x24] sm:$0xff] }
 0x29f   :  { %v1879_v34 = vpack.c.b16 %v1495_v25, %v1495_v25 }
 0x2a0   :  { %4636 = vmatmul.bf16.vlgmr.msrb.gmra.mxu2 %v470_v30  ;;  %4649 = vmatmul.bf16.vlgmr.msrb.gmra.mxu3 %v471_v31  ;;  %v1880_v31 = vpack.c.b16 %v1496_v22, %v1496_v22 }
 0x2a1   :  { %4739 = vmatpush.bf16.xpose.msrb.mxu2 %v1876_v0  ;;  %4752 = vmatpush.bf16.xpose.msrb.mxu3 %v1877_v2  ;;  %v485_v0 = vld [vmem:[#allocation1 + $0x9] sm:$0xff]  ;;  %v487_v2 = vld [vmem:[#allocation1 + $0x1b] sm:$0xff] }
 0x2a2   :  { %v4197_v8 = vpop.f32.mrf.mxu0  ;;  %v4210_v9 = vpop.f32.mrf.mxu1 }
 0x2a3   :  { %v4221_v5 = vpop.f32.mrf.mxu2  ;;  %v4234_v6 = vpop.f32.mrf.mxu3  ;;  %v490_v8 = vld [vmem:[#allocation1 + $0x36] sm:$0xff]  ;;  %v491_v9 = vld [vmem:[#allocation1 + $0x3f] sm:$0xff] }
 0x2a4   :  { %v4222_v7 = vadd.f32 %v4221_v5, %v4209_v4  ;;  %v489_v5 = vld [vmem:[#allocation1 + $0x2d] sm:$0xff] }
 0x2a6   :  { %v4235_v15 = vadd.f32 %v4234_v6, %v4222_v7  ;;  %v163_v6 = vld [vmem:[%s8267_s1 + $0x2e8] sm:$0xff]  ;;  %v162_v7 = vld [vmem:[%s8267_s1 + $0x2e0] sm:$0xff] }
 0x2aa   :  { %v4247_v28 = vpop.f32.mrf.mxu0  ;;  %v4260_v29 = vpop.f32.mrf.mxu1 }
 0x2ab   :  { %v4223_v26 = vpop.f32.mrf.mxu2  ;;  %v4236_v27 = vpop.f32.mrf.mxu3  ;;  %v4248_v30 = vadd.f32 %v4247_v28, %v4235_v15 }
 0x2ad   :  { %v4261_v35 = vadd.f32 %v4260_v29, %v4248_v30  ;;  %4662 = vmatmul.bf16.vlgmr.msra.gmra.mxu0 %v474_v10  ;;  %4675 = vmatmul.bf16.vlgmr.msra.gmra.mxu1 %v475_v11  ;;  %v45_v10 = vld [vmem:[%s8268_s0 + $0xb8] sm:$0xff]  ;;  %v1504_v11 = vunpack.c.l.b16 %v163_v6 }
 0x2ae   :  { %4765 = vmatpush.bf16.xpose.msra.mxu0 %v1878_v32  ;;  %4778 = vmatpush.bf16.xpose.msra.mxu1 %v1879_v34  ;;  %493 = vst [vmem:[#allocation1] ss:$9 sm:$0xff] %v45_v10  ;;  %v164_v32 = vld [vmem:[%s8267_s1 + $0x2f0] sm:$0xff] }
 0x2af   :  { %v1506_v34 = vunpack.c.l.b16 %v164_v32 }
 0x2b0   :  { %4688 = vmatmul.bf16.vlgmr.msra.gmra.mxu2 %v476_v12  ;;  %4701 = vmatmul.bf16.vlgmr.msra.gmra.mxu3 %v477_v13  ;;  %v1502_v12 = vunpack.c.l.b16 %v162_v7  ;;  %v1505_v13 = vunpack.c.h.b16 %v163_v6 }
 0x2b1   :  { %4791 = vmatpush.bf16.xpose.msra.mxu2 %v1880_v31  ;;  %4804 = vmatpush.bf16.xpose.msra.mxu3 %v1881_v33  ;;  %v165_v31 = vld [vmem:[%s8267_s1 + $0x2f8] sm:$0xff]  ;;  %v1890_v43 = vpack.c.b16 %v1506_v34, %v1506_v34 }
 0x2b2   :  { %v4249_v39 = vpop.f32.mrf.mxu0  ;;  %v4262_v40 = vpop.f32.mrf.mxu1  ;;  %v1886_v21 = vpack.c.b16 %v1502_v12, %v1502_v12  ;;  %v1889_v22 = vpack.c.b16 %v1505_v13, %v1505_v13  ;;  %v1508_v33 = vunpack.c.l.b16 %v165_v31 }
 0x2b3   :  { %v4273_v36 = vpop.f32.mrf.mxu2  ;;  %v4286_v37 = vpop.f32.mrf.mxu3 }
 0x2b4   :  { %v4274_v38 = vadd.f32 %v4273_v36, %v4261_v35  ;;  %v1509_v35 = vunpack.c.h.b16 %v165_v31  ;;  %v1507_v36 = vunpack.c.h.b16 %v164_v32  ;;  %v1892_v42 = vpack.c.b16 %v1508_v33, %v1508_v33 }
 0x2b6   :  { %v4287_v41 = vadd.f32 %v4286_v37, %v4274_v38  ;;  %v1893_v44 = vpack.c.b16 %v1509_v35, %v1509_v35  ;;  %v1891_v45 = vpack.c.b16 %v1507_v36, %v1507_v36 }
 0x2ba   :  { %v4299_v50 = vpop.f32.mrf.mxu0  ;;  %v4312_v51 = vpop.f32.mrf.mxu1 }
 0x2bb   :  { %v4275_v48 = vpop.f32.mrf.mxu2  ;;  %v4288_v49 = vpop.f32.mrf.mxu3  ;;  %v4300_v52 = vadd.f32 %v4299_v50, %v4287_v41 }
 0x2bd   :  { %v4313_v57 = vadd.f32 %v4312_v51, %v4300_v52  ;;  %4714 = vmatmul.bf16.vlgmr.msrb.gmra.mxu0 %v478_v14  ;;  %4727 = vmatmul.bf16.vlgmr.msrb.gmra.mxu1 %v479_v16  ;;  %v1503_v14 = vunpack.c.h.b16 %v162_v7  ;;  %v494_v52 = vld [vmem:[#allocation1] sm:$0xff] }
 0x2be   :  { %4817 = vmatpush.bf16.xpose.msrb.mxu0 %v1882_v54  ;;  %4830 = vmatpush.bf16.xpose.msrb.mxu1 %v1883_v56  ;;  %v496_v54 = vld [vmem:[#allocation1 + $0x12] sm:$0xff]  ;;  %v498_v56 = vld [vmem:[#allocation1 + $0x24] sm:$0xff] }
 0x2bf   :  { %v1887_v23 = vpack.c.b16 %v1503_v14, %v1503_v14 }
 0x2c0   :  { %4740 = vmatmul.bf16.vlgmr.msrb.gmra.mxu2 %v480_v19  ;;  %4753 = vmatmul.bf16.vlgmr.msrb.gmra.mxu3 %v481_v20  ;;  %v1888_v20 = vpack.c.b16 %v1504_v11, %v1504_v11 }
 0x2c1   :  { %4843 = vmatpush.bf16.xpose.msrb.mxu2 %v1884_v53  ;;  %4856 = vmatpush.bf16.xpose.msrb.mxu3 %v1885_v55  ;;  %v495_v53 = vld [vmem:[#allocation1 + $0x9] sm:$0xff]  ;;  %v497_v55 = vld [vmem:[#allocation1 + $0x1b] sm:$0xff] }
 0x2c2   :  { %v4301_v61 = vpop.f32.mrf.mxu0  ;;  %v4314_v62 = vpop.f32.mrf.mxu1 }
 0x2c3   :  { %v4325_v58 = vpop.f32.mrf.mxu2  ;;  %v4338_v59 = vpop.f32.mrf.mxu3  ;;  %v500_v61 = vld [vmem:[#allocation1 + $0x36] sm:$0xff]  ;;  %v501_v62 = vld [vmem:[#allocation1 + $0x3f] sm:$0xff] }
 0x2c4   :  { %v4326_v60 = vadd.f32 %v4325_v58, %v4313_v57  ;;  %v499_v58 = vld [vmem:[#allocation1 + $0x2d] sm:$0xff] }
 0x2c6   :  { %v4339_v4 = vadd.f32 %v4338_v59, %v4326_v60  ;;  %v167_v59 = vld [vmem:[%s8267_s1 + $0x308] sm:$0xff]  ;;  %v166_v60 = vld [vmem:[%s8267_s1 + $0x300] sm:$0xff] }
 0x2ca   :  { %v4351_v17 = vpop.f32.mrf.mxu0  ;;  %v4364_v18 = vpop.f32.mrf.mxu1 }
 0x2cb   :  { %v4327_v15 = vpop.f32.mrf.mxu2  ;;  %v4340_v16 = vpop.f32.mrf.mxu3  ;;  %v4352_v19 = vadd.f32 %v4351_v17, %v4339_v4 }
 0x2cd   :  { %v4365_v24 = vadd.f32 %v4364_v18, %v4352_v19  ;;  %4766 = vmatmul.bf16.vlgmr.msra.gmra.mxu0 %v484_v63  ;;  %4779 = vmatmul.bf16.vlgmr.msra.gmra.mxu1 %v485_v0  ;;  %v46_v63 = vld [vmem:[%s8268_s0 + $0xc0] sm:$0xff]  ;;  %v1512_v0 = vunpack.c.l.b16 %v167_v59 }
 0x2ce   :  { %4869 = vmatpush.bf16.xpose.msra.mxu0 %v1886_v21  ;;  %4882 = vmatpush.bf16.xpose.msra.mxu1 %v1887_v23  ;;  %503 = vst [vmem:[#allocation1] ss:$9 sm:$0xff] %v46_v63  ;;  %v168_v21 = vld [vmem:[%s8267_s1 + $0x310] sm:$0xff] }
 0x2cf   :  { %v1514_v23 = vunpack.c.l.b16 %v168_v21 }
 0x2d0   :  { %4792 = vmatmul.bf16.vlgmr.msra.gmra.mxu2 %v486_v1  ;;  %4805 = vmatmul.bf16.vlgmr.msra.gmra.mxu3 %v487_v2  ;;  %v1510_v1 = vunpack.c.l.b16 %v166_v60  ;;  %v1513_v2 = vunpack.c.h.b16 %v167_v59 }
 0x2d1   :  { %4895 = vmatpush.bf16.xpose.msra.mxu2 %v1888_v20  ;;  %4908 = vmatpush.bf16.xpose.msra.mxu3 %v1889_v22  ;;  %v169_v20 = vld [vmem:[%s8267_s1 + $0x318] sm:$0xff]  ;;  %v1898_v32 = vpack.c.b16 %v1514_v23, %v1514_v23 }
 0x2d2   :  { %v4353_v28 = vpop.f32.mrf.mxu0  ;;  %v4366_v29 = vpop.f32.mrf.mxu1  ;;  %v1894_v10 = vpack.c.b16 %v1510_v1, %v1510_v1  ;;  %v1897_v11 = vpack.c.b16 %v1513_v2, %v1513_v2  ;;  %v1516_v22 = vunpack.c.l.b16 %v169_v20 }
 0x2d3   :  { %v4377_v25 = vpop.f32.mrf.mxu2  ;;  %v4390_v26 = vpop.f32.mrf.mxu3 }
 0x2d4   :  { %v4378_v27 = vadd.f32 %v4377_v25, %v4365_v24  ;;  %v1517_v24 = vunpack.c.h.b16 %v169_v20  ;;  %v1515_v25 = vunpack.c.h.b16 %v168_v21  ;;  %v1900_v31 = vpack.c.b16 %v1516_v22, %v1516_v22 }
 0x2d6   :  { %v4391_v30 = vadd.f32 %v4390_v26, %v4378_v27  ;;  %v1901_v33 = vpack.c.b16 %v1517_v24, %v1517_v24  ;;  %v1899_v34 = vpack.c.b16 %v1515_v25, %v1515_v25 }
 0x2da   :  { %v4403_v39 = vpop.f32.mrf.mxu0  ;;  %v4416_v40 = vpop.f32.mrf.mxu1 }
 0x2db   :  { %v4379_v37 = vpop.f32.mrf.mxu2  ;;  %v4392_v38 = vpop.f32.mrf.mxu3  ;;  %v4404_v41 = vadd.f32 %v4403_v39, %v4391_v30 }
 0x2dd   :  { %v4417_v46 = vadd.f32 %v4416_v40, %v4404_v41  ;;  %4818 = vmatmul.bf16.vlgmr.msrb.gmra.mxu0 %v488_v3  ;;  %4831 = vmatmul.bf16.vlgmr.msrb.gmra.mxu1 %v489_v5  ;;  %v1511_v3 = vunpack.c.h.b16 %v166_v60  ;;  %v504_v41 = vld [vmem:[#allocation1] sm:$0xff] }
 0x2de   :  { %4921 = vmatpush.bf16.xpose.msrb.mxu0 %v1890_v43  ;;  %4934 = vmatpush.bf16.xpose.msrb.mxu1 %v1891_v45  ;;  %v506_v43 = vld [vmem:[#allocation1 + $0x12] sm:$0xff]  ;;  %v508_v45 = vld [vmem:[#allocation1 + $0x24] sm:$0xff] }
 0x2df   :  { %v1895_v12 = vpack.c.b16 %v1511_v3, %v1511_v3 }
 0x2e0   :  { %4844 = vmatmul.bf16.vlgmr.msrb.gmra.mxu2 %v490_v8  ;;  %4857 = vmatmul.bf16.vlgmr.msrb.gmra.mxu3 %v491_v9  ;;  %v1896_v9 = vpack.c.b16 %v1512_v0, %v1512_v0 }
 0x2e1   :  { %4947 = vmatpush.bf16.xpose.msrb.mxu2 %v1892_v42  ;;  %4960 = vmatpush.bf16.xpose.msrb.mxu3 %v1893_v44  ;;  %v505_v42 = vld [vmem:[#allocation1 + $0x9] sm:$0xff]  ;;  %v507_v44 = vld [vmem:[#allocation1 + $0x1b] sm:$0xff] }
 0x2e2   :  { %v4405_v50 = vpop.f32.mrf.mxu0  ;;  %v4418_v51 = vpop.f32.mrf.mxu1 }
 0x2e3   :  { %v4429_v47 = vpop.f32.mrf.mxu2  ;;  %v4442_v48 = vpop.f32.mrf.mxu3  ;;  %v510_v50 = vld [vmem:[#allocation1 + $0x36] sm:$0xff]  ;;  %v511_v51 = vld [vmem:[#allocation1 + $0x3f] sm:$0xff] }
 0x2e4   :  { %v4430_v49 = vadd.f32 %v4429_v47, %v4417_v46  ;;  %v509_v47 = vld [vmem:[#allocation1 + $0x2d] sm:$0xff] }
 0x2e6   :  { %v4443_v57 = vadd.f32 %v4442_v48, %v4430_v49  ;;  %v171_v48 = vld [vmem:[%s8267_s1 + $0x328] sm:$0xff]  ;;  %v170_v49 = vld [vmem:[%s8267_s1 + $0x320] sm:$0xff] }
 0x2ea   :  { %v4455_v6 = vpop.f32.mrf.mxu0  ;;  %v4468_v7 = vpop.f32.mrf.mxu1 }
 0x2eb   :  { %v4431_v4 = vpop.f32.mrf.mxu2  ;;  %v4444_v5 = vpop.f32.mrf.mxu3  ;;  %v4456_v8 = vadd.f32 %v4455_v6, %v4443_v57 }
 0x2ed   :  { %v4469_v13 = vadd.f32 %v4468_v7, %v4456_v8  ;;  %4870 = vmatmul.bf16.vlgmr.msra.gmra.mxu0 %v494_v52  ;;  %4883 = vmatmul.bf16.vlgmr.msra.gmra.mxu1 %v495_v53  ;;  %v47_v52 = vld [vmem:[%s8268_s0 + $0xc8] sm:$0xff]  ;;  %v1520_v53 = vunpack.c.l.b16 %v171_v48 }
 0x2ee   :  { %4973 = vmatpush.bf16.xpose.msra.mxu0 %v1894_v10  ;;  %4986 = vmatpush.bf16.xpose.msra.mxu1 %v1895_v12  ;;  %513 = vst [vmem:[#allocation1] ss:$9 sm:$0xff] %v47_v52  ;;  %v172_v10 = vld [vmem:[%s8267_s1 + $0x330] sm:$0xff] }
 0x2ef   :  { %v1522_v12 = vunpack.c.l.b16 %v172_v10 }
 0x2f0   :  { %4896 = vmatmul.bf16.vlgmr.msra.gmra.mxu2 %v496_v54  ;;  %4909 = vmatmul.bf16.vlgmr.msra.gmra.mxu3 %v497_v55  ;;  %v1518_v54 = vunpack.c.l.b16 %v170_v49  ;;  %v1521_v55 = vunpack.c.h.b16 %v171_v48 }
 0x2f1   :  { %4999 = vmatpush.bf16.xpose.msra.mxu2 %v1896_v9  ;;  %5012 = vmatpush.bf16.xpose.msra.mxu3 %v1897_v11  ;;  %v173_v9 = vld [vmem:[%s8267_s1 + $0x338] sm:$0xff]  ;;  %v1906_v21 = vpack.c.b16 %v1522_v12, %v1522_v12 }
 0x2f2   :  { %v4457_v17 = vpop.f32.mrf.mxu0  ;;  %v4470_v18 = vpop.f32.mrf.mxu1  ;;  %v1902_v63 = vpack.c.b16 %v1518_v54, %v1518_v54  ;;  %v1905_v0 = vpack.c.b16 %v1521_v55, %v1521_v55  ;;  %v1524_v11 = vunpack.c.l.b16 %v173_v9 }
 0x2f3   :  { %v4481_v14 = vpop.f32.mrf.mxu2  ;;  %v4494_v15 = vpop.f32.mrf.mxu3 }
 0x2f4   :  { %v4482_v16 = vadd.f32 %v4481_v14, %v4469_v13  ;;  %v1525_v13 = vunpack.c.h.b16 %v173_v9  ;;  %v1523_v14 = vunpack.c.h.b16 %v172_v10  ;;  %v1908_v20 = vpack.c.b16 %v1524_v11, %v1524_v11 }
 0x2f6   :  { %v4495_v19 = vadd.f32 %v4494_v15, %v4482_v16  ;;  %v1909_v22 = vpack.c.b16 %v1525_v13, %v1525_v13  ;;  %v1907_v23 = vpack.c.b16 %v1523_v14, %v1523_v14 }
 0x2fa   :  { %v4507_v28 = vpop.f32.mrf.mxu0  ;;  %v4520_v29 = vpop.f32.mrf.mxu1 }
 0x2fb   :  { %v4483_v26 = vpop.f32.mrf.mxu2  ;;  %v4496_v27 = vpop.f32.mrf.mxu3  ;;  %v4508_v30 = vadd.f32 %v4507_v28, %v4495_v19 }
 0x2fd   :  { %v4521_v35 = vadd.f32 %v4520_v29, %v4508_v30  ;;  %4922 = vmatmul.bf16.vlgmr.msrb.gmra.mxu0 %v498_v56  ;;  %4935 = vmatmul.bf16.vlgmr.msrb.gmra.mxu1 %v499_v58  ;;  %v1519_v56 = vunpack.c.h.b16 %v170_v49  ;;  %v514_v30 = vld [vmem:[#allocation1] sm:$0xff] }
 0x2fe   :  { %5025 = vmatpush.bf16.xpose.msrb.mxu0 %v1898_v32  ;;  %5038 = vmatpush.bf16.xpose.msrb.mxu1 %v1899_v34  ;;  %v516_v32 = vld [vmem:[#allocation1 + $0x12] sm:$0xff]  ;;  %v518_v34 = vld [vmem:[#allocation1 + $0x24] sm:$0xff] }
 0x2ff   :  { %v1903_v1 = vpack.c.b16 %v1519_v56, %v1519_v56 }
 0x300   :  { %4948 = vmatmul.bf16.vlgmr.msrb.gmra.mxu2 %v500_v61  ;;  %4961 = vmatmul.bf16.vlgmr.msrb.gmra.mxu3 %v501_v62  ;;  %v1904_v62 = vpack.c.b16 %v1520_v53, %v1520_v53 }
 0x301   :  { %5051 = vmatpush.bf16.xpose.msrb.mxu2 %v1900_v31  ;;  %5064 = vmatpush.bf16.xpose.msrb.mxu3 %v1901_v33  ;;  %v515_v31 = vld [vmem:[#allocation1 + $0x9] sm:$0xff]  ;;  %v517_v33 = vld [vmem:[#allocation1 + $0x1b] sm:$0xff] }
 0x302   :  { %v4509_v39 = vpop.f32.mrf.mxu0  ;;  %v4522_v40 = vpop.f32.mrf.mxu1 }
 0x303   :  { %v4533_v36 = vpop.f32.mrf.mxu2  ;;  %v4546_v37 = vpop.f32.mrf.mxu3  ;;  %v520_v39 = vld [vmem:[#allocation1 + $0x36] sm:$0xff]  ;;  %v521_v40 = vld [vmem:[#allocation1 + $0x3f] sm:$0xff] }
 0x304   :  { %v4534_v38 = vadd.f32 %v4533_v36, %v4521_v35  ;;  %v519_v36 = vld [vmem:[#allocation1 + $0x2d] sm:$0xff] }
 0x306   :  { %v4547_v46 = vadd.f32 %v4546_v37, %v4534_v38  ;;  %v175_v37 = vld [vmem:[%s8267_s1 + $0x348] sm:$0xff]  ;;  %v174_v38 = vld [vmem:[%s8267_s1 + $0x340] sm:$0xff] }
 0x30a   :  { %v4559_v59 = vpop.f32.mrf.mxu0  ;;  %v4572_v60 = vpop.f32.mrf.mxu1 }
 0x30b   :  { %v4535_v57 = vpop.f32.mrf.mxu2  ;;  %v4548_v58 = vpop.f32.mrf.mxu3  ;;  %v4560_v61 = vadd.f32 %v4559_v59, %v4547_v46 }
 0x30d   :  { %v4573_v2 = vadd.f32 %v4572_v60, %v4560_v61  ;;  %4974 = vmatmul.bf16.vlgmr.msra.gmra.mxu0 %v504_v41  ;;  %4987 = vmatmul.bf16.vlgmr.msra.gmra.mxu1 %v505_v42  ;;  %v48_v41 = vld [vmem:[%s8268_s0 + $0xd0] sm:$0xff]  ;;  %v1528_v42 = vunpack.c.l.b16 %v175_v37 }
 0x30e   :  { %5077 = vmatpush.bf16.xpose.msra.mxu0 %v1902_v63  ;;  %5090 = vmatpush.bf16.xpose.msra.mxu1 %v1903_v1  ;;  %523 = vst [vmem:[#allocation1] ss:$9 sm:$0xff] %v48_v41  ;;  %v176_v63 = vld [vmem:[%s8267_s1 + $0x350] sm:$0xff] }
 0x30f   :  { %v1530_v1 = vunpack.c.l.b16 %v176_v63 }
 0x310   :  { %5000 = vmatmul.bf16.vlgmr.msra.gmra.mxu2 %v506_v43  ;;  %5013 = vmatmul.bf16.vlgmr.msra.gmra.mxu3 %v507_v44  ;;  %v1526_v43 = vunpack.c.l.b16 %v174_v38  ;;  %v1529_v44 = vunpack.c.h.b16 %v175_v37 }
 0x311   :  { %5103 = vmatpush.bf16.xpose.msra.mxu2 %v1904_v62  ;;  %5116 = vmatpush.bf16.xpose.msra.mxu3 %v1905_v0  ;;  %v177_v62 = vld [vmem:[%s8267_s1 + $0x358] sm:$0xff]  ;;  %v1914_v10 = vpack.c.b16 %v1530_v1, %v1530_v1 }
 0x312   :  { %v4561_v6 = vpop.f32.mrf.mxu0  ;;  %v4574_v7 = vpop.f32.mrf.mxu1  ;;  %v1910_v52 = vpack.c.b16 %v1526_v43, %v1526_v43  ;;  %v1913_v53 = vpack.c.b16 %v1529_v44, %v1529_v44  ;;  %v1532_v0 = vunpack.c.l.b16 %v177_v62 }
 0x313   :  { %v4585_v3 = vpop.f32.mrf.mxu2  ;;  %v4598_v4 = vpop.f32.mrf.mxu3 }
 0x314   :  { %v4586_v5 = vadd.f32 %v4585_v3, %v4573_v2  ;;  %v1533_v2 = vunpack.c.h.b16 %v177_v62  ;;  %v1531_v3 = vunpack.c.h.b16 %v176_v63  ;;  %v1916_v9 = vpack.c.b16 %v1532_v0, %v1532_v0 }
 0x316   :  { %v4599_v8 = vadd.f32 %v4598_v4, %v4586_v5  ;;  %v1917_v11 = vpack.c.b16 %v1533_v2, %v1533_v2  ;;  %v1915_v12 = vpack.c.b16 %v1531_v3, %v1531_v3 }
 0x31a   :  { %v4611_v17 = vpop.f32.mrf.mxu0  ;;  %v4624_v18 = vpop.f32.mrf.mxu1 }
 0x31b   :  { %v4587_v15 = vpop.f32.mrf.mxu2  ;;  %v4600_v16 = vpop.f32.mrf.mxu3  ;;  %v4612_v19 = vadd.f32 %v4611_v17, %v4599_v8 }
 0x31d   :  { %v4625_v24 = vadd.f32 %v4624_v18, %v4612_v19  ;;  %5026 = vmatmul.bf16.vlgmr.msrb.gmra.mxu0 %v508_v45  ;;  %5039 = vmatmul.bf16.vlgmr.msrb.gmra.mxu1 %v509_v47  ;;  %v1527_v45 = vunpack.c.h.b16 %v174_v38  ;;  %v524_v19 = vld [vmem:[#allocation1] sm:$0xff] }
 0x31e   :  { %5129 = vmatpush.bf16.xpose.msrb.mxu0 %v1906_v21  ;;  %5142 = vmatpush.bf16.xpose.msrb.mxu1 %v1907_v23  ;;  %v526_v21 = vld [vmem:[#allocation1 + $0x12] sm:$0xff]  ;;  %v528_v23 = vld [vmem:[#allocation1 + $0x24] sm:$0xff] }
 0x31f   :  { %v1911_v54 = vpack.c.b16 %v1527_v45, %v1527_v45 }
 0x320   :  { %5052 = vmatmul.bf16.vlgmr.msrb.gmra.mxu2 %v510_v50  ;;  %5065 = vmatmul.bf16.vlgmr.msrb.gmra.mxu3 %v511_v51  ;;  %v1912_v51 = vpack.c.b16 %v1528_v42, %v1528_v42 }
 0x321   :  { %5155 = vmatpush.bf16.xpose.msrb.mxu2 %v1908_v20  ;;  %5168 = vmatpush.bf16.xpose.msrb.mxu3 %v1909_v22  ;;  %v525_v20 = vld [vmem:[#allocation1 + $0x9] sm:$0xff]  ;;  %v527_v22 = vld [vmem:[#allocation1 + $0x1b] sm:$0xff] }
 0x322   :  { %v4613_v28 = vpop.f32.mrf.mxu0  ;;  %v4626_v29 = vpop.f32.mrf.mxu1 }
 0x323   :  { %v4637_v25 = vpop.f32.mrf.mxu2  ;;  %v4650_v26 = vpop.f32.mrf.mxu3  ;;  %v530_v28 = vld [vmem:[#allocation1 + $0x36] sm:$0xff]  ;;  %v531_v29 = vld [vmem:[#allocation1 + $0x3f] sm:$0xff] }
 0x324   :  { %v4638_v27 = vadd.f32 %v4637_v25, %v4625_v24  ;;  %v529_v25 = vld [vmem:[#allocation1 + $0x2d] sm:$0xff] }
 0x326   :  { %v4651_v35 = vadd.f32 %v4650_v26, %v4638_v27  ;;  %v179_v26 = vld [vmem:[%s8267_s1 + $0x368] sm:$0xff]  ;;  %v178_v27 = vld [vmem:[%s8267_s1 + $0x360] sm:$0xff] }
 0x32a   :  { %v4663_v48 = vpop.f32.mrf.mxu0  ;;  %v4676_v49 = vpop.f32.mrf.mxu1 }
 0x32b   :  { %v4639_v46 = vpop.f32.mrf.mxu2  ;;  %v4652_v47 = vpop.f32.mrf.mxu3  ;;  %v4664_v50 = vadd.f32 %v4663_v48, %v4651_v35 }
 0x32d   :  { %v4677_v55 = vadd.f32 %v4676_v49, %v4664_v50  ;;  %5078 = vmatmul.bf16.vlgmr.msra.gmra.mxu0 %v514_v30  ;;  %5091 = vmatmul.bf16.vlgmr.msra.gmra.mxu1 %v515_v31  ;;  %v49_v30 = vld [vmem:[%s8268_s0 + $0xd8] sm:$0xff]  ;;  %v1536_v31 = vunpack.c.l.b16 %v179_v26 }
 0x32e   :  { %5181 = vmatpush.bf16.xpose.msra.mxu0 %v1910_v52  ;;  %5194 = vmatpush.bf16.xpose.msra.mxu1 %v1911_v54  ;;  %533 = vst [vmem:[#allocation1] ss:$9 sm:$0xff] %v49_v30  ;;  %v180_v52 = vld [vmem:[%s8267_s1 + $0x370] sm:$0xff] }
 0x32f   :  { %v1538_v54 = vunpack.c.l.b16 %v180_v52 }
 0x330   :  { %5104 = vmatmul.bf16.vlgmr.msra.gmra.mxu2 %v516_v32  ;;  %5117 = vmatmul.bf16.vlgmr.msra.gmra.mxu3 %v517_v33  ;;  %v1534_v32 = vunpack.c.l.b16 %v178_v27  ;;  %v1537_v33 = vunpack.c.h.b16 %v179_v26 }
 0x331   :  { %5207 = vmatpush.bf16.xpose.msra.mxu2 %v1912_v51  ;;  %5220 = vmatpush.bf16.xpose.msra.mxu3 %v1913_v53  ;;  %v181_v51 = vld [vmem:[%s8267_s1 + $0x378] sm:$0xff]  ;;  %v1922_v63 = vpack.c.b16 %v1538_v54, %v1538_v54 }
 0x332   :  { %v4665_v59 = vpop.f32.mrf.mxu0  ;;  %v4678_v60 = vpop.f32.mrf.mxu1  ;;  %v1918_v41 = vpack.c.b16 %v1534_v32, %v1534_v32  ;;  %v1921_v42 = vpack.c.b16 %v1537_v33, %v1537_v33  ;;  %v1540_v53 = vunpack.c.l.b16 %v181_v51 }
 0x333   :  { %v4689_v56 = vpop.f32.mrf.mxu2  ;;  %v4702_v57 = vpop.f32.mrf.mxu3 }
 0x334   :  { %v4690_v58 = vadd.f32 %v4689_v56, %v4677_v55  ;;  %v1541_v55 = vunpack.c.h.b16 %v181_v51  ;;  %v1539_v56 = vunpack.c.h.b16 %v180_v52  ;;  %v1924_v62 = vpack.c.b16 %v1540_v53, %v1540_v53 }
 0x336   :  { %v4703_v61 = vadd.f32 %v4702_v57, %v4690_v58  ;;  %v1925_v0 = vpack.c.b16 %v1541_v55, %v1541_v55  ;;  %v1923_v1 = vpack.c.b16 %v1539_v56, %v1539_v56 }
 0x33a   :  { %v4715_v6 = vpop.f32.mrf.mxu0  ;;  %v4728_v7 = vpop.f32.mrf.mxu1 }
 0x33b   :  { %v4691_v4 = vpop.f32.mrf.mxu2  ;;  %v4704_v5 = vpop.f32.mrf.mxu3  ;;  %v4716_v8 = vadd.f32 %v4715_v6, %v4703_v61 }
 0x33d   :  { %v4729_v13 = vadd.f32 %v4728_v7, %v4716_v8  ;;  %5130 = vmatmul.bf16.vlgmr.msrb.gmra.mxu0 %v518_v34  ;;  %5143 = vmatmul.bf16.vlgmr.msrb.gmra.mxu1 %v519_v36  ;;  %v1535_v34 = vunpack.c.h.b16 %v178_v27  ;;  %v534_v8 = vld [vmem:[#allocation1] sm:$0xff] }
 0x33e   :  { %5233 = vmatpush.bf16.xpose.msrb.mxu0 %v1914_v10  ;;  %5246 = vmatpush.bf16.xpose.msrb.mxu1 %v1915_v12  ;;  %v536_v10 = vld [vmem:[#allocation1 + $0x12] sm:$0xff]  ;;  %v538_v12 = vld [vmem:[#allocation1 + $0x24] sm:$0xff] }
 0x33f   :  { %v1919_v43 = vpack.c.b16 %v1535_v34, %v1535_v34 }
 0x340   :  { %5156 = vmatmul.bf16.vlgmr.msrb.gmra.mxu2 %v520_v39  ;;  %5169 = vmatmul.bf16.vlgmr.msrb.gmra.mxu3 %v521_v40  ;;  %v1920_v40 = vpack.c.b16 %v1536_v31, %v1536_v31 }
 0x341   :  { %5259 = vmatpush.bf16.xpose.msrb.mxu2 %v1916_v9  ;;  %5272 = vmatpush.bf16.xpose.msrb.mxu3 %v1917_v11  ;;  %v535_v9 = vld [vmem:[#allocation1 + $0x9] sm:$0xff]  ;;  %v537_v11 = vld [vmem:[#allocation1 + $0x1b] sm:$0xff] }
 0x342   :  { %v4717_v17 = vpop.f32.mrf.mxu0  ;;  %v4730_v18 = vpop.f32.mrf.mxu1 }
 0x343   :  { %v4741_v14 = vpop.f32.mrf.mxu2  ;;  %v4754_v15 = vpop.f32.mrf.mxu3  ;;  %v540_v17 = vld [vmem:[#allocation1 + $0x36] sm:$0xff]  ;;  %v541_v18 = vld [vmem:[#allocation1 + $0x3f] sm:$0xff] }
 0x344   :  { %v4742_v16 = vadd.f32 %v4741_v14, %v4729_v13  ;;  %v539_v14 = vld [vmem:[#allocation1 + $0x2d] sm:$0xff] }
 0x346   :  { %v4755_v24 = vadd.f32 %v4754_v15, %v4742_v16  ;;  %v183_v15 = vld [vmem:[%s8267_s1 + $0x388] sm:$0xff]  ;;  %v182_v16 = vld [vmem:[%s8267_s1 + $0x380] sm:$0xff] }
 0x34a   :  { %v4767_v37 = vpop.f32.mrf.mxu0  ;;  %v4780_v38 = vpop.f32.mrf.mxu1 }
 0x34b   :  { %v4743_v35 = vpop.f32.mrf.mxu2  ;;  %v4756_v36 = vpop.f32.mrf.mxu3  ;;  %v4768_v39 = vadd.f32 %v4767_v37, %v4755_v24 }
 0x34d   :  { %v4781_v44 = vadd.f32 %v4780_v38, %v4768_v39  ;;  %5182 = vmatmul.bf16.vlgmr.msra.gmra.mxu0 %v524_v19  ;;  %5195 = vmatmul.bf16.vlgmr.msra.gmra.mxu1 %v525_v20  ;;  %v50_v19 = vld [vmem:[%s8268_s0 + $0xe0] sm:$0xff]  ;;  %v1544_v20 = vunpack.c.l.b16 %v183_v15 }
 0x34e   :  { %5285 = vmatpush.bf16.xpose.msra.mxu0 %v1918_v41  ;;  %5298 = vmatpush.bf16.xpose.msra.mxu1 %v1919_v43  ;;  %543 = vst [vmem:[#allocation1] ss:$9 sm:$0xff] %v50_v19  ;;  %v184_v41 = vld [vmem:[%s8267_s1 + $0x390] sm:$0xff] }
 0x34f   :  { %v1546_v43 = vunpack.c.l.b16 %v184_v41 }
 0x350   :  { %5208 = vmatmul.bf16.vlgmr.msra.gmra.mxu2 %v526_v21  ;;  %5221 = vmatmul.bf16.vlgmr.msra.gmra.mxu3 %v527_v22  ;;  %v1542_v21 = vunpack.c.l.b16 %v182_v16  ;;  %v1545_v22 = vunpack.c.h.b16 %v183_v15 }
 0x351   :  { %5311 = vmatpush.bf16.xpose.msra.mxu2 %v1920_v40  ;;  %5324 = vmatpush.bf16.xpose.msra.mxu3 %v1921_v42  ;;  %v185_v40 = vld [vmem:[%s8267_s1 + $0x398] sm:$0xff]  ;;  %v1930_v52 = vpack.c.b16 %v1546_v43, %v1546_v43 }
 0x352   :  { %v4769_v48 = vpop.f32.mrf.mxu0  ;;  %v4782_v49 = vpop.f32.mrf.mxu1  ;;  %v1926_v30 = vpack.c.b16 %v1542_v21, %v1542_v21  ;;  %v1929_v31 = vpack.c.b16 %v1545_v22, %v1545_v22  ;;  %v1548_v42 = vunpack.c.l.b16 %v185_v40 }
 0x353   :  { %v4793_v45 = vpop.f32.mrf.mxu2  ;;  %v4806_v46 = vpop.f32.mrf.mxu3 }
 0x354   :  { %v4794_v47 = vadd.f32 %v4793_v45, %v4781_v44  ;;  %v1549_v44 = vunpack.c.h.b16 %v185_v40  ;;  %v1547_v45 = vunpack.c.h.b16 %v184_v41  ;;  %v1932_v51 = vpack.c.b16 %v1548_v42, %v1548_v42 }
 0x356   :  { %v4807_v50 = vadd.f32 %v4806_v46, %v4794_v47  ;;  %v1933_v53 = vpack.c.b16 %v1549_v44, %v1549_v44  ;;  %v1931_v54 = vpack.c.b16 %v1547_v45, %v1547_v45 }
 0x35a   :  { %v4819_v59 = vpop.f32.mrf.mxu0  ;;  %v4832_v60 = vpop.f32.mrf.mxu1 }
 0x35b   :  { %v4795_v57 = vpop.f32.mrf.mxu2  ;;  %v4808_v58 = vpop.f32.mrf.mxu3  ;;  %v4820_v61 = vadd.f32 %v4819_v59, %v4807_v50 }
 0x35d   :  { %v4833_v2 = vadd.f32 %v4832_v60, %v4820_v61  ;;  %5234 = vmatmul.bf16.vlgmr.msrb.gmra.mxu0 %v528_v23  ;;  %5247 = vmatmul.bf16.vlgmr.msrb.gmra.mxu1 %v529_v25  ;;  %v1543_v23 = vunpack.c.h.b16 %v182_v16  ;;  %v544_v61 = vld [vmem:[#allocation1] sm:$0xff] }
 0x35e   :  { %5337 = vmatpush.bf16.xpose.msrb.mxu0 %v1922_v63  ;;  %5350 = vmatpush.bf16.xpose.msrb.mxu1 %v1923_v1  ;;  %v546_v63 = vld [vmem:[#allocation1 + $0x12] sm:$0xff]  ;;  %v548_v1 = vld [vmem:[#allocation1 + $0x24] sm:$0xff] }
 0x35f   :  { %v1927_v32 = vpack.c.b16 %v1543_v23, %v1543_v23 }
 0x360   :  { %5260 = vmatmul.bf16.vlgmr.msrb.gmra.mxu2 %v530_v28  ;;  %5273 = vmatmul.bf16.vlgmr.msrb.gmra.mxu3 %v531_v29  ;;  %v1928_v29 = vpack.c.b16 %v1544_v20, %v1544_v20 }
 0x361   :  { %5363 = vmatpush.bf16.xpose.msrb.mxu2 %v1924_v62  ;;  %5376 = vmatpush.bf16.xpose.msrb.mxu3 %v1925_v0  ;;  %v545_v62 = vld [vmem:[#allocation1 + $0x9] sm:$0xff]  ;;  %v547_v0 = vld [vmem:[#allocation1 + $0x1b] sm:$0xff] }
 0x362   :  { %v4821_v6 = vpop.f32.mrf.mxu0  ;;  %v4834_v7 = vpop.f32.mrf.mxu1 }
 0x363   :  { %v4845_v3 = vpop.f32.mrf.mxu2  ;;  %v4858_v4 = vpop.f32.mrf.mxu3  ;;  %v550_v6 = vld [vmem:[#allocation1 + $0x36] sm:$0xff]  ;;  %v551_v7 = vld [vmem:[#allocation1 + $0x3f] sm:$0xff] }
 0x364   :  { %v4846_v5 = vadd.f32 %v4845_v3, %v4833_v2  ;;  %v549_v3 = vld [vmem:[#allocation1 + $0x2d] sm:$0xff] }
 0x366   :  { %v4859_v13 = vadd.f32 %v4858_v4, %v4846_v5  ;;  %v187_v4 = vld [vmem:[%s8267_s1 + $0x3a8] sm:$0xff]  ;;  %v186_v5 = vld [vmem:[%s8267_s1 + $0x3a0] sm:$0xff] }
 0x36a   :  { %v4871_v26 = vpop.f32.mrf.mxu0  ;;  %v4884_v27 = vpop.f32.mrf.mxu1 }
 0x36b   :  { %v4847_v24 = vpop.f32.mrf.mxu2  ;;  %v4860_v25 = vpop.f32.mrf.mxu3  ;;  %v4872_v28 = vadd.f32 %v4871_v26, %v4859_v13 }
 0x36d   :  { %v4885_v33 = vadd.f32 %v4884_v27, %v4872_v28  ;;  %5286 = vmatmul.bf16.vlgmr.msra.gmra.mxu0 %v534_v8  ;;  %5299 = vmatmul.bf16.vlgmr.msra.gmra.mxu1 %v535_v9  ;;  %v51_v8 = vld [vmem:[%s8268_s0 + $0xe8] sm:$0xff]  ;;  %v1552_v9 = vunpack.c.l.b16 %v187_v4 }
 0x36e   :  { %5389 = vmatpush.bf16.xpose.msra.mxu0 %v1926_v30  ;;  %5402 = vmatpush.bf16.xpose.msra.mxu1 %v1927_v32  ;;  %553 = vst [vmem:[#allocation1] ss:$9 sm:$0xff] %v51_v8  ;;  %v188_v30 = vld [vmem:[%s8267_s1 + $0x3b0] sm:$0xff] }
 0x36f   :  { %v1554_v32 = vunpack.c.l.b16 %v188_v30 }
 0x370   :  { %5312 = vmatmul.bf16.vlgmr.msra.gmra.mxu2 %v536_v10  ;;  %5325 = vmatmul.bf16.vlgmr.msra.gmra.mxu3 %v537_v11  ;;  %v1550_v10 = vunpack.c.l.b16 %v186_v5  ;;  %v1553_v11 = vunpack.c.h.b16 %v187_v4 }
 0x371   :  { %5415 = vmatpush.bf16.xpose.msra.mxu2 %v1928_v29  ;;  %5428 = vmatpush.bf16.xpose.msra.mxu3 %v1929_v31  ;;  %v189_v29 = vld [vmem:[%s8267_s1 + $0x3b8] sm:$0xff]  ;;  %v1938_v41 = vpack.c.b16 %v1554_v32, %v1554_v32 }
 0x372   :  { %v4873_v37 = vpop.f32.mrf.mxu0  ;;  %v4886_v38 = vpop.f32.mrf.mxu1  ;;  %v1934_v19 = vpack.c.b16 %v1550_v10, %v1550_v10  ;;  %v1937_v20 = vpack.c.b16 %v1553_v11, %v1553_v11  ;;  %v1556_v31 = vunpack.c.l.b16 %v189_v29 }
 0x373   :  { %v4897_v34 = vpop.f32.mrf.mxu2  ;;  %v4910_v35 = vpop.f32.mrf.mxu3 }
 0x374   :  { %v4898_v36 = vadd.f32 %v4897_v34, %v4885_v33  ;;  %v1557_v33 = vunpack.c.h.b16 %v189_v29  ;;  %v1555_v34 = vunpack.c.h.b16 %v188_v30  ;;  %v1940_v40 = vpack.c.b16 %v1556_v31, %v1556_v31 }
 0x376   :  { %v4911_v39 = vadd.f32 %v4910_v35, %v4898_v36  ;;  %v1941_v42 = vpack.c.b16 %v1557_v33, %v1557_v33  ;;  %v1939_v43 = vpack.c.b16 %v1555_v34, %v1555_v34 }
 0x37a   :  { %v4923_v48 = vpop.f32.mrf.mxu0  ;;  %v4936_v49 = vpop.f32.mrf.mxu1 }
 0x37b   :  { %v4899_v46 = vpop.f32.mrf.mxu2  ;;  %v4912_v47 = vpop.f32.mrf.mxu3  ;;  %v4924_v50 = vadd.f32 %v4923_v48, %v4911_v39 }
 0x37d   :  { %v4937_v55 = vadd.f32 %v4936_v49, %v4924_v50  ;;  %5338 = vmatmul.bf16.vlgmr.msrb.gmra.mxu0 %v538_v12  ;;  %5351 = vmatmul.bf16.vlgmr.msrb.gmra.mxu1 %v539_v14  ;;  %v1551_v12 = vunpack.c.h.b16 %v186_v5  ;;  %v554_v50 = vld [vmem:[#allocation1] sm:$0xff] }
 0x37e   :  { %5441 = vmatpush.bf16.xpose.msrb.mxu0 %v1930_v52  ;;  %5454 = vmatpush.bf16.xpose.msrb.mxu1 %v1931_v54  ;;  %v556_v52 = vld [vmem:[#allocation1 + $0x12] sm:$0xff]  ;;  %v558_v54 = vld [vmem:[#allocation1 + $0x24] sm:$0xff] }
 0x37f   :  { %v1935_v21 = vpack.c.b16 %v1551_v12, %v1551_v12 }
 0x380   :  { %5364 = vmatmul.bf16.vlgmr.msrb.gmra.mxu2 %v540_v17  ;;  %5377 = vmatmul.bf16.vlgmr.msrb.gmra.mxu3 %v541_v18  ;;  %v1936_v18 = vpack.c.b16 %v1552_v9, %v1552_v9 }
 0x381   :  { %5467 = vmatpush.bf16.xpose.msrb.mxu2 %v1932_v51  ;;  %5480 = vmatpush.bf16.xpose.msrb.mxu3 %v1933_v53  ;;  %v555_v51 = vld [vmem:[#allocation1 + $0x9] sm:$0xff]  ;;  %v557_v53 = vld [vmem:[#allocation1 + $0x1b] sm:$0xff] }
 0x382   :  { %v4925_v59 = vpop.f32.mrf.mxu0  ;;  %v4938_v60 = vpop.f32.mrf.mxu1 }
 0x383   :  { %v4949_v56 = vpop.f32.mrf.mxu2  ;;  %v4962_v57 = vpop.f32.mrf.mxu3  ;;  %v560_v59 = vld [vmem:[#allocation1 + $0x36] sm:$0xff]  ;;  %v561_v60 = vld [vmem:[#allocation1 + $0x3f] sm:$0xff] }
 0x384   :  { %v4950_v58 = vadd.f32 %v4949_v56, %v4937_v55  ;;  %v559_v56 = vld [vmem:[#allocation1 + $0x2d] sm:$0xff] }
 0x386   :  { %v4963_v2 = vadd.f32 %v4962_v57, %v4950_v58  ;;  %v191_v57 = vld [vmem:[%s8267_s1 + $0x3c8] sm:$0xff]  ;;  %v190_v58 = vld [vmem:[%s8267_s1 + $0x3c0] sm:$0xff] }
 0x38a   :  { %v4975_v15 = vpop.f32.mrf.mxu0  ;;  %v4988_v16 = vpop.f32.mrf.mxu1 }
 0x38b   :  { %v4951_v13 = vpop.f32.mrf.mxu2  ;;  %v4964_v14 = vpop.f32.mrf.mxu3  ;;  %v4976_v17 = vadd.f32 %v4975_v15, %v4963_v2 }
 0x38d   :  { %v4989_v22 = vadd.f32 %v4988_v16, %v4976_v17  ;;  %5390 = vmatmul.bf16.vlgmr.msra.gmra.mxu0 %v544_v61  ;;  %5403 = vmatmul.bf16.vlgmr.msra.gmra.mxu1 %v545_v62  ;;  %v52_v61 = vld [vmem:[%s8268_s0 + $0xf0] sm:$0xff]  ;;  %v1560_v62 = vunpack.c.l.b16 %v191_v57 }
 0x38e   :  { %5493 = vmatpush.bf16.xpose.msra.mxu0 %v1934_v19  ;;  %5506 = vmatpush.bf16.xpose.msra.mxu1 %v1935_v21  ;;  %563 = vst [vmem:[#allocation1] ss:$9 sm:$0xff] %v52_v61  ;;  %v192_v19 = vld [vmem:[%s8267_s1 + $0x3d0] sm:$0xff] }
 0x38f   :  { %v1562_v21 = vunpack.c.l.b16 %v192_v19 }
 0x390   :  { %5416 = vmatmul.bf16.vlgmr.msra.gmra.mxu2 %v546_v63  ;;  %5429 = vmatmul.bf16.vlgmr.msra.gmra.mxu3 %v547_v0  ;;  %v1558_v63 = vunpack.c.l.b16 %v190_v58  ;;  %v1561_v0 = vunpack.c.h.b16 %v191_v57 }
 0x391   :  { %5519 = vmatpush.bf16.xpose.msra.mxu2 %v1936_v18  ;;  %5532 = vmatpush.bf16.xpose.msra.mxu3 %v1937_v20  ;;  %v193_v18 = vld [vmem:[%s8267_s1 + $0x3d8] sm:$0xff]  ;;  %v1946_v30 = vpack.c.b16 %v1562_v21, %v1562_v21 }
 0x392   :  { %v4977_v26 = vpop.f32.mrf.mxu0  ;;  %v4990_v27 = vpop.f32.mrf.mxu1  ;;  %v1942_v8 = vpack.c.b16 %v1558_v63, %v1558_v63  ;;  %v1945_v9 = vpack.c.b16 %v1561_v0, %v1561_v0  ;;  %v1564_v20 = vunpack.c.l.b16 %v193_v18 }
 0x393   :  { %v5001_v23 = vpop.f32.mrf.mxu2  ;;  %v5014_v24 = vpop.f32.mrf.mxu3 }
 0x394   :  { %v5002_v25 = vadd.f32 %v5001_v23, %v4989_v22  ;;  %v1565_v22 = vunpack.c.h.b16 %v193_v18  ;;  %v1563_v23 = vunpack.c.h.b16 %v192_v19  ;;  %v1948_v29 = vpack.c.b16 %v1564_v20, %v1564_v20 }
 0x396   :  { %v5015_v28 = vadd.f32 %v5014_v24, %v5002_v25  ;;  %v1949_v31 = vpack.c.b16 %v1565_v22, %v1565_v22  ;;  %v1947_v32 = vpack.c.b16 %v1563_v23, %v1563_v23 }
 0x39a   :  { %v5027_v37 = vpop.f32.mrf.mxu0  ;;  %v5040_v38 = vpop.f32.mrf.mxu1 }
 0x39b   :  { %v5003_v35 = vpop.f32.mrf.mxu2  ;;  %v5016_v36 = vpop.f32.mrf.mxu3  ;;  %v5028_v39 = vadd.f32 %v5027_v37, %v5015_v28 }
 0x39d   :  { %v5041_v44 = vadd.f32 %v5040_v38, %v5028_v39  ;;  %5442 = vmatmul.bf16.vlgmr.msrb.gmra.mxu0 %v548_v1  ;;  %5455 = vmatmul.bf16.vlgmr.msrb.gmra.mxu1 %v549_v3  ;;  %v1559_v1 = vunpack.c.h.b16 %v190_v58  ;;  %v564_v39 = vld [vmem:[#allocation1] sm:$0xff] }
 0x39e   :  { %5545 = vmatpush.bf16.xpose.msrb.mxu0 %v1938_v41  ;;  %5558 = vmatpush.bf16.xpose.msrb.mxu1 %v1939_v43  ;;  %v566_v41 = vld [vmem:[#allocation1 + $0x12] sm:$0xff]  ;;  %v568_v43 = vld [vmem:[#allocation1 + $0x24] sm:$0xff] }
 0x39f   :  { %v1943_v10 = vpack.c.b16 %v1559_v1, %v1559_v1 }
 0x3a0   :  { %5468 = vmatmul.bf16.vlgmr.msrb.gmra.mxu2 %v550_v6  ;;  %5481 = vmatmul.bf16.vlgmr.msrb.gmra.mxu3 %v551_v7  ;;  %v1944_v7 = vpack.c.b16 %v1560_v62, %v1560_v62 }
 0x3a1   :  { %5571 = vmatpush.bf16.xpose.msrb.mxu2 %v1940_v40  ;;  %5584 = vmatpush.bf16.xpose.msrb.mxu3 %v1941_v42  ;;  %v565_v40 = vld [vmem:[#allocation1 + $0x9] sm:$0xff]  ;;  %v567_v42 = vld [vmem:[#allocation1 + $0x1b] sm:$0xff] }
 0x3a2   :  { %v5029_v48 = vpop.f32.mrf.mxu0  ;;  %v5042_v49 = vpop.f32.mrf.mxu1 }
 0x3a3   :  { %v5053_v45 = vpop.f32.mrf.mxu2  ;;  %v5066_v46 = vpop.f32.mrf.mxu3  ;;  %v570_v48 = vld [vmem:[#allocation1 + $0x36] sm:$0xff]  ;;  %v571_v49 = vld [vmem:[#allocation1 + $0x3f] sm:$0xff] }
 0x3a4   :  { %v5054_v47 = vadd.f32 %v5053_v45, %v5041_v44  ;;  %v569_v45 = vld [vmem:[#allocation1 + $0x2d] sm:$0xff] }
 0x3a6   :  { %v5067_v55 = vadd.f32 %v5066_v46, %v5054_v47  ;;  %v195_v46 = vld [vmem:[%s8267_s1 + $0x3e8] sm:$0xff]  ;;  %v194_v47 = vld [vmem:[%s8267_s1 + $0x3e0] sm:$0xff] }
 0x3aa   :  { %v5079_v4 = vpop.f32.mrf.mxu0  ;;  %v5092_v5 = vpop.f32.mrf.mxu1 }
 0x3ab   :  { %v5055_v2 = vpop.f32.mrf.mxu2  ;;  %v5068_v3 = vpop.f32.mrf.mxu3  ;;  %v5080_v6 = vadd.f32 %v5079_v4, %v5067_v55 }
 0x3ad   :  { %v5093_v11 = vadd.f32 %v5092_v5, %v5080_v6  ;;  %5494 = vmatmul.bf16.vlgmr.msra.gmra.mxu0 %v554_v50  ;;  %5507 = vmatmul.bf16.vlgmr.msra.gmra.mxu1 %v555_v51  ;;  %v53_v50 = vld [vmem:[%s8268_s0 + $0xf8] sm:$0xff]  ;;  %v1568_v51 = vunpack.c.l.b16 %v195_v46 }
 0x3ae   :  { %5597 = vmatpush.bf16.xpose.msra.mxu0 %v1942_v8  ;;  %5610 = vmatpush.bf16.xpose.msra.mxu1 %v1943_v10  ;;  %573 = vst [vmem:[#allocation1] ss:$9 sm:$0xff] %v53_v50  ;;  %v196_v8 = vld [vmem:[%s8267_s1 + $0x3f0] sm:$0xff] }
 0x3af   :  { %v1570_v10 = vunpack.c.l.b16 %v196_v8 }
 0x3b0   :  { %5520 = vmatmul.bf16.vlgmr.msra.gmra.mxu2 %v556_v52  ;;  %5533 = vmatmul.bf16.vlgmr.msra.gmra.mxu3 %v557_v53  ;;  %v1566_v52 = vunpack.c.l.b16 %v194_v47  ;;  %v1569_v53 = vunpack.c.h.b16 %v195_v46 }
 0x3b1   :  { %5623 = vmatpush.bf16.xpose.msra.mxu2 %v1944_v7  ;;  %5636 = vmatpush.bf16.xpose.msra.mxu3 %v1945_v9  ;;  %v197_v7 = vld [vmem:[%s8267_s1 + $0x3f8] sm:$0xff]  ;;  %v1954_v19 = vpack.c.b16 %v1570_v10, %v1570_v10 }
 0x3b2   :  { %v5081_v15 = vpop.f32.mrf.mxu0  ;;  %v5094_v16 = vpop.f32.mrf.mxu1  ;;  %v1950_v61 = vpack.c.b16 %v1566_v52, %v1566_v52  ;;  %v1953_v62 = vpack.c.b16 %v1569_v53, %v1569_v53  ;;  %v1572_v9 = vunpack.c.l.b16 %v197_v7 }
 0x3b3   :  { %v5105_v12 = vpop.f32.mrf.mxu2  ;;  %v5118_v13 = vpop.f32.mrf.mxu3 }
 0x3b4   :  { %v5106_v14 = vadd.f32 %v5105_v12, %v5093_v11  ;;  %v1573_v11 = vunpack.c.h.b16 %v197_v7  ;;  %v1571_v12 = vunpack.c.h.b16 %v196_v8  ;;  %v1956_v18 = vpack.c.b16 %v1572_v9, %v1572_v9 }
 0x3b6   :  { %v5119_v17 = vadd.f32 %v5118_v13, %v5106_v14  ;;  %v1957_v20 = vpack.c.b16 %v1573_v11, %v1573_v11  ;;  %v1955_v21 = vpack.c.b16 %v1571_v12, %v1571_v12 }
 0x3ba   :  { %v5131_v26 = vpop.f32.mrf.mxu0  ;;  %v5144_v27 = vpop.f32.mrf.mxu1 }
 0x3bb   :  { %v5107_v24 = vpop.f32.mrf.mxu2  ;;  %v5120_v25 = vpop.f32.mrf.mxu3  ;;  %v5132_v28 = vadd.f32 %v5131_v26, %v5119_v17 }
 0x3bd   :  { %v5145_v33 = vadd.f32 %v5144_v27, %v5132_v28  ;;  %5546 = vmatmul.bf16.vlgmr.msrb.gmra.mxu0 %v558_v54  ;;  %5559 = vmatmul.bf16.vlgmr.msrb.gmra.mxu1 %v559_v56  ;;  %v1567_v54 = vunpack.c.h.b16 %v194_v47  ;;  %v574_v28 = vld [vmem:[#allocation1] sm:$0xff] }
 0x3be   :  { %5649 = vmatpush.bf16.xpose.msrb.mxu0 %v1946_v30  ;;  %5662 = vmatpush.bf16.xpose.msrb.mxu1 %v1947_v32  ;;  %v576_v30 = vld [vmem:[#allocation1 + $0x12] sm:$0xff]  ;;  %v578_v32 = vld [vmem:[#allocation1 + $0x24] sm:$0xff] }
 0x3bf   :  { %v1951_v63 = vpack.c.b16 %v1567_v54, %v1567_v54 }
 0x3c0   :  { %5572 = vmatmul.bf16.vlgmr.msrb.gmra.mxu2 %v560_v59  ;;  %5585 = vmatmul.bf16.vlgmr.msrb.gmra.mxu3 %v561_v60  ;;  %v1952_v60 = vpack.c.b16 %v1568_v51, %v1568_v51 }
 0x3c1   :  { %5675 = vmatpush.bf16.xpose.msrb.mxu2 %v1948_v29  ;;  %5688 = vmatpush.bf16.xpose.msrb.mxu3 %v1949_v31  ;;  %v575_v29 = vld [vmem:[#allocation1 + $0x9] sm:$0xff]  ;;  %v577_v31 = vld [vmem:[#allocation1 + $0x1b] sm:$0xff] }
 0x3c2   :  { %v5133_v37 = vpop.f32.mrf.mxu0  ;;  %v5146_v38 = vpop.f32.mrf.mxu1 }
 0x3c3   :  { %v5157_v34 = vpop.f32.mrf.mxu2  ;;  %v5170_v35 = vpop.f32.mrf.mxu3  ;;  %v580_v37 = vld [vmem:[#allocation1 + $0x36] sm:$0xff]  ;;  %v581_v38 = vld [vmem:[#allocation1 + $0x3f] sm:$0xff] }
 0x3c4   :  { %v5158_v36 = vadd.f32 %v5157_v34, %v5145_v33  ;;  %v579_v34 = vld [vmem:[#allocation1 + $0x2d] sm:$0xff] }
 0x3c6   :  { %v5171_v44 = vadd.f32 %v5170_v35, %v5158_v36  ;;  %v199_v35 = vld [vmem:[%s8267_s1 + $0x408] sm:$0xff]  ;;  %v198_v36 = vld [vmem:[%s8267_s1 + $0x400] sm:$0xff] }
 0x3ca   :  { %v5183_v57 = vpop.f32.mrf.mxu0  ;;  %v5196_v58 = vpop.f32.mrf.mxu1 }
 0x3cb   :  { %v5159_v55 = vpop.f32.mrf.mxu2  ;;  %v5172_v56 = vpop.f32.mrf.mxu3  ;;  %v5184_v59 = vadd.f32 %v5183_v57, %v5171_v44 }
 0x3cd   :  { %v5197_v0 = vadd.f32 %v5196_v58, %v5184_v59  ;;  %5598 = vmatmul.bf16.vlgmr.msra.gmra.mxu0 %v564_v39  ;;  %5611 = vmatmul.bf16.vlgmr.msra.gmra.mxu1 %v565_v40  ;;  %v54_v39 = vld [vmem:[%s8268_s0 + $0x100] sm:$0xff]  ;;  %v1576_v40 = vunpack.c.l.b16 %v199_v35 }
 0x3ce   :  { %5701 = vmatpush.bf16.xpose.msra.mxu0 %v1950_v61  ;;  %5714 = vmatpush.bf16.xpose.msra.mxu1 %v1951_v63  ;;  %583 = vst [vmem:[#allocation1] ss:$9 sm:$0xff] %v54_v39  ;;  %v200_v61 = vld [vmem:[%s8267_s1 + $0x410] sm:$0xff] }
 0x3cf   :  { %v1578_v63 = vunpack.c.l.b16 %v200_v61 }
 0x3d0   :  { %5624 = vmatmul.bf16.vlgmr.msra.gmra.mxu2 %v566_v41  ;;  %5637 = vmatmul.bf16.vlgmr.msra.gmra.mxu3 %v567_v42  ;;  %v1574_v41 = vunpack.c.l.b16 %v198_v36  ;;  %v1577_v42 = vunpack.c.h.b16 %v199_v35 }
 0x3d1   :  { %5727 = vmatpush.bf16.xpose.msra.mxu2 %v1952_v60  ;;  %5740 = vmatpush.bf16.xpose.msra.mxu3 %v1953_v62  ;;  %v201_v60 = vld [vmem:[%s8267_s1 + $0x418] sm:$0xff]  ;;  %v1962_v8 = vpack.c.b16 %v1578_v63, %v1578_v63 }
 0x3d2   :  { %v5185_v4 = vpop.f32.mrf.mxu0  ;;  %v5198_v5 = vpop.f32.mrf.mxu1  ;;  %v1958_v50 = vpack.c.b16 %v1574_v41, %v1574_v41  ;;  %v1961_v51 = vpack.c.b16 %v1577_v42, %v1577_v42  ;;  %v1580_v62 = vunpack.c.l.b16 %v201_v60 }
 0x3d3   :  { %v5209_v1 = vpop.f32.mrf.mxu2  ;;  %v5222_v2 = vpop.f32.mrf.mxu3 }
 0x3d4   :  { %v5210_v3 = vadd.f32 %v5209_v1, %v5197_v0  ;;  %v1581_v0 = vunpack.c.h.b16 %v201_v60  ;;  %v1579_v1 = vunpack.c.h.b16 %v200_v61  ;;  %v1964_v7 = vpack.c.b16 %v1580_v62, %v1580_v62 }
 0x3d6   :  { %v5223_v6 = vadd.f32 %v5222_v2, %v5210_v3  ;;  %v1965_v9 = vpack.c.b16 %v1581_v0, %v1581_v0  ;;  %v1963_v10 = vpack.c.b16 %v1579_v1, %v1579_v1 }
 0x3da   :  { %v5235_v15 = vpop.f32.mrf.mxu0  ;;  %v5248_v16 = vpop.f32.mrf.mxu1 }
 0x3db   :  { %v5211_v13 = vpop.f32.mrf.mxu2  ;;  %v5224_v14 = vpop.f32.mrf.mxu3  ;;  %v5236_v17 = vadd.f32 %v5235_v15, %v5223_v6 }
 0x3dd   :  { %v5249_v22 = vadd.f32 %v5248_v16, %v5236_v17  ;;  %5650 = vmatmul.bf16.vlgmr.msrb.gmra.mxu0 %v568_v43  ;;  %5663 = vmatmul.bf16.vlgmr.msrb.gmra.mxu1 %v569_v45  ;;  %v1575_v43 = vunpack.c.h.b16 %v198_v36  ;;  %v584_v17 = vld [vmem:[#allocation1] sm:$0xff] }
 0x3de   :  { %5753 = vmatpush.bf16.xpose.msrb.mxu0 %v1954_v19  ;;  %5766 = vmatpush.bf16.xpose.msrb.mxu1 %v1955_v21  ;;  %v586_v19 = vld [vmem:[#allocation1 + $0x12] sm:$0xff]  ;;  %v588_v21 = vld [vmem:[#allocation1 + $0x24] sm:$0xff] }
 0x3df   :  { %v1959_v52 = vpack.c.b16 %v1575_v43, %v1575_v43 }
 0x3e0   :  { %5676 = vmatmul.bf16.vlgmr.msrb.gmra.mxu2 %v570_v48  ;;  %5689 = vmatmul.bf16.vlgmr.msrb.gmra.mxu3 %v571_v49  ;;  %v1960_v49 = vpack.c.b16 %v1576_v40, %v1576_v40 }
 0x3e1   :  { %5779 = vmatpush.bf16.xpose.msrb.mxu2 %v1956_v18  ;;  %5792 = vmatpush.bf16.xpose.msrb.mxu3 %v1957_v20  ;;  %v585_v18 = vld [vmem:[#allocation1 + $0x9] sm:$0xff]  ;;  %v587_v20 = vld [vmem:[#allocation1 + $0x1b] sm:$0xff] }
 0x3e2   :  { %v5237_v26 = vpop.f32.mrf.mxu0  ;;  %v5250_v27 = vpop.f32.mrf.mxu1 }
 0x3e3   :  { %v5261_v23 = vpop.f32.mrf.mxu2  ;;  %v5274_v24 = vpop.f32.mrf.mxu3  ;;  %v590_v26 = vld [vmem:[#allocation1 + $0x36] sm:$0xff]  ;;  %v591_v27 = vld [vmem:[#allocation1 + $0x3f] sm:$0xff] }
 0x3e4   :  { %v5262_v25 = vadd.f32 %v5261_v23, %v5249_v22  ;;  %v589_v23 = vld [vmem:[#allocation1 + $0x2d] sm:$0xff] }
 0x3e6   :  { %v5275_v33 = vadd.f32 %v5274_v24, %v5262_v25  ;;  %v203_v24 = vld [vmem:[%s8267_s1 + $0x428] sm:$0xff]  ;;  %v202_v25 = vld [vmem:[%s8267_s1 + $0x420] sm:$0xff] }
 0x3ea   :  { %v5287_v46 = vpop.f32.mrf.mxu0  ;;  %v5300_v47 = vpop.f32.mrf.mxu1 }
 0x3eb   :  { %v5263_v44 = vpop.f32.mrf.mxu2  ;;  %v5276_v45 = vpop.f32.mrf.mxu3  ;;  %v5288_v48 = vadd.f32 %v5287_v46, %v5275_v33 }
 0x3ed   :  { %v5301_v53 = vadd.f32 %v5300_v47, %v5288_v48  ;;  %5702 = vmatmul.bf16.vlgmr.msra.gmra.mxu0 %v574_v28  ;;  %5715 = vmatmul.bf16.vlgmr.msra.gmra.mxu1 %v575_v29  ;;  %v55_v28 = vld [vmem:[%s8268_s0 + $0x108] sm:$0xff]  ;;  %v1584_v29 = vunpack.c.l.b16 %v203_v24 }
 0x3ee   :  { %5805 = vmatpush.bf16.xpose.msra.mxu0 %v1958_v50  ;;  %5818 = vmatpush.bf16.xpose.msra.mxu1 %v1959_v52  ;;  %593 = vst [vmem:[#allocation1] ss:$9 sm:$0xff] %v55_v28  ;;  %v204_v50 = vld [vmem:[%s8267_s1 + $0x430] sm:$0xff] }
 0x3ef   :  { %v1586_v52 = vunpack.c.l.b16 %v204_v50 }
 0x3f0   :  { %5728 = vmatmul.bf16.vlgmr.msra.gmra.mxu2 %v576_v30  ;;  %5741 = vmatmul.bf16.vlgmr.msra.gmra.mxu3 %v577_v31  ;;  %v1582_v30 = vunpack.c.l.b16 %v202_v25  ;;  %v1585_v31 = vunpack.c.h.b16 %v203_v24 }
 0x3f1   :  { %5831 = vmatpush.bf16.xpose.msra.mxu2 %v1960_v49  ;;  %5844 = vmatpush.bf16.xpose.msra.mxu3 %v1961_v51  ;;  %v205_v49 = vld [vmem:[%s8267_s1 + $0x438] sm:$0xff]  ;;  %v1970_v61 = vpack.c.b16 %v1586_v52, %v1586_v52 }
 0x3f2   :  { %v5289_v57 = vpop.f32.mrf.mxu0  ;;  %v5302_v58 = vpop.f32.mrf.mxu1  ;;  %v1966_v39 = vpack.c.b16 %v1582_v30, %v1582_v30  ;;  %v1969_v40 = vpack.c.b16 %v1585_v31, %v1585_v31  ;;  %v1588_v51 = vunpack.c.l.b16 %v205_v49 }
 0x3f3   :  { %v5313_v54 = vpop.f32.mrf.mxu2  ;;  %v5326_v55 = vpop.f32.mrf.mxu3 }
 0x3f4   :  { %v5314_v56 = vadd.f32 %v5313_v54, %v5301_v53  ;;  %v1589_v53 = vunpack.c.h.b16 %v205_v49  ;;  %v1587_v54 = vunpack.c.h.b16 %v204_v50  ;;  %v1972_v60 = vpack.c.b16 %v1588_v51, %v1588_v51 }
 0x3f6   :  { %v5327_v59 = vadd.f32 %v5326_v55, %v5314_v56  ;;  %v1973_v62 = vpack.c.b16 %v1589_v53, %v1589_v53  ;;  %v1971_v63 = vpack.c.b16 %v1587_v54, %v1587_v54 }
 0x3fa   :  { %v5339_v4 = vpop.f32.mrf.mxu0  ;;  %v5352_v5 = vpop.f32.mrf.mxu1 }
 0x3fb   :  { %v5315_v2 = vpop.f32.mrf.mxu2  ;;  %v5328_v3 = vpop.f32.mrf.mxu3  ;;  %v5340_v6 = vadd.f32 %v5339_v4, %v5327_v59 }
 0x3fd   :  { %v5353_v11 = vadd.f32 %v5352_v5, %v5340_v6  ;;  %5754 = vmatmul.bf16.vlgmr.msrb.gmra.mxu0 %v578_v32  ;;  %5767 = vmatmul.bf16.vlgmr.msrb.gmra.mxu1 %v579_v34  ;;  %v1583_v32 = vunpack.c.h.b16 %v202_v25  ;;  %v594_v6 = vld [vmem:[#allocation1] sm:$0xff] }
 0x3fe   :  { %5857 = vmatpush.bf16.xpose.msrb.mxu0 %v1962_v8  ;;  %5870 = vmatpush.bf16.xpose.msrb.mxu1 %v1963_v10  ;;  %v596_v8 = vld [vmem:[#allocation1 + $0x12] sm:$0xff]  ;;  %v598_v10 = vld [vmem:[#allocation1 + $0x24] sm:$0xff] }
 0x3ff   :  { %v1967_v41 = vpack.c.b16 %v1583_v32, %v1583_v32 }
 0x400   :  { %5780 = vmatmul.bf16.vlgmr.msrb.gmra.mxu2 %v580_v37  ;;  %5793 = vmatmul.bf16.vlgmr.msrb.gmra.mxu3 %v581_v38  ;;  %v1968_v38 = vpack.c.b16 %v1584_v29, %v1584_v29 }
 0x401   :  { %5883 = vmatpush.bf16.xpose.msrb.mxu2 %v1964_v7  ;;  %5896 = vmatpush.bf16.xpose.msrb.mxu3 %v1965_v9  ;;  %v595_v7 = vld [vmem:[#allocation1 + $0x9] sm:$0xff]  ;;  %v597_v9 = vld [vmem:[#allocation1 + $0x1b] sm:$0xff] }
 0x402   :  { %v5341_v15 = vpop.f32.mrf.mxu0  ;;  %v5354_v16 = vpop.f32.mrf.mxu1 }
 0x403   :  { %v5365_v12 = vpop.f32.mrf.mxu2  ;;  %v5378_v13 = vpop.f32.mrf.mxu3  ;;  %v600_v15 = vld [vmem:[#allocation1 + $0x36] sm:$0xff]  ;;  %v601_v16 = vld [vmem:[#allocation1 + $0x3f] sm:$0xff] }
 0x404   :  { %v5366_v14 = vadd.f32 %v5365_v12, %v5353_v11  ;;  %v599_v12 = vld [vmem:[#allocation1 + $0x2d] sm:$0xff] }
 0x406   :  { %v5379_v22 = vadd.f32 %v5378_v13, %v5366_v14  ;;  %v207_v13 = vld [vmem:[%s8267_s1 + $0x448] sm:$0xff]  ;;  %v206_v14 = vld [vmem:[%s8267_s1 + $0x440] sm:$0xff] }
 0x40a   :  { %v5391_v35 = vpop.f32.mrf.mxu0  ;;  %v5404_v36 = vpop.f32.mrf.mxu1 }
 0x40b   :  { %v5367_v33 = vpop.f32.mrf.mxu2  ;;  %v5380_v34 = vpop.f32.mrf.mxu3  ;;  %v5392_v37 = vadd.f32 %v5391_v35, %v5379_v22 }
 0x40d   :  { %v5405_v42 = vadd.f32 %v5404_v36, %v5392_v37  ;;  %5806 = vmatmul.bf16.vlgmr.msra.gmra.mxu0 %v584_v17  ;;  %5819 = vmatmul.bf16.vlgmr.msra.gmra.mxu1 %v585_v18  ;;  %v56_v17 = vld [vmem:[%s8268_s0 + $0x110] sm:$0xff]  ;;  %v1592_v18 = vunpack.c.l.b16 %v207_v13 }
 0x40e   :  { %5909 = vmatpush.bf16.xpose.msra.mxu0 %v1966_v39  ;;  %5922 = vmatpush.bf16.xpose.msra.mxu1 %v1967_v41  ;;  %603 = vst [vmem:[#allocation1] ss:$9 sm:$0xff] %v56_v17  ;;  %v208_v39 = vld [vmem:[%s8267_s1 + $0x450] sm:$0xff] }
 0x40f   :  { %v1594_v41 = vunpack.c.l.b16 %v208_v39 }
 0x410   :  { %5832 = vmatmul.bf16.vlgmr.msra.gmra.mxu2 %v586_v19  ;;  %5845 = vmatmul.bf16.vlgmr.msra.gmra.mxu3 %v587_v20  ;;  %v1590_v19 = vunpack.c.l.b16 %v206_v14  ;;  %v1593_v20 = vunpack.c.h.b16 %v207_v13 }
 0x411   :  { %5935 = vmatpush.bf16.xpose.msra.mxu2 %v1968_v38  ;;  %5948 = vmatpush.bf16.xpose.msra.mxu3 %v1969_v40  ;;  %v209_v38 = vld [vmem:[%s8267_s1 + $0x458] sm:$0xff]  ;;  %v1978_v50 = vpack.c.b16 %v1594_v41, %v1594_v41 }
 0x412   :  { %v5393_v46 = vpop.f32.mrf.mxu0  ;;  %v5406_v47 = vpop.f32.mrf.mxu1  ;;  %v1974_v28 = vpack.c.b16 %v1590_v19, %v1590_v19  ;;  %v1977_v29 = vpack.c.b16 %v1593_v20, %v1593_v20  ;;  %v1596_v40 = vunpack.c.l.b16 %v209_v38 }
 0x413   :  { %v5417_v43 = vpop.f32.mrf.mxu2  ;;  %v5430_v44 = vpop.f32.mrf.mxu3 }
 0x414   :  { %v5418_v45 = vadd.f32 %v5417_v43, %v5405_v42  ;;  %v1597_v42 = vunpack.c.h.b16 %v209_v38  ;;  %v1595_v43 = vunpack.c.h.b16 %v208_v39  ;;  %v1980_v49 = vpack.c.b16 %v1596_v40, %v1596_v40 }
 0x416   :  { %v5431_v48 = vadd.f32 %v5430_v44, %v5418_v45  ;;  %v1981_v51 = vpack.c.b16 %v1597_v42, %v1597_v42  ;;  %v1979_v52 = vpack.c.b16 %v1595_v43, %v1595_v43 }
 0x41a   :  { %v5443_v57 = vpop.f32.mrf.mxu0  ;;  %v5456_v58 = vpop.f32.mrf.mxu1 }
 0x41b   :  { %v5419_v55 = vpop.f32.mrf.mxu2  ;;  %v5432_v56 = vpop.f32.mrf.mxu3  ;;  %v5444_v59 = vadd.f32 %v5443_v57, %v5431_v48 }
 0x41d   :  { %v5457_v0 = vadd.f32 %v5456_v58, %v5444_v59  ;;  %5858 = vmatmul.bf16.vlgmr.msrb.gmra.mxu0 %v588_v21  ;;  %5871 = vmatmul.bf16.vlgmr.msrb.gmra.mxu1 %v589_v23  ;;  %v1591_v21 = vunpack.c.h.b16 %v206_v14  ;;  %v604_v59 = vld [vmem:[#allocation1] sm:$0xff] }
 0x41e   :  { %5961 = vmatpush.bf16.xpose.msrb.mxu0 %v1970_v61  ;;  %5974 = vmatpush.bf16.xpose.msrb.mxu1 %v1971_v63  ;;  %v606_v61 = vld [vmem:[#allocation1 + $0x12] sm:$0xff]  ;;  %v608_v63 = vld [vmem:[#allocation1 + $0x24] sm:$0xff] }
 0x41f   :  { %v1975_v30 = vpack.c.b16 %v1591_v21, %v1591_v21 }
 0x420   :  { %5884 = vmatmul.bf16.vlgmr.msrb.gmra.mxu2 %v590_v26  ;;  %5897 = vmatmul.bf16.vlgmr.msrb.gmra.mxu3 %v591_v27  ;;  %v1976_v27 = vpack.c.b16 %v1592_v18, %v1592_v18 }
 0x421   :  { %5987 = vmatpush.bf16.xpose.msrb.mxu2 %v1972_v60  ;;  %6000 = vmatpush.bf16.xpose.msrb.mxu3 %v1973_v62  ;;  %v605_v60 = vld [vmem:[#allocation1 + $0x9] sm:$0xff]  ;;  %v607_v62 = vld [vmem:[#allocation1 + $0x1b] sm:$0xff] }
 0x422   :  { %v5445_v4 = vpop.f32.mrf.mxu0  ;;  %v5458_v5 = vpop.f32.mrf.mxu1 }
 0x423   :  { %v5469_v1 = vpop.f32.mrf.mxu2  ;;  %v5482_v2 = vpop.f32.mrf.mxu3  ;;  %v610_v4 = vld [vmem:[#allocation1 + $0x36] sm:$0xff]  ;;  %v611_v5 = vld [vmem:[#allocation1 + $0x3f] sm:$0xff] }
 0x424   :  { %v5470_v3 = vadd.f32 %v5469_v1, %v5457_v0  ;;  %v609_v1 = vld [vmem:[#allocation1 + $0x2d] sm:$0xff] }
 0x426   :  { %v5483_v11 = vadd.f32 %v5482_v2, %v5470_v3  ;;  %v211_v2 = vld [vmem:[%s8267_s1 + $0x468] sm:$0xff]  ;;  %v210_v3 = vld [vmem:[%s8267_s1 + $0x460] sm:$0xff] }
 0x42a   :  { %v5495_v24 = vpop.f32.mrf.mxu0  ;;  %v5508_v25 = vpop.f32.mrf.mxu1 }
 0x42b   :  { %v5471_v22 = vpop.f32.mrf.mxu2  ;;  %v5484_v23 = vpop.f32.mrf.mxu3  ;;  %v5496_v26 = vadd.f32 %v5495_v24, %v5483_v11 }
 0x42d   :  { %v5509_v31 = vadd.f32 %v5508_v25, %v5496_v26  ;;  %5910 = vmatmul.bf16.vlgmr.msra.gmra.mxu0 %v594_v6  ;;  %5923 = vmatmul.bf16.vlgmr.msra.gmra.mxu1 %v595_v7  ;;  %v57_v6 = vld [vmem:[%s8268_s0 + $0x118] sm:$0xff]  ;;  %v1600_v7 = vunpack.c.l.b16 %v211_v2 }
 0x42e   :  { %6013 = vmatpush.bf16.xpose.msra.mxu0 %v1974_v28  ;;  %6026 = vmatpush.bf16.xpose.msra.mxu1 %v1975_v30  ;;  %613 = vst [vmem:[#allocation1] ss:$9 sm:$0xff] %v57_v6  ;;  %v212_v28 = vld [vmem:[%s8267_s1 + $0x470] sm:$0xff] }
 0x42f   :  { %v1602_v30 = vunpack.c.l.b16 %v212_v28 }
 0x430   :  { %5936 = vmatmul.bf16.vlgmr.msra.gmra.mxu2 %v596_v8  ;;  %5949 = vmatmul.bf16.vlgmr.msra.gmra.mxu3 %v597_v9  ;;  %v1598_v8 = vunpack.c.l.b16 %v210_v3  ;;  %v1601_v9 = vunpack.c.h.b16 %v211_v2 }
 0x431   :  { %6039 = vmatpush.bf16.xpose.msra.mxu2 %v1976_v27  ;;  %6052 = vmatpush.bf16.xpose.msra.mxu3 %v1977_v29  ;;  %v213_v27 = vld [vmem:[%s8267_s1 + $0x478] sm:$0xff]  ;;  %v1986_v39 = vpack.c.b16 %v1602_v30, %v1602_v30 }
 0x432   :  { %v5497_v35 = vpop.f32.mrf.mxu0  ;;  %v5510_v36 = vpop.f32.mrf.mxu1  ;;  %v1982_v17 = vpack.c.b16 %v1598_v8, %v1598_v8  ;;  %v1985_v18 = vpack.c.b16 %v1601_v9, %v1601_v9  ;;  %v1604_v29 = vunpack.c.l.b16 %v213_v27 }
 0x433   :  { %v5521_v32 = vpop.f32.mrf.mxu2  ;;  %v5534_v33 = vpop.f32.mrf.mxu3 }
 0x434   :  { %v5522_v34 = vadd.f32 %v5521_v32, %v5509_v31  ;;  %v1605_v31 = vunpack.c.h.b16 %v213_v27  ;;  %v1603_v32 = vunpack.c.h.b16 %v212_v28  ;;  %v1988_v38 = vpack.c.b16 %v1604_v29, %v1604_v29 }
 0x436   :  { %v5535_v37 = vadd.f32 %v5534_v33, %v5522_v34  ;;  %v1989_v40 = vpack.c.b16 %v1605_v31, %v1605_v31  ;;  %v1987_v41 = vpack.c.b16 %v1603_v32, %v1603_v32 }
 0x43a   :  { %v5547_v46 = vpop.f32.mrf.mxu0  ;;  %v5560_v47 = vpop.f32.mrf.mxu1 }
 0x43b   :  { %v5523_v44 = vpop.f32.mrf.mxu2  ;;  %v5536_v45 = vpop.f32.mrf.mxu3  ;;  %v5548_v48 = vadd.f32 %v5547_v46, %v5535_v37 }
 0x43d   :  { %v5561_v53 = vadd.f32 %v5560_v47, %v5548_v48  ;;  %5962 = vmatmul.bf16.vlgmr.msrb.gmra.mxu0 %v598_v10  ;;  %5975 = vmatmul.bf16.vlgmr.msrb.gmra.mxu1 %v599_v12  ;;  %v1599_v10 = vunpack.c.h.b16 %v210_v3  ;;  %v614_v48 = vld [vmem:[#allocation1] sm:$0xff] }
 0x43e   :  { %6065 = vmatpush.bf16.xpose.msrb.mxu0 %v1978_v50  ;;  %6078 = vmatpush.bf16.xpose.msrb.mxu1 %v1979_v52  ;;  %v616_v50 = vld [vmem:[#allocation1 + $0x12] sm:$0xff]  ;;  %v618_v52 = vld [vmem:[#allocation1 + $0x24] sm:$0xff] }
 0x43f   :  { %v1983_v19 = vpack.c.b16 %v1599_v10, %v1599_v10 }
 0x440   :  { %5988 = vmatmul.bf16.vlgmr.msrb.gmra.mxu2 %v600_v15  ;;  %6001 = vmatmul.bf16.vlgmr.msrb.gmra.mxu3 %v601_v16  ;;  %v1984_v16 = vpack.c.b16 %v1600_v7, %v1600_v7 }
 0x441   :  { %6091 = vmatpush.bf16.xpose.msrb.mxu2 %v1980_v49  ;;  %6104 = vmatpush.bf16.xpose.msrb.mxu3 %v1981_v51  ;;  %v615_v49 = vld [vmem:[#allocation1 + $0x9] sm:$0xff]  ;;  %v617_v51 = vld [vmem:[#allocation1 + $0x1b] sm:$0xff] }
 0x442   :  { %v5549_v57 = vpop.f32.mrf.mxu0  ;;  %v5562_v58 = vpop.f32.mrf.mxu1 }
 0x443   :  { %v5573_v54 = vpop.f32.mrf.mxu2  ;;  %v5586_v55 = vpop.f32.mrf.mxu3  ;;  %v620_v57 = vld [vmem:[#allocation1 + $0x36] sm:$0xff]  ;;  %v621_v58 = vld [vmem:[#allocation1 + $0x3f] sm:$0xff] }
 0x444   :  { %v5574_v56 = vadd.f32 %v5573_v54, %v5561_v53  ;;  %v619_v54 = vld [vmem:[#allocation1 + $0x2d] sm:$0xff] }
 0x446   :  { %v5587_v0 = vadd.f32 %v5586_v55, %v5574_v56  ;;  %v215_v55 = vld [vmem:[%s8267_s1 + $0x488] sm:$0xff]  ;;  %v214_v56 = vld [vmem:[%s8267_s1 + $0x480] sm:$0xff] }
 0x44a   :  { %v5599_v13 = vpop.f32.mrf.mxu0  ;;  %v5612_v14 = vpop.f32.mrf.mxu1 }
 0x44b   :  { %v5575_v11 = vpop.f32.mrf.mxu2  ;;  %v5588_v12 = vpop.f32.mrf.mxu3  ;;  %v5600_v15 = vadd.f32 %v5599_v13, %v5587_v0 }
 0x44d   :  { %v5613_v20 = vadd.f32 %v5612_v14, %v5600_v15  ;;  %6014 = vmatmul.bf16.vlgmr.msra.gmra.mxu0 %v604_v59  ;;  %6027 = vmatmul.bf16.vlgmr.msra.gmra.mxu1 %v605_v60  ;;  %v58_v59 = vld [vmem:[%s8268_s0 + $0x120] sm:$0xff]  ;;  %v1608_v60 = vunpack.c.l.b16 %v215_v55 }
 0x44e   :  { %6117 = vmatpush.bf16.xpose.msra.mxu0 %v1982_v17  ;;  %6130 = vmatpush.bf16.xpose.msra.mxu1 %v1983_v19  ;;  %623 = vst [vmem:[#allocation1] ss:$9 sm:$0xff] %v58_v59  ;;  %v216_v17 = vld [vmem:[%s8267_s1 + $0x490] sm:$0xff] }
 0x44f   :  { %v1610_v19 = vunpack.c.l.b16 %v216_v17 }
 0x450   :  { %6040 = vmatmul.bf16.vlgmr.msra.gmra.mxu2 %v606_v61  ;;  %6053 = vmatmul.bf16.vlgmr.msra.gmra.mxu3 %v607_v62  ;;  %v1606_v61 = vunpack.c.l.b16 %v214_v56  ;;  %v1609_v62 = vunpack.c.h.b16 %v215_v55 }
 0x451   :  { %6143 = vmatpush.bf16.xpose.msra.mxu2 %v1984_v16  ;;  %6156 = vmatpush.bf16.xpose.msra.mxu3 %v1985_v18  ;;  %v217_v16 = vld [vmem:[%s8267_s1 + $0x498] sm:$0xff]  ;;  %v1994_v28 = vpack.c.b16 %v1610_v19, %v1610_v19 }
 0x452   :  { %v5601_v24 = vpop.f32.mrf.mxu0  ;;  %v5614_v25 = vpop.f32.mrf.mxu1  ;;  %v1990_v6 = vpack.c.b16 %v1606_v61, %v1606_v61  ;;  %v1993_v7 = vpack.c.b16 %v1609_v62, %v1609_v62  ;;  %v1612_v18 = vunpack.c.l.b16 %v217_v16 }
 0x453   :  { %v5625_v21 = vpop.f32.mrf.mxu2  ;;  %v5638_v22 = vpop.f32.mrf.mxu3 }
 0x454   :  { %v5626_v23 = vadd.f32 %v5625_v21, %v5613_v20  ;;  %v1613_v20 = vunpack.c.h.b16 %v217_v16  ;;  %v1611_v21 = vunpack.c.h.b16 %v216_v17  ;;  %v1996_v27 = vpack.c.b16 %v1612_v18, %v1612_v18 }
 0x456   :  { %v5639_v26 = vadd.f32 %v5638_v22, %v5626_v23  ;;  %v1997_v29 = vpack.c.b16 %v1613_v20, %v1613_v20  ;;  %v1995_v30 = vpack.c.b16 %v1611_v21, %v1611_v21 }
 0x45a   :  { %v5651_v35 = vpop.f32.mrf.mxu0  ;;  %v5664_v36 = vpop.f32.mrf.mxu1 }
 0x45b   :  { %v5627_v33 = vpop.f32.mrf.mxu2  ;;  %v5640_v34 = vpop.f32.mrf.mxu3  ;;  %v5652_v37 = vadd.f32 %v5651_v35, %v5639_v26 }
 0x45d   :  { %v5665_v42 = vadd.f32 %v5664_v36, %v5652_v37  ;;  %6066 = vmatmul.bf16.vlgmr.msrb.gmra.mxu0 %v608_v63  ;;  %6079 = vmatmul.bf16.vlgmr.msrb.gmra.mxu1 %v609_v1  ;;  %v1607_v63 = vunpack.c.h.b16 %v214_v56  ;;  %v624_v37 = vld [vmem:[#allocation1] sm:$0xff] }
 0x45e   :  { %6169 = vmatpush.bf16.xpose.msrb.mxu0 %v1986_v39  ;;  %6182 = vmatpush.bf16.xpose.msrb.mxu1 %v1987_v41  ;;  %v626_v39 = vld [vmem:[#allocation1 + $0x12] sm:$0xff]  ;;  %v628_v41 = vld [vmem:[#allocation1 + $0x24] sm:$0xff] }
 0x45f   :  { %v1991_v8 = vpack.c.b16 %v1607_v63, %v1607_v63 }
 0x460   :  { %6092 = vmatmul.bf16.vlgmr.msrb.gmra.mxu2 %v610_v4  ;;  %6105 = vmatmul.bf16.vlgmr.msrb.gmra.mxu3 %v611_v5  ;;  %v1992_v5 = vpack.c.b16 %v1608_v60, %v1608_v60 }
 0x461   :  { %6195 = vmatpush.bf16.xpose.msrb.mxu2 %v1988_v38  ;;  %6208 = vmatpush.bf16.xpose.msrb.mxu3 %v1989_v40  ;;  %v625_v38 = vld [vmem:[#allocation1 + $0x9] sm:$0xff]  ;;  %v627_v40 = vld [vmem:[#allocation1 + $0x1b] sm:$0xff] }
 0x462   :  { %v5653_v46 = vpop.f32.mrf.mxu0  ;;  %v5666_v47 = vpop.f32.mrf.mxu1 }
 0x463   :  { %v5677_v43 = vpop.f32.mrf.mxu2  ;;  %v5690_v44 = vpop.f32.mrf.mxu3  ;;  %v630_v46 = vld [vmem:[#allocation1 + $0x36] sm:$0xff]  ;;  %v631_v47 = vld [vmem:[#allocation1 + $0x3f] sm:$0xff] }
 0x464   :  { %v5678_v45 = vadd.f32 %v5677_v43, %v5665_v42  ;;  %v629_v43 = vld [vmem:[#allocation1 + $0x2d] sm:$0xff] }
 0x466   :  { %v5691_v53 = vadd.f32 %v5690_v44, %v5678_v45  ;;  %v219_v44 = vld [vmem:[%s8267_s1 + $0x4a8] sm:$0xff]  ;;  %v218_v45 = vld [vmem:[%s8267_s1 + $0x4a0] sm:$0xff] }
 0x46a   :  { %v5703_v2 = vpop.f32.mrf.mxu0  ;;  %v5716_v3 = vpop.f32.mrf.mxu1 }
 0x46b   :  { %v5679_v0 = vpop.f32.mrf.mxu2  ;;  %v5692_v1 = vpop.f32.mrf.mxu3  ;;  %v5704_v4 = vadd.f32 %v5703_v2, %v5691_v53 }
 0x46d   :  { %v5717_v9 = vadd.f32 %v5716_v3, %v5704_v4  ;;  %6118 = vmatmul.bf16.vlgmr.msra.gmra.mxu0 %v614_v48  ;;  %6131 = vmatmul.bf16.vlgmr.msra.gmra.mxu1 %v615_v49  ;;  %v59_v48 = vld [vmem:[%s8268_s0 + $0x128] sm:$0xff]  ;;  %v1616_v49 = vunpack.c.l.b16 %v219_v44 }
 0x46e   :  { %6221 = vmatpush.bf16.xpose.msra.mxu0 %v1990_v6  ;;  %6234 = vmatpush.bf16.xpose.msra.mxu1 %v1991_v8  ;;  %633 = vst [vmem:[#allocation1] ss:$9 sm:$0xff] %v59_v48  ;;  %v220_v6 = vld [vmem:[%s8267_s1 + $0x4b0] sm:$0xff] }
 0x46f   :  { %v1618_v8 = vunpack.c.l.b16 %v220_v6 }
 0x470   :  { %6144 = vmatmul.bf16.vlgmr.msra.gmra.mxu2 %v616_v50  ;;  %6157 = vmatmul.bf16.vlgmr.msra.gmra.mxu3 %v617_v51  ;;  %v1614_v50 = vunpack.c.l.b16 %v218_v45  ;;  %v1617_v51 = vunpack.c.h.b16 %v219_v44 }
 0x471   :  { %6247 = vmatpush.bf16.xpose.msra.mxu2 %v1992_v5  ;;  %6260 = vmatpush.bf16.xpose.msra.mxu3 %v1993_v7  ;;  %v221_v5 = vld [vmem:[%s8267_s1 + $0x4b8] sm:$0xff]  ;;  %v2002_v17 = vpack.c.b16 %v1618_v8, %v1618_v8 }
 0x472   :  { %v5705_v13 = vpop.f32.mrf.mxu0  ;;  %v5718_v14 = vpop.f32.mrf.mxu1  ;;  %v1998_v59 = vpack.c.b16 %v1614_v50, %v1614_v50  ;;  %v2001_v60 = vpack.c.b16 %v1617_v51, %v1617_v51  ;;  %v1620_v7 = vunpack.c.l.b16 %v221_v5 }
 0x473   :  { %v5729_v10 = vpop.f32.mrf.mxu2  ;;  %v5742_v11 = vpop.f32.mrf.mxu3 }
 0x474   :  { %v5730_v12 = vadd.f32 %v5729_v10, %v5717_v9  ;;  %v1621_v9 = vunpack.c.h.b16 %v221_v5  ;;  %v1619_v10 = vunpack.c.h.b16 %v220_v6  ;;  %v2004_v16 = vpack.c.b16 %v1620_v7, %v1620_v7 }
 0x476   :  { %v5743_v15 = vadd.f32 %v5742_v11, %v5730_v12  ;;  %v2005_v18 = vpack.c.b16 %v1621_v9, %v1621_v9  ;;  %v2003_v19 = vpack.c.b16 %v1619_v10, %v1619_v10 }
 0x47a   :  { %v5755_v24 = vpop.f32.mrf.mxu0  ;;  %v5768_v25 = vpop.f32.mrf.mxu1 }
 0x47b   :  { %v5731_v22 = vpop.f32.mrf.mxu2  ;;  %v5744_v23 = vpop.f32.mrf.mxu3  ;;  %v5756_v26 = vadd.f32 %v5755_v24, %v5743_v15 }
 0x47d   :  { %v5769_v31 = vadd.f32 %v5768_v25, %v5756_v26  ;;  %6170 = vmatmul.bf16.vlgmr.msrb.gmra.mxu0 %v618_v52  ;;  %6183 = vmatmul.bf16.vlgmr.msrb.gmra.mxu1 %v619_v54  ;;  %v1615_v52 = vunpack.c.h.b16 %v218_v45  ;;  %v634_v26 = vld [vmem:[#allocation1] sm:$0xff] }
 0x47e   :  { %6273 = vmatpush.bf16.xpose.msrb.mxu0 %v1994_v28  ;;  %6286 = vmatpush.bf16.xpose.msrb.mxu1 %v1995_v30  ;;  %v636_v28 = vld [vmem:[#allocation1 + $0x12] sm:$0xff]  ;;  %v638_v30 = vld [vmem:[#allocation1 + $0x24] sm:$0xff] }
 0x47f   :  { %v1999_v61 = vpack.c.b16 %v1615_v52, %v1615_v52 }
 0x480   :  { %6196 = vmatmul.bf16.vlgmr.msrb.gmra.mxu2 %v620_v57  ;;  %6209 = vmatmul.bf16.vlgmr.msrb.gmra.mxu3 %v621_v58  ;;  %v2000_v58 = vpack.c.b16 %v1616_v49, %v1616_v49 }
 0x481   :  { %6299 = vmatpush.bf16.xpose.msrb.mxu2 %v1996_v27  ;;  %6312 = vmatpush.bf16.xpose.msrb.mxu3 %v1997_v29  ;;  %v635_v27 = vld [vmem:[#allocation1 + $0x9] sm:$0xff]  ;;  %v637_v29 = vld [vmem:[#allocation1 + $0x1b] sm:$0xff] }
 0x482   :  { %v5757_v35 = vpop.f32.mrf.mxu0  ;;  %v5770_v36 = vpop.f32.mrf.mxu1 }
 0x483   :  { %v5781_v32 = vpop.f32.mrf.mxu2  ;;  %v5794_v33 = vpop.f32.mrf.mxu3  ;;  %v640_v35 = vld [vmem:[#allocation1 + $0x36] sm:$0xff]  ;;  %v641_v36 = vld [vmem:[#allocation1 + $0x3f] sm:$0xff] }
 0x484   :  { %v5782_v34 = vadd.f32 %v5781_v32, %v5769_v31  ;;  %v639_v32 = vld [vmem:[#allocation1 + $0x2d] sm:$0xff] }
 0x486   :  { %v5795_v42 = vadd.f32 %v5794_v33, %v5782_v34  ;;  %v223_v33 = vld [vmem:[%s8267_s1 + $0x4c8] sm:$0xff]  ;;  %v222_v34 = vld [vmem:[%s8267_s1 + $0x4c0] sm:$0xff] }
 0x48a   :  { %v5807_v55 = vpop.f32.mrf.mxu0  ;;  %v5820_v56 = vpop.f32.mrf.mxu1 }
 0x48b   :  { %v5783_v53 = vpop.f32.mrf.mxu2  ;;  %v5796_v54 = vpop.f32.mrf.mxu3  ;;  %v5808_v57 = vadd.f32 %v5807_v55, %v5795_v42 }
 0x48d   :  { %v5821_v62 = vadd.f32 %v5820_v56, %v5808_v57  ;;  %6222 = vmatmul.bf16.vlgmr.msra.gmra.mxu0 %v624_v37  ;;  %6235 = vmatmul.bf16.vlgmr.msra.gmra.mxu1 %v625_v38  ;;  %v60_v37 = vld [vmem:[%s8268_s0 + $0x130] sm:$0xff]  ;;  %v1624_v38 = vunpack.c.l.b16 %v223_v33 }
 0x48e   :  { %6325 = vmatpush.bf16.xpose.msra.mxu0 %v1998_v59  ;;  %6338 = vmatpush.bf16.xpose.msra.mxu1 %v1999_v61  ;;  %643 = vst [vmem:[#allocation1] ss:$9 sm:$0xff] %v60_v37  ;;  %v224_v59 = vld [vmem:[%s8267_s1 + $0x4d0] sm:$0xff] }
 0x48f   :  { %v1626_v61 = vunpack.c.l.b16 %v224_v59 }
 0x490   :  { %6248 = vmatmul.bf16.vlgmr.msra.gmra.mxu2 %v626_v39  ;;  %6261 = vmatmul.bf16.vlgmr.msra.gmra.mxu3 %v627_v40  ;;  %v1622_v39 = vunpack.c.l.b16 %v222_v34  ;;  %v1625_v40 = vunpack.c.h.b16 %v223_v33 }
 0x491   :  { %6351 = vmatpush.bf16.xpose.msra.mxu2 %v2000_v58  ;;  %6364 = vmatpush.bf16.xpose.msra.mxu3 %v2001_v60  ;;  %v225_v58 = vld [vmem:[%s8267_s1 + $0x4d8] sm:$0xff]  ;;  %v2010_v6 = vpack.c.b16 %v1626_v61, %v1626_v61 }
 0x492   :  { %v5809_v2 = vpop.f32.mrf.mxu0  ;;  %v5822_v3 = vpop.f32.mrf.mxu1  ;;  %v2006_v48 = vpack.c.b16 %v1622_v39, %v1622_v39  ;;  %v2009_v49 = vpack.c.b16 %v1625_v40, %v1625_v40  ;;  %v1628_v60 = vunpack.c.l.b16 %v225_v58 }
 0x493   :  { %v5833_v63 = vpop.f32.mrf.mxu2  ;;  %v5846_v0 = vpop.f32.mrf.mxu3 }
 0x494   :  { %v5834_v1 = vadd.f32 %v5833_v63, %v5821_v62  ;;  %v1629_v62 = vunpack.c.h.b16 %v225_v58  ;;  %v1627_v63 = vunpack.c.h.b16 %v224_v59  ;;  %v2012_v5 = vpack.c.b16 %v1628_v60, %v1628_v60 }
 0x496   :  { %v5847_v4 = vadd.f32 %v5846_v0, %v5834_v1  ;;  %v2013_v7 = vpack.c.b16 %v1629_v62, %v1629_v62  ;;  %v2011_v8 = vpack.c.b16 %v1627_v63, %v1627_v63 }
 0x49a   :  { %v5859_v13 = vpop.f32.mrf.mxu0  ;;  %v5872_v14 = vpop.f32.mrf.mxu1 }
 0x49b   :  { %v5835_v11 = vpop.f32.mrf.mxu2  ;;  %v5848_v12 = vpop.f32.mrf.mxu3  ;;  %v5860_v15 = vadd.f32 %v5859_v13, %v5847_v4 }
 0x49d   :  { %v5873_v20 = vadd.f32 %v5872_v14, %v5860_v15  ;;  %6274 = vmatmul.bf16.vlgmr.msrb.gmra.mxu0 %v628_v41  ;;  %6287 = vmatmul.bf16.vlgmr.msrb.gmra.mxu1 %v629_v43  ;;  %v1623_v41 = vunpack.c.h.b16 %v222_v34  ;;  %v644_v15 = vld [vmem:[#allocation1] sm:$0xff] }
 0x49e   :  { %6377 = vmatpush.bf16.xpose.msrb.mxu0 %v2002_v17  ;;  %6390 = vmatpush.bf16.xpose.msrb.mxu1 %v2003_v19  ;;  %v646_v17 = vld [vmem:[#allocation1 + $0x12] sm:$0xff]  ;;  %v648_v19 = vld [vmem:[#allocation1 + $0x24] sm:$0xff] }
 0x49f   :  { %v2007_v50 = vpack.c.b16 %v1623_v41, %v1623_v41 }
 0x4a0   :  { %6300 = vmatmul.bf16.vlgmr.msrb.gmra.mxu2 %v630_v46  ;;  %6313 = vmatmul.bf16.vlgmr.msrb.gmra.mxu3 %v631_v47  ;;  %v2008_v47 = vpack.c.b16 %v1624_v38, %v1624_v38 }
 0x4a1   :  { %6403 = vmatpush.bf16.xpose.msrb.mxu2 %v2004_v16  ;;  %6416 = vmatpush.bf16.xpose.msrb.mxu3 %v2005_v18  ;;  %v645_v16 = vld [vmem:[#allocation1 + $0x9] sm:$0xff]  ;;  %v647_v18 = vld [vmem:[#allocation1 + $0x1b] sm:$0xff] }
 0x4a2   :  { %v5861_v24 = vpop.f32.mrf.mxu0  ;;  %v5874_v25 = vpop.f32.mrf.mxu1 }
 0x4a3   :  { %v5885_v21 = vpop.f32.mrf.mxu2  ;;  %v5898_v22 = vpop.f32.mrf.mxu3  ;;  %v650_v24 = vld [vmem:[#allocation1 + $0x36] sm:$0xff]  ;;  %v651_v25 = vld [vmem:[#allocation1 + $0x3f] sm:$0xff] }
 0x4a4   :  { %v5886_v23 = vadd.f32 %v5885_v21, %v5873_v20  ;;  %v649_v21 = vld [vmem:[#allocation1 + $0x2d] sm:$0xff] }
 0x4a6   :  { %v5899_v31 = vadd.f32 %v5898_v22, %v5886_v23  ;;  %v227_v22 = vld [vmem:[%s8267_s1 + $0x4e8] sm:$0xff]  ;;  %v226_v23 = vld [vmem:[%s8267_s1 + $0x4e0] sm:$0xff] }
 0x4aa   :  { %v5911_v44 = vpop.f32.mrf.mxu0  ;;  %v5924_v45 = vpop.f32.mrf.mxu1 }
 0x4ab   :  { %v5887_v42 = vpop.f32.mrf.mxu2  ;;  %v5900_v43 = vpop.f32.mrf.mxu3  ;;  %v5912_v46 = vadd.f32 %v5911_v44, %v5899_v31 }
 0x4ad   :  { %v5925_v51 = vadd.f32 %v5924_v45, %v5912_v46  ;;  %6326 = vmatmul.bf16.vlgmr.msra.gmra.mxu0 %v634_v26  ;;  %6339 = vmatmul.bf16.vlgmr.msra.gmra.mxu1 %v635_v27  ;;  %v61_v26 = vld [vmem:[%s8268_s0 + $0x138] sm:$0xff]  ;;  %v1632_v27 = vunpack.c.l.b16 %v227_v22 }
 0x4ae   :  { %6429 = vmatpush.bf16.xpose.msra.mxu0 %v2006_v48  ;;  %6442 = vmatpush.bf16.xpose.msra.mxu1 %v2007_v50  ;;  %653 = vst [vmem:[#allocation1] ss:$9 sm:$0xff] %v61_v26  ;;  %v228_v48 = vld [vmem:[%s8267_s1 + $0x4f0] sm:$0xff] }
 0x4af   :  { %v1634_v50 = vunpack.c.l.b16 %v228_v48 }
 0x4b0   :  { %6352 = vmatmul.bf16.vlgmr.msra.gmra.mxu2 %v636_v28  ;;  %6365 = vmatmul.bf16.vlgmr.msra.gmra.mxu3 %v637_v29  ;;  %v1630_v28 = vunpack.c.l.b16 %v226_v23  ;;  %v1633_v29 = vunpack.c.h.b16 %v227_v22 }
 0x4b1   :  { %6455 = vmatpush.bf16.xpose.msra.mxu2 %v2008_v47  ;;  %6468 = vmatpush.bf16.xpose.msra.mxu3 %v2009_v49  ;;  %v229_v47 = vld [vmem:[%s8267_s1 + $0x4f8] sm:$0xff]  ;;  %v2018_v59 = vpack.c.b16 %v1634_v50, %v1634_v50 }
 0x4b2   :  { %v5913_v55 = vpop.f32.mrf.mxu0  ;;  %v5926_v56 = vpop.f32.mrf.mxu1  ;;  %v2014_v37 = vpack.c.b16 %v1630_v28, %v1630_v28  ;;  %v2017_v38 = vpack.c.b16 %v1633_v29, %v1633_v29  ;;  %v1636_v49 = vunpack.c.l.b16 %v229_v47 }
 0x4b3   :  { %v5937_v52 = vpop.f32.mrf.mxu2  ;;  %v5950_v53 = vpop.f32.mrf.mxu3 }
 0x4b4   :  { %v5938_v54 = vadd.f32 %v5937_v52, %v5925_v51  ;;  %v1637_v51 = vunpack.c.h.b16 %v229_v47  ;;  %v1635_v52 = vunpack.c.h.b16 %v228_v48  ;;  %v2020_v58 = vpack.c.b16 %v1636_v49, %v1636_v49 }
 0x4b6   :  { %v5951_v57 = vadd.f32 %v5950_v53, %v5938_v54  ;;  %v2021_v60 = vpack.c.b16 %v1637_v51, %v1637_v51  ;;  %v2019_v61 = vpack.c.b16 %v1635_v52, %v1635_v52 }
 0x4ba   :  { %v5963_v2 = vpop.f32.mrf.mxu0  ;;  %v5976_v3 = vpop.f32.mrf.mxu1 }
 0x4bb   :  { %v5939_v0 = vpop.f32.mrf.mxu2  ;;  %v5952_v1 = vpop.f32.mrf.mxu3  ;;  %v5964_v4 = vadd.f32 %v5963_v2, %v5951_v57 }
 0x4bd   :  { %v5977_v9 = vadd.f32 %v5976_v3, %v5964_v4  ;;  %6378 = vmatmul.bf16.vlgmr.msrb.gmra.mxu0 %v638_v30  ;;  %6391 = vmatmul.bf16.vlgmr.msrb.gmra.mxu1 %v639_v32  ;;  %v1631_v30 = vunpack.c.h.b16 %v226_v23  ;;  %v654_v4 = vld [vmem:[#allocation1] sm:$0xff] }
 0x4be   :  { %6481 = vmatpush.bf16.xpose.msrb.mxu0 %v2010_v6  ;;  %6494 = vmatpush.bf16.xpose.msrb.mxu1 %v2011_v8  ;;  %v656_v6 = vld [vmem:[#allocation1 + $0x12] sm:$0xff]  ;;  %v658_v8 = vld [vmem:[#allocation1 + $0x24] sm:$0xff] }
 0x4bf   :  { %v2015_v39 = vpack.c.b16 %v1631_v30, %v1631_v30 }
 0x4c0   :  { %6404 = vmatmul.bf16.vlgmr.msrb.gmra.mxu2 %v640_v35  ;;  %6417 = vmatmul.bf16.vlgmr.msrb.gmra.mxu3 %v641_v36  ;;  %v2016_v36 = vpack.c.b16 %v1632_v27, %v1632_v27 }
 0x4c1   :  { %6507 = vmatpush.bf16.xpose.msrb.mxu2 %v2012_v5  ;;  %6520 = vmatpush.bf16.xpose.msrb.mxu3 %v2013_v7  ;;  %v655_v5 = vld [vmem:[#allocation1 + $0x9] sm:$0xff]  ;;  %v657_v7 = vld [vmem:[#allocation1 + $0x1b] sm:$0xff] }
 0x4c2   :  { %v5965_v13 = vpop.f32.mrf.mxu0  ;;  %v5978_v14 = vpop.f32.mrf.mxu1 }
 0x4c3   :  { %v5989_v10 = vpop.f32.mrf.mxu2  ;;  %v6002_v11 = vpop.f32.mrf.mxu3  ;;  %v660_v13 = vld [vmem:[#allocation1 + $0x36] sm:$0xff]  ;;  %v661_v14 = vld [vmem:[#allocation1 + $0x3f] sm:$0xff] }
 0x4c4   :  { %v5990_v12 = vadd.f32 %v5989_v10, %v5977_v9  ;;  %v659_v10 = vld [vmem:[#allocation1 + $0x2d] sm:$0xff] }
 0x4c6   :  { %v6003_v20 = vadd.f32 %v6002_v11, %v5990_v12  ;;  %v231_v11 = vld [vmem:[%s8267_s1 + $0x508] sm:$0xff]  ;;  %v230_v12 = vld [vmem:[%s8267_s1 + $0x500] sm:$0xff] }
 0x4ca   :  { %v6015_v33 = vpop.f32.mrf.mxu0  ;;  %v6028_v34 = vpop.f32.mrf.mxu1 }
 0x4cb   :  { %v5991_v31 = vpop.f32.mrf.mxu2  ;;  %v6004_v32 = vpop.f32.mrf.mxu3  ;;  %v6016_v35 = vadd.f32 %v6015_v33, %v6003_v20 }
 0x4cd   :  { %v6029_v40 = vadd.f32 %v6028_v34, %v6016_v35  ;;  %6430 = vmatmul.bf16.vlgmr.msra.gmra.mxu0 %v644_v15  ;;  %6443 = vmatmul.bf16.vlgmr.msra.gmra.mxu1 %v645_v16  ;;  %v62_v15 = vld [vmem:[%s8268_s0 + $0x140] sm:$0xff]  ;;  %v1640_v16 = vunpack.c.l.b16 %v231_v11 }
 0x4ce   :  { %6533 = vmatpush.bf16.xpose.msra.mxu0 %v2014_v37  ;;  %6546 = vmatpush.bf16.xpose.msra.mxu1 %v2015_v39  ;;  %663 = vst [vmem:[#allocation1] ss:$9 sm:$0xff] %v62_v15  ;;  %v232_v37 = vld [vmem:[%s8267_s1 + $0x510] sm:$0xff] }
 0x4cf   :  { %v1642_v39 = vunpack.c.l.b16 %v232_v37 }
 0x4d0   :  { %6456 = vmatmul.bf16.vlgmr.msra.gmra.mxu2 %v646_v17  ;;  %6469 = vmatmul.bf16.vlgmr.msra.gmra.mxu3 %v647_v18  ;;  %v1638_v17 = vunpack.c.l.b16 %v230_v12  ;;  %v1641_v18 = vunpack.c.h.b16 %v231_v11 }
 0x4d1   :  { %6559 = vmatpush.bf16.xpose.msra.mxu2 %v2016_v36  ;;  %6572 = vmatpush.bf16.xpose.msra.mxu3 %v2017_v38  ;;  %v233_v36 = vld [vmem:[%s8267_s1 + $0x518] sm:$0xff]  ;;  %v2026_v48 = vpack.c.b16 %v1642_v39, %v1642_v39 }
 0x4d2   :  { %v6017_v44 = vpop.f32.mrf.mxu0  ;;  %v6030_v45 = vpop.f32.mrf.mxu1  ;;  %v2022_v26 = vpack.c.b16 %v1638_v17, %v1638_v17  ;;  %v2025_v27 = vpack.c.b16 %v1641_v18, %v1641_v18  ;;  %v1644_v38 = vunpack.c.l.b16 %v233_v36 }
 0x4d3   :  { %v6041_v41 = vpop.f32.mrf.mxu2  ;;  %v6054_v42 = vpop.f32.mrf.mxu3 }
 0x4d4   :  { %v6042_v43 = vadd.f32 %v6041_v41, %v6029_v40  ;;  %v1645_v40 = vunpack.c.h.b16 %v233_v36  ;;  %v1643_v41 = vunpack.c.h.b16 %v232_v37  ;;  %v2028_v47 = vpack.c.b16 %v1644_v38, %v1644_v38 }
 0x4d6   :  { %v6055_v46 = vadd.f32 %v6054_v42, %v6042_v43  ;;  %v2029_v49 = vpack.c.b16 %v1645_v40, %v1645_v40  ;;  %v2027_v50 = vpack.c.b16 %v1643_v41, %v1643_v41 }
 0x4da   :  { %v6067_v55 = vpop.f32.mrf.mxu0  ;;  %v6080_v56 = vpop.f32.mrf.mxu1 }
 0x4db   :  { %v6043_v53 = vpop.f32.mrf.mxu2  ;;  %v6056_v54 = vpop.f32.mrf.mxu3  ;;  %v6068_v57 = vadd.f32 %v6067_v55, %v6055_v46 }
 0x4dd   :  { %v6081_v62 = vadd.f32 %v6080_v56, %v6068_v57  ;;  %6482 = vmatmul.bf16.vlgmr.msrb.gmra.mxu0 %v648_v19  ;;  %6495 = vmatmul.bf16.vlgmr.msrb.gmra.mxu1 %v649_v21  ;;  %v1639_v19 = vunpack.c.h.b16 %v230_v12  ;;  %v664_v57 = vld [vmem:[#allocation1] sm:$0xff] }
 0x4de   :  { %6585 = vmatpush.bf16.xpose.msrb.mxu0 %v2018_v59  ;;  %6598 = vmatpush.bf16.xpose.msrb.mxu1 %v2019_v61  ;;  %v666_v59 = vld [vmem:[#allocation1 + $0x12] sm:$0xff]  ;;  %v668_v61 = vld [vmem:[#allocation1 + $0x24] sm:$0xff] }
 0x4df   :  { %v2023_v28 = vpack.c.b16 %v1639_v19, %v1639_v19 }
 0x4e0   :  { %6508 = vmatmul.bf16.vlgmr.msrb.gmra.mxu2 %v650_v24  ;;  %6521 = vmatmul.bf16.vlgmr.msrb.gmra.mxu3 %v651_v25  ;;  %v2024_v25 = vpack.c.b16 %v1640_v16, %v1640_v16 }
 0x4e1   :  { %6611 = vmatpush.bf16.xpose.msrb.mxu2 %v2020_v58  ;;  %6624 = vmatpush.bf16.xpose.msrb.mxu3 %v2021_v60  ;;  %v665_v58 = vld [vmem:[#allocation1 + $0x9] sm:$0xff]  ;;  %v667_v60 = vld [vmem:[#allocation1 + $0x1b] sm:$0xff] }
 0x4e2   :  { %v6069_v2 = vpop.f32.mrf.mxu0  ;;  %v6082_v3 = vpop.f32.mrf.mxu1 }
 0x4e3   :  { %v6093_v63 = vpop.f32.mrf.mxu2  ;;  %v6106_v0 = vpop.f32.mrf.mxu3  ;;  %v670_v2 = vld [vmem:[#allocation1 + $0x36] sm:$0xff]  ;;  %v671_v3 = vld [vmem:[#allocation1 + $0x3f] sm:$0xff] }
 0x4e4   :  { %v6094_v1 = vadd.f32 %v6093_v63, %v6081_v62  ;;  %v669_v63 = vld [vmem:[#allocation1 + $0x2d] sm:$0xff] }
 0x4e6   :  { %v6107_v9 = vadd.f32 %v6106_v0, %v6094_v1  ;;  %v235_v0 = vld [vmem:[%s8267_s1 + $0x528] sm:$0xff]  ;;  %v234_v1 = vld [vmem:[%s8267_s1 + $0x520] sm:$0xff] }
 0x4ea   :  { %v6119_v22 = vpop.f32.mrf.mxu0  ;;  %v6132_v23 = vpop.f32.mrf.mxu1 }
 0x4eb   :  { %v6095_v20 = vpop.f32.mrf.mxu2  ;;  %v6108_v21 = vpop.f32.mrf.mxu3  ;;  %v6120_v24 = vadd.f32 %v6119_v22, %v6107_v9 }
 0x4ed   :  { %v6133_v29 = vadd.f32 %v6132_v23, %v6120_v24  ;;  %6534 = vmatmul.bf16.vlgmr.msra.gmra.mxu0 %v654_v4  ;;  %6547 = vmatmul.bf16.vlgmr.msra.gmra.mxu1 %v655_v5  ;;  %v63_v4 = vld [vmem:[%s8268_s0 + $0x148] sm:$0xff]  ;;  %v1648_v5 = vunpack.c.l.b16 %v235_v0 }
 0x4ee   :  { %6637 = vmatpush.bf16.xpose.msra.mxu0 %v2022_v26  ;;  %6650 = vmatpush.bf16.xpose.msra.mxu1 %v2023_v28  ;;  %673 = vst [vmem:[#allocation1] ss:$9 sm:$0xff] %v63_v4  ;;  %v236_v26 = vld [vmem:[%s8267_s1 + $0x530] sm:$0xff] }
 0x4ef   :  { %v1650_v28 = vunpack.c.l.b16 %v236_v26 }
 0x4f0   :  { %6560 = vmatmul.bf16.vlgmr.msra.gmra.mxu2 %v656_v6  ;;  %6573 = vmatmul.bf16.vlgmr.msra.gmra.mxu3 %v657_v7  ;;  %v1646_v6 = vunpack.c.l.b16 %v234_v1  ;;  %v1649_v7 = vunpack.c.h.b16 %v235_v0 }
 0x4f1   :  { %6663 = vmatpush.bf16.xpose.msra.mxu2 %v2024_v25  ;;  %6676 = vmatpush.bf16.xpose.msra.mxu3 %v2025_v27  ;;  %v237_v25 = vld [vmem:[%s8267_s1 + $0x538] sm:$0xff]  ;;  %v2034_v37 = vpack.c.b16 %v1650_v28, %v1650_v28 }
 0x4f2   :  { %v6121_v33 = vpop.f32.mrf.mxu0  ;;  %v6134_v34 = vpop.f32.mrf.mxu1  ;;  %v2030_v15 = vpack.c.b16 %v1646_v6, %v1646_v6  ;;  %v2033_v16 = vpack.c.b16 %v1649_v7, %v1649_v7  ;;  %v1652_v27 = vunpack.c.l.b16 %v237_v25 }
 0x4f3   :  { %v6145_v30 = vpop.f32.mrf.mxu2  ;;  %v6158_v31 = vpop.f32.mrf.mxu3 }
 0x4f4   :  { %v6146_v32 = vadd.f32 %v6145_v30, %v6133_v29  ;;  %v1653_v29 = vunpack.c.h.b16 %v237_v25  ;;  %v1651_v30 = vunpack.c.h.b16 %v236_v26  ;;  %v2036_v36 = vpack.c.b16 %v1652_v27, %v1652_v27 }
 0x4f6   :  { %v6159_v35 = vadd.f32 %v6158_v31, %v6146_v32  ;;  %v2037_v38 = vpack.c.b16 %v1653_v29, %v1653_v29  ;;  %v2035_v39 = vpack.c.b16 %v1651_v30, %v1651_v30 }
 0x4fa   :  { %v6171_v44 = vpop.f32.mrf.mxu0  ;;  %v6184_v45 = vpop.f32.mrf.mxu1 }
 0x4fb   :  { %v6147_v42 = vpop.f32.mrf.mxu2  ;;  %v6160_v43 = vpop.f32.mrf.mxu3  ;;  %v6172_v46 = vadd.f32 %v6171_v44, %v6159_v35 }
 0x4fd   :  { %v6185_v51 = vadd.f32 %v6184_v45, %v6172_v46  ;;  %6586 = vmatmul.bf16.vlgmr.msrb.gmra.mxu0 %v658_v8  ;;  %6599 = vmatmul.bf16.vlgmr.msrb.gmra.mxu1 %v659_v10  ;;  %v1647_v8 = vunpack.c.h.b16 %v234_v1  ;;  %v674_v46 = vld [vmem:[#allocation1] sm:$0xff] }
 0x4fe   :  { %6689 = vmatpush.bf16.xpose.msrb.mxu0 %v2026_v48  ;;  %6702 = vmatpush.bf16.xpose.msrb.mxu1 %v2027_v50  ;;  %v676_v48 = vld [vmem:[#allocation1 + $0x12] sm:$0xff]  ;;  %v678_v50 = vld [vmem:[#allocation1 + $0x24] sm:$0xff] }
 0x4ff   :  { %v2031_v17 = vpack.c.b16 %v1647_v8, %v1647_v8 }
 0x500   :  { %6612 = vmatmul.bf16.vlgmr.msrb.gmra.mxu2 %v660_v13  ;;  %6625 = vmatmul.bf16.vlgmr.msrb.gmra.mxu3 %v661_v14  ;;  %v2032_v14 = vpack.c.b16 %v1648_v5, %v1648_v5 }
 0x501   :  { %6715 = vmatpush.bf16.xpose.msrb.mxu2 %v2028_v47  ;;  %6728 = vmatpush.bf16.xpose.msrb.mxu3 %v2029_v49  ;;  %v675_v47 = vld [vmem:[#allocation1 + $0x9] sm:$0xff]  ;;  %v677_v49 = vld [vmem:[#allocation1 + $0x1b] sm:$0xff] }
 0x502   :  { %v6173_v55 = vpop.f32.mrf.mxu0  ;;  %v6186_v56 = vpop.f32.mrf.mxu1 }
 0x503   :  { %v6197_v52 = vpop.f32.mrf.mxu2  ;;  %v6210_v53 = vpop.f32.mrf.mxu3  ;;  %v680_v55 = vld [vmem:[#allocation1 + $0x36] sm:$0xff]  ;;  %v681_v56 = vld [vmem:[#allocation1 + $0x3f] sm:$0xff] }
 0x504   :  { %v6198_v54 = vadd.f32 %v6197_v52, %v6185_v51  ;;  %v679_v52 = vld [vmem:[#allocation1 + $0x2d] sm:$0xff] }
 0x506   :  { %v6211_v62 = vadd.f32 %v6210_v53, %v6198_v54  ;;  %v239_v53 = vld [vmem:[%s8267_s1 + $0x548] sm:$0xff]  ;;  %v238_v54 = vld [vmem:[%s8267_s1 + $0x540] sm:$0xff] }
 0x50a   :  { %v6223_v11 = vpop.f32.mrf.mxu0  ;;  %v6236_v12 = vpop.f32.mrf.mxu1 }
 0x50b   :  { %v6199_v9 = vpop.f32.mrf.mxu2  ;;  %v6212_v10 = vpop.f32.mrf.mxu3  ;;  %v6224_v13 = vadd.f32 %v6223_v11, %v6211_v62 }
 0x50d   :  { %v6237_v18 = vadd.f32 %v6236_v12, %v6224_v13  ;;  %6638 = vmatmul.bf16.vlgmr.msra.gmra.mxu0 %v664_v57  ;;  %6651 = vmatmul.bf16.vlgmr.msra.gmra.mxu1 %v665_v58  ;;  %v64_v57 = vld [vmem:[%s8268_s0 + $0x150] sm:$0xff]  ;;  %v1656_v58 = vunpack.c.l.b16 %v239_v53 }
 0x50e   :  { %6741 = vmatpush.bf16.xpose.msra.mxu0 %v2030_v15  ;;  %6754 = vmatpush.bf16.xpose.msra.mxu1 %v2031_v17  ;;  %683 = vst [vmem:[#allocation1] ss:$9 sm:$0xff] %v64_v57  ;;  %v240_v15 = vld [vmem:[%s8267_s1 + $0x550] sm:$0xff] }
 0x50f   :  { %v1658_v17 = vunpack.c.l.b16 %v240_v15 }
 0x510   :  { %6664 = vmatmul.bf16.vlgmr.msra.gmra.mxu2 %v666_v59  ;;  %6677 = vmatmul.bf16.vlgmr.msra.gmra.mxu3 %v667_v60  ;;  %v1654_v59 = vunpack.c.l.b16 %v238_v54  ;;  %v1657_v60 = vunpack.c.h.b16 %v239_v53 }
 0x511   :  { %6767 = vmatpush.bf16.xpose.msra.mxu2 %v2032_v14  ;;  %6780 = vmatpush.bf16.xpose.msra.mxu3 %v2033_v16  ;;  %v241_v14 = vld [vmem:[%s8267_s1 + $0x558] sm:$0xff]  ;;  %v2042_v26 = vpack.c.b16 %v1658_v17, %v1658_v17 }
 0x512   :  { %v6225_v22 = vpop.f32.mrf.mxu0  ;;  %v6238_v23 = vpop.f32.mrf.mxu1  ;;  %v2038_v4 = vpack.c.b16 %v1654_v59, %v1654_v59  ;;  %v2041_v5 = vpack.c.b16 %v1657_v60, %v1657_v60  ;;  %v1660_v16 = vunpack.c.l.b16 %v241_v14 }
 0x513   :  { %v6249_v19 = vpop.f32.mrf.mxu2  ;;  %v6262_v20 = vpop.f32.mrf.mxu3 }
 0x514   :  { %v6250_v21 = vadd.f32 %v6249_v19, %v6237_v18  ;;  %v1661_v18 = vunpack.c.h.b16 %v241_v14  ;;  %v1659_v19 = vunpack.c.h.b16 %v240_v15  ;;  %v2044_v25 = vpack.c.b16 %v1660_v16, %v1660_v16 }
 0x516   :  { %v6263_v24 = vadd.f32 %v6262_v20, %v6250_v21  ;;  %v2045_v27 = vpack.c.b16 %v1661_v18, %v1661_v18  ;;  %v2043_v28 = vpack.c.b16 %v1659_v19, %v1659_v19 }
 0x51a   :  { %v6275_v33 = vpop.f32.mrf.mxu0  ;;  %v6288_v34 = vpop.f32.mrf.mxu1 }
 0x51b   :  { %v6251_v31 = vpop.f32.mrf.mxu2  ;;  %v6264_v32 = vpop.f32.mrf.mxu3  ;;  %v6276_v35 = vadd.f32 %v6275_v33, %v6263_v24 }
 0x51d   :  { %v6289_v40 = vadd.f32 %v6288_v34, %v6276_v35  ;;  %6690 = vmatmul.bf16.vlgmr.msrb.gmra.mxu0 %v668_v61  ;;  %6703 = vmatmul.bf16.vlgmr.msrb.gmra.mxu1 %v669_v63  ;;  %v1655_v61 = vunpack.c.h.b16 %v238_v54  ;;  %v684_v35 = vld [vmem:[#allocation1] sm:$0xff] }
 0x51e   :  { %6793 = vmatpush.bf16.xpose.msrb.mxu0 %v2034_v37  ;;  %6806 = vmatpush.bf16.xpose.msrb.mxu1 %v2035_v39  ;;  %v686_v37 = vld [vmem:[#allocation1 + $0x12] sm:$0xff]  ;;  %v688_v39 = vld [vmem:[#allocation1 + $0x24] sm:$0xff] }
 0x51f   :  { %v2039_v6 = vpack.c.b16 %v1655_v61, %v1655_v61 }
 0x520   :  { %6716 = vmatmul.bf16.vlgmr.msrb.gmra.mxu2 %v670_v2  ;;  %6729 = vmatmul.bf16.vlgmr.msrb.gmra.mxu3 %v671_v3  ;;  %v2040_v3 = vpack.c.b16 %v1656_v58, %v1656_v58 }
 0x521   :  { %6819 = vmatpush.bf16.xpose.msrb.mxu2 %v2036_v36  ;;  %6832 = vmatpush.bf16.xpose.msrb.mxu3 %v2037_v38  ;;  %v685_v36 = vld [vmem:[#allocation1 + $0x9] sm:$0xff]  ;;  %v687_v38 = vld [vmem:[#allocation1 + $0x1b] sm:$0xff] }
 0x522   :  { %v6277_v44 = vpop.f32.mrf.mxu0  ;;  %v6290_v45 = vpop.f32.mrf.mxu1 }
 0x523   :  { %v6301_v41 = vpop.f32.mrf.mxu2  ;;  %v6314_v42 = vpop.f32.mrf.mxu3  ;;  %v690_v44 = vld [vmem:[#allocation1 + $0x36] sm:$0xff]  ;;  %v691_v45 = vld [vmem:[#allocation1 + $0x3f] sm:$0xff] }
 0x524   :  { %v6302_v43 = vadd.f32 %v6301_v41, %v6289_v40  ;;  %v689_v41 = vld [vmem:[#allocation1 + $0x2d] sm:$0xff] }
 0x526   :  { %v6315_v51 = vadd.f32 %v6314_v42, %v6302_v43  ;;  %v243_v42 = vld [vmem:[%s8267_s1 + $0x568] sm:$0xff]  ;;  %v242_v43 = vld [vmem:[%s8267_s1 + $0x560] sm:$0xff] }
 0x52a   :  { %v6327_v0 = vpop.f32.mrf.mxu0  ;;  %v6340_v1 = vpop.f32.mrf.mxu1 }
 0x52b   :  { %v6303_v62 = vpop.f32.mrf.mxu2  ;;  %v6316_v63 = vpop.f32.mrf.mxu3  ;;  %v6328_v2 = vadd.f32 %v6327_v0, %v6315_v51 }
 0x52d   :  { %v6341_v7 = vadd.f32 %v6340_v1, %v6328_v2  ;;  %6742 = vmatmul.bf16.vlgmr.msra.gmra.mxu0 %v674_v46  ;;  %6755 = vmatmul.bf16.vlgmr.msra.gmra.mxu1 %v675_v47  ;;  %v65_v46 = vld [vmem:[%s8268_s0 + $0x158] sm:$0xff]  ;;  %v1664_v47 = vunpack.c.l.b16 %v243_v42 }
 0x52e   :  { %6845 = vmatpush.bf16.xpose.msra.mxu0 %v2038_v4  ;;  %6858 = vmatpush.bf16.xpose.msra.mxu1 %v2039_v6  ;;  %693 = vst [vmem:[#allocation1] ss:$9 sm:$0xff] %v65_v46  ;;  %v244_v4 = vld [vmem:[%s8267_s1 + $0x570] sm:$0xff] }
 0x52f   :  { %v1666_v6 = vunpack.c.l.b16 %v244_v4 }
 0x530   :  { %6768 = vmatmul.bf16.vlgmr.msra.gmra.mxu2 %v676_v48  ;;  %6781 = vmatmul.bf16.vlgmr.msra.gmra.mxu3 %v677_v49  ;;  %v1662_v48 = vunpack.c.l.b16 %v242_v43  ;;  %v1665_v49 = vunpack.c.h.b16 %v243_v42 }
 0x531   :  { %6871 = vmatpush.bf16.xpose.msra.mxu2 %v2040_v3  ;;  %6884 = vmatpush.bf16.xpose.msra.mxu3 %v2041_v5  ;;  %v245_v3 = vld [vmem:[%s8267_s1 + $0x578] sm:$0xff]  ;;  %v2050_v15 = vpack.c.b16 %v1666_v6, %v1666_v6 }
 0x532   :  { %v6329_v11 = vpop.f32.mrf.mxu0  ;;  %v6342_v12 = vpop.f32.mrf.mxu1  ;;  %v2046_v57 = vpack.c.b16 %v1662_v48, %v1662_v48  ;;  %v2049_v58 = vpack.c.b16 %v1665_v49, %v1665_v49  ;;  %v1668_v5 = vunpack.c.l.b16 %v245_v3 }
 0x533   :  { %v6353_v8 = vpop.f32.mrf.mxu2  ;;  %v6366_v9 = vpop.f32.mrf.mxu3 }
 0x534   :  { %v6354_v10 = vadd.f32 %v6353_v8, %v6341_v7  ;;  %v1669_v7 = vunpack.c.h.b16 %v245_v3  ;;  %v1667_v8 = vunpack.c.h.b16 %v244_v4  ;;  %v2052_v14 = vpack.c.b16 %v1668_v5, %v1668_v5 }
 0x536   :  { %v6367_v13 = vadd.f32 %v6366_v9, %v6354_v10  ;;  %v2053_v16 = vpack.c.b16 %v1669_v7, %v1669_v7  ;;  %v2051_v17 = vpack.c.b16 %v1667_v8, %v1667_v8 }
 0x53a   :  { %v6379_v22 = vpop.f32.mrf.mxu0  ;;  %v6392_v23 = vpop.f32.mrf.mxu1 }
 0x53b   :  { %v6355_v20 = vpop.f32.mrf.mxu2  ;;  %v6368_v21 = vpop.f32.mrf.mxu3  ;;  %v6380_v24 = vadd.f32 %v6379_v22, %v6367_v13 }
 0x53d   :  { %v6393_v29 = vadd.f32 %v6392_v23, %v6380_v24  ;;  %6794 = vmatmul.bf16.vlgmr.msrb.gmra.mxu0 %v678_v50  ;;  %6807 = vmatmul.bf16.vlgmr.msrb.gmra.mxu1 %v679_v52  ;;  %v1663_v50 = vunpack.c.h.b16 %v242_v43  ;;  %v694_v24 = vld [vmem:[#allocation1] sm:$0xff] }
 0x53e   :  { %6897 = vmatpush.bf16.xpose.msrb.mxu0 %v2042_v26  ;;  %6910 = vmatpush.bf16.xpose.msrb.mxu1 %v2043_v28  ;;  %v696_v26 = vld [vmem:[#allocation1 + $0x12] sm:$0xff]  ;;  %v698_v28 = vld [vmem:[#allocation1 + $0x24] sm:$0xff] }
 0x53f   :  { %v2047_v59 = vpack.c.b16 %v1663_v50, %v1663_v50 }
 0x540   :  { %6820 = vmatmul.bf16.vlgmr.msrb.gmra.mxu2 %v680_v55  ;;  %6833 = vmatmul.bf16.vlgmr.msrb.gmra.mxu3 %v681_v56  ;;  %v2048_v56 = vpack.c.b16 %v1664_v47, %v1664_v47 }
 0x541   :  { %6923 = vmatpush.bf16.xpose.msrb.mxu2 %v2044_v25  ;;  %6936 = vmatpush.bf16.xpose.msrb.mxu3 %v2045_v27  ;;  %v695_v25 = vld [vmem:[#allocation1 + $0x9] sm:$0xff]  ;;  %v697_v27 = vld [vmem:[#allocation1 + $0x1b] sm:$0xff] }
 0x542   :  { %v6381_v33 = vpop.f32.mrf.mxu0  ;;  %v6394_v34 = vpop.f32.mrf.mxu1 }
 0x543   :  { %v6405_v30 = vpop.f32.mrf.mxu2  ;;  %v6418_v31 = vpop.f32.mrf.mxu3  ;;  %v700_v33 = vld [vmem:[#allocation1 + $0x36] sm:$0xff]  ;;  %v701_v34 = vld [vmem:[#allocation1 + $0x3f] sm:$0xff] }
 0x544   :  { %v6406_v32 = vadd.f32 %v6405_v30, %v6393_v29  ;;  %v699_v30 = vld [vmem:[#allocation1 + $0x2d] sm:$0xff] }
 0x546   :  { %v6419_v40 = vadd.f32 %v6418_v31, %v6406_v32  ;;  %v247_v31 = vld [vmem:[%s8267_s1 + $0x588] sm:$0xff]  ;;  %v246_v32 = vld [vmem:[%s8267_s1 + $0x580] sm:$0xff] }
 0x54a   :  { %v6431_v53 = vpop.f32.mrf.mxu0  ;;  %v6444_v54 = vpop.f32.mrf.mxu1 }
 0x54b   :  { %v6407_v51 = vpop.f32.mrf.mxu2  ;;  %v6420_v52 = vpop.f32.mrf.mxu3  ;;  %v6432_v55 = vadd.f32 %v6431_v53, %v6419_v40 }
 0x54d   :  { %v6445_v60 = vadd.f32 %v6444_v54, %v6432_v55  ;;  %6846 = vmatmul.bf16.vlgmr.msra.gmra.mxu0 %v684_v35  ;;  %6859 = vmatmul.bf16.vlgmr.msra.gmra.mxu1 %v685_v36  ;;  %v66_v35 = vld [vmem:[%s8268_s0 + $0x160] sm:$0xff]  ;;  %v1672_v36 = vunpack.c.l.b16 %v247_v31 }
 0x54e   :  { %6949 = vmatpush.bf16.xpose.msra.mxu0 %v2046_v57  ;;  %6962 = vmatpush.bf16.xpose.msra.mxu1 %v2047_v59  ;;  %703 = vst [vmem:[#allocation1] ss:$9 sm:$0xff] %v66_v35  ;;  %v248_v57 = vld [vmem:[%s8267_s1 + $0x590] sm:$0xff] }
 0x54f   :  { %v1674_v59 = vunpack.c.l.b16 %v248_v57 }
 0x550   :  { %6872 = vmatmul.bf16.vlgmr.msra.gmra.mxu2 %v686_v37  ;;  %6885 = vmatmul.bf16.vlgmr.msra.gmra.mxu3 %v687_v38  ;;  %v1670_v37 = vunpack.c.l.b16 %v246_v32  ;;  %v1673_v38 = vunpack.c.h.b16 %v247_v31 }
 0x551   :  { %6975 = vmatpush.bf16.xpose.msra.mxu2 %v2048_v56  ;;  %6988 = vmatpush.bf16.xpose.msra.mxu3 %v2049_v58  ;;  %v249_v56 = vld [vmem:[%s8267_s1 + $0x598] sm:$0xff]  ;;  %v2058_v4 = vpack.c.b16 %v1674_v59, %v1674_v59 }
 0x552   :  { %v6433_v0 = vpop.f32.mrf.mxu0  ;;  %v6446_v1 = vpop.f32.mrf.mxu1  ;;  %v2054_v46 = vpack.c.b16 %v1670_v37, %v1670_v37  ;;  %v2057_v47 = vpack.c.b16 %v1673_v38, %v1673_v38  ;;  %v1676_v58 = vunpack.c.l.b16 %v249_v56 }
 0x553   :  { %v6457_v61 = vpop.f32.mrf.mxu2  ;;  %v6470_v62 = vpop.f32.mrf.mxu3 }
 0x554   :  { %v6458_v63 = vadd.f32 %v6457_v61, %v6445_v60  ;;  %v1677_v60 = vunpack.c.h.b16 %v249_v56  ;;  %v1675_v61 = vunpack.c.h.b16 %v248_v57  ;;  %v2060_v3 = vpack.c.b16 %v1676_v58, %v1676_v58 }
 0x556   :  { %v6471_v2 = vadd.f32 %v6470_v62, %v6458_v63  ;;  %v2061_v5 = vpack.c.b16 %v1677_v60, %v1677_v60  ;;  %v2059_v6 = vpack.c.b16 %v1675_v61, %v1675_v61 }
 0x55a   :  { %v6483_v11 = vpop.f32.mrf.mxu0  ;;  %v6496_v12 = vpop.f32.mrf.mxu1 }
 0x55b   :  { %v6459_v9 = vpop.f32.mrf.mxu2  ;;  %v6472_v10 = vpop.f32.mrf.mxu3  ;;  %v6484_v13 = vadd.f32 %v6483_v11, %v6471_v2 }
 0x55d   :  { %v6497_v18 = vadd.f32 %v6496_v12, %v6484_v13  ;;  %6898 = vmatmul.bf16.vlgmr.msrb.gmra.mxu0 %v688_v39  ;;  %6911 = vmatmul.bf16.vlgmr.msrb.gmra.mxu1 %v689_v41  ;;  %v1671_v39 = vunpack.c.h.b16 %v246_v32  ;;  %v704_v13 = vld [vmem:[#allocation1] sm:$0xff] }
 0x55e   :  { %7001 = vmatpush.bf16.xpose.msrb.mxu0 %v2050_v15  ;;  %7014 = vmatpush.bf16.xpose.msrb.mxu1 %v2051_v17  ;;  %v706_v15 = vld [vmem:[#allocation1 + $0x12] sm:$0xff]  ;;  %v708_v17 = vld [vmem:[#allocation1 + $0x24] sm:$0xff] }
 0x55f   :  { %v2055_v48 = vpack.c.b16 %v1671_v39, %v1671_v39 }
 0x560   :  { %6924 = vmatmul.bf16.vlgmr.msrb.gmra.mxu2 %v690_v44  ;;  %6937 = vmatmul.bf16.vlgmr.msrb.gmra.mxu3 %v691_v45  ;;  %v2056_v45 = vpack.c.b16 %v1672_v36, %v1672_v36 }
 0x561   :  { %7027 = vmatpush.bf16.xpose.msrb.mxu2 %v2052_v14  ;;  %7040 = vmatpush.bf16.xpose.msrb.mxu3 %v2053_v16  ;;  %v705_v14 = vld [vmem:[#allocation1 + $0x9] sm:$0xff]  ;;  %v707_v16 = vld [vmem:[#allocation1 + $0x1b] sm:$0xff] }
 0x562   :  { %v6485_v22 = vpop.f32.mrf.mxu0  ;;  %v6498_v23 = vpop.f32.mrf.mxu1 }
 0x563   :  { %v6509_v19 = vpop.f32.mrf.mxu2  ;;  %v6522_v20 = vpop.f32.mrf.mxu3  ;;  %v710_v22 = vld [vmem:[#allocation1 + $0x36] sm:$0xff]  ;;  %v711_v23 = vld [vmem:[#allocation1 + $0x3f] sm:$0xff] }
 0x564   :  { %v6510_v21 = vadd.f32 %v6509_v19, %v6497_v18  ;;  %v709_v19 = vld [vmem:[#allocation1 + $0x2d] sm:$0xff] }
 0x566   :  { %v6523_v29 = vadd.f32 %v6522_v20, %v6510_v21  ;;  %v251_v20 = vld [vmem:[%s8267_s1 + $0x5a8] sm:$0xff]  ;;  %v250_v21 = vld [vmem:[%s8267_s1 + $0x5a0] sm:$0xff] }
 0x56a   :  { %v6535_v42 = vpop.f32.mrf.mxu0  ;;  %v6548_v43 = vpop.f32.mrf.mxu1 }
 0x56b   :  { %v6511_v40 = vpop.f32.mrf.mxu2  ;;  %v6524_v41 = vpop.f32.mrf.mxu3  ;;  %v6536_v44 = vadd.f32 %v6535_v42, %v6523_v29 }
 0x56d   :  { %v6549_v49 = vadd.f32 %v6548_v43, %v6536_v44  ;;  %6950 = vmatmul.bf16.vlgmr.msra.gmra.mxu0 %v694_v24  ;;  %6963 = vmatmul.bf16.vlgmr.msra.gmra.mxu1 %v695_v25  ;;  %v67_v24 = vld [vmem:[%s8268_s0 + $0x168] sm:$0xff]  ;;  %v1680_v25 = vunpack.c.l.b16 %v251_v20 }
 0x56e   :  { %7053 = vmatpush.bf16.xpose.msra.mxu0 %v2054_v46  ;;  %7066 = vmatpush.bf16.xpose.msra.mxu1 %v2055_v48  ;;  %713 = vst [vmem:[#allocation1] ss:$9 sm:$0xff] %v67_v24  ;;  %v252_v46 = vld [vmem:[%s8267_s1 + $0x5b0] sm:$0xff] }
 0x56f   :  { %v1682_v48 = vunpack.c.l.b16 %v252_v46 }
 0x570   :  { %6976 = vmatmul.bf16.vlgmr.msra.gmra.mxu2 %v696_v26  ;;  %6989 = vmatmul.bf16.vlgmr.msra.gmra.mxu3 %v697_v27  ;;  %v1678_v26 = vunpack.c.l.b16 %v250_v21  ;;  %v1681_v27 = vunpack.c.h.b16 %v251_v20 }
 0x571   :  { %7079 = vmatpush.bf16.xpose.msra.mxu2 %v2056_v45  ;;  %7092 = vmatpush.bf16.xpose.msra.mxu3 %v2057_v47  ;;  %v253_v45 = vld [vmem:[%s8267_s1 + $0x5b8] sm:$0xff]  ;;  %v2066_v57 = vpack.c.b16 %v1682_v48, %v1682_v48 }
 0x572   :  { %v6537_v53 = vpop.f32.mrf.mxu0  ;;  %v6550_v54 = vpop.f32.mrf.mxu1  ;;  %v2062_v35 = vpack.c.b16 %v1678_v26, %v1678_v26  ;;  %v2065_v36 = vpack.c.b16 %v1681_v27, %v1681_v27  ;;  %v1684_v47 = vunpack.c.l.b16 %v253_v45 }
 0x573   :  { %v6561_v50 = vpop.f32.mrf.mxu2  ;;  %v6574_v51 = vpop.f32.mrf.mxu3 }
 0x574   :  { %v6562_v52 = vadd.f32 %v6561_v50, %v6549_v49  ;;  %v1685_v49 = vunpack.c.h.b16 %v253_v45  ;;  %v1683_v50 = vunpack.c.h.b16 %v252_v46  ;;  %v2068_v56 = vpack.c.b16 %v1684_v47, %v1684_v47 }
 0x576   :  { %v6575_v55 = vadd.f32 %v6574_v51, %v6562_v52  ;;  %v2069_v58 = vpack.c.b16 %v1685_v49, %v1685_v49  ;;  %v2067_v59 = vpack.c.b16 %v1683_v50, %v1683_v50 }
 0x57a   :  { %v6587_v0 = vpop.f32.mrf.mxu0  ;;  %v6600_v1 = vpop.f32.mrf.mxu1 }
 0x57b   :  { %v6563_v62 = vpop.f32.mrf.mxu2  ;;  %v6576_v63 = vpop.f32.mrf.mxu3  ;;  %v6588_v2 = vadd.f32 %v6587_v0, %v6575_v55 }
 0x57d   :  { %v6601_v7 = vadd.f32 %v6600_v1, %v6588_v2  ;;  %7002 = vmatmul.bf16.vlgmr.msrb.gmra.mxu0 %v698_v28  ;;  %7015 = vmatmul.bf16.vlgmr.msrb.gmra.mxu1 %v699_v30  ;;  %v1679_v28 = vunpack.c.h.b16 %v250_v21  ;;  %v714_v2 = vld [vmem:[#allocation1] sm:$0xff] }
 0x57e   :  { %7105 = vmatpush.bf16.xpose.msrb.mxu0 %v2058_v4  ;;  %7118 = vmatpush.bf16.xpose.msrb.mxu1 %v2059_v6  ;;  %v716_v4 = vld [vmem:[#allocation1 + $0x12] sm:$0xff]  ;;  %v718_v6 = vld [vmem:[#allocation1 + $0x24] sm:$0xff] }
 0x57f   :  { %v2063_v37 = vpack.c.b16 %v1679_v28, %v1679_v28 }
 0x580   :  { %7028 = vmatmul.bf16.vlgmr.msrb.gmra.mxu2 %v700_v33  ;;  %7041 = vmatmul.bf16.vlgmr.msrb.gmra.mxu3 %v701_v34  ;;  %v2064_v34 = vpack.c.b16 %v1680_v25, %v1680_v25 }
 0x581   :  { %7131 = vmatpush.bf16.xpose.msrb.mxu2 %v2060_v3  ;;  %7144 = vmatpush.bf16.xpose.msrb.mxu3 %v2061_v5  ;;  %v715_v3 = vld [vmem:[#allocation1 + $0x9] sm:$0xff]  ;;  %v717_v5 = vld [vmem:[#allocation1 + $0x1b] sm:$0xff] }
 0x582   :  { %v6589_v11 = vpop.f32.mrf.mxu0  ;;  %v6602_v12 = vpop.f32.mrf.mxu1 }
 0x583   :  { %v6613_v8 = vpop.f32.mrf.mxu2  ;;  %v6626_v9 = vpop.f32.mrf.mxu3  ;;  %v720_v11 = vld [vmem:[#allocation1 + $0x36] sm:$0xff]  ;;  %v721_v12 = vld [vmem:[#allocation1 + $0x3f] sm:$0xff] }
 0x584   :  { %v6614_v10 = vadd.f32 %v6613_v8, %v6601_v7  ;;  %v719_v8 = vld [vmem:[#allocation1 + $0x2d] sm:$0xff] }
 0x586   :  { %v6627_v18 = vadd.f32 %v6626_v9, %v6614_v10  ;;  %v255_v9 = vld [vmem:[%s8267_s1 + $0x5c8] sm:$0xff]  ;;  %v254_v10 = vld [vmem:[%s8267_s1 + $0x5c0] sm:$0xff] }
 0x58a   :  { %v6639_v31 = vpop.f32.mrf.mxu0  ;;  %v6652_v32 = vpop.f32.mrf.mxu1 }
 0x58b   :  { %v6615_v29 = vpop.f32.mrf.mxu2  ;;  %v6628_v30 = vpop.f32.mrf.mxu3  ;;  %v6640_v33 = vadd.f32 %v6639_v31, %v6627_v18 }
 0x58d   :  { %v6653_v38 = vadd.f32 %v6652_v32, %v6640_v33  ;;  %7054 = vmatmul.bf16.vlgmr.msra.gmra.mxu0 %v704_v13  ;;  %7067 = vmatmul.bf16.vlgmr.msra.gmra.mxu1 %v705_v14  ;;  %v68_v13 = vld [vmem:[%s8268_s0 + $0x170] sm:$0xff]  ;;  %v1688_v14 = vunpack.c.l.b16 %v255_v9 }
 0x58e   :  { %7157 = vmatpush.bf16.xpose.msra.mxu0 %v2062_v35  ;;  %7170 = vmatpush.bf16.xpose.msra.mxu1 %v2063_v37  ;;  %723 = vst [vmem:[#allocation1] ss:$9 sm:$0xff] %v68_v13  ;;  %v256_v35 = vld [vmem:[%s8267_s1 + $0x5d0] sm:$0xff] }
 0x58f   :  { %v1690_v37 = vunpack.c.l.b16 %v256_v35 }
 0x590   :  { %7080 = vmatmul.bf16.vlgmr.msra.gmra.mxu2 %v706_v15  ;;  %7093 = vmatmul.bf16.vlgmr.msra.gmra.mxu3 %v707_v16  ;;  %v1686_v15 = vunpack.c.l.b16 %v254_v10  ;;  %v1689_v16 = vunpack.c.h.b16 %v255_v9 }
 0x591   :  { %7183 = vmatpush.bf16.xpose.msra.mxu2 %v2064_v34  ;;  %7196 = vmatpush.bf16.xpose.msra.mxu3 %v2065_v36  ;;  %v257_v34 = vld [vmem:[%s8267_s1 + $0x5d8] sm:$0xff]  ;;  %v2074_v46 = vpack.c.b16 %v1690_v37, %v1690_v37 }
 0x592   :  { %v6641_v42 = vpop.f32.mrf.mxu0  ;;  %v6654_v43 = vpop.f32.mrf.mxu1  ;;  %v2070_v24 = vpack.c.b16 %v1686_v15, %v1686_v15  ;;  %v2073_v25 = vpack.c.b16 %v1689_v16, %v1689_v16  ;;  %v1692_v36 = vunpack.c.l.b16 %v257_v34 }
 0x593   :  { %v6665_v39 = vpop.f32.mrf.mxu2  ;;  %v6678_v40 = vpop.f32.mrf.mxu3 }
 0x594   :  { %v6666_v41 = vadd.f32 %v6665_v39, %v6653_v38  ;;  %v1693_v38 = vunpack.c.h.b16 %v257_v34  ;;  %v1691_v39 = vunpack.c.h.b16 %v256_v35  ;;  %v2076_v45 = vpack.c.b16 %v1692_v36, %v1692_v36 }
 0x596   :  { %v6679_v44 = vadd.f32 %v6678_v40, %v6666_v41  ;;  %v2077_v47 = vpack.c.b16 %v1693_v38, %v1693_v38  ;;  %v2075_v48 = vpack.c.b16 %v1691_v39, %v1691_v39 }
 0x59a   :  { %v6691_v53 = vpop.f32.mrf.mxu0  ;;  %v6704_v54 = vpop.f32.mrf.mxu1 }
 0x59b   :  { %v6667_v51 = vpop.f32.mrf.mxu2  ;;  %v6680_v52 = vpop.f32.mrf.mxu3  ;;  %v6692_v55 = vadd.f32 %v6691_v53, %v6679_v44 }
 0x59d   :  { %v6705_v60 = vadd.f32 %v6704_v54, %v6692_v55  ;;  %7106 = vmatmul.bf16.vlgmr.msrb.gmra.mxu0 %v708_v17  ;;  %7119 = vmatmul.bf16.vlgmr.msrb.gmra.mxu1 %v709_v19  ;;  %v1687_v17 = vunpack.c.h.b16 %v254_v10  ;;  %v724_v55 = vld [vmem:[#allocation1] sm:$0xff] }
 0x59e   :  { %7209 = vmatpush.bf16.xpose.msrb.mxu0 %v2066_v57  ;;  %7222 = vmatpush.bf16.xpose.msrb.mxu1 %v2067_v59  ;;  %v726_v57 = vld [vmem:[#allocation1 + $0x12] sm:$0xff]  ;;  %v728_v59 = vld [vmem:[#allocation1 + $0x24] sm:$0xff] }
 0x59f   :  { %v2071_v26 = vpack.c.b16 %v1687_v17, %v1687_v17 }
 0x5a0   :  { %7132 = vmatmul.bf16.vlgmr.msrb.gmra.mxu2 %v710_v22  ;;  %7145 = vmatmul.bf16.vlgmr.msrb.gmra.mxu3 %v711_v23  ;;  %v2072_v23 = vpack.c.b16 %v1688_v14, %v1688_v14 }
 0x5a1   :  { %7235 = vmatpush.bf16.xpose.msrb.mxu2 %v2068_v56  ;;  %7248 = vmatpush.bf16.xpose.msrb.mxu3 %v2069_v58  ;;  %v725_v56 = vld [vmem:[#allocation1 + $0x9] sm:$0xff]  ;;  %v727_v58 = vld [vmem:[#allocation1 + $0x1b] sm:$0xff] }
 0x5a2   :  { %v6693_v0 = vpop.f32.mrf.mxu0  ;;  %v6706_v1 = vpop.f32.mrf.mxu1 }
 0x5a3   :  { %v6717_v61 = vpop.f32.mrf.mxu2  ;;  %v6730_v62 = vpop.f32.mrf.mxu3  ;;  %v730_v0 = vld [vmem:[#allocation1 + $0x36] sm:$0xff]  ;;  %v731_v1 = vld [vmem:[#allocation1 + $0x3f] sm:$0xff] }
 0x5a4   :  { %v6718_v63 = vadd.f32 %v6717_v61, %v6705_v60  ;;  %v729_v61 = vld [vmem:[#allocation1 + $0x2d] sm:$0xff] }
 0x5a6   :  { %v6731_v7 = vadd.f32 %v6730_v62, %v6718_v63  ;;  %v259_v62 = vld [vmem:[%s8267_s1 + $0x5e8] sm:$0xff]  ;;  %v258_v63 = vld [vmem:[%s8267_s1 + $0x5e0] sm:$0xff] }
 0x5aa   :  { %v6743_v20 = vpop.f32.mrf.mxu0  ;;  %v6756_v21 = vpop.f32.mrf.mxu1 }
 0x5ab   :  { %v6719_v18 = vpop.f32.mrf.mxu2  ;;  %v6732_v19 = vpop.f32.mrf.mxu3  ;;  %v6744_v22 = vadd.f32 %v6743_v20, %v6731_v7 }
 0x5ad   :  { %v6757_v27 = vadd.f32 %v6756_v21, %v6744_v22  ;;  %7158 = vmatmul.bf16.vlgmr.msra.gmra.mxu0 %v714_v2  ;;  %7171 = vmatmul.bf16.vlgmr.msra.gmra.mxu1 %v715_v3  ;;  %v69_v2 = vld [vmem:[%s8268_s0 + $0x178] sm:$0xff]  ;;  %v1696_v3 = vunpack.c.l.b16 %v259_v62 }
 0x5ae   :  { %7261 = vmatpush.bf16.xpose.msra.mxu0 %v2070_v24  ;;  %7274 = vmatpush.bf16.xpose.msra.mxu1 %v2071_v26  ;;  %733 = vst [vmem:[#allocation1] ss:$9 sm:$0xff] %v69_v2  ;;  %v260_v24 = vld [vmem:[%s8267_s1 + $0x5f0] sm:$0xff] }
 0x5af   :  { %v1698_v26 = vunpack.c.l.b16 %v260_v24 }
 0x5b0   :  { %7184 = vmatmul.bf16.vlgmr.msra.gmra.mxu2 %v716_v4  ;;  %7197 = vmatmul.bf16.vlgmr.msra.gmra.mxu3 %v717_v5  ;;  %v1694_v4 = vunpack.c.l.b16 %v258_v63  ;;  %v1697_v5 = vunpack.c.h.b16 %v259_v62 }
 0x5b1   :  { %7287 = vmatpush.bf16.xpose.msra.mxu2 %v2072_v23  ;;  %7300 = vmatpush.bf16.xpose.msra.mxu3 %v2073_v25  ;;  %v261_v23 = vld [vmem:[%s8267_s1 + $0x5f8] sm:$0xff]  ;;  %v2082_v35 = vpack.c.b16 %v1698_v26, %v1698_v26 }
 0x5b2   :  { %v6745_v31 = vpop.f32.mrf.mxu0  ;;  %v6758_v32 = vpop.f32.mrf.mxu1  ;;  %v2078_v13 = vpack.c.b16 %v1694_v4, %v1694_v4  ;;  %v2081_v14 = vpack.c.b16 %v1697_v5, %v1697_v5  ;;  %v1700_v25 = vunpack.c.l.b16 %v261_v23 }
 0x5b3   :  { %v6769_v28 = vpop.f32.mrf.mxu2  ;;  %v6782_v29 = vpop.f32.mrf.mxu3 }
 0x5b4   :  { %v6770_v30 = vadd.f32 %v6769_v28, %v6757_v27  ;;  %v1701_v27 = vunpack.c.h.b16 %v261_v23  ;;  %v1699_v28 = vunpack.c.h.b16 %v260_v24  ;;  %v2084_v34 = vpack.c.b16 %v1700_v25, %v1700_v25 }
 0x5b5   :  { %v739_v2 = vld [vmem:[#allocation1 + $0x2d] sm:$0xff]  ;;  %v740_v4 = vld [vmem:[#allocation1 + $0x36] sm:$0xff]  ;;  %v741_v5 = vld [vmem:[#allocation1 + $0x3f] sm:$0xff] }
 0x5b6   :  { %v6783_v33 = vadd.f32 %v6782_v29, %v6770_v30  ;;  %v2085_v36 = vpack.c.b16 %v1701_v27, %v1701_v27  ;;  %v2083_v37 = vpack.c.b16 %v1699_v28, %v1699_v28 }
 0x5ba   :  { %v6795_v42 = vpop.f32.mrf.mxu0  ;;  %v6808_v43 = vpop.f32.mrf.mxu1 }
 0x5bb   :  { %v6771_v40 = vpop.f32.mrf.mxu2  ;;  %v6784_v41 = vpop.f32.mrf.mxu3  ;;  %v6796_v44 = vadd.f32 %v6795_v42, %v6783_v33 }
 0x5bd   :  { %v6809_v49 = vadd.f32 %v6808_v43, %v6796_v44  ;;  %7210 = vmatmul.bf16.vlgmr.msrb.gmra.mxu0 %v718_v6  ;;  %7223 = vmatmul.bf16.vlgmr.msrb.gmra.mxu1 %v719_v8  ;;  %v1695_v6 = vunpack.c.h.b16 %v258_v63 }
 0x5be   :  { %7313 = vmatpush.bf16.xpose.msrb.mxu0 %v2074_v46  ;;  %7326 = vmatpush.bf16.xpose.msrb.mxu1 %v2075_v48 }
 0x5bf   :  { %v2079_v15 = vpack.c.b16 %v1695_v6, %v1695_v6 }
 0x5c0   :  { %7236 = vmatmul.bf16.vlgmr.msrb.gmra.mxu2 %v720_v11  ;;  %7249 = vmatmul.bf16.vlgmr.msrb.gmra.mxu3 %v721_v12  ;;  %v2080_v12 = vpack.c.b16 %v1696_v3, %v1696_v3 }
 0x5c1   :  { %7339 = vmatpush.bf16.xpose.msrb.mxu2 %v2076_v45  ;;  %7352 = vmatpush.bf16.xpose.msrb.mxu3 %v2077_v47 }
 0x5c2   :  { %v6797_v53 = vpop.f32.mrf.mxu0  ;;  %v6810_v54 = vpop.f32.mrf.mxu1 }
 0x5c3   :  { %v6821_v50 = vpop.f32.mrf.mxu2  ;;  %v6834_v51 = vpop.f32.mrf.mxu3  ;;  %v737_v53 = vld [vmem:[#allocation1 + $0x1b] sm:$0xff] }
 0x5c4   :  { %v6822_v52 = vadd.f32 %v6821_v50, %v6809_v49  ;;  %v734_v49 = vld [vmem:[#allocation1] sm:$0xff]  ;;  %v735_v50 = vld [vmem:[#allocation1 + $0x9] sm:$0xff] }
 0x5c6   :  { %v6835_v60 = vadd.f32 %v6834_v51, %v6822_v52  ;;  %v736_v52 = vld [vmem:[#allocation1 + $0x12] sm:$0xff] }
 0x5ca   :  { %v6847_v9 = vpop.f32.mrf.mxu0  ;;  %v6860_v10 = vpop.f32.mrf.mxu1 }
 0x5cb   :  { %v6823_v7 = vpop.f32.mrf.mxu2  ;;  %v6836_v8 = vpop.f32.mrf.mxu3  ;;  %v6848_v11 = vadd.f32 %v6847_v9, %v6835_v60 }
 0x5cd   :  { %v6861_v16 = vadd.f32 %v6860_v10, %v6848_v11  ;;  %7262 = vmatmul.bf16.vlgmr.msra.gmra.mxu0 %v724_v55  ;;  %7275 = vmatmul.bf16.vlgmr.msra.gmra.mxu1 %v725_v56 }
 0x5ce   :  { %7365 = vmatpush.bf16.xpose.msra.mxu0 %v2078_v13  ;;  %7378 = vmatpush.bf16.xpose.msra.mxu1 %v2079_v15 }
 0x5d0   :  { %7288 = vmatmul.bf16.vlgmr.msra.gmra.mxu2 %v726_v57  ;;  %7301 = vmatmul.bf16.vlgmr.msra.gmra.mxu3 %v727_v58 }
 0x5d1   :  { %7391 = vmatpush.bf16.xpose.msra.mxu2 %v2080_v12  ;;  %7404 = vmatpush.bf16.xpose.msra.mxu3 %v2081_v14 }
 0x5d2   :  { %v6849_v20 = vpop.f32.mrf.mxu0  ;;  %v6862_v21 = vpop.f32.mrf.mxu1 }
 0x5d3   :  { %v6873_v17 = vpop.f32.mrf.mxu2  ;;  %v6886_v18 = vpop.f32.mrf.mxu3 }
 0x5d4   :  { %v6874_v19 = vadd.f32 %v6873_v17, %v6861_v16 }
 0x5d6   :  { %v6887_v22 = vadd.f32 %v6886_v18, %v6874_v19 }
 0x5da   :  { %v6899_v31 = vpop.f32.mrf.mxu0  ;;  %v6912_v32 = vpop.f32.mrf.mxu1 }
 0x5db   :  { %v6875_v29 = vpop.f32.mrf.mxu2  ;;  %v6888_v30 = vpop.f32.mrf.mxu3  ;;  %v6900_v33 = vadd.f32 %v6899_v31, %v6887_v22 }
 0x5dd   :  { %v6913_v38 = vadd.f32 %v6912_v32, %v6900_v33  ;;  %7314 = vmatmul.bf16.vlgmr.msrb.gmra.mxu0 %v728_v59  ;;  %7327 = vmatmul.bf16.vlgmr.msrb.gmra.mxu1 %v729_v61 }
 0x5de   :  { %7417 = vmatpush.bf16.xpose.msrb.mxu0 %v2082_v35  ;;  %7430 = vmatpush.bf16.xpose.msrb.mxu1 %v2083_v37 }
 0x5e0   :  { %7340 = vmatmul.bf16.vlgmr.msrb.gmra.mxu2 %v730_v0  ;;  %7353 = vmatmul.bf16.vlgmr.msrb.gmra.mxu3 %v731_v1  ;;  %v738_v1 = vld [vmem:[#allocation1 + $0x24] sm:$0xff] }
 0x5e1   :  { %7443 = vmatpush.bf16.xpose.msrb.mxu2 %v2084_v34  ;;  %7456 = vmatpush.bf16.xpose.msrb.mxu3 %v2085_v36 }
 0x5e2   :  { %v6901_v42 = vpop.f32.mrf.mxu0  ;;  %v6914_v43 = vpop.f32.mrf.mxu1 }
 0x5e3   :  { %v6925_v39 = vpop.f32.mrf.mxu2  ;;  %v6938_v40 = vpop.f32.mrf.mxu3 }
 0x5e4   :  { %v6926_v41 = vadd.f32 %v6925_v39, %v6913_v38 }
 0x5e6   :  { %v6939_v44 = vadd.f32 %v6938_v40, %v6926_v41 }
 0x5ea   :  { %v6951_v47 = vpop.f32.mrf.mxu0  ;;  %v6964_v48 = vpop.f32.mrf.mxu1 }
 0x5eb   :  { %v6927_v45 = vpop.f32.mrf.mxu2  ;;  %v6940_v46 = vpop.f32.mrf.mxu3  ;;  %v6952_v51 = vadd.f32 %v6951_v47, %v6939_v44 }
 0x5ed   :  { %v6965_v54 = vadd.f32 %v6964_v48, %v6952_v51  ;;  %7366 = vmatmul.bf16.vlgmr.msra.gmra.mxu0 %v734_v49  ;;  %7379 = vmatmul.bf16.vlgmr.msra.gmra.mxu1 %v735_v50 }
 0x5f0   :  { %7392 = vmatmul.bf16.vlgmr.msra.gmra.mxu2 %v736_v52  ;;  %7405 = vmatmul.bf16.vlgmr.msra.gmra.mxu3 %v737_v53 }
 0x5f2   :  { %v6953_v58 = vpop.f32.mrf.mxu0  ;;  %v6966_v59 = vpop.f32.mrf.mxu1 }
 0x5f3   :  { %v6977_v55 = vpop.f32.mrf.mxu2  ;;  %v6990_v56 = vpop.f32.mrf.mxu3 }
 0x5f4   :  { %v6978_v57 = vadd.f32 %v6977_v55, %v6965_v54 }
 0x5f6   :  { %v6991_v60 = vadd.f32 %v6990_v56, %v6978_v57 }
 0x5fa   :  { %v7003_v63 = vpop.f32.mrf.mxu0  ;;  %v7016_v0 = vpop.f32.mrf.mxu1 }
 0x5fb   :  { %v6979_v61 = vpop.f32.mrf.mxu2  ;;  %v6992_v62 = vpop.f32.mrf.mxu3  ;;  %v7004_v3 = vadd.f32 %v7003_v63, %v6991_v60 }
 0x5fd   :  { %v7017_v6 = vadd.f32 %v7016_v0, %v7004_v3  ;;  %7418 = vmatmul.bf16.vlgmr.msrb.gmra.mxu0 %v738_v1  ;;  %7431 = vmatmul.bf16.vlgmr.msrb.gmra.mxu1 %v739_v2 }
 0x600   :  { %7444 = vmatmul.bf16.vlgmr.msrb.gmra.mxu2 %v740_v4  ;;  %7457 = vmatmul.bf16.vlgmr.msrb.gmra.mxu3 %v741_v5 }
 0x602   :  { %v7005_v10 = vpop.f32.mrf.mxu0  ;;  %v7018_v11 = vpop.f32.mrf.mxu1 }
 0x603   :  { %v7029_v7 = vpop.f32.mrf.mxu2  ;;  %v7042_v8 = vpop.f32.mrf.mxu3 }
 0x604   :  { %v7030_v9 = vadd.f32 %v7029_v7, %v7017_v6 }
 0x606   :  { %v7043_v12 = vadd.f32 %v7042_v8, %v7030_v9 }
 0x60a   :  { %v7055_v15 = vpop.f32.mrf.mxu0  ;;  %v7068_v16 = vpop.f32.mrf.mxu1 }
 0x60b   :  { %v7031_v13 = vpop.f32.mrf.mxu2  ;;  %v7044_v14 = vpop.f32.mrf.mxu3  ;;  %v7056_v29 = vadd.f32 %v7055_v15, %v7043_v12  ;;  %v7505_v12 = vmov 0.0  }
 0x60c   :  { %20 = vst.msk [vmem:[%s8270_s3] sm:$0x3] %vm19_vm0, %v7505_v12 }
 0x60d   :  { %v7069_v34 = vadd.f32 %v7068_v16, %v7056_v29 }
 0x612   :  { %v7057_v19 = vpop.f32.mrf.mxu0  ;;  %v7070_v20 = vpop.f32.mrf.mxu1 }
 0x613   :  { %v7081_v17 = vpop.f32.mrf.mxu2  ;;  %v7094_v18 = vpop.f32.mrf.mxu3 }
 0x614   :  { %v7082_v35 = vadd.f32 %v7081_v17, %v7069_v34 }
 0x616   :  { %v7095_v38 = vadd.f32 %v7094_v18, %v7082_v35 }
 0x61a   :  { %v7107_v23 = vpop.f32.mrf.mxu0  ;;  %v7120_v24 = vpop.f32.mrf.mxu1 }
 0x61b   :  { %v7083_v21 = vpop.f32.mrf.mxu2  ;;  %v7096_v22 = vpop.f32.mrf.mxu3  ;;  %v7108_v41 = vadd.f32 %v7107_v23, %v7095_v38 }
 0x61d   :  { %v7121_v42 = vadd.f32 %v7120_v24, %v7108_v41 }
 0x622   :  { %v7109_v27 = vpop.f32.mrf.mxu0  ;;  %v7122_v28 = vpop.f32.mrf.mxu1 }
 0x623   :  { %v7133_v25 = vpop.f32.mrf.mxu2  ;;  %v7146_v26 = vpop.f32.mrf.mxu3 }
 0x624   :  { %v7134_v45 = vadd.f32 %v7133_v25, %v7121_v42 }
 0x626   :  { %v7147_v48 = vadd.f32 %v7146_v26, %v7134_v45  ;;  %v21_v45 = vld [vmem:[%s8270_s3] sm:$0x3] }
 0x62a   :  { %v7159_v32 = vpop.f32.mrf.mxu0  ;;  %v7172_v33 = vpop.f32.mrf.mxu1 }
 0x62b   :  { %v7135_v30 = vpop.f32.mrf.mxu2  ;;  %v7148_v31 = vpop.f32.mrf.mxu3  ;;  %v7160_v49 = vadd.f32 %v7159_v32, %v7147_v48 }
 0x62d   :  { %v7173_v54 = vadd.f32 %v7172_v33, %v7160_v49 }
 0x632   :  { %v7161_v39 = vpop.f32.mrf.mxu0  ;;  %v7174_v40 = vpop.f32.mrf.mxu1 }
 0x633   :  { %v7185_v36 = vpop.f32.mrf.mxu2  ;;  %v7198_v37 = vpop.f32.mrf.mxu3 }
 0x634   :  { %v7186_v55 = vadd.f32 %v7185_v36, %v7173_v54 }
 0x636   :  { %v7199_v58 = vadd.f32 %v7198_v37, %v7186_v55 }
 0x63a   :  { %v7211_v46 = vpop.f32.mrf.mxu0  ;;  %v7224_v47 = vpop.f32.mrf.mxu1 }
 0x63b   :  { %v7187_v43 = vpop.f32.mrf.mxu2  ;;  %v7200_v44 = vpop.f32.mrf.mxu3  ;;  %v7212_v61 = vadd.f32 %v7211_v46, %v7199_v58 }
 0x63d   :  { %v7225_v62 = vadd.f32 %v7224_v47, %v7212_v61 }
 0x642   :  { %v7213_v52 = vpop.f32.mrf.mxu0  ;;  %v7226_v53 = vpop.f32.mrf.mxu1 }
 0x643   :  { %v7237_v50 = vpop.f32.mrf.mxu2  ;;  %v7250_v51 = vpop.f32.mrf.mxu3 }
 0x644   :  { %v7238_v1 = vadd.f32 %v7237_v50, %v7225_v62  ;;  %v7500_v50 = vld [vmem:[%s8269_s2] ss:$0 sm:$0xff] }
 0x646   :  { %v7251_v4 = vadd.f32 %v7250_v51, %v7238_v1 }
 0x64a   :  { %v7263_v59 = vpop.f32.mrf.mxu0  ;;  %v7276_v60 = vpop.f32.mrf.mxu1 }
 0x64b   :  { %v7239_v56 = vpop.f32.mrf.mxu2  ;;  %v7252_v57 = vpop.f32.mrf.mxu3  ;;  %v7264_v5 = vadd.f32 %v7263_v59, %v7251_v4 }
 0x64d   :  { %v7277_v10 = vadd.f32 %v7276_v60, %v7264_v5 }
 0x652   :  { %v7265_v2 = vpop.f32.mrf.mxu0  ;;  %v7278_v3 = vpop.f32.mrf.mxu1 }
 0x653   :  { %v7289_v63 = vpop.f32.mrf.mxu2  ;;  %v7302_v0 = vpop.f32.mrf.mxu3 }
 0x654   :  { %v7290_v11 = vadd.f32 %v7289_v63, %v7277_v10 }
 0x656   :  { %v7303_v15 = vadd.f32 %v7302_v0, %v7290_v11 }
 0x65a   :  { %v7315_v8 = vpop.f32.mrf.mxu0  ;;  %v7328_v9 = vpop.f32.mrf.mxu1 }
 0x65b   :  { %v7291_v6 = vpop.f32.mrf.mxu2  ;;  %v7304_v7 = vpop.f32.mrf.mxu3  ;;  %v7316_v18 = vadd.f32 %v7315_v8, %v7303_v15 }
 0x65d   :  { %v7329_v19 = vadd.f32 %v7328_v9, %v7316_v18 }
 0x662   :  { %v7317_v16 = vpop.f32.mrf.mxu0  ;;  %v7330_v17 = vpop.f32.mrf.mxu1 }
 0x663   :  { %v7341_v13 = vpop.f32.mrf.mxu2  ;;  %v7354_v14 = vpop.f32.mrf.mxu3 }
 0x664   :  { %v7342_v22 = vadd.f32 %v7341_v13, %v7329_v19 }
 0x666   :  { %v7355_v25 = vadd.f32 %v7354_v14, %v7342_v22 }
 0x66a   :  { %v7367_v23 = vpop.f32.mrf.mxu0  ;;  %v7380_v24 = vpop.f32.mrf.mxu1 }
 0x66b   :  { %v7343_v20 = vpop.f32.mrf.mxu2  ;;  %v7356_v21 = vpop.f32.mrf.mxu3  ;;  %v7368_v26 = vadd.f32 %v7367_v23, %v7355_v25 }
 0x66d   :  { %v7381_v31 = vadd.f32 %v7380_v24, %v7368_v26 }
 0x672   :  { %v7369_v29 = vpop.f32.mrf.mxu0  ;;  %v7382_v30 = vpop.f32.mrf.mxu1 }
 0x673   :  { %v7393_v27 = vpop.f32.mrf.mxu2  ;;  %v7406_v28 = vpop.f32.mrf.mxu3 }
 0x674   :  { %v7394_v32 = vadd.f32 %v7393_v27, %v7381_v31 }
 0x676   :  { %v7407_v35 = vadd.f32 %v7406_v28, %v7394_v32 }
 0x67a   :  { %v7419_v36 = vpop.f32.mrf.mxu0  ;;  %v7432_v37 = vpop.f32.mrf.mxu1 }
 0x67b   :  { %v7395_v33 = vpop.f32.mrf.mxu2  ;;  %v7408_v34 = vpop.f32.mrf.mxu3  ;;  %v7420_v38 = vadd.f32 %v7419_v36, %v7407_v35 }
 0x67d   :  { %v7433_v39 = vadd.f32 %v7432_v37, %v7420_v38 }
 0x682   :  { %v7421_v43 = vpop.f32.mrf.mxu0  ;;  %v7434_v44 = vpop.f32.mrf.mxu1 }
 0x683   :  { %v7445_v40 = vpop.f32.mrf.mxu2  ;;  %v7458_v41 = vpop.f32.mrf.mxu3 }
 0x684   :  { %v7446_v42 = vadd.f32 %v7445_v40, %v7433_v39 }
 0x686   :  { %v7459_v46 = vadd.f32 %v7458_v41, %v7446_v42 }
 0x688   :  { %v7462_v47 = vadd.f32 %v7459_v46, %v21_v45 }
 0x68a   :  { %7464 = vst.msk [vmem:[%s8270_s3] sm:$0x3] %vm19_vm0, %v7462_v47 }
 0x68b   :  { %v7447_v48 = vpop.f32.mrf.mxu2  ;;  %v7460_v49 = vpop.f32.mrf.mxu3 }
 0x691   :  { %v7468_v51 = vld [vmem:[%s8270_s3] sm:$0x3] }
 0x692   :  { %v7473_v52 = vadd.f32 %v7500_v50, %v7468_v51 }
 0x694   :  { %v7498_v53 = vmul.f32 -1.442695, %v7473_v52 }
 0x696   :  { %7501 = vpow2.f32 %v7498_v53 }
 0x69c   :  { %v7502_v54 = vpop.eup %7501 }
 0x69d   :  { %v7477_v55 = vadd.f32 1.0, %v7502_v54 }
 0x69f   :  { %7503 = vrcp.f32 %v7477_v55  ;;  %v7489_v59 = vand.u32 2147483648, %v7477_v55  ;;  %v7487_v61 = vand.u32 2147483647, %v7477_v55  ;;  %vm7483_vm2 = vweird.f32 %v7477_v55 }
 0x6a1   :  { %v7490_v63 = vor.u32 1.1754944e-38, %v7489_v59  ;;  %vm7488_vm4 = vcmp.eq.f32.partialorder %v7487_v61, 8.507059e+37 }
 0x6a5   :  { %v7504_v56 = vpop.eup %7503 }
 0x6a6   :  { %v7479_v57 = vmul.f32 %v7504_v56, %v7477_v55  ;;  %vm7484_vm1 = vweird.f32 %v7504_v56 }
 0x6a7   :  { %vm7485_vm3 = vmor %vm7483_vm2, %vm7484_vm1 }
 0x6a8   :  { %v7480_v58 = vsub.f32 1.0, %v7479_v57 }
 0x6aa   :  { %v7481_v60 = vmul.f32 %v7504_v56, %v7480_v58 }
 0x6ac   :  { %v7482_v62 = vadd.f32 %v7504_v56, %v7481_v60 }
 0x6ae   :  { %v7486_v0 = vsel %vm7485_vm3, %v7504_v56, %v7482_v62 }
 0x6af   :  { %v7491_v1 = vsel %vm7488_vm4, %v7490_v63, %v7486_v0 }
 0x6b0   :  { %7493 = vst.msk [vmem:[%s8270_s3] sm:$0x3] %vm19_vm0, %v7491_v1 }

// kernel: forward.3
= control target key start
LH: loop header
LB: loop body
LE: loop exit
PB: predicated region body
PF: predicated region fallthrough
CT: control target
= control target key end

     0   :  { %vm1837_vm0 = vcmask 392192   ;;  %s5011_s21 = smov 126   ;;  %s5013_s24 = smov 2   ;;  %s7370_s1 = inlined_call_operand.vmem [shape: bf16[2352,256], index: 1, kind: input, shape index: {}]   ;;  %s7371_s0 = inlined_call_operand.vmem [shape: bf16[2,2352], index: 0, kind: input, shape index: {}]   ;;  %s7372_s2 = inlined_call_operand.vmem [shape: f32[1,256], index: 2, kind: input, shape index: {}]   ;;  %s7373_s3 = inlined_call_operand.vmem [shape: bf16[256,384], index: 3, kind: input, shape index: {}]   ;;  %s7374_s4 = inlined_call_operand.vmem [shape: f32[1,384], index: 4, kind: input, shape index: {}]   ;;  %s7375_s5 = inlined_call_operand.vmem [shape: f32[2,256], index: 5, kind: output, shape index: {}]  }
   0x1   :  { %v3315_v0 = vld [vmem:[%s7370_s1 + $0x70] sm:$0xf]  ;;  %v4648_v1 = vld [vmem:[%s7370_s1 + $0x74] sm:$0xf0]  ;;  %v3307_v11 = vld [vmem:[%s7370_s1 + $0x60] sm:$0xf] }
   0x2   :  { %v3379_v2 = vld [vmem:[%s7370_s1 + $0xf0] sm:$0xf]  ;;  %v3316_v3 = vor.u32 %v4648_v1, %v3315_v0  ;;  %v4664_v4 = vld [vmem:[%s7370_s1 + $0xf4] sm:$0xf0]  ;;  %v4646_v13 = vld [vmem:[%s7370_s1 + $0x64] sm:$0xf0] }
   0x3   :  { %v3443_v5 = vld [vmem:[%s7370_s1 + $0x170] sm:$0xf]  ;;  %v4680_v6 = vld [vmem:[%s7370_s1 + $0x174] sm:$0xf0]  ;;  %v3380_v7 = vor.u32 %v4664_v4, %v3379_v2  ;;  %v3371_v14 = vld [vmem:[%s7370_s1 + $0xe0] sm:$0xf]  ;;  %v3308_v16 = vor.u32 %v4646_v13, %v3307_v11 }
   0x4   :  { %v3444_v8 = vor.u32 %v4680_v6, %v3443_v5  ;;  %v3507_v9 = vld [vmem:[%s7370_s1 + $0x1f0] sm:$0xf]  ;;  %v4696_v10 = vld [vmem:[%s7370_s1 + $0x1f4] sm:$0xf0]  ;;  %1840 = vmatpush.bf16.msra.mxu0 %v3316_v3  ;;  %v4662_v15 = vld [vmem:[%s7370_s1 + $0xe4] sm:$0xf0] }
   0x5   :  { %v3508_v12 = vor.u32 %v4696_v10, %v3507_v9  ;;  %1853 = vmatpush.bf16.msra.mxu1 %v3380_v7  ;;  %v3372_v17 = vor.u32 %v4662_v15, %v3371_v14  ;;  %v3435_v18 = vld [vmem:[%s7370_s1 + $0x160] sm:$0xf]  ;;  %v4678_v19 = vld [vmem:[%s7370_s1 + $0x164] sm:$0xf0]  ;;  %v3299_v23 = vld [vmem:[%s7370_s1 + $0x50] sm:$0xf] }
   0x6   :  { %1866 = vmatpush.bf16.msra.mxu2 %v3444_v8  ;;  %v3499_v20 = vld [vmem:[%s7370_s1 + $0x1e0] sm:$0xf]  ;;  %v3436_v21 = vor.u32 %v4678_v19, %v3435_v18  ;;  %v4694_v22 = vld [vmem:[%s7370_s1 + $0x1e4] sm:$0xf0]  ;;  %v4644_v24 = vld [vmem:[%s7370_s1 + $0x54] sm:$0xf0] }
   0x7   :  { %1879 = vmatpush.bf16.msra.mxu3 %v3508_v12  ;;  %v3500_v25 = vor.u32 %v4694_v22, %v3499_v20  ;;  %v3363_v26 = vld [vmem:[%s7370_s1 + $0xd0] sm:$0xf]  ;;  %v4660_v27 = vld [vmem:[%s7370_s1 + $0xd4] sm:$0xf0]  ;;  %v3300_v29 = vor.u32 %v4644_v24, %v3299_v23  ;;  %v3291_v35 = vld [vmem:[%s7370_s1 + $0x40] sm:$0xf] }
   0x8   :  { %v3427_v28 = vld [vmem:[%s7370_s1 + $0x150] sm:$0xf]  ;;  %1841 = vmatpush.bf16.msra.mxu0 %v3308_v16  ;;  %v4676_v30 = vld [vmem:[%s7370_s1 + $0x154] sm:$0xf0]  ;;  %v3364_v33 = vor.u32 %v4660_v27, %v3363_v26  ;;  %v4642_v36 = vld [vmem:[%s7370_s1 + $0x44] sm:$0xf0] }
   0x9   :  { %v3491_v31 = vld [vmem:[%s7370_s1 + $0x1d0] sm:$0xf]  ;;  %v4692_v32 = vld [vmem:[%s7370_s1 + $0x1d4] sm:$0xf0]  ;;  %1854 = vmatpush.bf16.msra.mxu1 %v3372_v17  ;;  %v3428_v34 = vor.u32 %v4676_v30, %v3427_v28  ;;  %v3355_v37 = vld [vmem:[%s7370_s1 + $0xc0] sm:$0xf]  ;;  %v3292_v44 = vor.u32 %v4642_v36, %v3291_v35 }
   0xa   :  { %1867 = vmatpush.bf16.msra.mxu2 %v3436_v21  ;;  %v3492_v38 = vor.u32 %v4692_v32, %v3491_v31  ;;  %v4658_v39 = vld [vmem:[%s7370_s1 + $0xc4] sm:$0xf0]  ;;  %v3419_v40 = vld [vmem:[%s7370_s1 + $0x140] sm:$0xf]  ;;  %v3283_v47 = vld [vmem:[%s7370_s1 + $0x30] sm:$0xf] }
   0xb   :  { %1880 = vmatpush.bf16.msra.mxu3 %v3500_v25  ;;  %v4674_v41 = vld [vmem:[%s7370_s1 + $0x144] sm:$0xf0]  ;;  %v3483_v42 = vld [vmem:[%s7370_s1 + $0x1c0] sm:$0xf]  ;;  %v3356_v45 = vor.u32 %v4658_v39, %v3355_v37  ;;  %v4640_v48 = vld [vmem:[%s7370_s1 + $0x34] sm:$0xf0] }
   0xc   :  { %v4690_v43 = vld [vmem:[%s7370_s1 + $0x1c4] sm:$0xf0]  ;;  %1842 = vmatpush.bf16.msra.mxu0 %v3300_v29  ;;  %v3420_v46 = vor.u32 %v4674_v41, %v3419_v40  ;;  %v3347_v49 = vld [vmem:[%s7370_s1 + $0xb0] sm:$0xf]  ;;  %v4656_v51 = vld [vmem:[%s7370_s1 + $0xb4] sm:$0xf0]  ;;  %v3284_v56 = vor.u32 %v4640_v48, %v3283_v47 }
   0xd   :  { %1855 = vmatpush.bf16.msra.mxu1 %v3364_v33  ;;  %v3484_v50 = vor.u32 %v4690_v43, %v3483_v42  ;;  %v3411_v52 = vld [vmem:[%s7370_s1 + $0x130] sm:$0xf]  ;;  %v4672_v53 = vld [vmem:[%s7370_s1 + $0x134] sm:$0xf0]  ;;  %v3348_v57 = vor.u32 %v4656_v51, %v3347_v49  ;;  %v3275_v59 = vld [vmem:[%s7370_s1 + $0x20] sm:$0xf] }
   0xe   :  { %1868 = vmatpush.bf16.msra.mxu2 %v3428_v34  ;;  %v3475_v54 = vld [vmem:[%s7370_s1 + $0x1b0] sm:$0xf]  ;;  %v4688_v55 = vld [vmem:[%s7370_s1 + $0x1b4] sm:$0xf0]  ;;  %v3412_v58 = vor.u32 %v4672_v53, %v3411_v52  ;;  %v4638_v60 = vld [vmem:[%s7370_s1 + $0x24] sm:$0xf0] }
   0xf   :  { %1881 = vmatpush.bf16.msra.mxu3 %v3492_v38  ;;  %v3339_v61 = vld [vmem:[%s7370_s1 + $0xa0] sm:$0xf]  ;;  %v3476_v62 = vor.u32 %v4688_v55, %v3475_v54  ;;  %v4654_v63 = vld [vmem:[%s7370_s1 + $0xa4] sm:$0xf0]  ;;  %v3276_v4 = vor.u32 %v4638_v60, %v3275_v59  ;;  %v3267_v7 = vld [vmem:[%s7370_s1 + $0x10] sm:$0xf] }
  0x10   :  { %1843 = vmatpush.bf16.msra.mxu0 %v3292_v44  ;;  %v3403_v0 = vld [vmem:[%s7370_s1 + $0x120] sm:$0xf]  ;;  %v4670_v1 = vld [vmem:[%s7370_s1 + $0x124] sm:$0xf0]  ;;  %v3340_v5 = vor.u32 %v4654_v63, %v3339_v61  ;;  %v4636_v8 = vld [vmem:[%s7370_s1 + $0x14] sm:$0xf0] }
  0x11   :  { %1856 = vmatpush.bf16.msra.mxu1 %v3356_v45  ;;  %v3467_v2 = vld [vmem:[%s7370_s1 + $0x1a0] sm:$0xf]  ;;  %v4686_v3 = vld [vmem:[%s7370_s1 + $0x1a4] sm:$0xf0]  ;;  %v3404_v6 = vor.u32 %v4670_v1, %v3403_v0  ;;  %v3331_v9 = vld [vmem:[%s7370_s1 + $0x90] sm:$0xf]  ;;  %v3268_v16 = vor.u32 %v4636_v8, %v3267_v7 }
  0x12   :  { %1869 = vmatpush.bf16.msra.mxu2 %v3420_v46  ;;  %v3468_v10 = vor.u32 %v4686_v3, %v3467_v2  ;;  %v4652_v11 = vld [vmem:[%s7370_s1 + $0x94] sm:$0xf0]  ;;  %v3395_v12 = vld [vmem:[%s7370_s1 + $0x110] sm:$0xf]  ;;  %v3259_v17 = vld [vmem:[%s7370_s1] sm:$0xf] }
  0x13   :  { %1882 = vmatpush.bf16.msra.mxu3 %v3484_v50  ;;  %v4668_v13 = vld [vmem:[%s7370_s1 + $0x114] sm:$0xf0]  ;;  %v3459_v14 = vld [vmem:[%s7370_s1 + $0x190] sm:$0xf]  ;;  %v4634_v18 = vld [vmem:[%s7370_s1 + $0x4] sm:$0xf0]  ;;  %v3332_v19 = vor.u32 %v4652_v11, %v3331_v9 }
  0x14   :  { %1844 = vmatpush.bf16.msra.mxu0 %v3284_v56  ;;  %v4684_v15 = vld [vmem:[%s7370_s1 + $0x194] sm:$0xf0]  ;;  %v3396_v20 = vor.u32 %v4668_v13, %v3395_v12  ;;  %v3323_v21 = vld [vmem:[%s7370_s1 + $0x80] sm:$0xf]  ;;  %v4650_v22 = vld [vmem:[%s7370_s1 + $0x84] sm:$0xf0]  ;;  %v3260_v31 = vor.u32 %v4634_v18, %v3259_v17 }
  0x15   :  { %1857 = vmatpush.bf16.msra.mxu1 %v3348_v57  ;;  %v3387_v23 = vld [vmem:[%s7370_s1 + $0x100] sm:$0xf]  ;;  %v3460_v24 = vor.u32 %v4684_v15, %v3459_v14  ;;  %v4666_v25 = vld [vmem:[%s7370_s1 + $0x104] sm:$0xf0]  ;;  %v3571_v28 = vld [vmem:[%s7370_s1 + $0x270] sm:$0xf]  ;;  %v3324_v35 = vor.u32 %v4650_v22, %v3323_v21 }
  0x16   :  { %1870 = vmatpush.bf16.msra.mxu2 %v3412_v58  ;;  %v3451_v26 = vld [vmem:[%s7370_s1 + $0x180] sm:$0xf]  ;;  %v4682_v27 = vld [vmem:[%s7370_s1 + $0x184] sm:$0xf0]  ;;  %v4712_v29 = vld [vmem:[%s7370_s1 + $0x274] sm:$0xf0]  ;;  %v3388_v36 = vor.u32 %v4666_v25, %v3387_v23 }
  0x17   :  { %1883 = vmatpush.bf16.msra.mxu3 %v3476_v62  ;;  %v3635_v30 = vld [vmem:[%s7370_s1 + $0x2f0] sm:$0xf]  ;;  %v4728_v32 = vld [vmem:[%s7370_s1 + $0x2f4] sm:$0xf0]  ;;  %v3452_v39 = vor.u32 %v4682_v27, %v3451_v26  ;;  %v3572_v40 = vor.u32 %v4712_v29, %v3571_v28  ;;  %v3563_v43 = vld [vmem:[%s7370_s1 + $0x260] sm:$0xf] }
  0x18   :  { %1845 = vmatpush.bf16.msra.mxu0 %v3276_v4  ;;  %v3699_v33 = vld [vmem:[%s7370_s1 + $0x370] sm:$0xf]  ;;  %v4744_v34 = vld [vmem:[%s7370_s1 + $0x374] sm:$0xf0]  ;;  %v3636_v41 = vor.u32 %v4728_v32, %v3635_v30  ;;  %v4710_v44 = vld [vmem:[%s7370_s1 + $0x264] sm:$0xf0] }
  0x19   :  { %1858 = vmatpush.bf16.msra.mxu1 %v3340_v5  ;;  %v3763_v37 = vld [vmem:[%s7370_s1 + $0x3f0] sm:$0xf]  ;;  %v4760_v38 = vld [vmem:[%s7370_s1 + $0x3f4] sm:$0xf0]  ;;  %v3700_v42 = vor.u32 %v4744_v34, %v3699_v33  ;;  %v3627_v45 = vld [vmem:[%s7370_s1 + $0x2e0] sm:$0xf]  ;;  %v3564_v52 = vor.u32 %v4710_v44, %v3563_v43 }
  0x1a   :  { %1871 = vmatpush.bf16.msra.mxu2 %v3404_v6  ;;  %v3764_v46 = vor.u32 %v4760_v38, %v3763_v37  ;;  %v4726_v47 = vld [vmem:[%s7370_s1 + $0x2e4] sm:$0xf0]  ;;  %v3691_v48 = vld [vmem:[%s7370_s1 + $0x360] sm:$0xf]  ;;  %v3555_v53 = vld [vmem:[%s7370_s1 + $0x250] sm:$0xf] }
  0x1b   :  { %1884 = vmatpush.bf16.msra.mxu3 %v3468_v10  ;;  %v4742_v49 = vld [vmem:[%s7370_s1 + $0x364] sm:$0xf0]  ;;  %v3755_v50 = vld [vmem:[%s7370_s1 + $0x3e0] sm:$0xf]  ;;  %v4708_v54 = vld [vmem:[%s7370_s1 + $0x254] sm:$0xf0]  ;;  %v3628_v55 = vor.u32 %v4726_v47, %v3627_v45 }
  0x1c   :  { %1846 = vmatpush.bf16.msra.mxu0 %v3268_v16  ;;  %v4758_v51 = vld [vmem:[%s7370_s1 + $0x3e4] sm:$0xf0]  ;;  %v3692_v56 = vor.u32 %v4742_v49, %v3691_v48  ;;  %v3619_v57 = vld [vmem:[%s7370_s1 + $0x2d0] sm:$0xf]  ;;  %v4724_v58 = vld [vmem:[%s7370_s1 + $0x2d4] sm:$0xf0]  ;;  %v3556_v1 = vor.u32 %v4708_v54, %v3555_v53 }
  0x1d   :  { %1859 = vmatpush.bf16.msra.mxu1 %v3332_v19  ;;  %v21_v59 = vld [vmem:[%s7371_s0] sm:$0xff]  ;;  %v3756_v60 = vor.u32 %v4758_v51, %v3755_v50  ;;  %v3683_v61 = vld [vmem:[%s7370_s1 + $0x350] sm:$0xf]  ;;  %v4740_v62 = vld [vmem:[%s7370_s1 + $0x354] sm:$0xf0]  ;;  %v3620_v2 = vor.u32 %v4724_v58, %v3619_v57 }
  0x1e   :  { %1872 = vmatpush.bf16.msra.mxu2 %v3396_v20  ;;  %325 = vst [vmem:[#allocation1] ss:$9 sm:$0xff] %v21_v59  ;;  %v3747_v63 = vld [vmem:[%s7370_s1 + $0x3d0] sm:$0xf]  ;;  %v4756_v0 = vld [vmem:[%s7370_s1 + $0x3d4] sm:$0xf0]  ;;  %v3684_v3 = vor.u32 %v4740_v62, %v3683_v61 }
  0x1f   :  { %1885 = vmatpush.bf16.msra.mxu3 %v3460_v24  ;;  %v3547_v4 = vld [vmem:[%s7370_s1 + $0x240] sm:$0xf]  ;;  %v4706_v5 = vld [vmem:[%s7370_s1 + $0x244] sm:$0xf0]  ;;  %v3748_v7 = vor.u32 %v4756_v0, %v3747_v63  ;;  %v3539_v13 = vld [vmem:[%s7370_s1 + $0x230] sm:$0xf] }
  0x20   :  { %1847 = vmatpush.bf16.msra.mxu0 %v3260_v31  ;;  %v3611_v6 = vld [vmem:[%s7370_s1 + $0x2c0] sm:$0xf]  ;;  %v4722_v8 = vld [vmem:[%s7370_s1 + $0x2c4] sm:$0xf0]  ;;  %v3548_v14 = vor.u32 %v4706_v5, %v3547_v4  ;;  %v4704_v15 = vld [vmem:[%s7370_s1 + $0x234] sm:$0xf0] }
  0x21   :  { %1860 = vmatpush.bf16.msra.mxu1 %v3324_v35  ;;  %v3675_v9 = vld [vmem:[%s7370_s1 + $0x340] sm:$0xf]  ;;  %v4738_v10 = vld [vmem:[%s7370_s1 + $0x344] sm:$0xf0]  ;;  %v3603_v16 = vld [vmem:[%s7370_s1 + $0x2b0] sm:$0xf]  ;;  %v3612_v18 = vor.u32 %v4722_v8, %v3611_v6  ;;  %v3540_v29 = vor.u32 %v4704_v15, %v3539_v13 }
  0x22   :  { %1873 = vmatpush.bf16.msra.mxu2 %v3388_v36  ;;  %v3739_v11 = vld [vmem:[%s7370_s1 + $0x3c0] sm:$0xf]  ;;  %v4754_v12 = vld [vmem:[%s7370_s1 + $0x3c4] sm:$0xf0]  ;;  %v4720_v17 = vld [vmem:[%s7370_s1 + $0x2b4] sm:$0xf0]  ;;  %v3676_v19 = vor.u32 %v4738_v10, %v3675_v9 }
  0x23   :  { %1886 = vmatpush.bf16.msra.mxu3 %v3452_v39  ;;  %v3740_v23 = vor.u32 %v4754_v12, %v3739_v11  ;;  %v3667_v24 = vld [vmem:[%s7370_s1 + $0x330] sm:$0xf]  ;;  %v4736_v25 = vld [vmem:[%s7370_s1 + $0x334] sm:$0xf0]  ;;  %v3604_v30 = vor.u32 %v4720_v17, %v3603_v16  ;;  %v3531_v32 = vld [vmem:[%s7370_s1 + $0x220] sm:$0xf] }
  0x24   :  { %1892 = vmatpush.bf16.msrb.mxu0 %v3572_v40  ;;  %v3731_v27 = vld [vmem:[%s7370_s1 + $0x3b0] sm:$0xf]  ;;  %v4752_v28 = vld [vmem:[%s7370_s1 + $0x3b4] sm:$0xf0]  ;;  %v3668_v31 = vor.u32 %v4736_v25, %v3667_v24  ;;  %v4702_v33 = vld [vmem:[%s7370_s1 + $0x224] sm:$0xf0] }
  0x25   :  { %1905 = vmatpush.bf16.msrb.mxu1 %v3636_v41  ;;  %v5359_v20 = vld [vmem:[#allocation1 + $0x12] sm:$0xff]  ;;  %v5361_v21 = vld [vmem:[#allocation1] sm:$0xff]  ;;  %v5372_v26 = vld [vmem:[#allocation1 + $0x9] sm:$0xff]  ;;  %v3732_v35 = vor.u32 %v4752_v28, %v3731_v27  ;;  %v3532_v41 = vor.u32 %v4702_v33, %v3531_v32 }
  0x26   :  { %1918 = vmatpush.bf16.msrb.mxu2 %v3700_v42  ;;  %v5363_v22 = vld [vmem:[#allocation1 + $0x1b] sm:$0xff]  ;;  %1848 = vmatmul.bf16.vlgmr.msra.gmra.mxu0 %v5361_v21  ;;  %v4718_v36 = vld [vmem:[%s7370_s1 + $0x2a4] sm:$0xf0]  ;;  %v3523_v42 = vld [vmem:[%s7370_s1 + $0x210] sm:$0xf] }
  0x27   :  { %1931 = vmatpush.bf16.msrb.mxu3 %v3764_v46  ;;  %1874 = vmatmul.bf16.vlgmr.msra.gmra.mxu2 %v5359_v20  ;;  %v3595_v34 = vld [vmem:[%s7370_s1 + $0x2a0] sm:$0xf]  ;;  %v4734_v38 = vld [vmem:[%s7370_s1 + $0x324] sm:$0xf0]  ;;  %v4700_v46 = vld [vmem:[%s7370_s1 + $0x214] sm:$0xf0] }
  0x28   :  { %1893 = vmatpush.bf16.msrb.mxu0 %v3564_v52  ;;  %1887 = vmatmul.bf16.vlgmr.msra.gmra.mxu3 %v5363_v22  ;;  %v3659_v37 = vld [vmem:[%s7370_s1 + $0x320] sm:$0xf]  ;;  %v4750_v40 = vld [vmem:[%s7370_s1 + $0x3a4] sm:$0xf0]  ;;  %v3596_v44 = vor.u32 %v4718_v36, %v3595_v34  ;;  %v3587_v47 = vld [vmem:[%s7370_s1 + $0x290] sm:$0xf] }
  0x29   :  { %1906 = vmatpush.bf16.msrb.mxu1 %v3628_v55  ;;  %v3723_v39 = vld [vmem:[%s7370_s1 + $0x3a0] sm:$0xf]  ;;  %v22_v43 = vld [vmem:[%s7371_s0 + $0x8] sm:$0xff]  ;;  %v3660_v45 = vor.u32 %v4734_v38, %v3659_v37  ;;  %v4716_v48 = vld [vmem:[%s7370_s1 + $0x294] sm:$0xf0] }
  0x2a   :  { %1919 = vmatpush.bf16.msrb.mxu2 %v3692_v56  ;;  %1861 = vmatmul.bf16.vlgmr.msra.gmra.mxu1 %v5372_v26  ;;  %v3724_v49 = vor.u32 %v4750_v40, %v3723_v39  ;;  %v3651_v50 = vld [vmem:[%s7370_s1 + $0x310] sm:$0xf]  ;;  %v4732_v51 = vld [vmem:[%s7370_s1 + $0x314] sm:$0xf0]  ;;  %v3515_v54 = vld [vmem:[%s7370_s1 + $0x200] sm:$0xf]  ;;  %v3524_v56 = vor.u32 %v4700_v46, %v3523_v42  ;;  %v3588_v62 = vor.u32 %v4716_v48, %v3587_v47 }
  0x2b   :  { %1932 = vmatpush.bf16.msrb.mxu3 %v3756_v60  ;;  %v3715_v52 = vld [vmem:[%s7370_s1 + $0x390] sm:$0xf]  ;;  %v4748_v53 = vld [vmem:[%s7370_s1 + $0x394] sm:$0xf0]  ;;  %v4698_v55 = vld [vmem:[%s7370_s1 + $0x204] sm:$0xf0]  ;;  %v3652_v63 = vor.u32 %v4732_v51, %v3651_v50 }
  0x2c   :  { %1894 = vmatpush.bf16.msrb.mxu0 %v3556_v1  ;;  %v3579_v57 = vld [vmem:[%s7370_s1 + $0x280] sm:$0xf]  ;;  %v4714_v58 = vld [vmem:[%s7370_s1 + $0x284] sm:$0xf0]  ;;  %v5452_v61 = vld [vmem:[#allocation1 + $0x36] sm:$0xff]  ;;  %v3516_v9 = vor.u32 %v4698_v55, %v3515_v54 }
  0x2d   :  { %1907 = vmatpush.bf16.msrb.mxu1 %v3620_v2  ;;  %v3643_v59 = vld [vmem:[%s7370_s1 + $0x300] sm:$0xf]  ;;  %v4730_v60 = vld [vmem:[%s7370_s1 + $0x304] sm:$0xf0]  ;;  %v5458_v2 = vld [vmem:[#allocation1 + $0x2d] sm:$0xff]  ;;  %v3580_v13 = vor.u32 %v4714_v58, %v3579_v57 }
  0x2e   :  { %1920 = vmatpush.bf16.msrb.mxu2 %v3684_v3  ;;  %v5454_v0 = vld [vmem:[#allocation1 + $0x24] sm:$0xff]  ;;  %v3716_v3 = vor.u32 %v4748_v53, %v3715_v52  ;;  %v3707_v4 = vld [vmem:[%s7370_s1 + $0x380] sm:$0xf]  ;;  %v3827_v6 = vld [vmem:[%s7370_s1 + $0x470] sm:$0xf] }
  0x2f   :  { %1933 = vmatpush.bf16.msrb.mxu3 %v3748_v7  ;;  %v5456_v1 = vld [vmem:[#allocation1 + $0x3f] sm:$0xff]  ;;  %v4746_v5 = vld [vmem:[%s7370_s1 + $0x384] sm:$0xf0]  ;;  %v4776_v7 = vld [vmem:[%s7370_s1 + $0x474] sm:$0xf0] }
  0x30   :  { %1895 = vmatpush.bf16.msrb.mxu0 %v3548_v14  ;;  %335 = vst [vmem:[#allocation1] ss:$9 sm:$0xff] %v22_v43  ;;  %v3891_v8 = vld [vmem:[%s7370_s1 + $0x4f0] sm:$0xf]  ;;  %v4792_v10 = vld [vmem:[%s7370_s1 + $0x4f4] sm:$0xf0]  ;;  %v3644_v14 = vor.u32 %v4730_v60, %v3643_v59  ;;  %v3708_v17 = vor.u32 %v4746_v5, %v3707_v4 }
  0x31   :  { %1908 = vmatpush.bf16.msrb.mxu1 %v3612_v18  ;;  %v3955_v11 = vld [vmem:[%s7370_s1 + $0x570] sm:$0xf]  ;;  %v4808_v12 = vld [vmem:[%s7370_s1 + $0x574] sm:$0xf0]  ;;  %v3828_v18 = vor.u32 %v4776_v7, %v3827_v6  ;;  %v3819_v24 = vld [vmem:[%s7370_s1 + $0x460] sm:$0xf] }
  0x32   :  { %1921 = vmatpush.bf16.msrb.mxu2 %v3676_v19  ;;  %v4019_v15 = vld [vmem:[%s7370_s1 + $0x5f0] sm:$0xf]  ;;  %v4824_v16 = vld [vmem:[%s7370_s1 + $0x5f4] sm:$0xf0]  ;;  %v3892_v19 = vor.u32 %v4792_v10, %v3891_v8  ;;  %v4774_v25 = vld [vmem:[%s7370_s1 + $0x464] sm:$0xf0] }
  0x33   :  { %1934 = vmatpush.bf16.msrb.mxu3 %v3740_v23  ;;  %v3956_v23 = vor.u32 %v4808_v12, %v3955_v11  ;;  %v3883_v27 = vld [vmem:[%s7370_s1 + $0x4e0] sm:$0xf]  ;;  %v4020_v28 = vor.u32 %v4824_v16, %v4019_v15  ;;  %v4822_v33 = vld [vmem:[%s7370_s1 + $0x5e4] sm:$0xf0]  ;;  %v3820_v34 = vor.u32 %v4774_v25, %v3819_v24  ;;  %v3811_v37 = vld [vmem:[%s7370_s1 + $0x450] sm:$0xf] }
  0x34   :  { %1896 = vmatpush.bf16.msrb.mxu0 %v3540_v29  ;;  %v4790_v29 = vld [vmem:[%s7370_s1 + $0x4e4] sm:$0xf0]  ;;  %v4011_v32 = vld [vmem:[%s7370_s1 + $0x5e0] sm:$0xf]  ;;  %v4772_v38 = vld [vmem:[%s7370_s1 + $0x454] sm:$0xf0] }
  0x35   :  { %1909 = vmatpush.bf16.msrb.mxu1 %v3604_v30  ;;  %v3947_v30 = vld [vmem:[%s7370_s1 + $0x560] sm:$0xf]  ;;  %v3875_v39 = vld [vmem:[%s7370_s1 + $0x4d0] sm:$0xf]  ;;  %v4012_v40 = vor.u32 %v4822_v33, %v4011_v32  ;;  %v4804_v43 = vld [vmem:[%s7370_s1 + $0x554] sm:$0xf0]  ;;  %v3812_v46 = vor.u32 %v4772_v38, %v3811_v37 }
  0x36   :  { %1922 = vmatpush.bf16.msrb.mxu2 %v3668_v31  ;;  %v4806_v31 = vld [vmem:[%s7370_s1 + $0x564] sm:$0xf0]  ;;  %v3939_v42 = vld [vmem:[%s7370_s1 + $0x550] sm:$0xf]  ;;  %v3867_v51 = vld [vmem:[%s7370_s1 + $0x4c0] sm:$0xf] }
  0x37   :  { %1935 = vmatpush.bf16.msrb.mxu3 %v3732_v35  ;;  %v3884_v35 = vor.u32 %v4790_v29, %v3883_v27  ;;  %v3948_v36 = vor.u32 %v4806_v31, %v3947_v30  ;;  %v3940_v48 = vor.u32 %v4804_v43, %v3939_v42  ;;  %v4770_v50 = vld [vmem:[%s7370_s1 + $0x444] sm:$0xf0]  ;;  %v3931_v54 = vld [vmem:[%s7370_s1 + $0x540] sm:$0xf]  ;;  %v4784_v5 = vld [vmem:[%s7370_s1 + $0x4b4] sm:$0xf0] }
  0x38   :  { %1897 = vmatpush.bf16.msrb.mxu0 %v3532_v41  ;;  %v4788_v41 = vld [vmem:[%s7370_s1 + $0x4d4] sm:$0xf0]  ;;  %v4786_v53 = vld [vmem:[%s7370_s1 + $0x4c4] sm:$0xf0]  ;;  %v3923_v6 = vld [vmem:[%s7370_s1 + $0x530] sm:$0xf] }
  0x39   :  { %1910 = vmatpush.bf16.msrb.mxu1 %v3596_v44  ;;  %v4003_v44 = vld [vmem:[%s7370_s1 + $0x5d0] sm:$0xf]  ;;  %v3876_v47 = vor.u32 %v4788_v41, %v3875_v39  ;;  %v4802_v55 = vld [vmem:[%s7370_s1 + $0x544] sm:$0xf0]  ;;  %v3868_v59 = vor.u32 %v4786_v53, %v3867_v51  ;;  %v4800_v7 = vld [vmem:[%s7370_s1 + $0x534] sm:$0xf0] }
  0x3a   :  { %1923 = vmatpush.bf16.msrb.mxu2 %v3660_v45  ;;  %v4820_v45 = vld [vmem:[%s7370_s1 + $0x5d4] sm:$0xf0]  ;;  %v4818_v57 = vld [vmem:[%s7370_s1 + $0x5c4] sm:$0xf0]  ;;  %v3932_v60 = vor.u32 %v4802_v55, %v3931_v54  ;;  %v3987_v8 = vld [vmem:[%s7370_s1 + $0x5b0] sm:$0xf]  ;;  %v3924_v12 = vor.u32 %v4800_v7, %v3923_v6 }
  0x3b   :  { %1936 = vmatpush.bf16.msrb.mxu3 %v3724_v49  ;;  %v3803_v49 = vld [vmem:[%s7370_s1 + $0x440] sm:$0xf]  ;;  %v4004_v52 = vor.u32 %v4820_v45, %v4003_v44  ;;  %v4814_v24 = vld [vmem:[%s7370_s1 + $0x5a4] sm:$0xf0]  ;;  %v3779_v29 = vld [vmem:[%s7370_s1 + $0x410] sm:$0xf] }
  0x3c   :  { %1898 = vmatpush.bf16.msrb.mxu0 %v3524_v56  ;;  %v3995_v56 = vld [vmem:[%s7370_s1 + $0x5c0] sm:$0xf]  ;;  %v3804_v58 = vor.u32 %v4770_v50, %v3803_v49  ;;  %v4764_v30 = vld [vmem:[%s7370_s1 + $0x414] sm:$0xf0]  ;;  %v3843_v31 = vld [vmem:[%s7370_s1 + $0x490] sm:$0xf] }
  0x3d   :  { %1911 = vmatpush.bf16.msrb.mxu1 %v3588_v62  ;;  %v3795_v62 = vld [vmem:[%s7370_s1 + $0x430] sm:$0xf]  ;;  %v3996_v4 = vor.u32 %v4818_v57, %v3995_v56  ;;  %v3851_v15 = vld [vmem:[%s7370_s1 + $0x4a0] sm:$0xf]  ;;  %v4780_v33 = vld [vmem:[%s7370_s1 + $0x494] sm:$0xf0]  ;;  %v3780_v38 = vor.u32 %v4764_v30, %v3779_v29 }
  0x3e   :  { %1924 = vmatpush.bf16.msrb.mxu2 %v3652_v63  ;;  %v4768_v63 = vld [vmem:[%s7370_s1 + $0x434] sm:$0xf0]  ;;  %v3771_v39 = vld [vmem:[%s7370_s1 + $0x400] sm:$0xf]  ;;  %v3844_v41 = vor.u32 %v4780_v33, %v3843_v31  ;;  %v4778_v44 = vld [vmem:[%s7370_s1 + $0x484] sm:$0xf0] }
  0x3f   :  { %1937 = vmatpush.bf16.msrb.mxu3 %v3716_v3  ;;  %v3859_v3 = vld [vmem:[%s7370_s1 + $0x4b0] sm:$0xf]  ;;  %v3796_v10 = vor.u32 %v4768_v63, %v3795_v62  ;;  %v4812_v37 = vld [vmem:[%s7370_s1 + $0x594] sm:$0xf0]  ;;  %v3835_v43 = vld [vmem:[%s7370_s1 + $0x480] sm:$0xf] }
  0x40   :  { %1899 = vmatpush.bf16.msrb.mxu0 %v3516_v9  ;;  %v4816_v9 = vld [vmem:[%s7370_s1 + $0x5b4] sm:$0xf0]  ;;  %v3860_v11 = vor.u32 %v4784_v5, %v3859_v3  ;;  %v3899_v45 = vld [vmem:[%s7370_s1 + $0x500] sm:$0xf]  ;;  %v4810_v49 = vld [vmem:[%s7370_s1 + $0x584] sm:$0xf0]  ;;  %v3836_v57 = vor.u32 %v4778_v44, %v3835_v43 }
  0x41   :  { %1912 = vmatpush.bf16.msrb.mxu1 %v3580_v13  ;;  %v3787_v13 = vld [vmem:[%s7370_s1 + $0x420] sm:$0xf]  ;;  %v3988_v16 = vor.u32 %v4816_v9, %v3987_v8  ;;  %v4083_v50 = vld [vmem:[%s7370_s1 + $0x670] sm:$0xf]  ;;  %v4840_v51 = vld [vmem:[%s7370_s1 + $0x674] sm:$0xf0] }
  0x42   :  { %1925 = vmatpush.bf16.msrb.mxu2 %v3644_v14  ;;  %v4766_v14 = vld [vmem:[%s7370_s1 + $0x424] sm:$0xf0]  ;;  %v4856_v54 = vld [vmem:[%s7370_s1 + $0x6f4] sm:$0xf0]  ;;  %v4211_v55 = vld [vmem:[%s7370_s1 + $0x770] sm:$0xf]  ;;  %v4084_v63 = vor.u32 %v4840_v51, %v4083_v50 }
  0x43   :  { %1938 = vmatpush.bf16.msrb.mxu3 %v3708_v17  ;;  %1900 = vmatmul.bf16.vlgmr.msrb.gmra.mxu0 %v5454_v0  ;;  %v4782_v17 = vld [vmem:[%s7370_s1 + $0x4a4] sm:$0xf0]  ;;  %v3788_v25 = vor.u32 %v4766_v14, %v3787_v13  ;;  %v4872_v56 = vld [vmem:[%s7370_s1 + $0x774] sm:$0xf0]  ;;  %v4075_v3 = vld [vmem:[%s7370_s1 + $0x660] sm:$0xf] }
  0x44   :  { %1944 = vmatpush.bf16.msra.mxu0 %v3828_v18  ;;  %1913 = vmatmul.bf16.vlgmr.msrb.gmra.mxu1 %v5458_v2  ;;  %v3915_v18 = vld [vmem:[%s7370_s1 + $0x520] sm:$0xf]  ;;  %v3852_v27 = vor.u32 %v4782_v17, %v3851_v15  ;;  %v4212_v6 = vor.u32 %v4872_v56, %v4211_v55  ;;  %v4838_v8 = vld [vmem:[%s7370_s1 + $0x664] sm:$0xf0]  ;;  %v5735_v31 = vld [vmem:[#allocation1 + $0x36] sm:$0xff] }
  0x45   :  { %1957 = vmatpush.bf16.msra.mxu1 %v3892_v19  ;;  %1926 = vmatmul.bf16.vlgmr.msrb.gmra.mxu2 %v5452_v61  ;;  %v4798_v19 = vld [vmem:[%s7370_s1 + $0x524] sm:$0xf0]  ;;  %v5692_v7 = vld [vmem:[#allocation1] sm:$0xff]  ;;  %v4832_v55 = vld [vmem:[%s7370_s1 + $0x634] sm:$0xf0] }
  0x46   :  { %1970 = vmatpush.bf16.msra.mxu2 %v3956_v23  ;;  %1939 = vmatmul.bf16.vlgmr.msrb.gmra.mxu3 %v5456_v1  ;;  %v3979_v23 = vld [vmem:[%s7370_s1 + $0x5a0] sm:$0xf]  ;;  %v5705_v13 = vld [vmem:[#allocation1 + $0x9] sm:$0xff] }
  0x47   :  { %1983 = vmatpush.bf16.msra.mxu3 %v4020_v28  ;;  %v3916_v28 = vor.u32 %v4798_v19, %v3915_v18  ;;  %v3980_v32 = vor.u32 %v4814_v24, %v3979_v23  ;;  %v4139_v9 = vld [vmem:[%s7370_s1 + $0x6e0] sm:$0xf]  ;;  %v4870_v15 = vld [vmem:[%s7370_s1 + $0x764] sm:$0xf0]  ;;  %v4067_v19 = vld [vmem:[%s7370_s1 + $0x650] sm:$0xf]  ;;  %v4076_v24 = vor.u32 %v4838_v8, %v4075_v3 }
  0x48   :  { %1945 = vmatpush.bf16.msra.mxu0 %v3820_v34  ;;  %v3907_v34 = vld [vmem:[%s7370_s1 + $0x510] sm:$0xf]  ;;  %v4203_v14 = vld [vmem:[%s7370_s1 + $0x760] sm:$0xf]  ;;  %v4886_v18 = vld [vmem:[%s7370_s1 + $0x7e4] sm:$0xf0] }
  0x49   :  { %1958 = vmatpush.bf16.msra.mxu1 %v3884_v35  ;;  %v4796_v35 = vld [vmem:[%s7370_s1 + $0x514] sm:$0xf0]  ;;  %v4204_v30 = vor.u32 %v4870_v15, %v4203_v14  ;;  %v5739_v33 = vld [vmem:[#allocation1 + $0x3f] sm:$0xff]  ;;  %v4834_v43 = vld [vmem:[%s7370_s1 + $0x644] sm:$0xf0] }
  0x4a   :  { %1971 = vmatpush.bf16.msra.mxu2 %v3948_v36  ;;  %v3971_v36 = vld [vmem:[%s7370_s1 + $0x590] sm:$0xf]  ;;  %v3908_v42 = vor.u32 %v4796_v35, %v3907_v34  ;;  %v5716_v17 = vld [vmem:[#allocation1 + $0x1b] sm:$0xff]  ;;  %v4882_v50 = vld [vmem:[%s7370_s1 + $0x7c4] sm:$0xf0] }
  0x4b   :  { %1984 = vmatpush.bf16.msra.mxu3 %v4012_v40  ;;  %v4762_v40 = vld [vmem:[%s7370_s1 + $0x404] sm:$0xf0]  ;;  %v4836_v23 = vld [vmem:[%s7370_s1 + $0x654] sm:$0xf0]  ;;  %v4195_v35 = vld [vmem:[%s7370_s1 + $0x750] sm:$0xf] }
  0x4c   :  { %1946 = vmatpush.bf16.msra.mxu0 %v3812_v46  ;;  %v3972_v46 = vor.u32 %v4812_v37, %v3971_v36  ;;  %v3772_v53 = vor.u32 %v4762_v40, %v3771_v39  ;;  %v4868_v36 = vld [vmem:[%s7370_s1 + $0x754] sm:$0xf0]  ;;  %v4259_v37 = vld [vmem:[%s7370_s1 + $0x7d0] sm:$0xf]  ;;  %v4068_v39 = vor.u32 %v4836_v23, %v4067_v19  ;;  %v4123_v44 = vld [vmem:[%s7370_s1 + $0x6c0] sm:$0xf] }
  0x4d   :  { %1959 = vmatpush.bf16.msra.mxu1 %v3876_v47  ;;  %v4794_v47 = vld [vmem:[%s7370_s1 + $0x504] sm:$0xf0]  ;;  %v4115_v56 = vld [vmem:[%s7370_s1 + $0x6b0] sm:$0xf]  ;;  %v4171_v14 = vld [vmem:[%s7370_s1 + $0x720] sm:$0xf] }
  0x4e   :  { %1972 = vmatpush.bf16.msra.mxu2 %v3940_v48  ;;  %v3963_v48 = vld [vmem:[%s7370_s1 + $0x580] sm:$0xf]  ;;  %v4830_v8 = vld [vmem:[%s7370_s1 + $0x624] sm:$0xf0] }
  0x4f   :  { %1985 = vmatpush.bf16.msra.mxu3 %v4004_v52  ;;  %v4147_v52 = vld [vmem:[%s7370_s1 + $0x6f0] sm:$0xf]  ;;  %v3964_v62 = vor.u32 %v4810_v49, %v3963_v48  ;;  %v4866_v48 = vld [vmem:[%s7370_s1 + $0x744] sm:$0xf0]  ;;  %v4251_v49 = vld [vmem:[%s7370_s1 + $0x7c0] sm:$0xf] }
  0x50   :  { %1947 = vmatpush.bf16.msra.mxu0 %v3804_v58  ;;  %v3900_v58 = vor.u32 %v4794_v47, %v3899_v45  ;;  %v4148_v5 = vor.u32 %v4856_v54, %v4147_v52  ;;  %v4187_v47 = vld [vmem:[%s7370_s1 + $0x740] sm:$0xf]  ;;  %v4051_v54 = vld [vmem:[%s7370_s1 + $0x630] sm:$0xf]  ;;  %v4862_v15 = vld [vmem:[%s7370_s1 + $0x724] sm:$0xf0] }
  0x51   :  { %1960 = vmatpush.bf16.msra.mxu1 %v3868_v59  ;;  %v4275_v59 = vld [vmem:[%s7370_s1 + $0x7f0] sm:$0xf]  ;;  %v4052_v3 = vor.u32 %v4832_v55, %v4051_v54  ;;  %v4920_v55 = vld [vmem:[%s7370_s1 + $0x8f4] sm:$0xf0] }
  0x52   :  { %1973 = vmatpush.bf16.msra.mxu2 %v3932_v60  ;;  %v4888_v60 = vld [vmem:[%s7370_s1 + $0x7f4] sm:$0xf0] }
  0x53   :  { %1986 = vmatpush.bf16.msra.mxu3 %v3996_v4  ;;  %v23_v4 = vld [vmem:[%s7371_s0 + $0x10] sm:$0x7] }
  0x54   :  { %1948 = vmatpush.bf16.msra.mxu0 %v3796_v10  ;;  %v4854_v10 = vld [vmem:[%s7370_s1 + $0x6e4] sm:$0xf0] }
  0x55   :  { %1961 = vmatpush.bf16.msra.mxu1 %v3860_v11  ;;  %v4276_v11 = vor.u32 %v4888_v60, %v4275_v59  ;;  %v4140_v29 = vor.u32 %v4854_v10, %v4139_v9  ;;  %v4179_v59 = vld [vmem:[%s7370_s1 + $0x730] sm:$0xf]  ;;  %v4864_v60 = vld [vmem:[%s7370_s1 + $0x734] sm:$0xf0]  ;;  %v4107_v9 = vld [vmem:[%s7370_s1 + $0x6a0] sm:$0xf] }
  0x56   :  { %1974 = vmatpush.bf16.msra.mxu2 %v3924_v12  ;;  %v5703_v12 = vld [vmem:[#allocation1 + $0x12] sm:$0xff] }
  0x57   :  { %1987 = vmatpush.bf16.msra.mxu3 %v3988_v16  ;;  %v4267_v16 = vld [vmem:[%s7370_s1 + $0x7e0] sm:$0xf] }
  0x58   :  { %1949 = vmatpush.bf16.msra.mxu0 %v3788_v25  ;;  %v4131_v25 = vld [vmem:[%s7370_s1 + $0x6d0] sm:$0xf]  ;;  %v4268_v34 = vor.u32 %v4886_v18, %v4267_v16  ;;  %v4235_v16 = vld [vmem:[%s7370_s1 + $0x7a0] sm:$0xf]  ;;  %v4878_v18 = vld [vmem:[%s7370_s1 + $0x7a4] sm:$0xf0] }
  0x59   :  { %1962 = vmatpush.bf16.msra.mxu1 %v3852_v27  ;;  %v4852_v27 = vld [vmem:[%s7370_s1 + $0x6d4] sm:$0xf0] }
  0x5a   :  { %1975 = vmatpush.bf16.msra.mxu2 %v3916_v28  ;;  %v5733_v28 = vld [vmem:[#allocation1 + $0x24] sm:$0xff]  ;;  %v4132_v40 = vor.u32 %v4852_v27, %v4131_v25  ;;  %v4035_v25 = vld [vmem:[%s7370_s1 + $0x610] sm:$0xf]  ;;  %v4828_v27 = vld [vmem:[%s7370_s1 + $0x614] sm:$0xf0] }
  0x5b   :  { %1988 = vmatpush.bf16.msra.mxu3 %v3980_v32  ;;  %v5737_v32 = vld [vmem:[#allocation1 + $0x2d] sm:$0xff] }
  0x5c   :  { %1950 = vmatpush.bf16.msra.mxu0 %v3780_v38  ;;  %345 = vst [vmem:[#allocation1] ss:$9 sm:$0xff] %v23_v4  ;;  %v4884_v38 = vld [vmem:[%s7370_s1 + $0x7d4] sm:$0xf0] }
  0x5d   :  { %1963 = vmatpush.bf16.msra.mxu1 %v3844_v41  ;;  %v4196_v41 = vor.u32 %v4868_v36, %v4195_v35  ;;  %v4260_v45 = vor.u32 %v4884_v38, %v4259_v37  ;;  %v4163_v35 = vld [vmem:[%s7370_s1 + $0x710] sm:$0xf]  ;;  %v4860_v36 = vld [vmem:[%s7370_s1 + $0x714] sm:$0xf0] }
  0x5e   :  { %1976 = vmatpush.bf16.msra.mxu2 %v3908_v42  ;;  %v4059_v42 = vld [vmem:[%s7370_s1 + $0x640] sm:$0xf]  ;;  %v4227_v37 = vld [vmem:[%s7370_s1 + $0x790] sm:$0xf]  ;;  %v4876_v38 = vld [vmem:[%s7370_s1 + $0x794] sm:$0xf0] }
  0x5f   :  { %1989 = vmatpush.bf16.msra.mxu3 %v3972_v46  ;;  %v4850_v46 = vld [vmem:[%s7370_s1 + $0x6c4] sm:$0xf0]  ;;  %v4060_v51 = vor.u32 %v4834_v43, %v4059_v42  ;;  %v4164_v43 = vor.u32 %v4860_v36, %v4163_v35  ;;  %v4411_v35 = vld [vmem:[%s7370_s1 + $0x900] sm:$0xf] }
  0x60   :  { %1951 = vmatpush.bf16.msra.mxu0 %v3772_v53  ;;  %v4124_v52 = vor.u32 %v4850_v46, %v4123_v44  ;;  %v4188_v53 = vor.u32 %v4866_v48, %v4187_v47  ;;  %v4091_v44 = vld [vmem:[%s7370_s1 + $0x680] sm:$0xf]  ;;  %v4228_v47 = vor.u32 %v4876_v38, %v4227_v37  ;;  %v4858_v48 = vld [vmem:[%s7370_s1 + $0x704] sm:$0xf0]  ;;  %v4643_v37 = vld [vmem:[%s7370_s1 + $0x54] sm:$0xf] }
  0x61   :  { %1964 = vmatpush.bf16.msra.mxu1 %v3836_v57  ;;  %v4252_v57 = vor.u32 %v4882_v50, %v4251_v49  ;;  %v4155_v46 = vld [vmem:[%s7370_s1 + $0x700] sm:$0xf]  ;;  %v4874_v50 = vld [vmem:[%s7370_s1 + $0x784] sm:$0xf0]  ;;  %v3301_v38 = vld [vmem:[%s7370_s1 + $0x58] sm:$0xf0] }
  0x62   :  { %1977 = vmatpush.bf16.msra.mxu2 %v3900_v58  ;;  %v4848_v58 = vld [vmem:[%s7370_s1 + $0x6b4] sm:$0xf0]  ;;  %v4219_v49 = vld [vmem:[%s7370_s1 + $0x780] sm:$0xf]  ;;  %v4922_v36 = vld [vmem:[%s7370_s1 + $0x904] sm:$0xf0] }
  0x63   :  { %1990 = vmatpush.bf16.msra.mxu3 %v3964_v62  ;;  %1952 = vmatmul.bf16.vlgmr.msra.gmra.mxu0 %v5692_v7  ;;  %v4243_v62 = vld [vmem:[%s7370_s1 + $0x7b0] sm:$0xf]  ;;  %v4116_v4 = vor.u32 %v4848_v58, %v4115_v56  ;;  %v4427_v56 = vld [vmem:[%s7370_s1 + $0x920] sm:$0xf] }
  0x64   :  { %1996 = vmatpush.bf16.msrb.mxu0 %v4084_v63  ;;  %1965 = vmatmul.bf16.vlgmr.msra.gmra.mxu1 %v5705_v13  ;;  %v4880_v63 = vld [vmem:[%s7370_s1 + $0x7b4] sm:$0xf0] }
  0x65   :  { %2009 = vmatpush.bf16.msrb.mxu1 %v4148_v5  ;;  %1978 = vmatmul.bf16.vlgmr.msra.gmra.mxu2 %v5703_v12  ;;  %v4180_v5 = vor.u32 %v4864_v60, %v4179_v59  ;;  %v4244_v10 = vor.u32 %v4880_v63, %v4243_v62  ;;  %v4156_v59 = vor.u32 %v4858_v48, %v4155_v46  ;;  %v4647_v60 = vld [vmem:[%s7370_s1 + $0x74] sm:$0xf]  ;;  %v3317_v62 = vld [vmem:[%s7370_s1 + $0x78] sm:$0xf0]  ;;  %v4379_v48 = vld [vmem:[%s7370_s1 + $0x8c0] sm:$0xf] }
  0x66   :  { %2022 = vmatpush.bf16.msrb.mxu2 %v4212_v6  ;;  %1991 = vmatmul.bf16.vlgmr.msra.gmra.mxu3 %v5716_v17  ;;  %v4043_v6 = vld [vmem:[%s7370_s1 + $0x620] sm:$0xf]  ;;  %v4220_v63 = vor.u32 %v4874_v50, %v4219_v49  ;;  %v3304_v46 = vor.u32 %v4643_v37, %v3301_v38  ;;  %v4914_v49 = vld [vmem:[%s7370_s1 + $0x8c4] sm:$0xf0]  ;;  %v4641_v50 = vld [vmem:[%s7370_s1 + $0x44] sm:$0xf] }
  0x67   :  { %2035 = vmatpush.bf16.msrb.mxu3 %v4276_v11  ;;  %v4846_v11 = vld [vmem:[%s7370_s1 + $0x6a4] sm:$0xf0]  ;;  %v4044_v19 = vor.u32 %v4830_v8, %v4043_v6  ;;  %v4331_v6 = vld [vmem:[%s7370_s1 + $0x860] sm:$0xf]  ;;  %v4355_v37 = vld [vmem:[%s7370_s1 + $0x890] sm:$0xf] }
  0x68   :  { %1997 = vmatpush.bf16.msrb.mxu0 %v4076_v24  ;;  %v4108_v23 = vor.u32 %v4846_v11, %v4107_v9  ;;  %v4172_v24 = vor.u32 %v4862_v15, %v4171_v14  ;;  %v4902_v8 = vld [vmem:[%s7370_s1 + $0x864] sm:$0xf0]  ;;  %v4395_v9 = vld [vmem:[%s7370_s1 + $0x8e0] sm:$0xf]  ;;  %v4419_v14 = vld [vmem:[%s7370_s1 + $0x910] sm:$0xf] }
  0x69   :  { %2010 = vmatpush.bf16.msrb.mxu1 %v4140_v29  ;;  %v4099_v29 = vld [vmem:[%s7370_s1 + $0x690] sm:$0xf]  ;;  %v4918_v11 = vld [vmem:[%s7370_s1 + $0x8e4] sm:$0xf0]  ;;  %v4924_v15 = vld [vmem:[%s7370_s1 + $0x914] sm:$0xf0] }
  0x6a   :  { %2023 = vmatpush.bf16.msrb.mxu2 %v4204_v30  ;;  %v4236_v30 = vor.u32 %v4878_v18, %v4235_v16  ;;  %v4645_v16 = vld [vmem:[%s7370_s1 + $0x64] sm:$0xf]  ;;  %v3309_v18 = vld [vmem:[%s7370_s1 + $0x68] sm:$0xf0]  ;;  %v4908_v38 = vld [vmem:[%s7370_s1 + $0x894] sm:$0xf0] }
  0x6b   :  { %2036 = vmatpush.bf16.msrb.mxu3 %v4268_v34  ;;  %v4844_v34 = vld [vmem:[%s7370_s1 + $0x694] sm:$0xf0] }
  0x6c   :  { %1998 = vmatpush.bf16.msrb.mxu0 %v4068_v39  ;;  %v4036_v39 = vor.u32 %v4828_v27, %v4035_v25  ;;  %v4100_v42 = vor.u32 %v4844_v34, %v4099_v29  ;;  %v4420_v25 = vor.u32 %v4924_v15, %v4419_v14  ;;  %v4900_v27 = vld [vmem:[%s7370_s1 + $0x854] sm:$0xf0]  ;;  %v4387_v29 = vld [vmem:[%s7370_s1 + $0x8d0] sm:$0xf]  ;;  %v3312_v34 = vor.u32 %v4645_v16, %v3309_v18  ;;  %v4363_v15 = vld [vmem:[%s7370_s1 + $0x8a0] sm:$0xf] }
  0x6d   :  { %2011 = vmatpush.bf16.msrb.mxu1 %v4132_v40  ;;  %v4027_v40 = vld [vmem:[%s7370_s1 + $0x600] sm:$0xf]  ;;  %v4910_v16 = vld [vmem:[%s7370_s1 + $0x8a4] sm:$0xf0]  ;;  %v4637_v18 = vld [vmem:[%s7370_s1 + $0x24] sm:$0xf] }
  0x6e   :  { %2024 = vmatpush.bf16.msrb.mxu2 %v4196_v41  ;;  %v4826_v41 = vld [vmem:[%s7370_s1 + $0x604] sm:$0xf0] }
  0x6f   :  { %2037 = vmatpush.bf16.msrb.mxu3 %v4260_v45  ;;  %v4842_v45 = vld [vmem:[%s7370_s1 + $0x684] sm:$0xf0]  ;;  %v4028_v54 = vor.u32 %v4826_v41, %v4027_v40  ;;  %v3381_v40 = vld [vmem:[%s7370_s1 + $0xf8] sm:$0xf0] }
  0x70   :  { %1999 = vmatpush.bf16.msrb.mxu0 %v4060_v51  ;;  %v4339_v51 = vld [vmem:[%s7370_s1 + $0x870] sm:$0xf]  ;;  %v4092_v58 = vor.u32 %v4842_v45, %v4091_v44  ;;  %v4315_v44 = vld [vmem:[%s7370_s1 + $0x840] sm:$0xf]  ;;  %v4898_v45 = vld [vmem:[%s7370_s1 + $0x844] sm:$0xf0] }
  0x71   :  { %2012 = vmatpush.bf16.msrb.mxu1 %v4124_v52  ;;  %v4904_v52 = vld [vmem:[%s7370_s1 + $0x874] sm:$0xf0] }
  0x72   :  { %2025 = vmatpush.bf16.msrb.mxu2 %v4188_v53  ;;  %v4403_v53 = vld [vmem:[%s7370_s1 + $0x8f0] sm:$0xf] }
  0x73   :  { %2038 = vmatpush.bf16.msrb.mxu3 %v4252_v57  ;;  %v4926_v57 = vld [vmem:[%s7370_s1 + $0x924] sm:$0xf0] }
  0x74   :  { %2000 = vmatpush.bf16.msrb.mxu0 %v4052_v3  ;;  %v4340_v3 = vor.u32 %v4904_v52, %v4339_v51  ;;  %v3293_v51 = vld [vmem:[%s7370_s1 + $0x48] sm:$0xf0]  ;;  %v4661_v52 = vld [vmem:[%s7370_s1 + $0xe4] sm:$0xf] }
  0x75   :  { %2013 = vmatpush.bf16.msrb.mxu1 %v4116_v4  ;;  %v4404_v4 = vor.u32 %v4920_v55, %v4403_v53  ;;  %v3373_v53 = vld [vmem:[%s7370_s1 + $0xe8] sm:$0xf0]  ;;  %v4380_v55 = vor.u32 %v4914_v49, %v4379_v48  ;;  %v4906_v48 = vld [vmem:[%s7370_s1 + $0x884] sm:$0xf0]  ;;  %v4633_v49 = vld [vmem:[%s7370_s1 + $0x4] sm:$0xf] }
  0x76   :  { %2026 = vmatpush.bf16.msrb.mxu2 %v4180_v5  ;;  %v4428_v5 = vor.u32 %v4926_v57, %v4427_v56  ;;  %v4307_v56 = vld [vmem:[%s7370_s1 + $0x830] sm:$0xf]  ;;  %v4896_v57 = vld [vmem:[%s7370_s1 + $0x834] sm:$0xf0] }
  0x77   :  { %2039 = vmatpush.bf16.msrb.mxu3 %v4244_v10  ;;  %v3320_v10 = vor.u32 %v4647_v60, %v3317_v62  ;;  %v4371_v60 = vld [vmem:[%s7370_s1 + $0x8b0] sm:$0xf]  ;;  %v4912_v62 = vld [vmem:[%s7370_s1 + $0x8b4] sm:$0xf0] }
  0x78   :  { %2001 = vmatpush.bf16.msrb.mxu0 %v4044_v19  ;;  %v4332_v19 = vor.u32 %v4902_v8, %v4331_v6  ;;  %v4308_v6 = vor.u32 %v4896_v57, %v4307_v56  ;;  %v4372_v8 = vor.u32 %v4912_v62, %v4371_v60  ;;  %v3341_v56 = vld [vmem:[%s7370_s1 + $0xa8] sm:$0xf0]  ;;  %v4695_v57 = vld [vmem:[%s7370_s1 + $0x1f4] sm:$0xf]  ;;  %v3573_v62 = vld [vmem:[%s7370_s1 + $0x278] sm:$0xf0] }
  0x79   :  { %2014 = vmatpush.bf16.msrb.mxu1 %v4108_v23  ;;  %v4323_v23 = vld [vmem:[%s7370_s1 + $0x850] sm:$0xf]  ;;  %v4711_v60 = vld [vmem:[%s7370_s1 + $0x274] sm:$0xf] }
  0x7a   :  { %2027 = vmatpush.bf16.msrb.mxu2 %v4172_v24  ;;  %v4396_v24 = vor.u32 %v4918_v11, %v4395_v9  ;;  %v4324_v41 = vor.u32 %v4900_v27, %v4323_v23  ;;  %v4299_v9 = vld [vmem:[%s7370_s1 + $0x820] sm:$0xf]  ;;  %v4657_v23 = vld [vmem:[%s7370_s1 + $0xc4] sm:$0xf]  ;;  %v348_v27 = vld [vmem:[#allocation1 + $0x12] sm:$0xff] }
  0x7b   :  { %2040 = vmatpush.bf16.msrb.mxu3 %v4236_v30  ;;  %v4916_v30 = vld [vmem:[%s7370_s1 + $0x8d4] sm:$0xf0] }
  0x7c   :  { %2002 = vmatpush.bf16.msrb.mxu0 %v4036_v39  ;;  %v4663_v39 = vld [vmem:[%s7370_s1 + $0xf4] sm:$0xf] }
  0x7d   :  { %2015 = vmatpush.bf16.msrb.mxu1 %v4100_v42  ;;  %v4388_v42 = vor.u32 %v4916_v30, %v4387_v29  ;;  %v4364_v29 = vor.u32 %v4910_v16, %v4363_v15  ;;  %v4291_v30 = vld [vmem:[%s7370_s1 + $0x810] sm:$0xf]  ;;  %v4693_v15 = vld [vmem:[%s7370_s1 + $0x1e4] sm:$0xf]  ;;  %v3501_v16 = vld [vmem:[%s7370_s1 + $0x1e8] sm:$0xf0] }
  0x7e   :  { %2028 = vmatpush.bf16.msrb.mxu2 %v4164_v43  ;;  %v4412_v43 = vor.u32 %v4922_v36, %v4411_v35 }
  0x7f   :  { %2041 = vmatpush.bf16.msrb.mxu3 %v4228_v47  ;;  %v3384_v47 = vor.u32 %v4663_v39, %v3381_v40  ;;  %v4635_v39 = vld [vmem:[%s7370_s1 + $0x14] sm:$0xf]  ;;  %v3269_v40 = vld [vmem:[%s7370_s1 + $0x18] sm:$0xf0] }
  0x80   :  { %2003 = vmatpush.bf16.msrb.mxu0 %v4028_v54  ;;  %v4316_v54 = vor.u32 %v4898_v45, %v4315_v44  ;;  %v4283_v44 = vld [vmem:[%s7370_s1 + $0x800] sm:$0xf]  ;;  %v4890_v45 = vld [vmem:[%s7370_s1 + $0x804] sm:$0xf0] }
  0x81   :  { %2016 = vmatpush.bf16.msrb.mxu1 %v4092_v58  ;;  %v3296_v58 = vor.u32 %v4641_v50, %v3293_v51  ;;  %v3272_v50 = vor.u32 %v4635_v39, %v3269_v40  ;;  %v3493_v39 = vld [vmem:[%s7370_s1 + $0x1d8] sm:$0xf0]  ;;  %v4707_v40 = vld [vmem:[%s7370_s1 + $0x254] sm:$0xf] }
  0x82   :  { %2029 = vmatpush.bf16.msrb.mxu2 %v4156_v59  ;;  %v3376_v59 = vor.u32 %v4661_v52, %v3373_v53  ;;  %v3261_v52 = vld [vmem:[%s7370_s1 + $0x8] sm:$0xf0]  ;;  %v4679_v53 = vld [vmem:[%s7370_s1 + $0x174] sm:$0xf] }
  0x83   :  { %2042 = vmatpush.bf16.msrb.mxu3 %v4220_v63  ;;  %2004 = vmatmul.bf16.vlgmr.msrb.gmra.mxu0 %v5733_v28  ;;  %v4639_v63 = vld [vmem:[%s7370_s1 + $0x34] sm:$0xf] }
  0x84   :  { %2048 = vmatpush.bf16.msra.mxu0 %v4340_v3  ;;  %2017 = vmatmul.bf16.vlgmr.msrb.gmra.mxu1 %v5737_v32  ;;  %v3285_v3 = vld [vmem:[%s7370_s1 + $0x38] sm:$0xf0] }
  0x85   :  { %2061 = vmatpush.bf16.msra.mxu1 %v4404_v4  ;;  %2030 = vmatmul.bf16.vlgmr.msrb.gmra.mxu2 %v5735_v31  ;;  %v4659_v4 = vld [vmem:[%s7370_s1 + $0xd4] sm:$0xf]  ;;  %v3288_v11 = vor.u32 %v4639_v63, %v3285_v3 }
  0x86   :  { %2079 = vmatpush.bf16.msra.mxu2 %v4428_v5  ;;  %2043 = vmatmul.bf16.vlgmr.msrb.gmra.mxu3 %v5739_v33  ;;  %v3365_v5 = vld [vmem:[%s7370_s1 + $0xd8] sm:$0xf0] }
  0x87   :  { %2087 = vmatpush.bf16.msra.mxu3 %v3320_v10  ;;  %v4894_v10 = vld [vmem:[%s7370_s1 + $0x824] sm:$0xf0]  ;;  %v3368_v14 = vor.u32 %v4659_v4, %v3365_v5  ;;  %v3264_v4 = vor.u32 %v4633_v49, %v3261_v52  ;;  %v4705_v52 = vld [vmem:[%s7370_s1 + $0x244] sm:$0xf] }
  0x88   :  { %2049 = vmatpush.bf16.msra.mxu0 %v4332_v19  ;;  %v3277_v19 = vld [vmem:[%s7370_s1 + $0x28] sm:$0xf0] }
  0x89   :  { %2062 = vmatpush.bf16.msra.mxu1 %v4396_v24  ;;  %v3357_v24 = vld [vmem:[%s7370_s1 + $0xc8] sm:$0xf0]  ;;  %v3280_v35 = vor.u32 %v4637_v18, %v3277_v19  ;;  %v4709_v18 = vld [vmem:[%s7370_s1 + $0x264] sm:$0xf] }
  0x8a   :  { %2080 = vmatpush.bf16.msra.mxu2 %v4420_v25  ;;  %v4300_v25 = vor.u32 %v4894_v10, %v4299_v9  ;;  %v3360_v36 = vor.u32 %v4657_v23, %v3357_v24  ;;  %v3576_v10 = vor.u32 %v4711_v60, %v3573_v62  ;;  %v3565_v19 = vld [vmem:[%s7370_s1 + $0x268] sm:$0xf0]  ;;  %v346_v23 = vld [vmem:[#allocation1] sm:$0xff]  ;;  %v4687_v62 = vld [vmem:[%s7370_s1 + $0x1b4] sm:$0xf] }
  0x8b   :  { %2088 = vmatpush.bf16.msra.mxu3 %v3312_v34  ;;  %v4892_v34 = vld [vmem:[%s7370_s1 + $0x814] sm:$0xf0]  ;;  %v347_v24 = vld [vmem:[#allocation1 + $0x9] sm:$0xff] }
  0x8c   :  { %2050 = vmatpush.bf16.msra.mxu0 %v4324_v41  ;;  %v4655_v41 = vld [vmem:[%s7370_s1 + $0xb4] sm:$0xf] }
  0x8d   :  { %2063 = vmatpush.bf16.msra.mxu1 %v4388_v42  ;;  %v3349_v42 = vld [vmem:[%s7370_s1 + $0xb8] sm:$0xf0] }
  0x8e   :  { %2081 = vmatpush.bf16.msra.mxu2 %v4412_v43  ;;  %v4292_v43 = vor.u32 %v4892_v34, %v4291_v30  ;;  %v3352_v51 = vor.u32 %v4655_v41, %v3349_v42  ;;  %v3429_v30 = vld [vmem:[%s7370_s1 + $0x158] sm:$0xf0]  ;;  %v3504_v34 = vor.u32 %v4693_v15, %v3501_v16 }
  0x8f   :  { %2089 = vmatpush.bf16.msra.mxu3 %v3304_v46  ;;  %v4356_v46 = vor.u32 %v4908_v38, %v4355_v37  ;;  %v3325_v37 = vld [vmem:[%s7370_s1 + $0x88] sm:$0xf0]  ;;  %v4691_v38 = vld [vmem:[%s7370_s1 + $0x1d4] sm:$0xf]  ;;  %v3557_v41 = vld [vmem:[%s7370_s1 + $0x258] sm:$0xf0] }
  0x90   :  { %2051 = vmatpush.bf16.msra.mxu0 %v4316_v54  ;;  %v3445_v54 = vld [vmem:[%s7370_s1 + $0x178] sm:$0xf0]  ;;  %v3560_v49 = vor.u32 %v4707_v40, %v3557_v41 }
  0x91   :  { %2064 = vmatpush.bf16.msra.mxu1 %v4380_v55  ;;  %v4653_v55 = vld [vmem:[%s7370_s1 + $0xa4] sm:$0xf]  ;;  %v3448_v3 = vor.u32 %v4679_v53, %v3445_v54  ;;  %v3549_v53 = vld [vmem:[%s7370_s1 + $0x248] sm:$0xf0] }
  0x92   :  { %2100 = vmatpush.bf16.msrb.mxu2 %v3384_v47  ;;  %v4347_v47 = vld [vmem:[%s7370_s1 + $0x880] sm:$0xf]  ;;  %v3344_v5 = vor.u32 %v4653_v55, %v3341_v56  ;;  %v4725_v55 = vld [vmem:[%s7370_s1 + $0x2e4] sm:$0xf]  ;;  %v3629_v56 = vld [vmem:[%s7370_s1 + $0x2e8] sm:$0xf0]  ;;  %v3552_v60 = vor.u32 %v4705_v52, %v3549_v53 }
  0x93   :  { %2090 = vmatpush.bf16.msra.mxu3 %v3296_v58  ;;  %v4284_v58 = vor.u32 %v4890_v45, %v4283_v44  ;;  %v4348_v63 = vor.u32 %v4906_v48, %v4347_v47  ;;  %v3637_v44 = vld [vmem:[%s7370_s1 + $0x2f8] sm:$0xf0]  ;;  %v3421_v47 = vld [vmem:[%s7370_s1 + $0x148] sm:$0xf0]  ;;  %v3496_v48 = vor.u32 %v4691_v38, %v3493_v39  ;;  %v4683_v39 = vld [vmem:[%s7370_s1 + $0x194] sm:$0xf] }
  0x94   :  { %2052 = vmatpush.bf16.msra.mxu0 %v4308_v6  ;;  %v4677_v6 = vld [vmem:[%s7370_s1 + $0x164] sm:$0xf] }
  0x95   :  { %2065 = vmatpush.bf16.msra.mxu1 %v4372_v8  ;;  %4433 = vmatmul.msk.bf16.vlgmr.msra.gmra.mxu2 %vm1837_vm0, %v348_v27  ;;  %v3437_v8 = vld [vmem:[%s7370_s1 + $0x168] sm:$0xf0] }
  0x96   :  { %2101 = vmatpush.bf16.msrb.mxu2 %v3376_v59  ;;  %v3509_v59 = vld [vmem:[%s7370_s1 + $0x1f8] sm:$0xf0] }
  0x97   :  { %2091 = vmatpush.bf16.msra.mxu3 %v3288_v11  ;;  %v3512_v9 = vor.u32 %v4695_v57, %v3509_v59  ;;  %v4651_v11 = vld [vmem:[%s7370_s1 + $0x94] sm:$0xf] }
  0x98   :  { %2053 = vmatpush.bf16.msra.mxu0 %v4300_v25  ;;  %v3440_v25 = vor.u32 %v4677_v6, %v3437_v8  ;;  %v4671_v57 = vld [vmem:[%s7370_s1 + $0x134] sm:$0xf]  ;;  %v318_v6 = vld [vmem:[%s7372_s2] sm:$0x3] }
  0x99   :  { %2066 = vmatpush.bf16.msra.mxu1 %v4364_v29  ;;  %v4675_v29 = vld [vmem:[%s7370_s1 + $0x154] sm:$0xf] }
  0x9a   :  { %2102 = vmatpush.bf16.msrb.mxu2 %v3368_v14  ;;  %v3333_v14 = vld [vmem:[%s7370_s1 + $0x98] sm:$0xf0]  ;;  %v3432_v42 = vor.u32 %v4675_v29, %v3429_v30  ;;  %v4721_v29 = vld [vmem:[%s7370_s1 + $0x2c4] sm:$0xf]  ;;  %v3613_v30 = vld [vmem:[%s7370_s1 + $0x2c8] sm:$0xf0] }
  0x9b   :  { %2092 = vmatpush.bf16.msra.mxu3 %v3280_v35  ;;  %v3336_v27 = vor.u32 %v4651_v11, %v3333_v14  ;;  %v3568_v35 = vor.u32 %v4709_v18, %v3565_v19  ;;  %v4669_v11 = vld [vmem:[%s7370_s1 + $0x124] sm:$0xf]  ;;  %v3405_v14 = vld [vmem:[%s7370_s1 + $0x128] sm:$0xf0]  ;;  %v320_v19 = vperm.slane %v318_v6, 0 }
  0x9c   :  { %2054 = vmatpush.bf16.msra.mxu0 %v4292_v43  ;;  %v4727_v43 = vld [vmem:[%s7370_s1 + $0x2f4] sm:$0xf]  ;;  %v4685_v18 = vld [vmem:[%s7370_s1 + $0x1a4] sm:$0xf] }
  0x9d   :  { %2067 = vmatpush.bf16.msra.mxu1 %v4356_v46  ;;  %v4673_v46 = vld [vmem:[%s7370_s1 + $0x144] sm:$0xf]  ;;  %v4759_v6 = vld [vmem:[%s7370_s1 + $0x3f4] sm:$0xf] }
  0x9e   :  { %2103 = vmatpush.bf16.msrb.mxu2 %v3360_v36  ;;  %v4649_v36 = vld [vmem:[%s7370_s1 + $0x84] sm:$0xf]  ;;  %v3424_v54 = vor.u32 %v4673_v46, %v3421_v47  ;;  %v4719_v47 = vld [vmem:[%s7370_s1 + $0x2b4] sm:$0xf] }
  0x9f   :  { %2093 = vmatpush.bf16.msra.mxu3 %v3272_v50  ;;  %v3328_v45 = vor.u32 %v4649_v36, %v3325_v37  ;;  %v4689_v50 = vld [vmem:[%s7370_s1 + $0x1c4] sm:$0xf] }
  0xa0   :  { %2055 = vmatpush.bf16.msra.mxu0 %v4284_v58  ;;  %v3413_v58 = vld [vmem:[%s7370_s1 + $0x138] sm:$0xf0] }
  0xa1   :  { %2068 = vmatpush.bf16.msra.mxu1 %v4348_v63  ;;  %v3477_v63 = vld [vmem:[%s7370_s1 + $0x1b8] sm:$0xf0]  ;;  %v3416_v8 = vor.u32 %v4671_v57, %v3413_v58 }
  0xa2   :  { %2104 = vmatpush.bf16.msrb.mxu2 %v3352_v51  ;;  %v3640_v51 = vor.u32 %v4727_v43, %v3637_v44  ;;  %v3480_v15 = vor.u32 %v4687_v62, %v3477_v63  ;;  %v3461_v43 = vld [vmem:[%s7370_s1 + $0x198] sm:$0xf0]  ;;  %v4699_v44 = vld [vmem:[%s7370_s1 + $0x214] sm:$0xf]  ;;  %v4717_v62 = vld [vmem:[%s7370_s1 + $0x2a4] sm:$0xf] }
  0xa3   :  { %2094 = vmatpush.bf16.msra.mxu3 %v3264_v4  ;;  %2056 = vmatmul.bf16.vlgmr.msra.gmra.mxu0 %v346_v23  ;;  %v4703_v4 = vld [vmem:[%s7370_s1 + $0x234] sm:$0xf]  ;;  %v1849_v36 = vpop.f32.mrf.mxu0  ;;  %v3464_v52 = vor.u32 %v4683_v39, %v3461_v43 }
  0xa4   :  { %2113 = vmatpush.bf16.msrb.mxu0 %v3448_v3  ;;  %2069 = vmatmul.bf16.vlgmr.msra.gmra.mxu1 %v347_v24  ;;  %v3632_v3 = vor.u32 %v4725_v55, %v3629_v56  ;;  %v4701_v24 = vld [vmem:[%s7370_s1 + $0x224] sm:$0xf]  ;;  %v1850_v40 = vadd.f32 %v1849_v36, %v320_v19  ;;  %v4743_v55 = vld [vmem:[%s7370_s1 + $0x374] sm:$0xf]  ;;  %v3701_v56 = vld [vmem:[%s7370_s1 + $0x378] sm:$0xf0] }
  0xa5   :  { %2126 = vmatpush.bf16.msrb.mxu1 %v3512_v9  ;;  %v4723_v9 = vld [vmem:[%s7370_s1 + $0x2d4] sm:$0xf]  ;;  %v4741_v19 = vld [vmem:[%s7370_s1 + $0x364] sm:$0xf] }
  0xa6   :  { %2105 = vmatpush.bf16.msrb.mxu2 %v3344_v5  ;;  %2095 = vmatmul.bf16.vlgmr.msra.gmra.mxu3 %v5361_v21  ;;  %v3485_v21 = vld [vmem:[%s7370_s1 + $0x1c8] sm:$0xf0]  ;;  %v3541_v5 = vld [vmem:[%s7370_s1 + $0x238] sm:$0xf0]  ;;  %v4739_v39 = vld [vmem:[%s7370_s1 + $0x354] sm:$0xf] }
  0xa7   :  { %2139 = vmatpush.bf16.msrb.mxu3 %v3576_v10  ;;  %v3488_v59 = vor.u32 %v4689_v50, %v3485_v21  ;;  %v3621_v10 = vld [vmem:[%s7370_s1 + $0x2d8] sm:$0xf0]  ;;  %v3544_v16 = vor.u32 %v4703_v4, %v3541_v5  ;;  %v1862_v41 = vpop.f32.mrf.mxu1  ;;  %v4665_v50 = vld [vmem:[%s7370_s1 + $0x104] sm:$0xf]  ;;  %v3597_v5 = vld [vmem:[%s7370_s1 + $0x2a8] sm:$0xf0] }
  0xa8   :  { %2114 = vmatpush.bf16.msrb.mxu0 %v3440_v25  ;;  %v3624_v23 = vor.u32 %v4723_v9, %v3621_v10  ;;  %v3533_v25 = vld [vmem:[%s7370_s1 + $0x228] sm:$0xf0]  ;;  %v4681_v21 = vld [vmem:[%s7370_s1 + $0x184] sm:$0xf]  ;;  %v3704_v9 = vor.u32 %v4743_v55, %v3701_v56  ;;  %v4775_v10 = vld [vmem:[%s7370_s1 + $0x474] sm:$0xf] }
  0xa9   :  { %2127 = vmatpush.bf16.msrb.mxu1 %v3504_v34  ;;  %v4667_v34 = vld [vmem:[%s7370_s1 + $0x114] sm:$0xf]  ;;  %v3536_v38 = vor.u32 %v4701_v24, %v3533_v25  ;;  %v3600_v24 = vor.u32 %v4717_v62, %v3597_v5  ;;  %v3805_v62 = vld [vmem:[%s7370_s1 + $0x448] sm:$0xf0]  ;;  %v3669_v5 = vld [vmem:[%s7370_s1 + $0x338] sm:$0xf0] }
  0xaa   :  { %2106 = vmatpush.bf16.msrb.mxu2 %v3336_v27  ;;  %v3408_v27 = vor.u32 %v4669_v11, %v3405_v14  ;;  %v1875_v57 = vpop.f32.mrf.mxu2  ;;  %v3829_v11 = vld [vmem:[%s7370_s1 + $0x478] sm:$0xf0] }
  0xab   :  { %2140 = vmatpush.bf16.msrb.mxu3 %v3568_v35  ;;  %v3397_v35 = vld [vmem:[%s7370_s1 + $0x118] sm:$0xf0] }
  0xac   :  { %2115 = vmatpush.bf16.msrb.mxu0 %v3432_v42  ;;  %v3616_v42 = vor.u32 %v4721_v29, %v3613_v30  ;;  %v3400_v46 = vor.u32 %v4667_v34, %v3397_v35  ;;  %v3832_v29 = vor.u32 %v4775_v10, %v3829_v11  ;;  %v3589_v30 = vld [vmem:[%s7370_s1 + $0x298] sm:$0xf0]  ;;  %v4757_v34 = vld [vmem:[%s7370_s1 + $0x3e4] sm:$0xf]  ;;  %v3757_v35 = vld [vmem:[%s7370_s1 + $0x3e8] sm:$0xf0] }
  0xad   :  { %2128 = vmatpush.bf16.msrb.mxu1 %v3496_v48  ;;  %v3605_v48 = vld [vmem:[%s7370_s1 + $0x2b8] sm:$0xf0]  ;;  %v3760_v43 = vor.u32 %v4757_v34, %v3757_v35  ;;  %v4751_v11 = vld [vmem:[%s7370_s1 + $0x3b4] sm:$0xf] }
  0xae   :  { %2107 = vmatpush.bf16.msrb.mxu2 %v3328_v45  ;;  %v3525_v45 = vld [vmem:[%s7370_s1 + $0x218] sm:$0xf0]  ;;  %v3608_v58 = vor.u32 %v4719_v47, %v3605_v48  ;;  %v4755_v48 = vld [vmem:[%s7370_s1 + $0x3d4] sm:$0xf] }
  0xaf   :  { %2141 = vmatpush.bf16.msrb.mxu3 %v3560_v49  ;;  %v1863_v49 = vadd.f32 %v1862_v41, %v1850_v40  ;;  %v3528_v53 = vor.u32 %v4699_v44, %v3525_v45  ;;  %v3685_v40 = vld [vmem:[%s7370_s1 + $0x358] sm:$0xf0]  ;;  %v4713_v44 = vld [vmem:[%s7370_s1 + $0x284] sm:$0xf]  ;;  %v3581_v45 = vld [vmem:[%s7370_s1 + $0x288] sm:$0xf0] }
  0xb0   :  { %2116 = vmatpush.bf16.msrb.mxu0 %v3424_v54  ;;  %v3453_v54 = vld [vmem:[%s7370_s1 + $0x188] sm:$0xf0]  ;;  %v3584_v55 = vor.u32 %v4713_v44, %v3581_v45  ;;  %v4731_v45 = vld [vmem:[%s7370_s1 + $0x314] sm:$0xf] }
  0xb1   :  { %2108 = vmatmul.bf16.vlgmr.msrb.gmra.mxu2 %v5372_v26  ;;  %2129 = vmatpush.bf16.msrb.mxu1 %v3488_v59  ;;  %v3469_v26 = vld [vmem:[%s7370_s1 + $0x1a8] sm:$0xf0]  ;;  %v4697_v59 = vld [vmem:[%s7370_s1 + $0x204] sm:$0xf]  ;;  %v1876_v63 = vadd.f32 %v1875_v57, %v1863_v49  ;;  %v3749_v49 = vld [vmem:[%s7370_s1 + $0x3d8] sm:$0xf0] }
  0xb2   :  { %2152 = vmatpush.bf16.msra.mxu2 %v3640_v51  ;;  %v3472_v37 = vor.u32 %v4685_v18, %v3469_v26  ;;  %v3389_v51 = vld [vmem:[%s7370_s1 + $0x108] sm:$0xf0]  ;;  %v1864_v26 = vpop.f32.mrf.mxu1  ;;  %v1877_v41 = vpop.f32.mrf.mxu2  ;;  %v3752_v56 = vor.u32 %v4755_v48, %v3749_v49 }
  0xb3   :  { %2142 = vmatpush.bf16.msrb.mxu3 %v3552_v60  ;;  %v3517_v60 = vld [vmem:[%s7370_s1 + $0x208] sm:$0xf0]  ;;  %v3392_v4 = vor.u32 %v4665_v50, %v3389_v51  ;;  %v4771_v50 = vld [vmem:[%s7370_s1 + $0x454] sm:$0xf]  ;;  %v3688_v51 = vor.u32 %v4739_v39, %v3685_v40  ;;  %v3797_v26 = vld [vmem:[%s7370_s1 + $0x438] sm:$0xf0] }
  0xb4   :  { %2117 = vmatpush.bf16.msrb.mxu0 %v3416_v8  ;;  %v3765_v8 = vld [vmem:[%s7370_s1 + $0x3f8] sm:$0xf0]  ;;  %v3520_v18 = vor.u32 %v4697_v59, %v3517_v60  ;;  %v3741_v59 = vld [vmem:[%s7370_s1 + $0x3c8] sm:$0xf0]  ;;  %v4769_v60 = vld [vmem:[%s7370_s1 + $0x444] sm:$0xf] }
  0xb5   :  { %2130 = vmatpush.bf16.msrb.mxu1 %v3480_v15  ;;  %v1851_v15 = vpop.f32.mrf.mxu0  ;;  %v3768_v25 = vor.u32 %v4759_v6, %v3765_v8  ;;  %v3789_v40 = vld [vmem:[%s7370_s1 + $0x428] sm:$0xf0]  ;;  %v4785_v41 = vld [vmem:[%s7370_s1 + $0x4c4] sm:$0xf] }
  0xb6   :  { %2153 = vmatpush.bf16.msra.mxu2 %v3632_v3  ;;  %v1888_v3 = vpop.f32.mrf.mxu3  ;;  %v3733_v15 = vld [vmem:[%s7370_s1 + $0x3b8] sm:$0xf0] }
  0xb7   :  { %2143 = vmatpush.bf16.msrb.mxu3 %v3544_v16  ;;  %v6295_v14 = vadd.f32 %v1888_v3, %v1876_v63  ;;  %v3456_v16 = vor.u32 %v4681_v21, %v3453_v54  ;;  %v3813_v21 = vld [vmem:[%s7370_s1 + $0x458] sm:$0xf0]  ;;  %v3677_v54 = vld [vmem:[%s7370_s1 + $0x348] sm:$0xf0]  ;;  %v4789_v63 = vld [vmem:[%s7370_s1 + $0x4e4] sm:$0xf] }
  0xb8   :  { %2118 = vmatpush.bf16.msrb.mxu0 %v3408_v27  ;;  %v4715_v27 = vld [vmem:[%s7370_s1 + $0x294] sm:$0xf]  ;;  %v3816_v57 = vor.u32 %v4771_v50, %v3813_v21  ;;  %v3885_v3 = vld [vmem:[%s7370_s1 + $0x4e8] sm:$0xf0] }
  0xb9   :  { %2131 = vmatpush.bf16.msrb.mxu1 %v3472_v37  ;;  %v4773_v37 = vld [vmem:[%s7370_s1 + $0x464] sm:$0xf]  ;;  %v3888_v10 = vor.u32 %v4789_v63, %v3885_v3  ;;  %v4747_v21 = vld [vmem:[%s7370_s1 + $0x394] sm:$0xf] }
  0xba   :  { %2154 = vmatpush.bf16.msra.mxu2 %v3624_v23  ;;  %v3693_v23 = vld [vmem:[%s7370_s1 + $0x368] sm:$0xf0] }
  0xbb   :  { %2144 = vmatpush.bf16.msrb.mxu3 %v3536_v38  ;;  %v3696_v36 = vor.u32 %v4741_v19, %v3693_v23  ;;  %v3821_v38 = vld [vmem:[%s7370_s1 + $0x468] sm:$0xf0] }
  0xbc   :  { %2119 = vmatpush.bf16.msrb.mxu0 %v3400_v46  ;;  %v3824_v47 = vor.u32 %v4773_v37, %v3821_v38  ;;  %v4765_v37 = vld [vmem:[%s7370_s1 + $0x424] sm:$0xf] }
  0xbd   :  { %2132 = vmatpush.bf16.msrb.mxu1 %v3464_v52  ;;  %v4791_v52 = vld [vmem:[%s7370_s1 + $0x4f4] sm:$0xf]  ;;  %v3792_v50 = vor.u32 %v4765_v37, %v3789_v40  ;;  %v4013_v37 = vld [vmem:[%s7370_s1 + $0x5e8] sm:$0xf0] }
  0xbe   :  { %2155 = vmatpush.bf16.msra.mxu2 %v3616_v42  ;;  %v3592_v42 = vor.u32 %v4715_v27, %v3589_v30  ;;  %v1890_v46 = vpop.f32.mrf.mxu3  ;;  %v3736_v30 = vor.u32 %v4751_v11, %v3733_v15  ;;  %v3853_v11 = vld [vmem:[%s7370_s1 + $0x4a8] sm:$0xf0]  ;;  %v4823_v15 = vld [vmem:[%s7370_s1 + $0x5f4] sm:$0xf] }
  0xbf   :  { %2145 = vmatpush.bf16.msrb.mxu3 %v3528_v53  ;;  %v3893_v53 = vld [vmem:[%s7370_s1 + $0x4f8] sm:$0xf0] }
  0xc0   :  { %2120 = vmatpush.bf16.msrb.mxu0 %v3392_v4  ;;  %v4735_v4 = vld [vmem:[%s7370_s1 + $0x334] sm:$0xf]  ;;  %v1901_v8 = vpop.f32.mrf.mxu0  ;;  %v3653_v46 = vld [vmem:[%s7370_s1 + $0x318] sm:$0xf0] }
  0xc1   :  { %2133 = vmatpush.bf16.msrb.mxu1 %v3456_v16  ;;  %v4767_v16 = vld [vmem:[%s7370_s1 + $0x434] sm:$0xf]  ;;  %v1914_v19 = vpop.f32.mrf.mxu1  ;;  %v3672_v23 = vor.u32 %v4735_v4, %v3669_v5  ;;  %v3709_v4 = vld [vmem:[%s7370_s1 + $0x388] sm:$0xf0]  ;;  %v4761_v5 = vld [vmem:[%s7370_s1 + $0x404] sm:$0xf] }
  0xc2   :  { %2156 = vmatpush.bf16.msra.mxu2 %v3608_v58  ;;  %v3896_v58 = vor.u32 %v4791_v52, %v3893_v53  ;;  %v3800_v34 = vor.u32 %v4767_v16, %v3797_v26  ;;  %v3717_v52 = vld [vmem:[%s7370_s1 + $0x398] sm:$0xf0]  ;;  %v4763_v53 = vld [vmem:[%s7370_s1 + $0x414] sm:$0xf] }
  0xc3   :  { %2146 = vmatpush.bf16.msrb.mxu3 %v3520_v18  ;;  %2121 = vmatmul.bf16.vlgmr.msrb.gmra.mxu0 %v5359_v20  ;;  %v4737_v20 = vld [vmem:[%s7370_s1 + $0x344] sm:$0xf]  ;;  %v1902_v18 = vadd.f32 %v1901_v8, %v6295_v14  ;;  %v4085_v26 = vld [vmem:[%s7370_s1 + $0x678] sm:$0xf0] }
  0xc4   :  { %2165 = vmatpush.bf16.msra.mxu0 %v3704_v9  ;;  %2134 = vmatmul.bf16.vlgmr.msrb.gmra.mxu1 %v5363_v22  ;;  %v3680_v22 = vor.u32 %v4737_v20, %v3677_v54  ;;  %v3808_v9 = vor.u32 %v4769_v60, %v3805_v62  ;;  %v4733_v14 = vld [vmem:[%s7370_s1 + $0x324] sm:$0xf]  ;;  %v3656_v54 = vor.u32 %v4731_v45, %v3653_v46  ;;  %v3957_v62 = vld [vmem:[%s7370_s1 + $0x578] sm:$0xf0] }
  0xc5   :  { %2178 = vmatpush.bf16.msra.mxu1 %v3768_v25  ;;  %v3877_v25 = vld [vmem:[%s7370_s1 + $0x4d8] sm:$0xf0]  ;;  %v1915_v27 = vadd.f32 %v1914_v19, %v1902_v18  ;;  %v4745_v60 = vld [vmem:[%s7370_s1 + $0x384] sm:$0xf] }
  0xc6   :  { %2157 = vmatpush.bf16.msra.mxu2 %v3600_v24  ;;  %2147 = vmatmul.bf16.vlgmr.msrb.gmra.mxu3 %v5454_v0  ;;  %v4753_v0 = vld [vmem:[%s7370_s1 + $0x3c4] sm:$0xf]  ;;  %v4787_v24 = vld [vmem:[%s7370_s1 + $0x4d4] sm:$0xf]  ;;  %v4021_v19 = vld [vmem:[%s7370_s1 + $0x5f8] sm:$0xf0] }
  0xc7   :  { %2191 = vmatpush.bf16.msra.mxu3 %v3832_v29  ;;  %v3744_v6 = vor.u32 %v4753_v0, %v3741_v59  ;;  %v3661_v29 = vld [vmem:[%s7370_s1 + $0x328] sm:$0xf0]  ;;  %v3880_v35 = vor.u32 %v4787_v24, %v3877_v25  ;;  %v3720_v59 = vor.u32 %v4747_v21, %v3717_v52  ;;  %v3712_v24 = vor.u32 %v4745_v60, %v3709_v4  ;;  %v4777_v46 = vld [vmem:[%s7370_s1 + $0x484] sm:$0xf]  ;;  %v4069_v21 = vld [vmem:[%s7370_s1 + $0x658] sm:$0xf0] }
  0xc8   :  { %2166 = vmatpush.bf16.msra.mxu0 %v3696_v36  ;;  %v4749_v36 = vld [vmem:[%s7370_s1 + $0x3a4] sm:$0xf]  ;;  %v1927_v38 = vpop.f32.mrf.mxu2  ;;  %v3664_v39 = vor.u32 %v4733_v14, %v3661_v29  ;;  %v1903_v49 = vpop.f32.mrf.mxu0  ;;  %v3645_v0 = vld [vmem:[%s7370_s1 + $0x308] sm:$0xf0]  ;;  %v3925_v4 = vld [vmem:[%s7370_s1 + $0x538] sm:$0xf0] }
  0xc9   :  { %2179 = vmatpush.bf16.msra.mxu1 %v3760_v43  ;;  %v1928_v43 = vadd.f32 %v1927_v38, %v1915_v27  ;;  %v1940_v44 = vpop.f32.mrf.mxu3  ;;  %v1916_v20 = vpop.f32.mrf.mxu1  ;;  %v4805_v14 = vld [vmem:[%s7370_s1 + $0x564] sm:$0xf]  ;;  %v3949_v29 = vld [vmem:[%s7370_s1 + $0x568] sm:$0xf0]  ;;  %v4819_v49 = vld [vmem:[%s7370_s1 + $0x5d4] sm:$0xf] }
  0xca   :  { %2158 = vmatpush.bf16.msra.mxu2 %v3592_v42  ;;  %v3869_v42 = vld [vmem:[%s7370_s1 + $0x4c8] sm:$0xf0]  ;;  %v4837_v38 = vld [vmem:[%s7370_s1 + $0x664] sm:$0xf]  ;;  %v3952_v40 = vor.u32 %v4805_v14, %v3949_v29 }
  0xcb   :  { %2192 = vmatpush.bf16.msra.mxu3 %v3824_v47  ;;  %v6434_v48 = vadd.f32 %v1940_v44, %v1928_v43  ;;  %v3941_v43 = vld [vmem:[%s7370_s1 + $0x558] sm:$0xf0]  ;;  %v4801_v20 = vld [vmem:[%s7370_s1 + $0x544] sm:$0xf]  ;;  %v3981_v29 = vld [vmem:[%s7370_s1 + $0x5a8] sm:$0xf0] }
  0xcc   :  { %2167 = vmatpush.bf16.msra.mxu0 %v3688_v51  ;;  %v3872_v51 = vor.u32 %v4785_v41, %v3869_v42  ;;  %v4803_v42 = vld [vmem:[%s7370_s1 + $0x554] sm:$0xf] }
  0xcd   :  { %2180 = vmatpush.bf16.msra.mxu1 %v3752_v56  ;;  %v4783_v56 = vld [vmem:[%s7370_s1 + $0x4b4] sm:$0xf]  ;;  %v3944_v52 = vor.u32 %v4803_v42, %v3941_v43 }
  0xce   :  { %2159 = vmatpush.bf16.msra.mxu2 %v3584_v55  ;;  %v3781_v55 = vld [vmem:[%s7370_s1 + $0x418] sm:$0xf0] }
  0xcf   :  { %2193 = vmatpush.bf16.msra.mxu3 %v3816_v57  ;;  %v3861_v57 = vld [vmem:[%s7370_s1 + $0x4b8] sm:$0xf0]  ;;  %v3784_v63 = vor.u32 %v4763_v53, %v3781_v55 }
  0xd0   :  { %2168 = vmatpush.bf16.msra.mxu0 %v3680_v22  ;;  %v4807_v22 = vld [vmem:[%s7370_s1 + $0x574] sm:$0xf]  ;;  %v3864_v3 = vor.u32 %v4783_v56, %v3861_v57  ;;  %v1929_v8 = vpop.f32.mrf.mxu2  ;;  %v4817_v56 = vld [vmem:[%s7370_s1 + $0x5c4] sm:$0xf] }
  0xd1   :  { %2160 = vmatmul.bf16.vlgmr.msra.gmra.mxu2 %v5458_v2  ;;  %2181 = vmatpush.bf16.msra.mxu1 %v3744_v6  ;;  %v3725_v2 = vld [vmem:[%s7370_s1 + $0x3a8] sm:$0xf0]  ;;  %v1942_v16 = vpop.f32.mrf.mxu3  ;;  %v3960_v18 = vor.u32 %v4807_v22, %v3957_v62  ;;  %v4853_v22 = vld [vmem:[%s7370_s1 + $0x6e4] sm:$0xf] }
  0xd2   :  { %2204 = vmatpush.bf16.msrb.mxu2 %v3896_v58  ;;  %v3728_v47 = vor.u32 %v4749_v36, %v3725_v2  ;;  %v4729_v58 = vld [vmem:[%s7370_s1 + $0x304] sm:$0xf]  ;;  %v3773_v6 = vld [vmem:[%s7370_s1 + $0x408] sm:$0xf0]  ;;  %v3845_v36 = vld [vmem:[%s7370_s1 + $0x498] sm:$0xf0] }
  0xd3   :  { %2194 = vmatpush.bf16.msra.mxu3 %v3808_v9  ;;  %v3648_v9 = vor.u32 %v4729_v58, %v3645_v0  ;;  %v3776_v25 = vor.u32 %v4761_v5, %v3773_v6  ;;  %v4821_v2 = vld [vmem:[%s7370_s1 + $0x5e4] sm:$0xf]  ;;  %v3997_v58 = vld [vmem:[%s7370_s1 + $0x5c8] sm:$0xf0]  ;;  %v4053_v16 = vld [vmem:[%s7370_s1 + $0x638] sm:$0xf0] }
  0xd4   :  { %2169 = vmatpush.bf16.msra.mxu0 %v3672_v23  ;;  %v4839_v23 = vld [vmem:[%s7370_s1 + $0x674] sm:$0xf]  ;;  %v4016_v44 = vor.u32 %v4821_v2, %v4013_v37  ;;  %v4833_v0 = vld [vmem:[%s7370_s1 + $0x644] sm:$0xf]  ;;  %v4141_v62 = vld [vmem:[%s7370_s1 + $0x6e8] sm:$0xf0]  ;;  %v4000_v5 = vor.u32 %v4817_v56, %v3997_v58 }
  0xd5   :  { %2182 = vmatpush.bf16.msra.mxu1 %v3736_v30  ;;  %v4024_v30 = vor.u32 %v4823_v15, %v4021_v19  ;;  %v4831_v15 = vld [vmem:[%s7370_s1 + $0x634] sm:$0xf]  ;;  %v4849_v2 = vld [vmem:[%s7370_s1 + $0x6c4] sm:$0xf]  ;;  %v4125_v37 = vld [vmem:[%s7370_s1 + $0x6c8] sm:$0xf0] }
  0xd6   :  { %2205 = vmatpush.bf16.msrb.mxu2 %v3888_v10  ;;  %v4781_v10 = vld [vmem:[%s7370_s1 + $0x4a4] sm:$0xf]  ;;  %v4851_v19 = vld [vmem:[%s7370_s1 + $0x6d4] sm:$0xf]  ;;  %v4213_v56 = vld [vmem:[%s7370_s1 + $0x778] sm:$0xf0] }
  0xd7   :  { %2195 = vmatpush.bf16.msra.mxu3 %v3800_v34  ;;  %v3856_v27 = vor.u32 %v4781_v10, %v3853_v11  ;;  %v4088_v34 = vor.u32 %v4839_v23, %v4085_v26  ;;  %v4144_v10 = vor.u32 %v4853_v22, %v4141_v62  ;;  %v3989_v11 = vld [vmem:[%s7370_s1 + $0x5b8] sm:$0xf0]  ;;  %v4797_v26 = vld [vmem:[%s7370_s1 + $0x524] sm:$0xf]  ;;  %v4109_v22 = vld [vmem:[%s7370_s1 + $0x6a8] sm:$0xf0] }
  0xd8   :  { %2170 = vmatpush.bf16.msra.mxu0 %v3664_v39  ;;  %v4077_v39 = vld [vmem:[%s7370_s1 + $0x668] sm:$0xf0]  ;;  %v4133_v23 = vld [vmem:[%s7370_s1 + $0x6d8] sm:$0xf0]  ;;  %v4825_v58 = vld [vmem:[%s7370_s1 + $0x604] sm:$0xf] }
  0xd9   :  { %2183 = vmatpush.bf16.msra.mxu1 %v3728_v47  ;;  %v4080_v45 = vor.u32 %v4837_v38, %v4077_v39  ;;  %v3837_v47 = vld [vmem:[%s7370_s1 + $0x488] sm:$0xf0]  ;;  %v4136_v14 = vor.u32 %v4851_v19, %v4133_v23  ;;  %v4795_v39 = vld [vmem:[%s7370_s1 + $0x514] sm:$0xf]  ;;  %v4869_v23 = vld [vmem:[%s7370_s1 + $0x764] sm:$0xf] }
  0xda   :  { %2206 = vmatpush.bf16.msrb.mxu2 %v3880_v35  ;;  %v4779_v35 = vld [vmem:[%s7370_s1 + $0x494] sm:$0xf]  ;;  %v3840_v53 = vor.u32 %v4777_v46, %v3837_v47  ;;  %v4128_v46 = vor.u32 %v4849_v2, %v4125_v37  ;;  %v3973_v47 = vld [vmem:[%s7370_s1 + $0x598] sm:$0xf0]  ;;  %v4093_v37 = vld [vmem:[%s7370_s1 + $0x688] sm:$0xf0] }
  0xdb   :  { %2196 = vmatpush.bf16.msra.mxu3 %v3792_v50  ;;  %v3848_v41 = vor.u32 %v4779_v35, %v3845_v36  ;;  %v4005_v50 = vld [vmem:[%s7370_s1 + $0x5d8] sm:$0xf0]  ;;  %v4887_v62 = vld [vmem:[%s7370_s1 + $0x7f4] sm:$0xf] }
  0xdc   :  { %2171 = vmatpush.bf16.msra.mxu0 %v3656_v54  ;;  %v4008_v54 = vor.u32 %v4819_v49, %v4005_v50  ;;  %v4827_v49 = vld [vmem:[%s7370_s1 + $0x614] sm:$0xf]  ;;  %v4037_v50 = vld [vmem:[%s7370_s1 + $0x618] sm:$0xf0] }
  0xdd   :  { %2184 = vmatpush.bf16.msra.mxu1 %v3720_v59  ;;  %v4061_v59 = vld [vmem:[%s7370_s1 + $0x648] sm:$0xf0]  ;;  %v4843_v19 = vld [vmem:[%s7370_s1 + $0x694] sm:$0xf] }
  0xde   :  { %2207 = vmatpush.bf16.msrb.mxu2 %v3872_v51  ;;  %v4835_v51 = vld [vmem:[%s7370_s1 + $0x654] sm:$0xf]  ;;  %v4064_v6 = vor.u32 %v4833_v0, %v4061_v59  ;;  %v4029_v0 = vld [vmem:[%s7370_s1 + $0x608] sm:$0xf0]  ;;  %v4845_v59 = vld [vmem:[%s7370_s1 + $0x6a4] sm:$0xf] }
  0xdf   :  { %2197 = vmatpush.bf16.msra.mxu3 %v3784_v63  ;;  %v4072_v55 = vor.u32 %v4835_v51, %v4069_v21  ;;  %v4847_v21 = vld [vmem:[%s7370_s1 + $0x6b4] sm:$0xf] }
  0xe0   :  { %2172 = vmatpush.bf16.msra.mxu0 %v3648_v9  ;;  %v6577_v63 = vpop.f32.mrf.mxu0  ;;  %v4815_v9 = vld [vmem:[%s7370_s1 + $0x5b4] sm:$0xf] }
  0xe1   :  { %2185 = vmatpush.bf16.msra.mxu1 %v3712_v24  ;;  %v6585_v8 = vpop.f32.mrf.mxu1  ;;  %v3917_v24 = vld [vmem:[%s7370_s1 + $0x528] sm:$0xf0] }
  0xe2   :  { %2208 = vmatpush.bf16.msrb.mxu2 %v3864_v3  ;;  %v4799_v3 = vld [vmem:[%s7370_s1 + $0x534] sm:$0xf]  ;;  %v3920_v36 = vor.u32 %v4797_v26, %v3917_v24  ;;  %v4205_v26 = vld [vmem:[%s7370_s1 + $0x768] sm:$0xf0] }
  0xe3   :  { %2198 = vmatpush.bf16.msra.mxu3 %v3776_v25  ;;  %2173 = vmatmul.bf16.vlgmr.msra.gmra.mxu0 %v5452_v61  ;;  %v4855_v61 = vld [vmem:[%s7370_s1 + $0x6f4] sm:$0xf]  ;;  %v4056_v25 = vor.u32 %v4831_v15, %v4053_v16  ;;  %v4032_v15 = vor.u32 %v4825_v58, %v4029_v0  ;;  %v4112_v16 = vor.u32 %v4845_v59, %v4109_v22  ;;  %v4181_v58 = vld [vmem:[%s7370_s1 + $0x738] sm:$0xf0] }
  0xe4   :  { %2217 = vmatpush.bf16.msrb.mxu0 %v3960_v18  ;;  %2186 = vmatmul.bf16.vlgmr.msra.gmra.mxu1 %v5456_v1  ;;  %v4149_v1 = vld [vmem:[%s7370_s1 + $0x6f8] sm:$0xf0]  ;;  %v3928_v18 = vor.u32 %v4799_v3, %v3925_v4  ;;  %v4879_v22 = vld [vmem:[%s7370_s1 + $0x7b4] sm:$0xf] }
  0xe5   :  { %2230 = vmatpush.bf16.msrb.mxu1 %v4024_v30  ;;  %v4152_v57 = vor.u32 %v4855_v61, %v4149_v1  ;;  %v4829_v30 = vld [vmem:[%s7370_s1 + $0x624] sm:$0xf]  ;;  %v3901_v1 = vld [vmem:[%s7370_s1 + $0x508] sm:$0xf0]  ;;  %v4277_v3 = vld [vmem:[%s7370_s1 + $0x7f8] sm:$0xf0] }
  0xe6   :  { %2209 = vmatpush.bf16.msrb.mxu2 %v3856_v27  ;;  %2199 = vmatmul.bf16.vlgmr.msra.gmra.mxu3 %v5692_v7  ;;  %v3933_v7 = vld [vmem:[%s7370_s1 + $0x548] sm:$0xf0]  ;;  %v4813_v27 = vld [vmem:[%s7370_s1 + $0x5a4] sm:$0xf] }
  0xe7   :  { %2243 = vmatpush.bf16.msrb.mxu3 %v4088_v34  ;;  %v3936_v60 = vor.u32 %v4801_v20, %v3933_v7  ;;  %v4045_v34 = vld [vmem:[%s7370_s1 + $0x628] sm:$0xf0]  ;;  %v3984_v42 = vor.u32 %v4813_v27, %v3981_v29  ;;  %v4793_v61 = vld [vmem:[%s7370_s1 + $0x504] sm:$0xf]  ;;  %v4040_v7 = vor.u32 %v4827_v49, %v4037_v50 }
  0xe8   :  { %2218 = vmatpush.bf16.msrb.mxu0 %v3952_v40  ;;  %v6624_v35 = vpop.f32.mrf.mxu2  ;;  %v3909_v40 = vld [vmem:[%s7370_s1 + $0x518] sm:$0xf0]  ;;  %v4048_v43 = vor.u32 %v4829_v30, %v4045_v34  ;;  %v4269_v27 = vld [vmem:[%s7370_s1 + $0x7e8] sm:$0xf0]  ;;  %v4208_v30 = vor.u32 %v4869_v23, %v4205_v26  ;;  %v4841_v34 = vld [vmem:[%s7370_s1 + $0x684] sm:$0xf] }
  0xe9   :  { %2231 = vmatpush.bf16.msrb.mxu1 %v4016_v44  ;;  %v6632_v38 = vpop.f32.mrf.mxu3  ;;  %v4811_v44 = vld [vmem:[%s7370_s1 + $0x594] sm:$0xf]  ;;  %v3912_v51 = vor.u32 %v4795_v39, %v3909_v40  ;;  %v4333_v29 = vld [vmem:[%s7370_s1 + $0x868] sm:$0xf0]  ;;  %v4197_v40 = vld [vmem:[%s7370_s1 + $0x758] sm:$0xf0]  ;;  %v4096_v49 = vor.u32 %v4841_v34, %v4093_v37 }
  0xea   :  { %2210 = vmatpush.bf16.msrb.mxu2 %v3848_v41  ;;  %v1955_v41 = vpop.f32.mrf.mxu0  ;;  %v3976_v20 = vor.u32 %v4811_v44, %v3973_v47  ;;  %v4867_v39 = vld [vmem:[%s7370_s1 + $0x754] sm:$0xf]  ;;  %v4189_v50 = vld [vmem:[%s7370_s1 + $0x748] sm:$0xf0]  ;;  %v4893_v23 = vld [vmem:[%s7370_s1 + $0x824] sm:$0xf] }
  0xeb   :  { %2244 = vmatpush.bf16.msrb.mxu3 %v4080_v45  ;;  %v1968_v45 = vpop.f32.mrf.mxu1  ;;  %v4899_v44 = vld [vmem:[%s7370_s1 + $0x854] sm:$0xf]  ;;  %v4200_v47 = vor.u32 %v4867_v39, %v4197_v40  ;;  %v4301_v26 = vld [vmem:[%s7370_s1 + $0x828] sm:$0xf0]  ;;  %v4165_v34 = vld [vmem:[%s7370_s1 + $0x718] sm:$0xf0] }
  0xec   :  { %2219 = vmatpush.bf16.msrb.mxu0 %v3944_v52  ;;  %v4117_v52 = vld [vmem:[%s7370_s1 + $0x6b8] sm:$0xf0]  ;;  %v4919_v45 = vld [vmem:[%s7370_s1 + $0x8f4] sm:$0xf] }
  0xed   :  { %2232 = vmatpush.bf16.msrb.mxu1 %v4008_v54  ;;  %v3965_v54 = vld [vmem:[%s7370_s1 + $0x588] sm:$0xf0]  ;;  %v4875_v39 = vld [vmem:[%s7370_s1 + $0x794] sm:$0xf]  ;;  %v4229_v40 = vld [vmem:[%s7370_s1 + $0x798] sm:$0xf0] }
  0xee   :  { %2211 = vmatpush.bf16.msrb.mxu2 %v3840_v53  ;;  %v4809_v53 = vld [vmem:[%s7370_s1 + $0x584] sm:$0xf] }
  0xef   :  { %2245 = vmatpush.bf16.msrb.mxu3 %v4072_v55  ;;  %v4871_v55 = vld [vmem:[%s7370_s1 + $0x774] sm:$0xf] }
  0xf0   :  { %2220 = vmatpush.bf16.msrb.mxu0 %v3936_v60  ;;  %v3904_v60 = vor.u32 %v4793_v61, %v3901_v1  ;;  %v1981_v4 = vpop.f32.mrf.mxu2  ;;  %v4253_v61 = vld [vmem:[%s7370_s1 + $0x7c8] sm:$0xf0]  ;;  %v4897_v1 = vld [vmem:[%s7370_s1 + $0x844] sm:$0xf] }
  0xf1   :  { %2212 = vmatmul.bf16.vlgmr.msrb.gmra.mxu2 %v5705_v13  ;;  %2233 = vmatpush.bf16.msrb.mxu1 %v4000_v5  ;;  %v3992_v13 = vor.u32 %v4815_v9, %v3989_v11  ;;  %v4216_v5 = vor.u32 %v4871_v55, %v4213_v56  ;;  %v4341_v9 = vld [vmem:[%s7370_s1 + $0x878] sm:$0xf0]  ;;  %v3968_v11 = vor.u32 %v4809_v53, %v3965_v54  ;;  %v4317_v53 = vld [vmem:[%s7370_s1 + $0x848] sm:$0xf0] }
  0xf2   :  { %2256 = vmatpush.bf16.msra.mxu2 %v4152_v57  ;;  %v4120_v57 = vor.u32 %v4847_v21, %v4117_v52  ;;  %v4881_v52 = vld [vmem:[%s7370_s1 + $0x7c4] sm:$0xf]  ;;  %v4320_v0 = vor.u32 %v4897_v1, %v4317_v53  ;;  %v4309_v4 = vld [vmem:[%s7370_s1 + $0x838] sm:$0xf0]  ;;  %v4285_v1 = vld [vmem:[%s7370_s1 + $0x808] sm:$0xf0] }
  0xf3   :  { %2246 = vmatpush.bf16.msrb.mxu3 %v4064_v6  ;;  %v4903_v6 = vld [vmem:[%s7370_s1 + $0x874] sm:$0xf]  ;;  %v4256_v56 = vor.u32 %v4881_v52, %v4253_v61  ;;  %v4925_v52 = vld [vmem:[%s7370_s1 + $0x924] sm:$0xf]  ;;  %v4429_v61 = vld [vmem:[%s7370_s1 + $0x928] sm:$0xf0] }
  0xf4   :  { %2221 = vmatpush.bf16.msrb.mxu0 %v3928_v18  ;;  %v4280_v18 = vor.u32 %v4887_v62, %v4277_v3  ;;  %v4344_v24 = vor.u32 %v4903_v6, %v4341_v9  ;;  %v4245_v62 = vld [vmem:[%s7370_s1 + $0x7b8] sm:$0xf0]  ;;  %v4895_v3 = vld [vmem:[%s7370_s1 + $0x834] sm:$0xf]  ;;  %v4909_v53 = vld [vmem:[%s7370_s1 + $0x8a4] sm:$0xf] }
  0xf5   :  { %2234 = vmatpush.bf16.msrb.mxu1 %v3992_v13  ;;  %v4101_v13 = vld [vmem:[%s7370_s1 + $0x698] sm:$0xf0] }
  0xf6   :  { %2257 = vmatpush.bf16.msra.mxu2 %v4144_v10  ;;  %v1994_v10 = vpop.f32.mrf.mxu3  ;;  %v4389_v6 = vld [vmem:[%s7370_s1 + $0x8d8] sm:$0xf0] }
  0xf7   :  { %2247 = vmatpush.bf16.msrb.mxu3 %v4056_v25  ;;  %v4885_v25 = vld [vmem:[%s7370_s1 + $0x7e4] sm:$0xf]  ;;  %v4248_v10 = vor.u32 %v4879_v22, %v4245_v62 }
  0xf8   :  { %2222 = vmatpush.bf16.msrb.mxu0 %v3920_v36  ;;  %v4104_v36 = vor.u32 %v4843_v19, %v4101_v13  ;;  %v4272_v2 = vor.u32 %v4885_v25, %v4269_v27  ;;  %v4237_v19 = vld [vmem:[%s7370_s1 + $0x7a8] sm:$0xf0] }
  0xf9   :  { %2235 = vmatpush.bf16.msrb.mxu1 %v3984_v42  ;;  %v4883_v42 = vld [vmem:[%s7370_s1 + $0x7d4] sm:$0xf]  ;;  %v4381_v13 = vld [vmem:[%s7370_s1 + $0x8c8] sm:$0xf0] }
  0xfa   :  { %2258 = vmatpush.bf16.msra.mxu2 %v4136_v14  ;;  %v4901_v14 = vld [vmem:[%s7370_s1 + $0x864] sm:$0xf] }
  0xfb   :  { %2248 = vmatpush.bf16.msrb.mxu3 %v4048_v43  ;;  %v4336_v41 = vor.u32 %v4901_v14, %v4333_v29  ;;  %v4261_v43 = vld [vmem:[%s7370_s1 + $0x7d8] sm:$0xf0] }
  0xfc   :  { %2223 = vmatpush.bf16.msrb.mxu0 %v3912_v51 }
  0xfd   :  { %2236 = vmatpush.bf16.msrb.mxu1 %v3976_v20  ;;  %v4917_v20 = vld [vmem:[%s7370_s1 + $0x8e4] sm:$0xf] }
  0xfe   :  { %2259 = vmatpush.bf16.msra.mxu2 %v4128_v46  ;;  %v4405_v46 = vld [vmem:[%s7370_s1 + $0x8f8] sm:$0xf0] }
  0xff   :  { %2249 = vmatpush.bf16.msrb.mxu3 %v4040_v7  ;;  %v4408_v21 = vor.u32 %v4919_v45, %v4405_v46  ;;  %v4397_v7 = vld [vmem:[%s7370_s1 + $0x8e8] sm:$0xf0]  ;;  %v4857_v46 = vld [vmem:[%s7370_s1 + $0x704] sm:$0xf] }
 0x100   :  { %2224 = vmatpush.bf16.msrb.mxu0 %v3904_v60  ;;  %v6781_v55 = vpop.f32.mrf.mxu0  ;;  %v4400_v60 = vor.u32 %v4917_v20, %v4397_v7  ;;  %v4365_v20 = vld [vmem:[%s7370_s1 + $0x8a8] sm:$0xf0]  ;;  %v1954_v7 = vadd.f32 %v6577_v63, %v6434_v48  ;;  %v4923_v48 = vld [vmem:[%s7370_s1 + $0x914] sm:$0xf]  ;;  %v4421_v63 = vld [vmem:[%s7370_s1 + $0x918] sm:$0xf0] }
 0x101   :  { %2237 = vmatpush.bf16.msrb.mxu1 %v3968_v11  ;;  %v6789_v59 = vpop.f32.mrf.mxu1  ;;  %v4861_v11 = vld [vmem:[%s7370_s1 + $0x724] sm:$0xf] }
 0x102   :  { %2260 = vmatpush.bf16.msra.mxu2 %v4120_v57  ;;  %v4863_v57 = vld [vmem:[%s7370_s1 + $0x734] sm:$0xf] }
 0x103   :  { %2250 = vmatpush.bf16.msrb.mxu3 %v4032_v15  ;;  %2225 = vmatmul.bf16.vlgmr.msrb.gmra.mxu0 %v5703_v12  ;;  %v4325_v12 = vld [vmem:[%s7370_s1 + $0x858] sm:$0xf0]  ;;  %v4184_v9 = vor.u32 %v4863_v57, %v4181_v58  ;;  %v4173_v15 = vld [vmem:[%s7370_s1 + $0x728] sm:$0xf0]  ;;  %v4521_v57 = vld [vmem:[%s7373_s3 + $0xa8] sm:$0xf] }
 0x104   :  { %2269 = vmatpush.bf16.msra.mxu0 %v4216_v5  ;;  %2238 = vmatmul.bf16.vlgmr.msrb.gmra.mxu1 %v5716_v17  ;;  %v4865_v17 = vld [vmem:[%s7370_s1 + $0x744] sm:$0xf]  ;;  %v4328_v51 = vor.u32 %v4899_v44, %v4325_v12  ;;  %v4915_v5 = vld [vmem:[%s7370_s1 + $0x8d4] sm:$0xf]  ;;  %v4176_v27 = vor.u32 %v4861_v11, %v4173_v15  ;;  %v4373_v12 = vld [vmem:[%s7370_s1 + $0x8b8] sm:$0xf0]  ;;  %v4424_v15 = vor.u32 %v4923_v48, %v4421_v63 }
 0x105   :  { %2282 = vmatpush.bf16.msra.mxu1 %v4280_v18  ;;  %v4192_v54 = vor.u32 %v4865_v17, %v4189_v50  ;;  %v4392_v18 = vor.u32 %v4915_v5, %v4389_v6  ;;  %v4911_v44 = vld [vmem:[%s7370_s1 + $0x8b4] sm:$0xf]  ;;  %v4221_v17 = vld [vmem:[%s7370_s1 + $0x788] sm:$0xf0]  ;;  %v4357_v6 = vld [vmem:[%s7370_s1 + $0x898] sm:$0xf0] }
 0x106   :  { %2261 = vmatpush.bf16.msra.mxu2 %v4112_v16  ;;  %2251 = vmatmul.bf16.vlgmr.msrb.gmra.mxu3 %v5733_v28  ;;  %v4264_v28 = vor.u32 %v4883_v42, %v4261_v43  ;;  %v4312_v16 = vor.u32 %v4895_v3, %v4309_v4  ;;  %v4293_v43 = vld [vmem:[%s7370_s1 + $0x818] sm:$0xf0]  ;;  %v4949_v58 = vld [vmem:[%s7373_s3 + $0xb0] sm:$0xf0]  ;;  %v4368_v3 = vor.u32 %v4909_v53, %v4365_v20 }
 0x107   :  { %2295 = vmatpush.bf16.msra.mxu3 %v4344_v24  ;;  %v4913_v24 = vld [vmem:[%s7370_s1 + $0x8c4] sm:$0xf]  ;;  %v4522_v4 = vor.u32 %v4949_v58, %v4521_v57  ;;  %v4907_v5 = vld [vmem:[%s7370_s1 + $0x894] sm:$0xf]  ;;  %v4946_v11 = vld [vmem:[%s7373_s3 + $0x98] sm:$0xf0] }
 0x108   :  { %2270 = vmatpush.bf16.msra.mxu0 %v4208_v30  ;;  %v6834_v25 = vpop.f32.mrf.mxu2  ;;  %v4859_v30 = vld [vmem:[%s7370_s1 + $0x714] sm:$0xf]  ;;  %v4384_v37 = vor.u32 %v4913_v24, %v4381_v13  ;;  %v4523_v24 = vld [vmem:[%s7373_s3 + $0xb4] sm:$0xf0] }
 0x109   :  { %2283 = vmatpush.bf16.msra.mxu1 %v4272_v2  ;;  %v6836_v14 = vpop.f32.mrf.mxu3  ;;  %v4304_v2 = vor.u32 %v4893_v23, %v4301_v26  ;;  %v2020_v42 = vpop.f32.mrf.mxu1  ;;  %v4168_v45 = vor.u32 %v4859_v30, %v4165_v34  ;;  %v4948_v26 = vld [vmem:[%s7373_s3 + $0xac] sm:$0xf]  ;;  %v4497_v13 = vld [vmem:[%s7373_s3 + $0x78] sm:$0xf] }
 0x10a   :  { %2262 = vmatpush.bf16.msra.mxu2 %v4104_v36  ;;  %v2007_v36 = vpop.f32.mrf.mxu0  ;;  %v4475_v57 = vld [vmem:[%s7373_s3 + $0x54] sm:$0xf0] }
 0x10b   :  { %2296 = vmatpush.bf16.msra.mxu3 %v4336_v41  ;;  %v4891_v41 = vld [vmem:[%s7370_s1 + $0x814] sm:$0xf] }
 0x10c   :  { %2271 = vmatpush.bf16.msra.mxu0 %v4200_v47  ;;  %v4232_v47 = vor.u32 %v4875_v39, %v4229_v40  ;;  %v4296_v50 = vor.u32 %v4891_v41, %v4293_v43  ;;  %v4511_v39 = vld [vmem:[%s7373_s3 + $0x9c] sm:$0xf0] }
 0x10d   :  { %2284 = vmatpush.bf16.msra.mxu1 %v4264_v28  ;;  %v4873_v28 = vld [vmem:[%s7370_s1 + $0x784] sm:$0xf]  ;;  %v4485_v41 = vld [vmem:[%s7373_s3 + $0x60] sm:$0xf] }
 0x10e   :  { %2263 = vmatpush.bf16.msra.mxu2 %v4096_v49  ;;  %v4157_v49 = vld [vmem:[%s7370_s1 + $0x708] sm:$0xf0] }
 0x10f   :  { %2297 = vmatpush.bf16.msra.mxu3 %v4328_v51  ;;  %v4376_v51 = vor.u32 %v4911_v44, %v4373_v12 }
 0x110   :  { %2272 = vmatpush.bf16.msra.mxu0 %v4192_v54  ;;  %v2033_v54 = vpop.f32.mrf.mxu2 }
 0x111   :  { %2264 = vmatmul.bf16.vlgmr.msra.gmra.mxu2 %v5737_v32  ;;  %2285 = vmatpush.bf16.msra.mxu1 %v4256_v56  ;;  %v4877_v32 = vld [vmem:[%s7370_s1 + $0x7a4] sm:$0xf]  ;;  %v4160_v56 = vor.u32 %v4857_v46, %v4157_v49  ;;  %v2046_v22 = vpop.f32.mrf.mxu3  ;;  %v4937_v49 = vld [vmem:[%s7373_s3 + $0x50] sm:$0xf0] }
 0x112   :  { %2308 = vmatpush.bf16.msrb.mxu2 %v4408_v21  ;;  %v4240_v29 = vor.u32 %v4877_v32, %v4237_v19  ;;  %v4889_v21 = vld [vmem:[%s7370_s1 + $0x804] sm:$0xf]  ;;  %v4413_v19 = vld [vmem:[%s7370_s1 + $0x908] sm:$0xf0] }
 0x113   :  { %2298 = vmatpush.bf16.msra.mxu3 %v4320_v0  ;;  %v4224_v0 = vor.u32 %v4873_v28, %v4221_v17  ;;  %v4288_v62 = vor.u32 %v4889_v21, %v4285_v1  ;;  %v4921_v32 = vld [vmem:[%s7370_s1 + $0x904] sm:$0xf]  ;;  %v5007_v17 = vld [vmem:[#allocation1 + $0x9] sm:$0xff] }
 0x114   :  { %2273 = vmatpush.bf16.msra.mxu0 %v4184_v9  ;;  %v1967_v9 = vadd.f32 %v6585_v8, %v1954_v7  ;;  %v4905_v8 = vld [vmem:[%s7370_s1 + $0x884] sm:$0xf]  ;;  %v4416_v30 = vor.u32 %v4921_v32, %v4413_v19  ;;  %v5008_v7 = vld [vmem:[#allocation1 + $0x12] sm:$0xff] }
 0x115   :  { %2286 = vmatpush.bf16.msra.mxu1 %v4248_v10  ;;  %v4509_v10 = vld [vmem:[%s7373_s3 + $0x90] sm:$0xf] }
 0x116   :  { %2309 = vmatpush.bf16.msrb.mxu2 %v4400_v60  ;;  %v4432_v60 = vor.u32 %v4925_v52, %v4429_v61  ;;  %v4510_v23 = vor.u32 %v4946_v11, %v4509_v10  ;;  %v4487_v52 = vld [vmem:[%s7373_s3 + $0x6c] sm:$0xf0]  ;;  %v4437_v10 = vld [vmem:[%s7373_s3] sm:$0xf]  ;;  %v4928_v11 = vld [vmem:[%s7373_s3 + $0x8] sm:$0xf0] }
 0x117   :  { %2299 = vmatpush.bf16.msra.mxu3 %v4312_v16  ;;  %v1980_v16 = vadd.f32 %v6624_v35, %v1967_v9  ;;  %v4349_v35 = vld [vmem:[%s7370_s1 + $0x888] sm:$0xf0]  ;;  %v4461_v61 = vld [vmem:[%s7373_s3 + $0x30] sm:$0xf]  ;;  %v4438_v19 = vor.u32 %v4928_v11, %v4437_v10  ;;  %v4967_v10 = vld [vmem:[%s7373_s3 + $0x140] sm:$0xf0] }
 0x118   :  { %2274 = vmatpush.bf16.msra.mxu0 %v4176_v27  ;;  %v6946_v27 = vpop.f32.mrf.mxu2  ;;  %v4352_v36 = vor.u32 %v4905_v8, %v4349_v35  ;;  %v4451_v35 = vld [vmem:[%s7373_s3 + $0x24] sm:$0xf0] }
 0x119   :  { %2287 = vmatpush.bf16.msra.mxu1 %v4240_v29  ;;  %v5006_v29 = vld [vmem:[#allocation1] sm:$0xff]  ;;  %v1993_v34 = vadd.f32 %v6632_v38, %v1980_v16  ;;  %v4940_v38 = vld [vmem:[%s7373_s3 + $0x68] sm:$0xf0]  ;;  %v4950_v16 = vld [vmem:[%s7373_s3 + $0xb8] sm:$0xf0] }
 0x11a   :  { %2310 = vmatpush.bf16.msrb.mxu2 %v4392_v18  ;;  %v4360_v18 = vor.u32 %v4907_v5, %v4357_v6  ;;  %v4486_v44 = vor.u32 %v4940_v38, %v4485_v41  ;;  %v4463_v5 = vld [vmem:[%s7373_s3 + $0x3c] sm:$0xf0]  ;;  %v4493_v38 = vld [vmem:[%s7373_s3 + $0x68] sm:$0xf] }
 0x11b   :  { %2300 = vmatpush.bf16.msra.mxu3 %v4304_v2  ;;  %v4526_v2 = vor.u32 %v4948_v26, %v4523_v24  ;;  %v2006_v40 = vadd.f32 %v6781_v55, %v1993_v34  ;;  %v4942_v55 = vld [vmem:[%s7373_s3 + $0x7c] sm:$0xf]  ;;  %v4927_v34 = vld [vmem:[%s7373_s3 + $0x4] sm:$0xf] }
 0x11c   :  { %2275 = vmatpush.bf16.msra.mxu0 %v4168_v45  ;;  %v4499_v45 = vld [vmem:[%s7373_s3 + $0x84] sm:$0xf0] }
 0x11d   :  { %2288 = vmatpush.bf16.msra.mxu1 %v4232_v47  ;;  %v2019_v46 = vadd.f32 %v6789_v59, %v2006_v40  ;;  %v4473_v47 = vld [vmem:[%s7373_s3 + $0x48] sm:$0xf]  ;;  %v4939_v59 = vld [vmem:[%s7373_s3 + $0x64] sm:$0xf] }
 0x11e   :  { %2311 = vmatpush.bf16.msrb.mxu2 %v4384_v37  ;;  %v4945_v37 = vld [vmem:[%s7373_s3 + $0x94] sm:$0xf]  ;;  %v4474_v21 = vor.u32 %v4937_v49, %v4473_v47  ;;  %v4490_v53 = vor.u32 %v4939_v59, %v4487_v52  ;;  %v4457_v52 = vld [vmem:[%s7373_s3 + $0x20] sm:$0xf] }
 0x11f   :  { %2301 = vmatpush.bf16.msra.mxu3 %v4296_v50  ;;  %v4514_v42 = vor.u32 %v4945_v37, %v4511_v39  ;;  %v2032_v50 = vadd.f32 %v6834_v25, %v2019_v46  ;;  %v4934_v25 = vld [vmem:[%s7373_s3 + $0x38] sm:$0xf0]  ;;  %v4944_v37 = vld [vmem:[%s7373_s3 + $0x88] sm:$0xf0] }
 0x120   :  { %2276 = vmatpush.bf16.msra.mxu0 %v4160_v56  ;;  %v2057_v43 = vpop.f32.mrf.mxu0  ;;  %v2085_v28 = vpop.f32.mrf.mxu2  ;;  %v4462_v54 = vor.u32 %v4934_v25, %v4461_v61  ;;  %v4936_v56 = vld [vmem:[%s7373_s3 + $0x4c] sm:$0xf] }
 0x121   :  { %2289 = vmatpush.bf16.msra.mxu1 %v4224_v0  ;;  %v2070_v12 = vpop.f32.mrf.mxu1  ;;  %v2045_v1 = vadd.f32 %v6836_v14, %v2032_v50  ;;  %v5009_v14 = vld [vmem:[%s7372_s2] sm:$0x3]  ;;  %v4478_v48 = vor.u32 %v4936_v56, %v4475_v57  ;;  %v4469_v28 = vld [vmem:[%s7373_s3 + $0x38] sm:$0xf]  ;;  %v4932_v61 = vld [vmem:[%s7373_s3 + $0x28] sm:$0xf0] }
 0x122   :  { %2312 = vmatpush.bf16.msrb.mxu2 %v4376_v51  ;;  %v4502_v51 = vor.u32 %v4942_v55, %v4499_v45  ;;  %v321_v0 = vperm.slane %v5009_v14, 1  ;;  %v4938_v55 = vld [vmem:[%s7373_s3 + $0x58] sm:$0xf0] }
 0x123   :  { %2302 = vmatpush.bf16.msra.mxu3 %v4288_v62  ;;  %2277 = vmatmul.bf16.vlgmr.msra.gmra.mxu0 %v5735_v31  ;;  %v4943_v31 = vld [vmem:[%s7373_s3 + $0x80] sm:$0xf0]  ;;  %v2058_v22 = vadd.f32 %v2057_v43, %v2045_v1  ;;  %v4449_v62 = vld [vmem:[%s7373_s3 + $0x18] sm:$0xf]  ;;  %v4458_v1 = vor.u32 %v4932_v61, %v4457_v52  ;;  %v4559_v52 = vld [vmem:[%s7373_s3 + $0xfc] sm:$0xf0] }
 0x124   :  { %2326 = vmatpush.bf16.msrb.mxu0 %v4432_v60  ;;  %2290 = vmatmul.bf16.vlgmr.msra.gmra.mxu1 %v5739_v33  ;;  %v4498_v33 = vor.u32 %v4943_v31, %v4497_v13  ;;  %v4517_v31 = vld [vmem:[%s7373_s3 + $0x98] sm:$0xf] }
 0x125   :  { %2664 = vmatpush.bf16.msrb.mxu1 %v4522_v4  ;;  %v4933_v4 = vld [vmem:[%s7373_s3 + $0x34] sm:$0xf]  ;;  %v2071_v9 = vadd.f32 %v2070_v12, %v2058_v22  ;;  %v4481_v12 = vld [vmem:[%s7373_s3 + $0x50] sm:$0xf]  ;;  %v4613_v61 = vld [vmem:[%s7373_s3 + $0x158] sm:$0xf] }
 0x126   :  { %2313 = vmatpush.bf16.msrb.mxu2 %v4368_v3  ;;  %2303 = vmatmul.bf16.vlgmr.msra.gmra.mxu3 %v5006_v29  ;;  %v4931_v3 = vld [vmem:[%s7373_s3 + $0x20] sm:$0xf0]  ;;  %v4482_v49 = vor.u32 %v4938_v55, %v4481_v12  ;;  %v4973_v22 = vld [vmem:[%s7373_s3 + $0x170] sm:$0xf0] }
 0x127   :  { %v4450_v63 = vor.u32 %v4931_v3, %v4449_v62  ;;  %v2084_v24 = vadd.f32 %v6946_v27, %v2071_v9  ;;  %v4947_v29 = vld [vmem:[%s7373_s3 + $0xa0] sm:$0xf0]  ;;  %v4439_v27 = vld [vmem:[%s7373_s3 + $0xc] sm:$0xf0]  ;;  %v4593_v9 = vld [vmem:[%s7373_s3 + $0x138] sm:$0xf] }
 0x128   :  { %2327 = vmatpush.bf16.msrb.mxu0 %v4424_v15  ;;  %v2059_v58 = vpop.f32.mrf.mxu0  ;;  %v4529_v15 = vld [vmem:[%s7373_s3 + $0xb0] sm:$0xf]  ;;  %v4442_v39 = vor.u32 %v4927_v34, %v4439_v27  ;;  %v4594_v11 = vor.u32 %v4967_v10, %v4593_v9  ;;  %v4958_v27 = vld [vmem:[%s7373_s3 + $0xf8] sm:$0xf0] }
 0x129   :  { %2665 = vmatpush.bf16.msrb.mxu1 %v4510_v23  ;;  %v2096_v20 = vpop.f32.mrf.mxu3  ;;  %v2072_v60 = vpop.f32.mrf.mxu1  ;;  %v4930_v23 = vld [vmem:[%s7373_s3 + $0x1c] sm:$0xf]  ;;  %v4530_v13 = vor.u32 %v4950_v16, %v4529_v15  ;;  %v4605_v3 = vld [vmem:[%s7373_s3 + $0x150] sm:$0xf]  ;;  %v4581_v15 = vld [vmem:[%s7373_s3 + $0x120] sm:$0xf] }
 0x12a   :  { %2314 = vmatpush.bf16.msrb.mxu2 %v4360_v18  ;;  %v2097_v6 = vadd.f32 %v2096_v20, %v321_v0  ;;  %v4466_v18 = vor.u32 %v4933_v4, %v4463_v5  ;;  %v4929_v20 = vld [vmem:[%s7373_s3 + $0x10] sm:$0xf0]  ;;  %v4617_v60 = vld [vmem:[%s7373_s3 + $0x168] sm:$0xf]  ;;  %v4964_v16 = vld [vmem:[%s7373_s3 + $0x128] sm:$0xf0] }
 0x12b   :  { %v4618_v62 = vor.u32 %v4973_v22, %v4617_v60  ;;  %v4557_v34 = vld [vmem:[%s7373_s3 + $0xf0] sm:$0xf]  ;;  %v4601_v60 = vld [vmem:[%s7373_s3 + $0x140] sm:$0xf] }
 0x12c   :  { %2328 = vmatpush.bf16.msrb.mxu0 %v4416_v30  ;;  %v4454_v30 = vor.u32 %v4930_v23, %v4451_v35  ;;  %v4619_v23 = vld [vmem:[%s7373_s3 + $0x174] sm:$0xf0]  ;;  %v4569_v35 = vld [vmem:[%s7373_s3 + $0x108] sm:$0xf] }
 0x12d   :  { %2666 = vmatpush.bf16.msrb.mxu1 %v4498_v33  ;;  %v4505_v33 = vld [vmem:[%s7373_s3 + $0x80] sm:$0xf]  ;;  %2677 = vmatpush.bf16.msrb.mxu3 %v4618_v62  ;;  %v4968_v62 = vld [vmem:[%s7373_s3 + $0x148] sm:$0xf0] }
 0x12e   :  { %2315 = vmatpush.bf16.msrb.mxu2 %v4352_v36  ;;  %v2334_v36 = vpack.c.bf16 %v2084_v24, %v2084_v24  ;;  %v4506_v41 = vor.u32 %v4944_v37, %v4505_v33  ;;  %v4558_v33 = vor.u32 %v4958_v27, %v4557_v34 }
 0x130   :  { %2690 = vmatpush.bf16.msra.mxu0 %v4526_v2  ;;  %v4518_v2 = vor.u32 %v4947_v29, %v4517_v31  ;;  %v4607_v31 = vld [vmem:[%s7373_s3 + $0x15c] sm:$0xf0] }
 0x131   :  { %2316 = vmatmul.bf16.vlgmr.msrb.gmra.mxu2 %v5007_v17  ;;  %2667 = vmatpush.bf16.msrb.mxu1 %v4486_v44  ;;  %v2098_v32 = vpop.f32.mrf.mxu3  ;;  %v4935_v17 = vld [vmem:[%s7373_s3 + $0x40] sm:$0xf0] }
 0x133   :  { %4434 = vmatmul.msk.bf16.vlgmr.msrb.gmra.mxu0 %vm1837_vm0, %v5008_v7 }
 0x134   :  { %2691 = vmatpush.bf16.msra.mxu0 %v4514_v42  ;;  %v2109_v8 = vpop.f32.mrf.mxu2  ;;  %v4941_v42 = vld [vmem:[%s7373_s3 + $0x70] sm:$0xf0] }
 0x135   :  { %2668 = vmatpush.bf16.msrb.mxu1 %v4474_v21  ;;  %v2110_v26 = vadd.f32 %v2109_v8, %v2097_v6  ;;  %v4494_v43 = vor.u32 %v4941_v42, %v4493_v38  ;;  %v4963_v42 = vld [vmem:[%s7373_s3 + $0x124] sm:$0xf] }
 0x138   :  { %2692 = vmatpush.bf16.msra.mxu0 %v4502_v51  ;;  %v4470_v51 = vor.u32 %v4935_v17, %v4469_v28  ;;  %v4571_v28 = vld [vmem:[%s7373_s3 + $0x114] sm:$0xf0]  ;;  %v4625_v17 = vld [vmem:[%s7373_s3 + $0x170] sm:$0xf] }
 0x139   :  { %2669 = vmatpush.bf16.msrb.mxu1 %v4462_v54 }
 0x13c   :  { %2693 = vmatpush.bf16.msra.mxu0 %v4490_v53  ;;  %v2111_v40 = vpop.f32.mrf.mxu2  ;;  %v4445_v53 = vld [vmem:[%s7373_s3 + $0x8] sm:$0xf] }
 0x13d   :  { %2670 = vmatpush.bf16.msrb.mxu1 %v4450_v63  ;;  %v4446_v54 = vor.u32 %v4929_v20, %v4445_v53  ;;  %v4545_v40 = vld [vmem:[%s7373_s3 + $0xd8] sm:$0xf]  ;;  %v4971_v53 = vld [vmem:[%s7373_s3 + $0x160] sm:$0xf0] }
 0x140   :  { %2694 = vmatpush.bf16.msra.mxu0 %v4478_v48  ;;  %v2122_v44 = vpop.f32.mrf.mxu0  ;;  %v4970_v48 = vld [vmem:[%s7373_s3 + $0x158] sm:$0xf0] }
 0x141   :  { %2671 = vmatpush.bf16.msrb.mxu1 %v4438_v19  ;;  %v2123_v45 = vadd.f32 %v2122_v44, %v2110_v26  ;;  %v2135_v46 = vpop.f32.mrf.mxu1  ;;  %v4606_v63 = vor.u32 %v4970_v48, %v4605_v3  ;;  %v4582_v19 = vor.u32 %v4964_v16, %v4581_v15  ;;  %v4961_v26 = vld [vmem:[%s7373_s3 + $0x110] sm:$0xf0]  ;;  %v4602_v3 = vor.u32 %v4968_v62, %v4601_v60 }
 0x142   :  { %v4570_v29 = vor.u32 %v4961_v26, %v4569_v35  ;;  %v4565_v35 = vld [vmem:[%s7373_s3 + $0xf8] sm:$0xf] }
 0x143   :  { %v2136_v47 = vadd.f32 %v2135_v46, %v2123_v45  ;;  %2678 = vmatpush.bf16.msrb.mxu3 %v4606_v63  ;;  %v4533_v45 = vld [vmem:[%s7373_s3 + $0xc0] sm:$0xf]  ;;  %v4952_v46 = vld [vmem:[%s7373_s3 + $0xc8] sm:$0xf0]  ;;  %v4951_v63 = vld [vmem:[%s7373_s3 + $0xc4] sm:$0xf] }
 0x144   :  { %2695 = vmatpush.bf16.msra.mxu0 %v4466_v18  ;;  %2672 = vmatmul.bf16.vlgmr.msrb.gmra.mxu1 %v2334_v36  ;;  %v4972_v18 = vld [vmem:[%s7373_s3 + $0x16c] sm:$0xf] }
 0x145   :  { %2716 = vmatpush.bf16.msra.mxu1 %v4530_v13  ;;  %v4622_v24 = vor.u32 %v4972_v18, %v4619_v23  ;;  %v4969_v13 = vld [vmem:[%s7373_s3 + $0x154] sm:$0xf]  ;;  %v4577_v18 = vld [vmem:[%s7373_s3 + $0x110] sm:$0xf] }
 0x147   :  { %2679 = vmatpush.bf16.msrb.mxu3 %v4594_v11  ;;  %2703 = vmatpush.bf16.msra.mxu2 %v4622_v24  ;;  %v4965_v11 = vld [vmem:[%s7373_s3 + $0x130] sm:$0xf0] }
 0x148   :  { %2696 = vmatpush.bf16.msra.mxu0 %v4454_v30  ;;  %v2124_v59 = vpop.f32.mrf.mxu0  ;;  %v4610_v30 = vor.u32 %v4969_v13, %v4607_v31  ;;  %v4956_v31 = vld [vmem:[%s7373_s3 + $0xe8] sm:$0xf0] }
 0x149   :  { %2717 = vmatpush.bf16.msra.mxu1 %v4518_v2  ;;  %v2148_v50 = vpop.f32.mrf.mxu3  ;;  %v2137_v25 = vpop.f32.mrf.mxu1  ;;  %v4595_v2 = vld [vmem:[%s7373_s3 + $0x144] sm:$0xf0]  ;;  %v4957_v59 = vld [vmem:[%s7373_s3 + $0xf4] sm:$0xf] }
 0x14a   :  { %v2149_v21 = vadd.f32 %v2148_v50, %v2136_v47  ;;  %v4534_v47 = vor.u32 %v4952_v46, %v4533_v45 }
 0x14b   :  { %2680 = vmatpush.bf16.msrb.mxu3 %v4582_v19  ;;  %2704 = vmatpush.bf16.msra.mxu2 %v4610_v30 }
 0x14c   :  { %2697 = vmatpush.bf16.msra.mxu0 %v4442_v39 }
 0x14d   :  { %2718 = vmatpush.bf16.msra.mxu1 %v4506_v41  ;;  %v4955_v41 = vld [vmem:[%s7373_s3 + $0xe0] sm:$0xf0] }
 0x14e   :  { %v4546_v38 = vor.u32 %v4955_v41, %v4545_v40 }
 0x14f   :  { %2698 = vmatmul.bf16.vlgmr.msra.gmra.mxu0 %v2334_v36  ;;  %2681 = vmatpush.bf16.msrb.mxu3 %v4570_v29 }
 0x151   :  { %2719 = vmatpush.bf16.msra.mxu1 %v4494_v43  ;;  %v2150_v7 = vpop.f32.mrf.mxu3  ;;  %v4583_v43 = vld [vmem:[%s7373_s3 + $0x12c] sm:$0xf0] }
 0x152   :  { %v4586_v12 = vor.u32 %v4963_v42, %v4583_v43  ;;  %v4614_v7 = vor.u32 %v4971_v53, %v4613_v61  ;;  %v2400_v53 = vld [vmem:[%s7374_s4] sm:$0x7]  ;;  %s5012_s4 = smov 1  }
 0x153   :  { %2682 = vmatpush.bf16.msrb.mxu3 %v4558_v33 }
 0x154   :  { %v2161_v56 = vpop.f32.mrf.mxu2 }
 0x155   :  { %2720 = vmatpush.bf16.msra.mxu1 %v4482_v49  ;;  %v7078_v57 = vadd.f32 %v2161_v56, %v2149_v21  ;;  %v4960_v49 = vld [vmem:[%s7373_s3 + $0x10c] sm:$0xf]  ;;  %v4954_v56 = vld [vmem:[%s7373_s3 + $0xdc] sm:$0xf] }
 0x156   :  { %v4574_v50 = vor.u32 %v4960_v49, %v4571_v28 }
 0x157   :  { %2683 = vmatpush.bf16.msrb.mxu3 %v4546_v38 }
 0x159   :  { %2721 = vmatpush.bf16.msra.mxu1 %v4470_v51  ;;  %v4974_v51 = vld [vmem:[%s7373_s3 + $0x178] sm:$0xf0] }
 0x15a   :  { %v4626_v21 = vor.u32 %v4974_v51, %v4625_v17 }
 0x15b   :  { %2684 = vmatpush.bf16.msrb.mxu3 %v4534_v47 }
 0x15c   :  { %v2163_v58 = vpop.f32.mrf.mxu2 }
 0x15d   :  { %2722 = vmatpush.bf16.msra.mxu1 %v4458_v1  ;;  %v4562_v1 = vor.u32 %v4957_v59, %v4559_v52  ;;  %v4547_v58 = vld [vmem:[%s7373_s3 + $0xe4] sm:$0xf0] }
 0x15e   :  { %v4550_v22 = vor.u32 %v4954_v56, %v4547_v58  ;;  %v2402_v56 = vperm.slane %v2400_v53, 0  ;;  %v2403_v58 = vperm.slane %v2400_v53, 1 }
 0x15f   :  { %2729 = vmatpush.bf16.msra.mxu3 %v4626_v21 }
 0x160   :  { %v7080_v14 = vpop.f32.mrf.mxu0 }
 0x161   :  { %2723 = vmatpush.bf16.msra.mxu1 %v4446_v54  ;;  %v7082_v0 = vpop.f32.mrf.mxu1  ;;  %v2175_v16 = vadd.f32 %v7080_v14, %v7078_v57  ;;  %v4959_v57 = vld [vmem:[%s7373_s3 + $0x100] sm:$0xf0] }
 0x162   :  { %v4566_v14 = vor.u32 %v4959_v57, %v4565_v35 }
 0x163   :  { %2730 = vmatpush.bf16.msra.mxu3 %v4614_v7  ;;  %v2188_v23 = vadd.f32 %v7082_v0, %v2175_v16  ;;  %v4553_v0 = vld [vmem:[%s7373_s3 + $0xe0] sm:$0xf] }
 0x164   :  { %2724 = vmatmul.bf16.vlgmr.msra.gmra.mxu1 %v2334_v36  ;;  %v4966_v36 = vld [vmem:[%s7373_s3 + $0x13c] sm:$0xf]  ;;  %v4554_v30 = vor.u32 %v4956_v31, %v4553_v0 }
 0x165   :  { %v4598_v37 = vor.u32 %v4966_v36, %v4595_v2 }
 0x167   :  { %2705 = vmatpush.bf16.msra.mxu2 %v4598_v37  ;;  %2731 = vmatpush.bf16.msra.mxu3 %v4602_v3 }
 0x168   :  { %v2176_v5 = vpop.f32.mrf.mxu0 }
 0x169   :  { %v7096_v4 = vpop.f32.mrf.mxu3  ;;  %v2189_v6 = vpop.f32.mrf.mxu1  ;;  %v4535_v5 = vld [vmem:[%s7373_s3 + $0xcc] sm:$0xf0] }
 0x16a   :  { %v4589_v6 = vld [vmem:[%s7373_s3 + $0x128] sm:$0xf]  ;;  %v4538_v10 = vor.u32 %v4951_v63, %v4535_v5  ;;  %v2201_v26 = vadd.f32 %v7096_v4, %v2188_v23 }
 0x16b   :  { %2706 = vmatpush.bf16.msra.mxu2 %v4586_v12  ;;  %v4590_v15 = vor.u32 %v4965_v11, %v4589_v6  ;;  %v4541_v4 = vld [vmem:[%s7373_s3 + $0xc8] sm:$0xf] }
 0x16d   :  { %2732 = vmatpush.bf16.msra.mxu3 %v4590_v15 }
 0x16f   :  { %2707 = vmatpush.bf16.msra.mxu2 %v4574_v50 }
 0x171   :  { %v2202_v32 = vpop.f32.mrf.mxu3 }
 0x172   :  { %v4962_v32 = vld [vmem:[%s7373_s3 + $0x118] sm:$0xf0] }
 0x173   :  { %2708 = vmatpush.bf16.msra.mxu2 %v4562_v1  ;;  %v4578_v19 = vor.u32 %v4962_v32, %v4577_v18  ;;  %v2404_v18 = vperm.slane %v2400_v53, 2 }
 0x174   :  { %v7113_v8 = vpop.f32.mrf.mxu2 }
 0x175   :  { %2733 = vmatpush.bf16.msra.mxu3 %v4578_v19  ;;  %v2214_v13 = vadd.f32 %v7113_v8, %v2201_v26  ;;  %v4953_v8 = vld [vmem:[%s7373_s3 + $0xd0] sm:$0xf0]  ;;  %s5010_s3 = smov 127  }
 0x176   :  { %v4542_v36 = vor.u32 %v4953_v8, %v4541_v4 }
 0x177   :  { %2709 = vmatpush.bf16.msra.mxu2 %v4550_v22 }
 0x179   :  { %2734 = vmatpush.bf16.msra.mxu3 %v4566_v14 }
 0x17b   :  { %2710 = vmatpush.bf16.msra.mxu2 %v4538_v10 }
 0x17c   :  { %v2215_v39 = vpop.f32.mrf.mxu2 }
 0x17d   :  { %2735 = vmatpush.bf16.msra.mxu3 %v4554_v30 }
 0x180   :  { %v2226_v44 = vpop.f32.mrf.mxu0 }
 0x181   :  { %v7154_v55 = vpop.f32.mrf.mxu1  ;;  %v2227_v29 = vadd.f32 %v2226_v44, %v2214_v13  ;;  %2736 = vmatpush.bf16.msra.mxu3 %v4542_v36 }
 0x183   :  { %v2240_v2 = vadd.f32 %v7154_v55, %v2227_v29 }
 0x188   :  { %v2228_v20 = vpop.f32.mrf.mxu0 }
 0x189   :  { %v2252_v25 = vpop.f32.mrf.mxu3  ;;  %v2241_v54 = vpop.f32.mrf.mxu1 }
 0x18a   :  { %v2253_v33 = vadd.f32 %v2252_v25, %v2240_v2 }
 0x191   :  { %v2254_v48 = vpop.f32.mrf.mxu3 }
 0x194   :  { %v2265_v9 = vpop.f32.mrf.mxu2 }
 0x195   :  { %v2266_v37 = vadd.f32 %v2265_v9, %v2253_v33 }
 0x19c   :  { %v2267_v24 = vpop.f32.mrf.mxu2 }
 0x1a0   :  { %v2278_v34 = vpop.f32.mrf.mxu0 }
 0x1a1   :  { %v2291_v27 = vpop.f32.mrf.mxu1  ;;  %v2279_v41 = vadd.f32 %v2278_v34, %v2266_v37  ;;  %v5014_v37 = vmov 683565275  }
 0x1a3   :  { %v2292_v42 = vadd.f32 %v2291_v27, %v2279_v41 }
 0x1a8   :  { %v2280_v40 = vpop.f32.mrf.mxu0 }
 0x1a9   :  { %v2304_v39 = vpop.f32.mrf.mxu3  ;;  %v2293_v38 = vpop.f32.mrf.mxu1  ;;  %v5015_v40 = vmov 2475754826  }
 0x1aa   :  { %v2305_v43 = vadd.f32 %v2304_v39, %v2292_v42  ;;  %v5016_v42 = vmov 2131351028  }
 0x1b0   :  { %v2330_v46 = vpop.f32.mrf.mxu0 }
 0x1b1   :  { %v2306_v44 = vpop.f32.mrf.mxu3 }
 0x1b4   :  { %v2317_v12 = vpop.f32.mrf.mxu2 }
 0x1b5   :  { %v2318_v45 = vadd.f32 %v2317_v12, %v2305_v43  ;;  %v5017_v12 = vmov 2102212464  }
 0x1b7   :  { %v7240_v47 = vadd.f32 %v2330_v46, %v2318_v45 }
 0x1b8   :  { %v2332_v50 = vpop.f32.mrf.mxu0 }
 0x1b9   :  { %v2335_v49 = vpack.c.bf16 %v7240_v47, %v7240_v47  ;;  %v2742_v55 = vadd.f32 1e-08, %v7240_v47 }
 0x1bb   :  { %2685 = vmatmul.bf16.vlgmr.msrb.gmra.mxu3 %v2335_v49  ;;  %2711 = vmatmul.bf16.vlgmr.msra.gmra.mxu2 %v2335_v49  ;;  %v2743_v28 = vmul.f32 %v2742_v55, %v2742_v55 }
 0x1bc   :  { %v2319_v17 = vpop.f32.mrf.mxu2 }
 0x1bd   :  { %2745 = vrot.lane.b32.xlu0 %v2743_v28, %s5010_s3  ;;  %v5019_v17 = vmov 1326507024  }
 0x1c1   :  { %v2673_v51 = vpop.f32.mrf.mxu1 }
 0x1c2   :  { %v2674_v60 = vadd.f32 %v2673_v51, %v2402_v56 }
 0x1c5   :  { %2749 = vrot.lane.b32.xlu0 %v2743_v28, %s5011_s21 }
 0x1c9   :  { %v2675_v59 = vpop.f32.mrf.mxu1 }
 0x1cb   :  { %2737 = vmatmul.bf16.vlgmr.msra.gmra.mxu3 %v2335_v49  ;;  %v5018_v49 = vmov 920167782  }
 0x1cc   :  { %v2699_v21 = vpop.f32.mrf.mxu0 }
 0x1cd   :  { %v2700_v22 = vadd.f32 %v2699_v21, %v2403_v58 }
 0x1d4   :  { %v2701_v52 = vpop.f32.mrf.mxu0 }
 0x1e1   :  { %v2725_v61 = vpop.f32.mrf.mxu1 }
 0x1e2   :  { %v2726_v35 = vadd.f32 %v2725_v61, %v2404_v18 }
 0x1e9   :  { %v2727_v25 = vpop.f32.mrf.mxu1 }
 0x22f   :  { %v2746_v1 = vpop.permute.xlu0 %2745 }
 0x230   :  { %v2748_v20 = vadd.f32 %v2746_v1, %v2743_v28 }
 0x237   :  { %v2750_v7 = vpop.permute.xlu0 %2749 }
 0x238   :  { %v2752_v54 = vadd.f32 %v2750_v7, %v2748_v20 }
 0x23a   :  { %4998 = vrsqrt.f32 %v2752_v54  ;;  %vm2760_vm1 = vcmp.eq.f32.partialorder %v2752_v54, inf  ;;  %v2763_v23 = vand.u32 2147483648, %v2752_v54  ;;  %vm2762_vm2 = vcmp.eq.f32.partialorder %v2752_v54, 0.0 }
 0x23e   :  { %v2686_v62 = vpop.f32.mrf.mxu3  ;;  %v2712_v3 = vpop.f32.mrf.mxu2 }
 0x23f   :  { %v7250_v48 = vadd.f32 %v2686_v62, %v2674_v60  ;;  %v7252_v63 = vadd.f32 %v2712_v3, %v2700_v22 }
 0x240   :  { %v4999_v5 = vpop.eup %4998 }
 0x241   :  { %v2754_v6 = vmul.f32 %v4999_v5, %v2752_v54 }
 0x243   :  { %v2755_v9 = vmul.f32 %v4999_v5, %v2754_v6 }
 0x245   :  { %v2756_v10 = vmul.f32 0.5, %v2755_v9 }
 0x246   :  { %v2688_v11 = vpop.f32.mrf.mxu3  ;;  %v2714_v15 = vpop.f32.mrf.mxu2 }
 0x247   :  { %v2757_v16 = vsub.f32 1.5, %v2756_v10 }
 0x249   :  { %v2758_v32 = vmul.f32 %v4999_v5, %v2757_v16 }
 0x24b   :  { %v2759_v19 = vmul.f32 %v2758_v32, %v2752_v54 }
 0x24d   :  { %v2761_v57 = vsel %vm2760_vm1, %v2752_v54, %v2759_v19 }
 0x24e   :  { %v2738_v14 = vpop.f32.mrf.mxu3  ;;  %v7254_v26 = vsel %vm2762_vm2, %v2763_v23, %v2761_v57 }
 0x24f   :  { %v7256_v24 = vadd.f32 %v2738_v14, %v2726_v35  ;;  %2781 = vrot.lane.b32.xlu1 %v7254_v26, %s5012_s4  ;;  %v2820_v13 = vand.u32 2139095040, %v7254_v26  ;;  %v7262_v29 = vand.u32 2147483647, %v7254_v26  ;;  %vm2819_vm15 = vcmp.lt.s32.totalorder %v7254_v26, 0 }
 0x250   :  { %5000 = vrcp.f32 %v7254_v26 }
 0x251   :  { %v2821_v0 = vshrl.u32 %v2820_v13, 23  ;;  %v2824_v27 = vand.u32 8388607, %v7262_v29  ;;  %vm2818_vm0 = vcmp.le.f32.partialorder %v7262_v29, 0.7853982 }
 0x253   :  { %v4627_v31 = vadd.s32 4294967169, %v2821_v0  ;;  %v2825_v2 = vor.u32 8388608, %v2824_v27  ;;  %v5020_v0 = vmov 0  }
 0x255   :  { %v2827_v34 = vadd.s32 1, %v4627_v31  ;;  %v7278_v25 = vshll.u32 %v2825_v2, 8 }
 0x256   :  { %v2740_v30 = vpop.f32.mrf.mxu3 }
 0x257   :  { %2799 = vrot.lane.b32.xlu1 %v7254_v26, %s5013_s24  ;;  %vm2828_vm3 = vcmp.gt.s32.totalorder %v2827_v34, 0  ;;  %v2866_v22 = vand.u32 65535, %v7278_v25  ;;  %v2867_v62 = vshrl.u32 %v7278_v25, 16 }
 0x258   :  { %v2829_v4 = vsel %vm2828_vm3, %v2827_v34, 0 }
 0x259   :  { %v2831_v8 = vand.u32 31, %v2829_v4  ;;  %v7269_v33 = vshrl.u32 %v2829_v4, 5 }
 0x25b   :  { %v7267_v36 = vsub.s32 32, %v2831_v8  ;;  %v2834_v39 = vshll.u32 %v5014_v37, %v2831_v8  ;;  %v2837_v41 = vshll.u32 %v5015_v40, %v2831_v8  ;;  %v2840_v44 = vshll.u32 %v5016_v42, %v2831_v8 }
 0x25c   :  { %v2843_v46 = vshll.u32 %v5017_v12, %v2831_v8  ;;  %v2846_v28 = vshll.u32 %v5018_v49, %v2831_v8  ;;  %vm2849_vm4 = vcmp.lt.s32.totalorder %v7269_v33, 1  ;;  %vm2852_vm5 = vcmp.lt.s32.totalorder %v7269_v33, 4 }
 0x25d   :  { %v2835_v38 = vshrl.u32 %v5015_v40, %v7267_v36  ;;  %v2838_v43 = vshrl.u32 %v5016_v42, %v7267_v36  ;;  %v2841_v45 = vshrl.u32 %v5017_v12, %v7267_v36  ;;  %v2844_v55 = vshrl.u32 %v5018_v49, %v7267_v36 }
 0x25e   :  { %v2847_v50 = vshrl.u32 %v5019_v17, %v7267_v36  ;;  %vm2851_vm6 = vcmp.lt.s32.totalorder %v7269_v33, 3  ;;  %vm2850_vm7 = vcmp.lt.s32.totalorder %v7269_v33, 2  ;;  %v2833_v40 = vshrl.u32 %v5014_v37, %v7267_v36 }
 0x25f   :  { %v2836_v51 = vor.u32 %v2835_v38, %v2834_v39  ;;  %v2839_v21 = vor.u32 %v2838_v43, %v2837_v41  ;;  %v2842_v59 = vor.u32 %v2841_v45, %v2840_v44  ;;  %v2845_v52 = vor.u32 %v2844_v55, %v2843_v46 }
 0x260   :  { %v2848_v61 = vor.u32 %v2847_v50, %v2846_v28 }
 0x261   :  { %v2857_v1 = vsel %vm2849_vm4, %v2836_v51, %v2839_v21  ;;  %v2861_v53 = vsel %vm2849_vm4, %v2839_v21, %v2842_v59  ;;  %v2858_v20 = vsel %vm2852_vm5, %v2845_v52, 920167782  ;;  %v2854_v8 = vsel %vm2852_vm5, %v2842_v59, 2102212464 }
 0x262   :  { %v2862_v7 = vsel %vm2852_vm5, %v2848_v61, 1326507024  ;;  %v2859_v54 = vsel %vm2851_vm6, %v2842_v59, %v2858_v20  ;;  %v2853_v12 = vsel %vm2849_vm4, %v2833_v40, %v2836_v51  ;;  %v2855_v45 = vsel %vm2851_vm6, %v2839_v21, %v2854_v8 }
 0x263   :  { %v2863_v56 = vsel %vm2851_vm6, %v2845_v52, %v2862_v7  ;;  %v2860_v58 = vsel %vm2850_vm7, %v2857_v1, %v2859_v54  ;;  %v2856_v36 = vsel %vm2850_vm7, %v2853_v12, %v2855_v45  ;;  %vm2770_vm5 = vweird.f32 %v7254_v26 }
 0x264   :  { %v2864_v60 = vsel %vm2850_vm7, %v2861_v53, %v2863_v56  ;;  %v2890_v6 = vand.u32 65535, %v2860_v58  ;;  %v2891_v9 = vshrl.u32 %v2860_v58, 16  ;;  %v2910_v52 = vmul.u32 %v7278_v25, %v2856_v36 }
 0x265   :  { %v2868_v3 = vand.u32 65535, %v2864_v60  ;;  %v2869_v5 = vshrl.u32 %v2864_v60, 16 }
 0x266   :  { %v2893_v15 = vmul.u32 %v2891_v9, %v2866_v22  ;;  %v2894_v16 = vmul.u32 %v2890_v6, %v2867_v62  ;;  %v2892_v23 = vmul.u32 %v2890_v6, %v2866_v22  ;;  %v2895_v13 = vmul.u32 %v2891_v9, %v2867_v62 }
 0x267   :  { %v2871_v10 = vmul.u32 %v2869_v5, %v2866_v22  ;;  %v2872_v11 = vmul.u32 %v2868_v3, %v2867_v62  ;;  %v2870_v18 = vmul.u32 %v2868_v3, %v2866_v22  ;;  %v2873_v19 = vmul.u32 %v2869_v5, %v2867_v62 }
 0x268   :  { %v2896_v35 = vshll.u32 %v2893_v15, 16  ;;  %v2898_v30 = vshll.u32 %v2894_v16, 16  ;;  %v2897_v43 = vshrl.u32 %v2893_v15, 16  ;;  %v2899_v55 = vshrl.u32 %v2894_v16, 16 }
 0x269   :  { %v2874_v32 = vshll.u32 %v2871_v10, 16  ;;  %v2876_v57 = vshll.u32 %v2872_v11, 16  ;;  %v2875_v41 = vshrl.u32 %v2871_v10, 16  ;;  %v2877_v46 = vshrl.u32 %v2872_v11, 16 }
 0x26a   :  { %vm2900_vm9 = vc.u32 %v2892_v23, %v2896_v35  ;;  %v2902_v34 = vadd.s32 %v2896_v35, %v2892_v23 }
 0x26b   :  { %vm2878_vm8 = vc.u32 %v2870_v18, %v2874_v32  ;;  %v2880_v14 = vadd.s32 %v2874_v32, %v2870_v18  ;;  %v2901_v4 = vsel %vm2900_vm9, 1, %v5020_v0 }
 0x26c   :  { %v2879_v31 = vsel %vm2878_vm8, 1, %v5020_v0  ;;  %v2903_v39 = vadd.s32 %v2901_v4, %v2895_v13  ;;  %vm2904_vm11 = vc.u32 %v2902_v34, %v2898_v30  ;;  %v2906_v50 = vadd.s32 %v2902_v34, %v2898_v30 }
 0x26d   :  { %v2881_v27 = vadd.s32 %v2879_v31, %v2873_v19  ;;  %vm2882_vm10 = vc.u32 %v2880_v14, %v2876_v57  ;;  %v2905_v42 = vsel %vm2904_vm11, 1, %v5020_v0 }
 0x26e   :  { %v2883_v2 = vsel %vm2882_vm10, 1, %v5020_v0  ;;  %v2907_v44 = vadd.s32 %v2905_v42, %v2903_v39 }
 0x26f   :  { %v2885_v38 = vadd.s32 %v2883_v2, %v2881_v27 }
 0x270   :  { %v2908_v28 = vadd.s32 %v2907_v44, %v2897_v43 }
 0x271   :  { %v2886_v49 = vadd.s32 %v2885_v38, %v2875_v41 }
 0x272   :  { %v2909_v37 = vadd.s32 %v2908_v28, %v2899_v55 }
 0x273   :  { %v2887_v17 = vadd.s32 %v2886_v49, %v2877_v46 }
 0x274   :  { %v2913_v59 = vadd.s32 1, %v2909_v37 }
 0x275   :  { %vm2912_vm12 = vc.u32 %v2887_v17, %v2906_v50  ;;  %v2911_v33 = vadd.s32 %v2906_v50, %v2887_v17 }
 0x276   :  { %v2914_v61 = vsel %vm2912_vm12, %v2913_v59, %v2909_v37 }
 0x277   :  { %v2915_v1 = vadd.s32 %v2914_v61, %v2910_v52  ;;  %v5021_v61 = vmov 72  }
 0x278   :  { %4991 = vset.pattern.permute.xlu2 %v5021_v61  ;;  %4994 = vset.pattern.permute.xlu0 %v5021_v61 }
 0x279   :  { %v2916_v51 = vadd.s32 536870912, %v2915_v1 }
 0x27b   :  { %v2917_v53 = vshrl.u32 %v2916_v51, 30 }
 0x27d   :  { %v2918_v20 = vshll.u32 %v2917_v53, 30  ;;  %v2941_v19 = vsub.s32 4, %v2917_v53 }
 0x27f   :  { %v2919_v21 = vsub.s32 %v2915_v1, %v2918_v20  ;;  %v2942_v13 = vsel %vm2819_vm15, %v2941_v19, %v2917_v53  ;;  %v5001_v1 = vpop.eup %5000  ;;  %v2776_v19 = vand.u32 2147483648, %v7254_v26 }
 0x280   :  { %v2944_v30 = vsel %vm2818_vm0, 0, %v2942_v13 }
 0x281   :  { %vm2920_vm13 = vcmp.lt.s32.totalorder %v2919_v21, 0  ;;  %v2921_v7 = vsub.s32 0, %v2919_v21  ;;  %v2961_v2 = vadd.s32 3, %v2944_v30  ;;  %v3116_v43 = vand.u32 3, %v2944_v30 }
 0x283   :  { %v2922_v54 = vsel %vm2920_vm13, %v2921_v7, %v2919_v21  ;;  %v2962_v42 = vand.u32 3, %v2961_v2  ;;  %vm3118_vm3 = vcmp.eq.s32.totalorder %v3116_v43, 0  ;;  %vm3121_vm6 = vcmp.eq.s32.totalorder %v3116_v43, 2 }
 0x284   :  { %v2923_v56 = vclz %v2922_v54  ;;  %vm3117_vm7 = vcmp.lt.s32.totalorder %v3116_v43, 2  ;;  %vm2771_vm13 = vweird.f32 %v5001_v1 }
 0x285   :  { %vm2964_vm1 = vcmp.eq.s32.totalorder %v2962_v42, 0  ;;  %vm2967_vm2 = vcmp.eq.s32.totalorder %v2962_v42, 2  ;;  %vm2963_vm4 = vcmp.lt.s32.totalorder %v2962_v42, 2  ;;  %v5022_v42 = vmov 73  }
 0x286   :  { %v4628_v58 = vadd.s32 4294967294, %v2923_v56  ;;  %4992 = vset.pattern.permute.xlu1 %v5022_v42 }
 0x288   :  { %vm4629_vm14 = vcmp.lt.s32.totalorder %v4628_v58, 0 }
 0x289   :  { %v2926_v60 = vsel %vm4629_vm14, 0, %v4628_v58 }
 0x28a   :  { %v2927_v22 = vsub.s32 32, %v2926_v60  ;;  %v2931_v62 = vsub.s32 4294967266, %v2926_v60  ;;  %v2928_v3 = vshll.u32 %v2919_v21, %v2926_v60  ;;  %v2766_v21 = vmul.f32 %v5001_v1, %v7254_v26 }
 0x28c   :  { %v2929_v5 = vshrl.u32 %v2911_v33, %v2927_v22  ;;  %v2932_v6 = vadd.s32 127, %v2931_v62  ;;  %v2767_v60 = vsub.f32 1.0, %v2766_v21 }
 0x28e   :  { %v2930_v25 = vor.u32 %v2929_v5, %v2928_v3  ;;  %v2933_v9 = vshll.u32 %v2932_v6, 23 }
 0x290   :  { %v2934_v10 = vor.u32 4788187, %v2933_v9  ;;  %v2937_v15 = vcvt.s32.f32 %v2930_v25  ;;  %v2768_v25 = vmul.f32 %v5001_v1, %v2767_v60 }
 0x292   :  { %v2935_v11 = vand.u32 2147483647, %v2934_v10 }
 0x294   :  { %v2938_v16 = vmul.f32 %v2937_v15, %v2935_v11 }
 0x296   :  { %v2939_v18 = vxor.u32 2147483648, %v2938_v16 }
 0x298   :  { %v2940_v32 = vsel %vm2819_vm15, %v2939_v18, %v2938_v16  ;;  %v2769_v18 = vadd.f32 %v5001_v1, %v2768_v25 }
 0x299   :  { %v2943_v23 = vsel %vm2818_vm0, %v7254_v26, %v2940_v32 }
 0x29a   :  { %v2945_v35 = vmul.f32 %v2943_v23, %v2943_v23 }
 0x29c   :  { %v2946_v57 = vmul.f32 -0.001358992, %v2945_v35  ;;  %v2953_v14 = vmul.f32 -0.00019511016, %v2945_v35 }
 0x29e   :  { %v2947_v0 = vadd.f32 0.041655596, %v2946_v57  ;;  %v2954_v31 = vadd.f32 0.008332121, %v2953_v14 }
 0x2a0   :  { %v2948_v34 = vmul.f32 %v2947_v0, %v2945_v35  ;;  %v2955_v27 = vmul.f32 %v2954_v31, %v2945_v35  ;;  %v2777_v0 = vor.u32 1.1754944e-38, %v2776_v19 }
 0x2a2   :  { %v2949_v4 = vadd.f32 -0.4999988, %v2948_v34  ;;  %v2956_v8 = vadd.f32 -0.16666654, %v2955_v27 }
 0x2a4   :  { %v2950_v39 = vmul.f32 %v2949_v4, %v2945_v35  ;;  %v2957_v40 = vmul.f32 %v2956_v8, %v2945_v35 }
 0x2a6   :  { %v2951_v41 = vadd.f32 1.0, %v2950_v39  ;;  %v2958_v38 = vadd.f32 1.0, %v2957_v40 }
 0x2a8   :  { %v2959_v44 = vmul.f32 %v2958_v38, %v2943_v23  ;;  %v2968_v12 = vxor.u32 2147483648, %v2951_v41 }
 0x2aa   :  { %v2965_v45 = vxor.u32 2147483648, %v2959_v44  ;;  %v2969_v49 = vsel %vm2967_vm2, %v2968_v12, %v2959_v44  ;;  %v3123_v50 = vsel %vm3121_vm6, %v2968_v12, %v2959_v44  ;;  %vm2775_vm2 = vcmp.eq.f32.partialorder %v7262_v29, 8.507059e+37 }
 0x2ac   :  { %v2966_v46 = vsel %vm2964_vm1, %v2951_v41, %v2965_v45  ;;  %v3120_v55 = vsel %vm3118_vm3, %v2951_v41, %v2965_v45  ;;  %vm2772_vm1 = vmor %vm2770_vm5, %vm2771_vm13  ;;  %vm3249_vm3 = vcmask 1041408  }
 0x2ad   :  { %v2970_v28 = vsel %vm2963_vm4, %v2966_v46, %v2969_v49  ;;  %v3124_v36 = vsel %vm3117_vm7, %v3120_v55, %v3123_v50  ;;  %v2773_v14 = vsel %vm2772_vm1, %v5001_v1, %v2769_v18 }
 0x2ae   :  { %v7318_v17 = vsel %vm2770_vm5, nan, %v2970_v28  ;;  %v7326_v37 = vsel %vm2770_vm5, nan, %v3124_v36  ;;  %v2778_v31 = vsel %vm2775_vm2, %v2777_v0, %v2773_v14 }
 0x2af   :  { %3152 = vrot.lane.b32.xlu0 %v7318_v17, %s5012_s4  ;;  %3137 = vrot.lane.b32.xlu2 %v7318_v17, %s5013_s24  ;;  %v7329_v59 = vsub.f32 1.0, %v7326_v37  ;;  %v2779_v30 = vmul.f32 %v2778_v31, %v7240_v47 }
 0x2b1   :  { %v3127_v34 = vmul.f32 %v2779_v30, %v2779_v30  ;;  %v3178_v40 = vmul.f32 %v7318_v17, %v2779_v30 }
 0x2b3   :  { %v3128_v27 = vmul.f32 %v3127_v34, %v7329_v59 }
 0x2b5   :  { %v3129_v26 = vadd.f32 %v3128_v27, %v7326_v37 }
 0x2b7   :  { %3164 = vrot.lane.b32.xlu2 %v7329_v59, %s5012_s4 }
 0x2c1   :  { %v2782_v52 = vpop.permute.xlu1 %2781 }
 0x2c2   :  { %5002 = vrcp.f32 %v2782_v52  ;;  %v2795_v54 = vand.u32 2147483648, %v2782_v52  ;;  %v2793_v58 = vand.u32 2147483647, %v2782_v52  ;;  %vm2789_vm9 = vweird.f32 %v2782_v52 }
 0x2c4   :  { %v2796_v62 = vor.u32 1.1754944e-38, %v2795_v54  ;;  %vm2794_vm11 = vcmp.eq.f32.partialorder %v2793_v58, 8.507059e+37 }
 0x2c8   :  { %v5003_v51 = vpop.eup %5002 }
 0x2c9   :  { %v2785_v53 = vmul.f32 %v5003_v51, %v2782_v52  ;;  %v2800_v20 = vpop.permute.xlu1 %2799  ;;  %vm2790_vm8 = vweird.f32 %v5003_v51 }
 0x2ca   :  { %5004 = vrcp.f32 %v2800_v20  ;;  %vm2791_vm10 = vmor %vm2789_vm9, %vm2790_vm8  ;;  %v2813_v11 = vand.u32 2147483648, %v2800_v20  ;;  %v2811_v16 = vand.u32 2147483647, %v2800_v20  ;;  %vm2807_vm14 = vweird.f32 %v2800_v20 }
 0x2cb   :  { %v2786_v7 = vsub.f32 1.0, %v2785_v53 }
 0x2cc   :  { %v2814_v23 = vor.u32 1.1754944e-38, %v2813_v11  ;;  %vm2812_vm0 = vcmp.eq.f32.partialorder %v2811_v16, 8.507059e+37 }
 0x2cd   :  { %v2787_v56 = vmul.f32 %v5003_v51, %v2786_v7 }
 0x2cf   :  { %v2788_v33 = vadd.f32 %v5003_v51, %v2787_v56  ;;  %v5024_v56 = vmov 78  }
 0x2d0   :  { %v5005_v22 = vpop.eup %5004 }
 0x2d1   :  { %v2803_v3 = vmul.f32 %v5005_v22, %v2800_v20  ;;  %v2792_v5 = vsel %vm2791_vm10, %v5003_v51, %v2788_v33  ;;  %vm2808_vm12 = vweird.f32 %v5005_v22  ;;  %v5023_v20 = vmov 80  }
 0x2d2   :  { %v2797_v6 = vsel %vm2794_vm11, %v2796_v62, %v2792_v5  ;;  %vm2809_vm15 = vmor %vm2807_vm14, %vm2808_vm12 }
 0x2d3   :  { %v2804_v9 = vsub.f32 1.0, %v2803_v3  ;;  %v2798_v10 = vmul.f32 %v2797_v6, %v7240_v47 }
 0x2d5   :  { %v2805_v15 = vmul.f32 %v5005_v22, %v2804_v9  ;;  %3131 = vrot.lane.b32.xlu1 %v2798_v10, %s5010_s3  ;;  %v3162_v2 = vmul.f32 %v2798_v10, %v2798_v10 }
 0x2d7   :  { %v2806_v32 = vadd.f32 %v5005_v22, %v2805_v15 }
 0x2d9   :  { %v2810_v35 = vsel %vm2809_vm15, %v5005_v22, %v2806_v32 }
 0x2da   :  { %v2815_v57 = vsel %vm2812_vm0, %v2814_v23, %v2810_v35 }
 0x2db   :  { %v2816_v13 = vmul.f32 %v2815_v57, %v7240_v47 }
 0x2dd   :  { %3173 = vrot.lane.b32.xlu2 %v2816_v13, %s5010_s3 }
 0x2e5   :  { %3147 = vrot.lane.b32.xlu2 %v2816_v13, %s5011_s21 }
 0x2ed   :  { %3186 = vperm.xlu2 %4991, %v3129_v26  }
 0x309   :  { %v3138_v4 = vpop.permute.xlu2 %3137 }
 0x30a   :  { %v3140_v8 = vmul.f32 %v3138_v4, %v2816_v13 }
 0x30c   :  { %3142 = vrot.lane.b32.xlu0 %v3140_v8, %s5011_s21 }
 0x311   :  { %v3165_v39 = vpop.permute.xlu2 %3164 }
 0x312   :  { %v3167_v29 = vmul.f32 %v3165_v39, %v3162_v2 }
 0x314   :  { %3169 = vrot.lane.b32.xlu1 %v3167_v29, %s5010_s3  ;;  %3180 = vrot.lane.b32.xlu0 %v3178_v40, %s5012_s4 }
 0x321   :  { %v3153_v41 = vpop.permute.xlu0 %3152 }
 0x322   :  { %v3155_v38 = vmul.f32 %v3153_v41, %v2798_v10 }
 0x324   :  { %3157 = vrot.lane.b32.xlu1 %v3155_v38, %s5010_s3 }
 0x337   :  { %v3174_v45 = vpop.permute.xlu2 %3173 }
 0x338   :  { %v3176_v55 = vmul.f32 %v3174_v45, %v2798_v10 }
 0x33a   :  { %v3177_v28 = vmul.f32 %v3176_v55, %v3165_v39 }
 0x33f   :  { %v3148_v1 = vpop.permute.xlu2 %3147 }
 0x340   :  { %v3150_v53 = vmul.f32 %v3148_v1, %v2779_v30 }
 0x342   :  { %v3151_v21 = vmul.f32 %v3150_v53, %v7329_v59 }
 0x347   :  { %v3132_v43 = vpop.permute.xlu1 %3131  ;;  %v3187_v58 = vpop.permute.xlu2 %3186 }
 0x348   :  { %v3134_v44 = vmul.f32 %v3132_v43, %v2779_v30  ;;  %v3189_v9 = vmul.f32 %v3187_v58, %v7250_v48 }
 0x34a   :  { %v3135_v12 = vmul.f32 %v3134_v44, %v7329_v59 }
 0x37e   :  { %v3143_v46 = vpop.permute.xlu0 %3142 }
 0x37f   :  { %v3161_v49 = vadd.f32 %v3143_v46, %v3135_v12  ;;  %v3145_v51 = vsub.f32 %v3135_v12, %v3143_v46 }
 0x381   :  { %3206 = vperm.xlu2 %4991, %v3161_v49  }
 0x386   :  { %v3170_v17 = vpop.permute.xlu1 %3169  ;;  %v3181_v50 = vpop.permute.xlu0 %3180 }
 0x387   :  { %v3172_v36 = vadd.f32 %v3170_v17, %v7326_v37  ;;  %v3183_v52 = vsub.f32 %v3177_v28, %v3181_v50  ;;  %v5025_v37 = vmov 79  }
 0x389   :  { %3212 = vperm.xlu0 %4994, %v3172_v36   ;;  %3219 = vperm.xlu1 %4992, %v3183_v52  }
 0x391   :  { %4995 = vset.pattern.permute.xlu0 %v5023_v20  ;;  %4993 = vset.pattern.permute.xlu1 %v5021_v61 }
 0x392   :  { %3238 = vperm.xlu0 %4995, %v7240_v47   ;;  %3192 = vperm.xlu1 %4993, %v3145_v51  }
 0x396   :  { %v3158_v7 = vpop.permute.xlu1 %3157 }
 0x397   :  { %v3160_v54 = vadd.f32 %v3158_v7, %v3151_v21 }
 0x399   :  { %3199 = vperm.xlu2 %4991, %v3160_v54  }
 0x39a   :  { %4996 = vset.pattern.permute.xlu1 %v5024_v56 }
 0x39b   :  { %3231 = vperm.xlu1 %4996, %v7240_v47  }
 0x3a1   :  { %4997 = vset.pattern.permute.xlu2 %v5025_v37 }
 0x3a2   :  { %3226 = vperm.xlu2 %4997, %v7240_v47  }
 0x3db   :  { %v3207_v60 = vpop.permute.xlu2 %3206 }
 0x3dc   :  { %v3209_v22 = vmul.f32 %v3207_v60, %v7250_v48 }
 0x3f3   :  { %v3200_v5 = vpop.permute.xlu2 %3199 }
 0x3f4   :  { %v3202_v47 = vmul.f32 %v3200_v5, %v7256_v24 }
 0x3fb   :  { %v3220_v33 = vpop.permute.xlu1 %3219  ;;  %v3213_v61 = vpop.permute.xlu0 %3212 }
 0x3fc   :  { %v3215_v62 = vmul.f32 %v3213_v61, %v7252_v63  ;;  %v3222_v59 = vmul.f32 %v3220_v33, %v7256_v24  ;;  %v3227_v18 = vpop.permute.xlu2 %3226 }
 0x3fe   :  { %v3216_v3 = vadd.f32 %v3215_v62, %v3209_v22 }
 0x400   :  { %v3223_v6 = vadd.f32 %v3222_v59, %v3216_v3 }
 0x404   :  { %v3193_v25 = vpop.permute.xlu1 %3192  ;;  %v3239_v15 = vpop.permute.xlu0 %3238 }
 0x405   :  { %v3195_v10 = vmul.f32 %v3193_v25, %v7252_v63  ;;  %v3241_v19 = vadd.f32 %v3239_v15, %v3223_v6 }
 0x407   :  { %v3196_v11 = vadd.f32 %v3195_v10, %v3189_v9 }
 0x409   :  { %v3203_v16 = vadd.f32 %v3202_v47, %v3196_v11 }
 0x40b   :  { %v3229_v32 = vadd.f32 %v3227_v18, %v3203_v16 }
 0x40d   :  { %v3232_v23 = vpop.permute.xlu1 %3231 }
 0x40e   :  { %v3234_v35 = vmul.f32 %v3232_v23, %v3229_v32  ;;  %v3242_v57 = vmul.f32 %v3241_v19, %v3232_v23 }
 0x410   :  { %v3243_v14 = vsub.f32 0.0, %v3242_v57  ;;  %v3235_v13 = vmul.f32 0.5, %v3234_v35 }
 0x412   :  { %v3244_v0 = vmul.f32 0.5, %v3243_v14  ;;  %v3236_v30 = vadd.f32 0.5, %v3235_v13 }
 0x414   :  { %v3245_v31 = vadd.f32 0.5, %v3244_v0 }
 0x416   :  { %v3248_v48 = vrot.slane %v3245_v31, 6 }
 0x418   :  { %v3250_v34 = vsel %vm3249_vm3, %v3236_v30, %v3248_v48 }
 0x419   :  { %3252 = vst [vmem:[%s7375_s5] sm:$0xf] %v3250_v34 }

</bundles_post_ra>
